<compile_context>
chip_gen: v6e
topology: v6e:2x2x1
jax: 0.10.0
libtpu: 0.0.40
codegen_flags: <defaults>
</compile_context>

<pallas_src>
import jax
import jax.numpy as jnp
from jax import lax
from jax.experimental import pallas as pl
from jax.experimental.pallas import tpu as pltpu

EPS = 0.8  # nn.BatchNorm2d(in_features, 0.8) -> eps = 0.8


def _sum_all(v):
    """(R, P) -> (1, 1): staged lane-reduce then sublane-reduce."""
    return jnp.sum(jnp.sum(v, axis=1, keepdims=True), axis=0, keepdims=True)


def _make_kernel(N, C, H, W, P):
    Hp, Wp = H + 2, W + 2
    inv_count = 1.0 / float(N * H * W)
    # k = ky*3 + kx ; source displacement on the flattened padded plane.
    shifts = [(ky - 1) * Wp + (kx - 1) for ky in range(3) for kx in range(3)]
    # rolled[q] = src[q + s]  (roll semantics match jnp.roll).  For interior
    # pixels q, q + s always stays inside [0, Hp*Wp), so no wraparound ever
    # reaches a valid output pixel.
    roll_amt = [(-s) % P for s in shifts]

    def conv_bn(read_slab, w_ref, b_ref, g_ref, be_ref, mask):
        """3x3 conv (zero padding comes from the zeroed halo of the source)
        followed by training-mode BatchNorm.  Returns per-output-channel
        (N, P) slabs (halo positions contain don't-care values)."""
        accs = [None] * C
        for ci in range(C):
            slab = read_slab(ci)                                 # (N, P)
            for k, r in enumerate(roll_amt):
                sh = pltpu.roll(slab, shift=r, axis=1) if r else slab
                for co in range(C):
                    wv = w_ref[co * C * 9 + ci * 9 + k]          # SMEM scalar
                    t = wv * sh                                  # broadcast-FMA
                    accs[co] = t if accs[co] is None else accs[co] + t
        outs = []
        for co in range(C):
            h = accs[co] + b_ref[co]                             # conv bias
            hm = h * mask                                        # interior only
            s = _sum_all(hm)                                     # one-pass stats
            ss = _sum_all(hm * h)                                # sum(h^2 * mask)
            mean = s * inv_count
            var = ss * inv_count - mean * mean                   # biased variance
            scale = lax.rsqrt(var + EPS) * g_ref[co]
            offset = be_ref[co] - mean * scale
            outs.append(h * scale + offset)
        return outs

    def kernel(x_ref, mask_ref,
               w1_ref, b1_ref, g1_ref, be1_ref, a_ref,
               w2_ref, b2_ref, g2_ref, be2_ref,
               out_ref, h_ref):
        mask = mask_ref[...]                                     # (1, P)
        alpha = a_ref[0]                                         # PReLU slope

        # conv1 -> BN1 -> PReLU; halo zeroing fused into the masked store so
        # the scratch is directly the zero-padded input of conv2.
        h1 = conv_bn(lambda ci: x_ref[pl.ds(ci * N, N), :],
                     w1_ref, b1_ref, g1_ref, be1_ref, mask)
        for co in range(C):
            v = h1[co]
            v = jnp.where(v > 0, v, v * alpha)                   # PReLU
            h_ref[pl.ds(co * N, N), :] = v * mask

        # conv2 -> BN2 -> residual add (halo of out is garbage; wrapper slices
        # the interior, and x's halo is zero anyway).
        h2 = conv_bn(lambda ci: h_ref[pl.ds(ci * N, N), :],
                     w2_ref, b2_ref, g2_ref, be2_ref, mask)
        for co in range(C):
            out_ref[pl.ds(co * N, N), :] = x_ref[pl.ds(co * N, N), :] + h2[co]

    return kernel


# -------------------------------- wrapper ----------------------------------- #
def residual_block(x_nchw, params):
    w1, b1, g1, be1, a, w2, b2, g2, be2 = params
    N, C, H, W = x_nchw.shape
    Hp, Wp = H + 2, W + 2
    P = ((Hp * Wp + 127) // 128) * 128          # lane-dense flattened plane
    f32 = jnp.float32

    # NCHW -> (C, N, Hp, Wp) zero-padded -> lane-dense (C*N, P) slab.
    xt = jnp.transpose(x_nchw, (1, 0, 2, 3)).astype(f32)
    xp = jnp.pad(xt, ((0, 0), (0, 0), (1, 1), (1, 1)))
    x_flat = jnp.pad(xp.reshape(C * N, Hp * Wp), ((0, 0), (0, P - Hp * Wp)))

    # Interior mask: 1.0 on the H*W valid pixels of each flattened padded plane.
    ry = (jnp.arange(Hp) >= 1) & (jnp.arange(Hp) <= H)
    rx = (jnp.arange(Wp) >= 1) & (jnp.arange(Wp) <= W)
    m = (ry[:, None] & rx[None, :]).astype(f32).reshape(1, Hp * Wp)
    mask = jnp.pad(m, ((0, 0), (0, P - Hp * Wp)))

    def prep_w(w):  # (Cout, Cin, 3, 3) -> flat [co, ci, k = ky*3 + kx]
        return w.astype(f32).reshape(C * C * 9)

    args = (x_flat, mask,
            prep_w(w1), b1.astype(f32), g1.astype(f32), be1.astype(f32),
            jnp.reshape(a, (1,)).astype(f32),
            prep_w(w2), b2.astype(f32), g2.astype(f32), be2.astype(f32))

    vmem = pl.BlockSpec(memory_space=pltpu.MemorySpace.VMEM)
    smem = pl.BlockSpec(memory_space=pltpu.MemorySpace.SMEM)

    out_flat = pl.pallas_call(
        _make_kernel(N, C, H, W, P),
        out_shape=jax.ShapeDtypeStruct((C * N, P), f32),
        in_specs=[vmem, vmem] + [smem] * 9,
        out_specs=vmem,
        scratch_shapes=[pltpu.VMEM((C * N, P), f32)],
    )(*args)

    # Layout plumbing back to NCHW: drop lane tail, drop halo, transpose.
    out = out_flat[:, :Hp * Wp].reshape(C, N, Hp, Wp)[:, :, 1:H + 1, 1:W + 1]
    return jnp.transpose(out, (1, 0, 2, 3))


# --------------------------- pure-JAX reference ----------------------------- #
def residual_block_ref(x, params):
    w1, b1, g1, be1, a, w2, b2, g2, be2 = params

    def conv(x, w, b):
        y = lax.conv_general_dilated(
            x, w, window_strides=(1, 1), padding=((1, 1), (1, 1)),
            dimension_numbers=('NCHW', 'OIHW', 'NCHW'))
        return y + b[None, :, None, None]

    def bn(x, g, be):
        mean = jnp.mean(x, axis=(0, 2, 3), keepdims=True)
        var = jnp.mean((x - mean) ** 2, axis=(0, 2, 3), keepdims=True)
        return (x - mean) / jnp.sqrt(var + EPS) * g[None, :, None, None] \
               + be[None, :, None, None]

    h = bn(conv(x, w1, b1), g1, be1)
    h = jnp.where(h > 0, h, a * h)
    h = bn(conv(h, w2, b2), g2, be2)
    return x + h


# ---------------------------------- main ------------------------------------ #
if __name__ == "__main__":
    N, C, H, W = 2, 4, 16, 16
    key = jax.random.PRNGKey(0)
    kx, k1, k2, k3, k4, k5, k6, k7, k8 = jax.random.split(key, 9)

    x = jax.random.normal(kx, (N, C, H, W), jnp.float32)

    params = (
        0.1 * jax.random.normal(k1, (C, C, 3, 3), jnp.float32),   # conv1 weight
        0.1 * jax.random.normal(k2, (C,), jnp.float32),           # conv1 bias
        1.0 + 0.1 * jax.random.normal(k3, (C,), jnp.float32),     # bn1 gamma
        0.1 * jax.random.normal(k4, (C,), jnp.float32),           # bn1 beta
        jnp.float32(0.25),                                        # PReLU slope
        0.1 * jax.random.normal(k5, (C, C, 3, 3), jnp.float32),   # conv2 weight
        0.1 * jax.random.normal(k6, (C,), jnp.float32),           # conv2 bias
        1.0 + 0.1 * jax.random.normal(k7, (C,), jnp.float32),     # bn2 gamma
        0.1 * jax.random.normal(k8, (C,), jnp.float32),           # bn2 beta
    )

    out = jax.block_until_ready(residual_block(x, params))
    ref = jax.block_until_ready(residual_block_ref(x, params))

    assert out.shape == (N, C, H, W)
    assert jnp.allclose(out, ref, atol=1e-4, rtol=1e-4), \
        f"max abs err = {jnp.max(jnp.abs(out - ref))}"
    print("KERNEL_OK")
</pallas_src>

<mosaic_0001>
module attributes {stable_mosaic.version = 11 : i64} {
  func.func @kernel(%arg0: memref<8x384xf32, #tpu.memory_space<vmem>>, %arg1: memref<1x384xf32, #tpu.memory_space<vmem>>, %arg2: memref<144xf32, #tpu.memory_space<smem>>, %arg3: memref<4xf32, #tpu.memory_space<smem>>, %arg4: memref<4xf32, #tpu.memory_space<smem>>, %arg5: memref<4xf32, #tpu.memory_space<smem>>, %arg6: memref<1xf32, #tpu.memory_space<smem>>, %arg7: memref<144xf32, #tpu.memory_space<smem>>, %arg8: memref<4xf32, #tpu.memory_space<smem>>, %arg9: memref<4xf32, #tpu.memory_space<smem>>, %arg10: memref<4xf32, #tpu.memory_space<smem>>, %arg11: memref<8x384xf32, #tpu.memory_space<vmem>>, %arg12: memref<8x384xf32, #tpu.memory_space<vmem>>) attributes {dimension_semantics = [], scalar_prefetch = 0 : i64, scratch_operands = 1 : i64, tpu.core_type = #tpu.core_type<tc>} {
    %c0 = arith.constant 0 : index
    %c0_0 = arith.constant 0 : index
    %0 = vector.load %arg1[%c0, %c0_0] : memref<1x384xf32, #tpu.memory_space<vmem>>, vector<1x384xf32>
    %c0_1 = arith.constant 0 : index
    %1 = memref.load %arg6[%c0_1] : memref<1xf32, #tpu.memory_space<smem>>
    %c0_2 = arith.constant 0 : index
    %c0_3 = arith.constant 0 : index
    %2 = vector.load %arg0[%c0_2, %c0_3] : memref<8x384xf32, #tpu.memory_space<vmem>>, vector<2x384xf32>
    %c19_i32 = arith.constant 19 : i32
    %3 = tpu.dynamic_rotate %2 by %c19_i32 dim 1 : vector<2x384xf32>, i32 -> vector<2x384xf32>
    %c0_4 = arith.constant 0 : index
    %4 = memref.load %arg2[%c0_4] : memref<144xf32, #tpu.memory_space<smem>>
    %5 = vector.broadcast %4 : f32 to vector<2x384xf32>
    %6 = arith.mulf %5, %3 : vector<2x384xf32>
    %c36 = arith.constant 36 : index
    %7 = memref.load %arg2[%c36] : memref<144xf32, #tpu.memory_space<smem>>
    %8 = vector.broadcast %7 : f32 to vector<2x384xf32>
    %9 = arith.mulf %8, %3 : vector<2x384xf32>
    %c72 = arith.constant 72 : index
    %10 = memref.load %arg2[%c72] : memref<144xf32, #tpu.memory_space<smem>>
    %11 = vector.broadcast %10 : f32 to vector<2x384xf32>
    %12 = arith.mulf %11, %3 : vector<2x384xf32>
    %c108 = arith.constant 108 : index
    %13 = memref.load %arg2[%c108] : memref<144xf32, #tpu.memory_space<smem>>
    %14 = vector.broadcast %13 : f32 to vector<2x384xf32>
    %15 = arith.mulf %14, %3 : vector<2x384xf32>
    %c18_i32 = arith.constant 18 : i32
    %16 = tpu.dynamic_rotate %2 by %c18_i32 dim 1 : vector<2x384xf32>, i32 -> vector<2x384xf32>
    %c1 = arith.constant 1 : index
    %17 = memref.load %arg2[%c1] : memref<144xf32, #tpu.memory_space<smem>>
    %18 = vector.broadcast %17 : f32 to vector<2x384xf32>
    %19 = arith.mulf %18, %16 : vector<2x384xf32>
    %20 = arith.addf %6, %19 : vector<2x384xf32>
    %c37 = arith.constant 37 : index
    %21 = memref.load %arg2[%c37] : memref<144xf32, #tpu.memory_space<smem>>
    %22 = vector.broadcast %21 : f32 to vector<2x384xf32>
    %23 = arith.mulf %22, %16 : vector<2x384xf32>
    %24 = arith.addf %9, %23 : vector<2x384xf32>
    %c73 = arith.constant 73 : index
    %25 = memref.load %arg2[%c73] : memref<144xf32, #tpu.memory_space<smem>>
    %26 = vector.broadcast %25 : f32 to vector<2x384xf32>
    %27 = arith.mulf %26, %16 : vector<2x384xf32>
    %28 = arith.addf %12, %27 : vector<2x384xf32>
    %c109 = arith.constant 109 : index
    %29 = memref.load %arg2[%c109] : memref<144xf32, #tpu.memory_space<smem>>
    %30 = vector.broadcast %29 : f32 to vector<2x384xf32>
    %31 = arith.mulf %30, %16 : vector<2x384xf32>
    %32 = arith.addf %15, %31 : vector<2x384xf32>
    %c17_i32 = arith.constant 17 : i32
    %33 = tpu.dynamic_rotate %2 by %c17_i32 dim 1 : vector<2x384xf32>, i32 -> vector<2x384xf32>
    %c2 = arith.constant 2 : index
    %34 = memref.load %arg2[%c2] : memref<144xf32, #tpu.memory_space<smem>>
    %35 = vector.broadcast %34 : f32 to vector<2x384xf32>
    %36 = arith.mulf %35, %33 : vector<2x384xf32>
    %37 = arith.addf %20, %36 : vector<2x384xf32>
    %c38 = arith.constant 38 : index
    %38 = memref.load %arg2[%c38] : memref<144xf32, #tpu.memory_space<smem>>
    %39 = vector.broadcast %38 : f32 to vector<2x384xf32>
    %40 = arith.mulf %39, %33 : vector<2x384xf32>
    %41 = arith.addf %24, %40 : vector<2x384xf32>
    %c74 = arith.constant 74 : index
    %42 = memref.load %arg2[%c74] : memref<144xf32, #tpu.memory_space<smem>>
    %43 = vector.broadcast %42 : f32 to vector<2x384xf32>
    %44 = arith.mulf %43, %33 : vector<2x384xf32>
    %45 = arith.addf %28, %44 : vector<2x384xf32>
    %c110 = arith.constant 110 : index
    %46 = memref.load %arg2[%c110] : memref<144xf32, #tpu.memory_space<smem>>
    %47 = vector.broadcast %46 : f32 to vector<2x384xf32>
    %48 = arith.mulf %47, %33 : vector<2x384xf32>
    %49 = arith.addf %32, %48 : vector<2x384xf32>
    %c1_i32 = arith.constant 1 : i32
    %50 = tpu.dynamic_rotate %2 by %c1_i32 dim 1 : vector<2x384xf32>, i32 -> vector<2x384xf32>
    %c3 = arith.constant 3 : index
    %51 = memref.load %arg2[%c3] : memref<144xf32, #tpu.memory_space<smem>>
    %52 = vector.broadcast %51 : f32 to vector<2x384xf32>
    %53 = arith.mulf %52, %50 : vector<2x384xf32>
    %54 = arith.addf %37, %53 : vector<2x384xf32>
    %c39 = arith.constant 39 : index
    %55 = memref.load %arg2[%c39] : memref<144xf32, #tpu.memory_space<smem>>
    %56 = vector.broadcast %55 : f32 to vector<2x384xf32>
    %57 = arith.mulf %56, %50 : vector<2x384xf32>
    %58 = arith.addf %41, %57 : vector<2x384xf32>
    %c75 = arith.constant 75 : index
    %59 = memref.load %arg2[%c75] : memref<144xf32, #tpu.memory_space<smem>>
    %60 = vector.broadcast %59 : f32 to vector<2x384xf32>
    %61 = arith.mulf %60, %50 : vector<2x384xf32>
    %62 = arith.addf %45, %61 : vector<2x384xf32>
    %c111 = arith.constant 111 : index
    %63 = memref.load %arg2[%c111] : memref<144xf32, #tpu.memory_space<smem>>
    %64 = vector.broadcast %63 : f32 to vector<2x384xf32>
    %65 = arith.mulf %64, %50 : vector<2x384xf32>
    %66 = arith.addf %49, %65 : vector<2x384xf32>
    %c4 = arith.constant 4 : index
    %67 = memref.load %arg2[%c4] : memref<144xf32, #tpu.memory_space<smem>>
    %68 = vector.broadcast %67 : f32 to vector<2x384xf32>
    %69 = arith.mulf %68, %2 : vector<2x384xf32>
    %70 = arith.addf %54, %69 : vector<2x384xf32>
    %c40 = arith.constant 40 : index
    %71 = memref.load %arg2[%c40] : memref<144xf32, #tpu.memory_space<smem>>
    %72 = vector.broadcast %71 : f32 to vector<2x384xf32>
    %73 = arith.mulf %72, %2 : vector<2x384xf32>
    %74 = arith.addf %58, %73 : vector<2x384xf32>
    %c76 = arith.constant 76 : index
    %75 = memref.load %arg2[%c76] : memref<144xf32, #tpu.memory_space<smem>>
    %76 = vector.broadcast %75 : f32 to vector<2x384xf32>
    %77 = arith.mulf %76, %2 : vector<2x384xf32>
    %78 = arith.addf %62, %77 : vector<2x384xf32>
    %c112 = arith.constant 112 : index
    %79 = memref.load %arg2[%c112] : memref<144xf32, #tpu.memory_space<smem>>
    %80 = vector.broadcast %79 : f32 to vector<2x384xf32>
    %81 = arith.mulf %80, %2 : vector<2x384xf32>
    %82 = arith.addf %66, %81 : vector<2x384xf32>
    %c383_i32 = arith.constant 383 : i32
    %83 = tpu.dynamic_rotate %2 by %c383_i32 dim 1 : vector<2x384xf32>, i32 -> vector<2x384xf32>
    %c5 = arith.constant 5 : index
    %84 = memref.load %arg2[%c5] : memref<144xf32, #tpu.memory_space<smem>>
    %85 = vector.broadcast %84 : f32 to vector<2x384xf32>
    %86 = arith.mulf %85, %83 : vector<2x384xf32>
    %87 = arith.addf %70, %86 : vector<2x384xf32>
    %c41 = arith.constant 41 : index
    %88 = memref.load %arg2[%c41] : memref<144xf32, #tpu.memory_space<smem>>
    %89 = vector.broadcast %88 : f32 to vector<2x384xf32>
    %90 = arith.mulf %89, %83 : vector<2x384xf32>
    %91 = arith.addf %74, %90 : vector<2x384xf32>
    %c77 = arith.constant 77 : index
    %92 = memref.load %arg2[%c77] : memref<144xf32, #tpu.memory_space<smem>>
    %93 = vector.broadcast %92 : f32 to vector<2x384xf32>
    %94 = arith.mulf %93, %83 : vector<2x384xf32>
    %95 = arith.addf %78, %94 : vector<2x384xf32>
    %c113 = arith.constant 113 : index
    %96 = memref.load %arg2[%c113] : memref<144xf32, #tpu.memory_space<smem>>
    %97 = vector.broadcast %96 : f32 to vector<2x384xf32>
    %98 = arith.mulf %97, %83 : vector<2x384xf32>
    %99 = arith.addf %82, %98 : vector<2x384xf32>
    %c367_i32 = arith.constant 367 : i32
    %100 = tpu.dynamic_rotate %2 by %c367_i32 dim 1 : vector<2x384xf32>, i32 -> vector<2x384xf32>
    %c6 = arith.constant 6 : index
    %101 = memref.load %arg2[%c6] : memref<144xf32, #tpu.memory_space<smem>>
    %102 = vector.broadcast %101 : f32 to vector<2x384xf32>
    %103 = arith.mulf %102, %100 : vector<2x384xf32>
    %104 = arith.addf %87, %103 : vector<2x384xf32>
    %c42 = arith.constant 42 : index
    %105 = memref.load %arg2[%c42] : memref<144xf32, #tpu.memory_space<smem>>
    %106 = vector.broadcast %105 : f32 to vector<2x384xf32>
    %107 = arith.mulf %106, %100 : vector<2x384xf32>
    %108 = arith.addf %91, %107 : vector<2x384xf32>
    %c78 = arith.constant 78 : index
    %109 = memref.load %arg2[%c78] : memref<144xf32, #tpu.memory_space<smem>>
    %110 = vector.broadcast %109 : f32 to vector<2x384xf32>
    %111 = arith.mulf %110, %100 : vector<2x384xf32>
    %112 = arith.addf %95, %111 : vector<2x384xf32>
    %c114 = arith.constant 114 : index
    %113 = memref.load %arg2[%c114] : memref<144xf32, #tpu.memory_space<smem>>
    %114 = vector.broadcast %113 : f32 to vector<2x384xf32>
    %115 = arith.mulf %114, %100 : vector<2x384xf32>
    %116 = arith.addf %99, %115 : vector<2x384xf32>
    %c366_i32 = arith.constant 366 : i32
    %117 = tpu.dynamic_rotate %2 by %c366_i32 dim 1 : vector<2x384xf32>, i32 -> vector<2x384xf32>
    %c7 = arith.constant 7 : index
    %118 = memref.load %arg2[%c7] : memref<144xf32, #tpu.memory_space<smem>>
    %119 = vector.broadcast %118 : f32 to vector<2x384xf32>
    %120 = arith.mulf %119, %117 : vector<2x384xf32>
    %121 = arith.addf %104, %120 : vector<2x384xf32>
    %c43 = arith.constant 43 : index
    %122 = memref.load %arg2[%c43] : memref<144xf32, #tpu.memory_space<smem>>
    %123 = vector.broadcast %122 : f32 to vector<2x384xf32>
    %124 = arith.mulf %123, %117 : vector<2x384xf32>
    %125 = arith.addf %108, %124 : vector<2x384xf32>
    %c79 = arith.constant 79 : index
    %126 = memref.load %arg2[%c79] : memref<144xf32, #tpu.memory_space<smem>>
    %127 = vector.broadcast %126 : f32 to vector<2x384xf32>
    %128 = arith.mulf %127, %117 : vector<2x384xf32>
    %129 = arith.addf %112, %128 : vector<2x384xf32>
    %c115 = arith.constant 115 : index
    %130 = memref.load %arg2[%c115] : memref<144xf32, #tpu.memory_space<smem>>
    %131 = vector.broadcast %130 : f32 to vector<2x384xf32>
    %132 = arith.mulf %131, %117 : vector<2x384xf32>
    %133 = arith.addf %116, %132 : vector<2x384xf32>
    %c365_i32 = arith.constant 365 : i32
    %134 = tpu.dynamic_rotate %2 by %c365_i32 dim 1 : vector<2x384xf32>, i32 -> vector<2x384xf32>
    %c8 = arith.constant 8 : index
    %135 = memref.load %arg2[%c8] : memref<144xf32, #tpu.memory_space<smem>>
    %136 = vector.broadcast %135 : f32 to vector<2x384xf32>
    %137 = arith.mulf %136, %134 : vector<2x384xf32>
    %138 = arith.addf %121, %137 : vector<2x384xf32>
    %c44 = arith.constant 44 : index
    %139 = memref.load %arg2[%c44] : memref<144xf32, #tpu.memory_space<smem>>
    %140 = vector.broadcast %139 : f32 to vector<2x384xf32>
    %141 = arith.mulf %140, %134 : vector<2x384xf32>
    %142 = arith.addf %125, %141 : vector<2x384xf32>
    %c80 = arith.constant 80 : index
    %143 = memref.load %arg2[%c80] : memref<144xf32, #tpu.memory_space<smem>>
    %144 = vector.broadcast %143 : f32 to vector<2x384xf32>
    %145 = arith.mulf %144, %134 : vector<2x384xf32>
    %146 = arith.addf %129, %145 : vector<2x384xf32>
    %c116 = arith.constant 116 : index
    %147 = memref.load %arg2[%c116] : memref<144xf32, #tpu.memory_space<smem>>
    %148 = vector.broadcast %147 : f32 to vector<2x384xf32>
    %149 = arith.mulf %148, %134 : vector<2x384xf32>
    %150 = arith.addf %133, %149 : vector<2x384xf32>
    %c2_5 = arith.constant 2 : index
    %c0_6 = arith.constant 0 : index
    %151 = vector.load %arg0[%c2_5, %c0_6] : memref<8x384xf32, #tpu.memory_space<vmem>>, vector<2x384xf32>
    %c19_i32_7 = arith.constant 19 : i32
    %152 = tpu.dynamic_rotate %151 by %c19_i32_7 dim 1 : vector<2x384xf32>, i32 -> vector<2x384xf32>
    %c9 = arith.constant 9 : index
    %153 = memref.load %arg2[%c9] : memref<144xf32, #tpu.memory_space<smem>>
    %154 = vector.broadcast %153 : f32 to vector<2x384xf32>
    %155 = arith.mulf %154, %152 : vector<2x384xf32>
    %156 = arith.addf %138, %155 : vector<2x384xf32>
    %c45 = arith.constant 45 : index
    %157 = memref.load %arg2[%c45] : memref<144xf32, #tpu.memory_space<smem>>
    %158 = vector.broadcast %157 : f32 to vector<2x384xf32>
    %159 = arith.mulf %158, %152 : vector<2x384xf32>
    %160 = arith.addf %142, %159 : vector<2x384xf32>
    %c81 = arith.constant 81 : index
    %161 = memref.load %arg2[%c81] : memref<144xf32, #tpu.memory_space<smem>>
    %162 = vector.broadcast %161 : f32 to vector<2x384xf32>
    %163 = arith.mulf %162, %152 : vector<2x384xf32>
    %164 = arith.addf %146, %163 : vector<2x384xf32>
    %c117 = arith.constant 117 : index
    %165 = memref.load %arg2[%c117] : memref<144xf32, #tpu.memory_space<smem>>
    %166 = vector.broadcast %165 : f32 to vector<2x384xf32>
    %167 = arith.mulf %166, %152 : vector<2x384xf32>
    %168 = arith.addf %150, %167 : vector<2x384xf32>
    %c18_i32_8 = arith.constant 18 : i32
    %169 = tpu.dynamic_rotate %151 by %c18_i32_8 dim 1 : vector<2x384xf32>, i32 -> vector<2x384xf32>
    %c10 = arith.constant 10 : index
    %170 = memref.load %arg2[%c10] : memref<144xf32, #tpu.memory_space<smem>>
    %171 = vector.broadcast %170 : f32 to vector<2x384xf32>
    %172 = arith.mulf %171, %169 : vector<2x384xf32>
    %173 = arith.addf %156, %172 : vector<2x384xf32>
    %c46 = arith.constant 46 : index
    %174 = memref.load %arg2[%c46] : memref<144xf32, #tpu.memory_space<smem>>
    %175 = vector.broadcast %174 : f32 to vector<2x384xf32>
    %176 = arith.mulf %175, %169 : vector<2x384xf32>
    %177 = arith.addf %160, %176 : vector<2x384xf32>
    %c82 = arith.constant 82 : index
    %178 = memref.load %arg2[%c82] : memref<144xf32, #tpu.memory_space<smem>>
    %179 = vector.broadcast %178 : f32 to vector<2x384xf32>
    %180 = arith.mulf %179, %169 : vector<2x384xf32>
    %181 = arith.addf %164, %180 : vector<2x384xf32>
    %c118 = arith.constant 118 : index
    %182 = memref.load %arg2[%c118] : memref<144xf32, #tpu.memory_space<smem>>
    %183 = vector.broadcast %182 : f32 to vector<2x384xf32>
    %184 = arith.mulf %183, %169 : vector<2x384xf32>
    %185 = arith.addf %168, %184 : vector<2x384xf32>
    %c17_i32_9 = arith.constant 17 : i32
    %186 = tpu.dynamic_rotate %151 by %c17_i32_9 dim 1 : vector<2x384xf32>, i32 -> vector<2x384xf32>
    %c11 = arith.constant 11 : index
    %187 = memref.load %arg2[%c11] : memref<144xf32, #tpu.memory_space<smem>>
    %188 = vector.broadcast %187 : f32 to vector<2x384xf32>
    %189 = arith.mulf %188, %186 : vector<2x384xf32>
    %190 = arith.addf %173, %189 : vector<2x384xf32>
    %c47 = arith.constant 47 : index
    %191 = memref.load %arg2[%c47] : memref<144xf32, #tpu.memory_space<smem>>
    %192 = vector.broadcast %191 : f32 to vector<2x384xf32>
    %193 = arith.mulf %192, %186 : vector<2x384xf32>
    %194 = arith.addf %177, %193 : vector<2x384xf32>
    %c83 = arith.constant 83 : index
    %195 = memref.load %arg2[%c83] : memref<144xf32, #tpu.memory_space<smem>>
    %196 = vector.broadcast %195 : f32 to vector<2x384xf32>
    %197 = arith.mulf %196, %186 : vector<2x384xf32>
    %198 = arith.addf %181, %197 : vector<2x384xf32>
    %c119 = arith.constant 119 : index
    %199 = memref.load %arg2[%c119] : memref<144xf32, #tpu.memory_space<smem>>
    %200 = vector.broadcast %199 : f32 to vector<2x384xf32>
    %201 = arith.mulf %200, %186 : vector<2x384xf32>
    %202 = arith.addf %185, %201 : vector<2x384xf32>
    %c1_i32_10 = arith.constant 1 : i32
    %203 = tpu.dynamic_rotate %151 by %c1_i32_10 dim 1 : vector<2x384xf32>, i32 -> vector<2x384xf32>
    %c12 = arith.constant 12 : index
    %204 = memref.load %arg2[%c12] : memref<144xf32, #tpu.memory_space<smem>>
    %205 = vector.broadcast %204 : f32 to vector<2x384xf32>
    %206 = arith.mulf %205, %203 : vector<2x384xf32>
    %207 = arith.addf %190, %206 : vector<2x384xf32>
    %c48 = arith.constant 48 : index
    %208 = memref.load %arg2[%c48] : memref<144xf32, #tpu.memory_space<smem>>
    %209 = vector.broadcast %208 : f32 to vector<2x384xf32>
    %210 = arith.mulf %209, %203 : vector<2x384xf32>
    %211 = arith.addf %194, %210 : vector<2x384xf32>
    %c84 = arith.constant 84 : index
    %212 = memref.load %arg2[%c84] : memref<144xf32, #tpu.memory_space<smem>>
    %213 = vector.broadcast %212 : f32 to vector<2x384xf32>
    %214 = arith.mulf %213, %203 : vector<2x384xf32>
    %215 = arith.addf %198, %214 : vector<2x384xf32>
    %c120 = arith.constant 120 : index
    %216 = memref.load %arg2[%c120] : memref<144xf32, #tpu.memory_space<smem>>
    %217 = vector.broadcast %216 : f32 to vector<2x384xf32>
    %218 = arith.mulf %217, %203 : vector<2x384xf32>
    %219 = arith.addf %202, %218 : vector<2x384xf32>
    %c13 = arith.constant 13 : index
    %220 = memref.load %arg2[%c13] : memref<144xf32, #tpu.memory_space<smem>>
    %221 = vector.broadcast %220 : f32 to vector<2x384xf32>
    %222 = arith.mulf %221, %151 : vector<2x384xf32>
    %223 = arith.addf %207, %222 : vector<2x384xf32>
    %c49 = arith.constant 49 : index
    %224 = memref.load %arg2[%c49] : memref<144xf32, #tpu.memory_space<smem>>
    %225 = vector.broadcast %224 : f32 to vector<2x384xf32>
    %226 = arith.mulf %225, %151 : vector<2x384xf32>
    %227 = arith.addf %211, %226 : vector<2x384xf32>
    %c85 = arith.constant 85 : index
    %228 = memref.load %arg2[%c85] : memref<144xf32, #tpu.memory_space<smem>>
    %229 = vector.broadcast %228 : f32 to vector<2x384xf32>
    %230 = arith.mulf %229, %151 : vector<2x384xf32>
    %231 = arith.addf %215, %230 : vector<2x384xf32>
    %c121 = arith.constant 121 : index
    %232 = memref.load %arg2[%c121] : memref<144xf32, #tpu.memory_space<smem>>
    %233 = vector.broadcast %232 : f32 to vector<2x384xf32>
    %234 = arith.mulf %233, %151 : vector<2x384xf32>
    %235 = arith.addf %219, %234 : vector<2x384xf32>
    %c383_i32_11 = arith.constant 383 : i32
    %236 = tpu.dynamic_rotate %151 by %c383_i32_11 dim 1 : vector<2x384xf32>, i32 -> vector<2x384xf32>
    %c14 = arith.constant 14 : index
    %237 = memref.load %arg2[%c14] : memref<144xf32, #tpu.memory_space<smem>>
    %238 = vector.broadcast %237 : f32 to vector<2x384xf32>
    %239 = arith.mulf %238, %236 : vector<2x384xf32>
    %240 = arith.addf %223, %239 : vector<2x384xf32>
    %c50 = arith.constant 50 : index
    %241 = memref.load %arg2[%c50] : memref<144xf32, #tpu.memory_space<smem>>
    %242 = vector.broadcast %241 : f32 to vector<2x384xf32>
    %243 = arith.mulf %242, %236 : vector<2x384xf32>
    %244 = arith.addf %227, %243 : vector<2x384xf32>
    %c86 = arith.constant 86 : index
    %245 = memref.load %arg2[%c86] : memref<144xf32, #tpu.memory_space<smem>>
    %246 = vector.broadcast %245 : f32 to vector<2x384xf32>
    %247 = arith.mulf %246, %236 : vector<2x384xf32>
    %248 = arith.addf %231, %247 : vector<2x384xf32>
    %c122 = arith.constant 122 : index
    %249 = memref.load %arg2[%c122] : memref<144xf32, #tpu.memory_space<smem>>
    %250 = vector.broadcast %249 : f32 to vector<2x384xf32>
    %251 = arith.mulf %250, %236 : vector<2x384xf32>
    %252 = arith.addf %235, %251 : vector<2x384xf32>
    %c367_i32_12 = arith.constant 367 : i32
    %253 = tpu.dynamic_rotate %151 by %c367_i32_12 dim 1 : vector<2x384xf32>, i32 -> vector<2x384xf32>
    %c15 = arith.constant 15 : index
    %254 = memref.load %arg2[%c15] : memref<144xf32, #tpu.memory_space<smem>>
    %255 = vector.broadcast %254 : f32 to vector<2x384xf32>
    %256 = arith.mulf %255, %253 : vector<2x384xf32>
    %257 = arith.addf %240, %256 : vector<2x384xf32>
    %c51 = arith.constant 51 : index
    %258 = memref.load %arg2[%c51] : memref<144xf32, #tpu.memory_space<smem>>
    %259 = vector.broadcast %258 : f32 to vector<2x384xf32>
    %260 = arith.mulf %259, %253 : vector<2x384xf32>
    %261 = arith.addf %244, %260 : vector<2x384xf32>
    %c87 = arith.constant 87 : index
    %262 = memref.load %arg2[%c87] : memref<144xf32, #tpu.memory_space<smem>>
    %263 = vector.broadcast %262 : f32 to vector<2x384xf32>
    %264 = arith.mulf %263, %253 : vector<2x384xf32>
    %265 = arith.addf %248, %264 : vector<2x384xf32>
    %c123 = arith.constant 123 : index
    %266 = memref.load %arg2[%c123] : memref<144xf32, #tpu.memory_space<smem>>
    %267 = vector.broadcast %266 : f32 to vector<2x384xf32>
    %268 = arith.mulf %267, %253 : vector<2x384xf32>
    %269 = arith.addf %252, %268 : vector<2x384xf32>
    %c366_i32_13 = arith.constant 366 : i32
    %270 = tpu.dynamic_rotate %151 by %c366_i32_13 dim 1 : vector<2x384xf32>, i32 -> vector<2x384xf32>
    %c16 = arith.constant 16 : index
    %271 = memref.load %arg2[%c16] : memref<144xf32, #tpu.memory_space<smem>>
    %272 = vector.broadcast %271 : f32 to vector<2x384xf32>
    %273 = arith.mulf %272, %270 : vector<2x384xf32>
    %274 = arith.addf %257, %273 : vector<2x384xf32>
    %c52 = arith.constant 52 : index
    %275 = memref.load %arg2[%c52] : memref<144xf32, #tpu.memory_space<smem>>
    %276 = vector.broadcast %275 : f32 to vector<2x384xf32>
    %277 = arith.mulf %276, %270 : vector<2x384xf32>
    %278 = arith.addf %261, %277 : vector<2x384xf32>
    %c88 = arith.constant 88 : index
    %279 = memref.load %arg2[%c88] : memref<144xf32, #tpu.memory_space<smem>>
    %280 = vector.broadcast %279 : f32 to vector<2x384xf32>
    %281 = arith.mulf %280, %270 : vector<2x384xf32>
    %282 = arith.addf %265, %281 : vector<2x384xf32>
    %c124 = arith.constant 124 : index
    %283 = memref.load %arg2[%c124] : memref<144xf32, #tpu.memory_space<smem>>
    %284 = vector.broadcast %283 : f32 to vector<2x384xf32>
    %285 = arith.mulf %284, %270 : vector<2x384xf32>
    %286 = arith.addf %269, %285 : vector<2x384xf32>
    %c365_i32_14 = arith.constant 365 : i32
    %287 = tpu.dynamic_rotate %151 by %c365_i32_14 dim 1 : vector<2x384xf32>, i32 -> vector<2x384xf32>
    %c17 = arith.constant 17 : index
    %288 = memref.load %arg2[%c17] : memref<144xf32, #tpu.memory_space<smem>>
    %289 = vector.broadcast %288 : f32 to vector<2x384xf32>
    %290 = arith.mulf %289, %287 : vector<2x384xf32>
    %291 = arith.addf %274, %290 : vector<2x384xf32>
    %c53 = arith.constant 53 : index
    %292 = memref.load %arg2[%c53] : memref<144xf32, #tpu.memory_space<smem>>
    %293 = vector.broadcast %292 : f32 to vector<2x384xf32>
    %294 = arith.mulf %293, %287 : vector<2x384xf32>
    %295 = arith.addf %278, %294 : vector<2x384xf32>
    %c89 = arith.constant 89 : index
    %296 = memref.load %arg2[%c89] : memref<144xf32, #tpu.memory_space<smem>>
    %297 = vector.broadcast %296 : f32 to vector<2x384xf32>
    %298 = arith.mulf %297, %287 : vector<2x384xf32>
    %299 = arith.addf %282, %298 : vector<2x384xf32>
    %c125 = arith.constant 125 : index
    %300 = memref.load %arg2[%c125] : memref<144xf32, #tpu.memory_space<smem>>
    %301 = vector.broadcast %300 : f32 to vector<2x384xf32>
    %302 = arith.mulf %301, %287 : vector<2x384xf32>
    %303 = arith.addf %286, %302 : vector<2x384xf32>
    %c4_15 = arith.constant 4 : index
    %c0_16 = arith.constant 0 : index
    %304 = vector.load %arg0[%c4_15, %c0_16] : memref<8x384xf32, #tpu.memory_space<vmem>>, vector<2x384xf32>
    %c19_i32_17 = arith.constant 19 : i32
    %305 = tpu.dynamic_rotate %304 by %c19_i32_17 dim 1 : vector<2x384xf32>, i32 -> vector<2x384xf32>
    %c18 = arith.constant 18 : index
    %306 = memref.load %arg2[%c18] : memref<144xf32, #tpu.memory_space<smem>>
    %307 = vector.broadcast %306 : f32 to vector<2x384xf32>
    %308 = arith.mulf %307, %305 : vector<2x384xf32>
    %309 = arith.addf %291, %308 : vector<2x384xf32>
    %c54 = arith.constant 54 : index
    %310 = memref.load %arg2[%c54] : memref<144xf32, #tpu.memory_space<smem>>
    %311 = vector.broadcast %310 : f32 to vector<2x384xf32>
    %312 = arith.mulf %311, %305 : vector<2x384xf32>
    %313 = arith.addf %295, %312 : vector<2x384xf32>
    %c90 = arith.constant 90 : index
    %314 = memref.load %arg2[%c90] : memref<144xf32, #tpu.memory_space<smem>>
    %315 = vector.broadcast %314 : f32 to vector<2x384xf32>
    %316 = arith.mulf %315, %305 : vector<2x384xf32>
    %317 = arith.addf %299, %316 : vector<2x384xf32>
    %c126 = arith.constant 126 : index
    %318 = memref.load %arg2[%c126] : memref<144xf32, #tpu.memory_space<smem>>
    %319 = vector.broadcast %318 : f32 to vector<2x384xf32>
    %320 = arith.mulf %319, %305 : vector<2x384xf32>
    %321 = arith.addf %303, %320 : vector<2x384xf32>
    %c18_i32_18 = arith.constant 18 : i32
    %322 = tpu.dynamic_rotate %304 by %c18_i32_18 dim 1 : vector<2x384xf32>, i32 -> vector<2x384xf32>
    %c19 = arith.constant 19 : index
    %323 = memref.load %arg2[%c19] : memref<144xf32, #tpu.memory_space<smem>>
    %324 = vector.broadcast %323 : f32 to vector<2x384xf32>
    %325 = arith.mulf %324, %322 : vector<2x384xf32>
    %326 = arith.addf %309, %325 : vector<2x384xf32>
    %c55 = arith.constant 55 : index
    %327 = memref.load %arg2[%c55] : memref<144xf32, #tpu.memory_space<smem>>
    %328 = vector.broadcast %327 : f32 to vector<2x384xf32>
    %329 = arith.mulf %328, %322 : vector<2x384xf32>
    %330 = arith.addf %313, %329 : vector<2x384xf32>
    %c91 = arith.constant 91 : index
    %331 = memref.load %arg2[%c91] : memref<144xf32, #tpu.memory_space<smem>>
    %332 = vector.broadcast %331 : f32 to vector<2x384xf32>
    %333 = arith.mulf %332, %322 : vector<2x384xf32>
    %334 = arith.addf %317, %333 : vector<2x384xf32>
    %c127 = arith.constant 127 : index
    %335 = memref.load %arg2[%c127] : memref<144xf32, #tpu.memory_space<smem>>
    %336 = vector.broadcast %335 : f32 to vector<2x384xf32>
    %337 = arith.mulf %336, %322 : vector<2x384xf32>
    %338 = arith.addf %321, %337 : vector<2x384xf32>
    %c17_i32_19 = arith.constant 17 : i32
    %339 = tpu.dynamic_rotate %304 by %c17_i32_19 dim 1 : vector<2x384xf32>, i32 -> vector<2x384xf32>
    %c20 = arith.constant 20 : index
    %340 = memref.load %arg2[%c20] : memref<144xf32, #tpu.memory_space<smem>>
    %341 = vector.broadcast %340 : f32 to vector<2x384xf32>
    %342 = arith.mulf %341, %339 : vector<2x384xf32>
    %343 = arith.addf %326, %342 : vector<2x384xf32>
    %c56 = arith.constant 56 : index
    %344 = memref.load %arg2[%c56] : memref<144xf32, #tpu.memory_space<smem>>
    %345 = vector.broadcast %344 : f32 to vector<2x384xf32>
    %346 = arith.mulf %345, %339 : vector<2x384xf32>
    %347 = arith.addf %330, %346 : vector<2x384xf32>
    %c92 = arith.constant 92 : index
    %348 = memref.load %arg2[%c92] : memref<144xf32, #tpu.memory_space<smem>>
    %349 = vector.broadcast %348 : f32 to vector<2x384xf32>
    %350 = arith.mulf %349, %339 : vector<2x384xf32>
    %351 = arith.addf %334, %350 : vector<2x384xf32>
    %c128 = arith.constant 128 : index
    %352 = memref.load %arg2[%c128] : memref<144xf32, #tpu.memory_space<smem>>
    %353 = vector.broadcast %352 : f32 to vector<2x384xf32>
    %354 = arith.mulf %353, %339 : vector<2x384xf32>
    %355 = arith.addf %338, %354 : vector<2x384xf32>
    %c1_i32_20 = arith.constant 1 : i32
    %356 = tpu.dynamic_rotate %304 by %c1_i32_20 dim 1 : vector<2x384xf32>, i32 -> vector<2x384xf32>
    %c21 = arith.constant 21 : index
    %357 = memref.load %arg2[%c21] : memref<144xf32, #tpu.memory_space<smem>>
    %358 = vector.broadcast %357 : f32 to vector<2x384xf32>
    %359 = arith.mulf %358, %356 : vector<2x384xf32>
    %360 = arith.addf %343, %359 : vector<2x384xf32>
    %c57 = arith.constant 57 : index
    %361 = memref.load %arg2[%c57] : memref<144xf32, #tpu.memory_space<smem>>
    %362 = vector.broadcast %361 : f32 to vector<2x384xf32>
    %363 = arith.mulf %362, %356 : vector<2x384xf32>
    %364 = arith.addf %347, %363 : vector<2x384xf32>
    %c93 = arith.constant 93 : index
    %365 = memref.load %arg2[%c93] : memref<144xf32, #tpu.memory_space<smem>>
    %366 = vector.broadcast %365 : f32 to vector<2x384xf32>
    %367 = arith.mulf %366, %356 : vector<2x384xf32>
    %368 = arith.addf %351, %367 : vector<2x384xf32>
    %c129 = arith.constant 129 : index
    %369 = memref.load %arg2[%c129] : memref<144xf32, #tpu.memory_space<smem>>
    %370 = vector.broadcast %369 : f32 to vector<2x384xf32>
    %371 = arith.mulf %370, %356 : vector<2x384xf32>
    %372 = arith.addf %355, %371 : vector<2x384xf32>
    %c22 = arith.constant 22 : index
    %373 = memref.load %arg2[%c22] : memref<144xf32, #tpu.memory_space<smem>>
    %374 = vector.broadcast %373 : f32 to vector<2x384xf32>
    %375 = arith.mulf %374, %304 : vector<2x384xf32>
    %376 = arith.addf %360, %375 : vector<2x384xf32>
    %c58 = arith.constant 58 : index
    %377 = memref.load %arg2[%c58] : memref<144xf32, #tpu.memory_space<smem>>
    %378 = vector.broadcast %377 : f32 to vector<2x384xf32>
    %379 = arith.mulf %378, %304 : vector<2x384xf32>
    %380 = arith.addf %364, %379 : vector<2x384xf32>
    %c94 = arith.constant 94 : index
    %381 = memref.load %arg2[%c94] : memref<144xf32, #tpu.memory_space<smem>>
    %382 = vector.broadcast %381 : f32 to vector<2x384xf32>
    %383 = arith.mulf %382, %304 : vector<2x384xf32>
    %384 = arith.addf %368, %383 : vector<2x384xf32>
    %c130 = arith.constant 130 : index
    %385 = memref.load %arg2[%c130] : memref<144xf32, #tpu.memory_space<smem>>
    %386 = vector.broadcast %385 : f32 to vector<2x384xf32>
    %387 = arith.mulf %386, %304 : vector<2x384xf32>
    %388 = arith.addf %372, %387 : vector<2x384xf32>
    %c383_i32_21 = arith.constant 383 : i32
    %389 = tpu.dynamic_rotate %304 by %c383_i32_21 dim 1 : vector<2x384xf32>, i32 -> vector<2x384xf32>
    %c23 = arith.constant 23 : index
    %390 = memref.load %arg2[%c23] : memref<144xf32, #tpu.memory_space<smem>>
    %391 = vector.broadcast %390 : f32 to vector<2x384xf32>
    %392 = arith.mulf %391, %389 : vector<2x384xf32>
    %393 = arith.addf %376, %392 : vector<2x384xf32>
    %c59 = arith.constant 59 : index
    %394 = memref.load %arg2[%c59] : memref<144xf32, #tpu.memory_space<smem>>
    %395 = vector.broadcast %394 : f32 to vector<2x384xf32>
    %396 = arith.mulf %395, %389 : vector<2x384xf32>
    %397 = arith.addf %380, %396 : vector<2x384xf32>
    %c95 = arith.constant 95 : index
    %398 = memref.load %arg2[%c95] : memref<144xf32, #tpu.memory_space<smem>>
    %399 = vector.broadcast %398 : f32 to vector<2x384xf32>
    %400 = arith.mulf %399, %389 : vector<2x384xf32>
    %401 = arith.addf %384, %400 : vector<2x384xf32>
    %c131 = arith.constant 131 : index
    %402 = memref.load %arg2[%c131] : memref<144xf32, #tpu.memory_space<smem>>
    %403 = vector.broadcast %402 : f32 to vector<2x384xf32>
    %404 = arith.mulf %403, %389 : vector<2x384xf32>
    %405 = arith.addf %388, %404 : vector<2x384xf32>
    %c367_i32_22 = arith.constant 367 : i32
    %406 = tpu.dynamic_rotate %304 by %c367_i32_22 dim 1 : vector<2x384xf32>, i32 -> vector<2x384xf32>
    %c24 = arith.constant 24 : index
    %407 = memref.load %arg2[%c24] : memref<144xf32, #tpu.memory_space<smem>>
    %408 = vector.broadcast %407 : f32 to vector<2x384xf32>
    %409 = arith.mulf %408, %406 : vector<2x384xf32>
    %410 = arith.addf %393, %409 : vector<2x384xf32>
    %c60 = arith.constant 60 : index
    %411 = memref.load %arg2[%c60] : memref<144xf32, #tpu.memory_space<smem>>
    %412 = vector.broadcast %411 : f32 to vector<2x384xf32>
    %413 = arith.mulf %412, %406 : vector<2x384xf32>
    %414 = arith.addf %397, %413 : vector<2x384xf32>
    %c96 = arith.constant 96 : index
    %415 = memref.load %arg2[%c96] : memref<144xf32, #tpu.memory_space<smem>>
    %416 = vector.broadcast %415 : f32 to vector<2x384xf32>
    %417 = arith.mulf %416, %406 : vector<2x384xf32>
    %418 = arith.addf %401, %417 : vector<2x384xf32>
    %c132 = arith.constant 132 : index
    %419 = memref.load %arg2[%c132] : memref<144xf32, #tpu.memory_space<smem>>
    %420 = vector.broadcast %419 : f32 to vector<2x384xf32>
    %421 = arith.mulf %420, %406 : vector<2x384xf32>
    %422 = arith.addf %405, %421 : vector<2x384xf32>
    %c366_i32_23 = arith.constant 366 : i32
    %423 = tpu.dynamic_rotate %304 by %c366_i32_23 dim 1 : vector<2x384xf32>, i32 -> vector<2x384xf32>
    %c25 = arith.constant 25 : index
    %424 = memref.load %arg2[%c25] : memref<144xf32, #tpu.memory_space<smem>>
    %425 = vector.broadcast %424 : f32 to vector<2x384xf32>
    %426 = arith.mulf %425, %423 : vector<2x384xf32>
    %427 = arith.addf %410, %426 : vector<2x384xf32>
    %c61 = arith.constant 61 : index
    %428 = memref.load %arg2[%c61] : memref<144xf32, #tpu.memory_space<smem>>
    %429 = vector.broadcast %428 : f32 to vector<2x384xf32>
    %430 = arith.mulf %429, %423 : vector<2x384xf32>
    %431 = arith.addf %414, %430 : vector<2x384xf32>
    %c97 = arith.constant 97 : index
    %432 = memref.load %arg2[%c97] : memref<144xf32, #tpu.memory_space<smem>>
    %433 = vector.broadcast %432 : f32 to vector<2x384xf32>
    %434 = arith.mulf %433, %423 : vector<2x384xf32>
    %435 = arith.addf %418, %434 : vector<2x384xf32>
    %c133 = arith.constant 133 : index
    %436 = memref.load %arg2[%c133] : memref<144xf32, #tpu.memory_space<smem>>
    %437 = vector.broadcast %436 : f32 to vector<2x384xf32>
    %438 = arith.mulf %437, %423 : vector<2x384xf32>
    %439 = arith.addf %422, %438 : vector<2x384xf32>
    %c365_i32_24 = arith.constant 365 : i32
    %440 = tpu.dynamic_rotate %304 by %c365_i32_24 dim 1 : vector<2x384xf32>, i32 -> vector<2x384xf32>
    %c26 = arith.constant 26 : index
    %441 = memref.load %arg2[%c26] : memref<144xf32, #tpu.memory_space<smem>>
    %442 = vector.broadcast %441 : f32 to vector<2x384xf32>
    %443 = arith.mulf %442, %440 : vector<2x384xf32>
    %444 = arith.addf %427, %443 : vector<2x384xf32>
    %c62 = arith.constant 62 : index
    %445 = memref.load %arg2[%c62] : memref<144xf32, #tpu.memory_space<smem>>
    %446 = vector.broadcast %445 : f32 to vector<2x384xf32>
    %447 = arith.mulf %446, %440 : vector<2x384xf32>
    %448 = arith.addf %431, %447 : vector<2x384xf32>
    %c98 = arith.constant 98 : index
    %449 = memref.load %arg2[%c98] : memref<144xf32, #tpu.memory_space<smem>>
    %450 = vector.broadcast %449 : f32 to vector<2x384xf32>
    %451 = arith.mulf %450, %440 : vector<2x384xf32>
    %452 = arith.addf %435, %451 : vector<2x384xf32>
    %c134 = arith.constant 134 : index
    %453 = memref.load %arg2[%c134] : memref<144xf32, #tpu.memory_space<smem>>
    %454 = vector.broadcast %453 : f32 to vector<2x384xf32>
    %455 = arith.mulf %454, %440 : vector<2x384xf32>
    %456 = arith.addf %439, %455 : vector<2x384xf32>
    %c6_25 = arith.constant 6 : index
    %c0_26 = arith.constant 0 : index
    %457 = vector.load %arg0[%c6_25, %c0_26] : memref<8x384xf32, #tpu.memory_space<vmem>>, vector<2x384xf32>
    %c19_i32_27 = arith.constant 19 : i32
    %458 = tpu.dynamic_rotate %457 by %c19_i32_27 dim 1 : vector<2x384xf32>, i32 -> vector<2x384xf32>
    %c27 = arith.constant 27 : index
    %459 = memref.load %arg2[%c27] : memref<144xf32, #tpu.memory_space<smem>>
    %460 = vector.broadcast %459 : f32 to vector<2x384xf32>
    %461 = arith.mulf %460, %458 : vector<2x384xf32>
    %462 = arith.addf %444, %461 : vector<2x384xf32>
    %c63 = arith.constant 63 : index
    %463 = memref.load %arg2[%c63] : memref<144xf32, #tpu.memory_space<smem>>
    %464 = vector.broadcast %463 : f32 to vector<2x384xf32>
    %465 = arith.mulf %464, %458 : vector<2x384xf32>
    %466 = arith.addf %448, %465 : vector<2x384xf32>
    %c99 = arith.constant 99 : index
    %467 = memref.load %arg2[%c99] : memref<144xf32, #tpu.memory_space<smem>>
    %468 = vector.broadcast %467 : f32 to vector<2x384xf32>
    %469 = arith.mulf %468, %458 : vector<2x384xf32>
    %470 = arith.addf %452, %469 : vector<2x384xf32>
    %c135 = arith.constant 135 : index
    %471 = memref.load %arg2[%c135] : memref<144xf32, #tpu.memory_space<smem>>
    %472 = vector.broadcast %471 : f32 to vector<2x384xf32>
    %473 = arith.mulf %472, %458 : vector<2x384xf32>
    %474 = arith.addf %456, %473 : vector<2x384xf32>
    %c18_i32_28 = arith.constant 18 : i32
    %475 = tpu.dynamic_rotate %457 by %c18_i32_28 dim 1 : vector<2x384xf32>, i32 -> vector<2x384xf32>
    %c28 = arith.constant 28 : index
    %476 = memref.load %arg2[%c28] : memref<144xf32, #tpu.memory_space<smem>>
    %477 = vector.broadcast %476 : f32 to vector<2x384xf32>
    %478 = arith.mulf %477, %475 : vector<2x384xf32>
    %479 = arith.addf %462, %478 : vector<2x384xf32>
    %c64 = arith.constant 64 : index
    %480 = memref.load %arg2[%c64] : memref<144xf32, #tpu.memory_space<smem>>
    %481 = vector.broadcast %480 : f32 to vector<2x384xf32>
    %482 = arith.mulf %481, %475 : vector<2x384xf32>
    %483 = arith.addf %466, %482 : vector<2x384xf32>
    %c100 = arith.constant 100 : index
    %484 = memref.load %arg2[%c100] : memref<144xf32, #tpu.memory_space<smem>>
    %485 = vector.broadcast %484 : f32 to vector<2x384xf32>
    %486 = arith.mulf %485, %475 : vector<2x384xf32>
    %487 = arith.addf %470, %486 : vector<2x384xf32>
    %c136 = arith.constant 136 : index
    %488 = memref.load %arg2[%c136] : memref<144xf32, #tpu.memory_space<smem>>
    %489 = vector.broadcast %488 : f32 to vector<2x384xf32>
    %490 = arith.mulf %489, %475 : vector<2x384xf32>
    %491 = arith.addf %474, %490 : vector<2x384xf32>
    %c17_i32_29 = arith.constant 17 : i32
    %492 = tpu.dynamic_rotate %457 by %c17_i32_29 dim 1 : vector<2x384xf32>, i32 -> vector<2x384xf32>
    %c29 = arith.constant 29 : index
    %493 = memref.load %arg2[%c29] : memref<144xf32, #tpu.memory_space<smem>>
    %494 = vector.broadcast %493 : f32 to vector<2x384xf32>
    %495 = arith.mulf %494, %492 : vector<2x384xf32>
    %496 = arith.addf %479, %495 : vector<2x384xf32>
    %c65 = arith.constant 65 : index
    %497 = memref.load %arg2[%c65] : memref<144xf32, #tpu.memory_space<smem>>
    %498 = vector.broadcast %497 : f32 to vector<2x384xf32>
    %499 = arith.mulf %498, %492 : vector<2x384xf32>
    %500 = arith.addf %483, %499 : vector<2x384xf32>
    %c101 = arith.constant 101 : index
    %501 = memref.load %arg2[%c101] : memref<144xf32, #tpu.memory_space<smem>>
    %502 = vector.broadcast %501 : f32 to vector<2x384xf32>
    %503 = arith.mulf %502, %492 : vector<2x384xf32>
    %504 = arith.addf %487, %503 : vector<2x384xf32>
    %c137 = arith.constant 137 : index
    %505 = memref.load %arg2[%c137] : memref<144xf32, #tpu.memory_space<smem>>
    %506 = vector.broadcast %505 : f32 to vector<2x384xf32>
    %507 = arith.mulf %506, %492 : vector<2x384xf32>
    %508 = arith.addf %491, %507 : vector<2x384xf32>
    %c1_i32_30 = arith.constant 1 : i32
    %509 = tpu.dynamic_rotate %457 by %c1_i32_30 dim 1 : vector<2x384xf32>, i32 -> vector<2x384xf32>
    %c30 = arith.constant 30 : index
    %510 = memref.load %arg2[%c30] : memref<144xf32, #tpu.memory_space<smem>>
    %511 = vector.broadcast %510 : f32 to vector<2x384xf32>
    %512 = arith.mulf %511, %509 : vector<2x384xf32>
    %513 = arith.addf %496, %512 : vector<2x384xf32>
    %c66 = arith.constant 66 : index
    %514 = memref.load %arg2[%c66] : memref<144xf32, #tpu.memory_space<smem>>
    %515 = vector.broadcast %514 : f32 to vector<2x384xf32>
    %516 = arith.mulf %515, %509 : vector<2x384xf32>
    %517 = arith.addf %500, %516 : vector<2x384xf32>
    %c102 = arith.constant 102 : index
    %518 = memref.load %arg2[%c102] : memref<144xf32, #tpu.memory_space<smem>>
    %519 = vector.broadcast %518 : f32 to vector<2x384xf32>
    %520 = arith.mulf %519, %509 : vector<2x384xf32>
    %521 = arith.addf %504, %520 : vector<2x384xf32>
    %c138 = arith.constant 138 : index
    %522 = memref.load %arg2[%c138] : memref<144xf32, #tpu.memory_space<smem>>
    %523 = vector.broadcast %522 : f32 to vector<2x384xf32>
    %524 = arith.mulf %523, %509 : vector<2x384xf32>
    %525 = arith.addf %508, %524 : vector<2x384xf32>
    %c31 = arith.constant 31 : index
    %526 = memref.load %arg2[%c31] : memref<144xf32, #tpu.memory_space<smem>>
    %527 = vector.broadcast %526 : f32 to vector<2x384xf32>
    %528 = arith.mulf %527, %457 : vector<2x384xf32>
    %529 = arith.addf %513, %528 : vector<2x384xf32>
    %c67 = arith.constant 67 : index
    %530 = memref.load %arg2[%c67] : memref<144xf32, #tpu.memory_space<smem>>
    %531 = vector.broadcast %530 : f32 to vector<2x384xf32>
    %532 = arith.mulf %531, %457 : vector<2x384xf32>
    %533 = arith.addf %517, %532 : vector<2x384xf32>
    %c103 = arith.constant 103 : index
    %534 = memref.load %arg2[%c103] : memref<144xf32, #tpu.memory_space<smem>>
    %535 = vector.broadcast %534 : f32 to vector<2x384xf32>
    %536 = arith.mulf %535, %457 : vector<2x384xf32>
    %537 = arith.addf %521, %536 : vector<2x384xf32>
    %c139 = arith.constant 139 : index
    %538 = memref.load %arg2[%c139] : memref<144xf32, #tpu.memory_space<smem>>
    %539 = vector.broadcast %538 : f32 to vector<2x384xf32>
    %540 = arith.mulf %539, %457 : vector<2x384xf32>
    %541 = arith.addf %525, %540 : vector<2x384xf32>
    %c383_i32_31 = arith.constant 383 : i32
    %542 = tpu.dynamic_rotate %457 by %c383_i32_31 dim 1 : vector<2x384xf32>, i32 -> vector<2x384xf32>
    %c32 = arith.constant 32 : index
    %543 = memref.load %arg2[%c32] : memref<144xf32, #tpu.memory_space<smem>>
    %544 = vector.broadcast %543 : f32 to vector<2x384xf32>
    %545 = arith.mulf %544, %542 : vector<2x384xf32>
    %546 = arith.addf %529, %545 : vector<2x384xf32>
    %c68 = arith.constant 68 : index
    %547 = memref.load %arg2[%c68] : memref<144xf32, #tpu.memory_space<smem>>
    %548 = vector.broadcast %547 : f32 to vector<2x384xf32>
    %549 = arith.mulf %548, %542 : vector<2x384xf32>
    %550 = arith.addf %533, %549 : vector<2x384xf32>
    %c104 = arith.constant 104 : index
    %551 = memref.load %arg2[%c104] : memref<144xf32, #tpu.memory_space<smem>>
    %552 = vector.broadcast %551 : f32 to vector<2x384xf32>
    %553 = arith.mulf %552, %542 : vector<2x384xf32>
    %554 = arith.addf %537, %553 : vector<2x384xf32>
    %c140 = arith.constant 140 : index
    %555 = memref.load %arg2[%c140] : memref<144xf32, #tpu.memory_space<smem>>
    %556 = vector.broadcast %555 : f32 to vector<2x384xf32>
    %557 = arith.mulf %556, %542 : vector<2x384xf32>
    %558 = arith.addf %541, %557 : vector<2x384xf32>
    %c367_i32_32 = arith.constant 367 : i32
    %559 = tpu.dynamic_rotate %457 by %c367_i32_32 dim 1 : vector<2x384xf32>, i32 -> vector<2x384xf32>
    %c33 = arith.constant 33 : index
    %560 = memref.load %arg2[%c33] : memref<144xf32, #tpu.memory_space<smem>>
    %561 = vector.broadcast %560 : f32 to vector<2x384xf32>
    %562 = arith.mulf %561, %559 : vector<2x384xf32>
    %563 = arith.addf %546, %562 : vector<2x384xf32>
    %c69 = arith.constant 69 : index
    %564 = memref.load %arg2[%c69] : memref<144xf32, #tpu.memory_space<smem>>
    %565 = vector.broadcast %564 : f32 to vector<2x384xf32>
    %566 = arith.mulf %565, %559 : vector<2x384xf32>
    %567 = arith.addf %550, %566 : vector<2x384xf32>
    %c105 = arith.constant 105 : index
    %568 = memref.load %arg2[%c105] : memref<144xf32, #tpu.memory_space<smem>>
    %569 = vector.broadcast %568 : f32 to vector<2x384xf32>
    %570 = arith.mulf %569, %559 : vector<2x384xf32>
    %571 = arith.addf %554, %570 : vector<2x384xf32>
    %c141 = arith.constant 141 : index
    %572 = memref.load %arg2[%c141] : memref<144xf32, #tpu.memory_space<smem>>
    %573 = vector.broadcast %572 : f32 to vector<2x384xf32>
    %574 = arith.mulf %573, %559 : vector<2x384xf32>
    %575 = arith.addf %558, %574 : vector<2x384xf32>
    %c366_i32_33 = arith.constant 366 : i32
    %576 = tpu.dynamic_rotate %457 by %c366_i32_33 dim 1 : vector<2x384xf32>, i32 -> vector<2x384xf32>
    %c34 = arith.constant 34 : index
    %577 = memref.load %arg2[%c34] : memref<144xf32, #tpu.memory_space<smem>>
    %578 = vector.broadcast %577 : f32 to vector<2x384xf32>
    %579 = arith.mulf %578, %576 : vector<2x384xf32>
    %580 = arith.addf %563, %579 : vector<2x384xf32>
    %c70 = arith.constant 70 : index
    %581 = memref.load %arg2[%c70] : memref<144xf32, #tpu.memory_space<smem>>
    %582 = vector.broadcast %581 : f32 to vector<2x384xf32>
    %583 = arith.mulf %582, %576 : vector<2x384xf32>
    %584 = arith.addf %567, %583 : vector<2x384xf32>
    %c106 = arith.constant 106 : index
    %585 = memref.load %arg2[%c106] : memref<144xf32, #tpu.memory_space<smem>>
    %586 = vector.broadcast %585 : f32 to vector<2x384xf32>
    %587 = arith.mulf %586, %576 : vector<2x384xf32>
    %588 = arith.addf %571, %587 : vector<2x384xf32>
    %c142 = arith.constant 142 : index
    %589 = memref.load %arg2[%c142] : memref<144xf32, #tpu.memory_space<smem>>
    %590 = vector.broadcast %589 : f32 to vector<2x384xf32>
    %591 = arith.mulf %590, %576 : vector<2x384xf32>
    %592 = arith.addf %575, %591 : vector<2x384xf32>
    %c365_i32_34 = arith.constant 365 : i32
    %593 = tpu.dynamic_rotate %457 by %c365_i32_34 dim 1 : vector<2x384xf32>, i32 -> vector<2x384xf32>
    %c35 = arith.constant 35 : index
    %594 = memref.load %arg2[%c35] : memref<144xf32, #tpu.memory_space<smem>>
    %595 = vector.broadcast %594 : f32 to vector<2x384xf32>
    %596 = arith.mulf %595, %593 : vector<2x384xf32>
    %597 = arith.addf %580, %596 : vector<2x384xf32>
    %c71 = arith.constant 71 : index
    %598 = memref.load %arg2[%c71] : memref<144xf32, #tpu.memory_space<smem>>
    %599 = vector.broadcast %598 : f32 to vector<2x384xf32>
    %600 = arith.mulf %599, %593 : vector<2x384xf32>
    %601 = arith.addf %584, %600 : vector<2x384xf32>
    %c107 = arith.constant 107 : index
    %602 = memref.load %arg2[%c107] : memref<144xf32, #tpu.memory_space<smem>>
    %603 = vector.broadcast %602 : f32 to vector<2x384xf32>
    %604 = arith.mulf %603, %593 : vector<2x384xf32>
    %605 = arith.addf %588, %604 : vector<2x384xf32>
    %c143 = arith.constant 143 : index
    %606 = memref.load %arg2[%c143] : memref<144xf32, #tpu.memory_space<smem>>
    %607 = vector.broadcast %606 : f32 to vector<2x384xf32>
    %608 = arith.mulf %607, %593 : vector<2x384xf32>
    %609 = arith.addf %592, %608 : vector<2x384xf32>
    %c0_35 = arith.constant 0 : index
    %610 = memref.load %arg3[%c0_35] : memref<4xf32, #tpu.memory_space<smem>>
    %611 = vector.broadcast %610 : f32 to vector<2x384xf32>
    %612 = arith.addf %597, %611 : vector<2x384xf32>
    %613 = vector.broadcast %0 : vector<1x384xf32> to vector<2x384xf32>
    %614 = arith.mulf %612, %613 : vector<2x384xf32>
    %cst = arith.constant dense<0.000000e+00> : vector<2xf32>
    %615 = vector.multi_reduction <add>, %614, %cst [1] : vector<2x384xf32> to vector<2xf32>
    %616 = vector.shape_cast %615 : vector<2xf32> to vector<2x1xf32>
    %cst_36 = arith.constant dense<0.000000e+00> : vector<1xf32>
    %617 = vector.multi_reduction <add>, %616, %cst_36 [0] : vector<2x1xf32> to vector<1xf32>
    %618 = vector.shape_cast %617 : vector<1xf32> to vector<1x1xf32>
    %619 = arith.mulf %614, %612 : vector<2x384xf32>
    %cst_37 = arith.constant dense<0.000000e+00> : vector<2xf32>
    %620 = vector.multi_reduction <add>, %619, %cst_37 [1] : vector<2x384xf32> to vector<2xf32>
    %621 = vector.shape_cast %620 : vector<2xf32> to vector<2x1xf32>
    %cst_38 = arith.constant dense<0.000000e+00> : vector<1xf32>
    %622 = vector.multi_reduction <add>, %621, %cst_38 [0] : vector<2x1xf32> to vector<1xf32>
    %623 = vector.shape_cast %622 : vector<1xf32> to vector<1x1xf32>
    %cst_39 = arith.constant 0.001953125 : f32
    %624 = vector.broadcast %cst_39 : f32 to vector<1x1xf32>
    %625 = arith.mulf %618, %624 : vector<1x1xf32>
    %cst_40 = arith.constant 0.001953125 : f32
    %626 = vector.broadcast %cst_40 : f32 to vector<1x1xf32>
    %627 = arith.mulf %623, %626 : vector<1x1xf32>
    %628 = arith.mulf %625, %625 : vector<1x1xf32>
    %629 = arith.subf %627, %628 : vector<1x1xf32>
    %cst_41 = arith.constant 8.000000e-01 : f32
    %630 = vector.broadcast %cst_41 : f32 to vector<1x1xf32>
    %631 = arith.addf %629, %630 : vector<1x1xf32>
    %632 = math.rsqrt %631 : vector<1x1xf32>
    %c0_42 = arith.constant 0 : index
    %633 = memref.load %arg4[%c0_42] : memref<4xf32, #tpu.memory_space<smem>>
    %634 = vector.broadcast %633 : f32 to vector<1x1xf32>
    %635 = arith.mulf %632, %634 : vector<1x1xf32>
    %c0_43 = arith.constant 0 : index
    %636 = memref.load %arg5[%c0_43] : memref<4xf32, #tpu.memory_space<smem>>
    %637 = arith.mulf %625, %635 : vector<1x1xf32>
    %638 = vector.broadcast %636 : f32 to vector<1x1xf32>
    %639 = arith.subf %638, %637 : vector<1x1xf32>
    %640 = vector.broadcast %635 : vector<1x1xf32> to vector<2x384xf32>
    %641 = arith.mulf %612, %640 : vector<2x384xf32>
    %642 = vector.broadcast %639 : vector<1x1xf32> to vector<2x384xf32>
    %643 = arith.addf %641, %642 : vector<2x384xf32>
    %c1_44 = arith.constant 1 : index
    %644 = memref.load %arg3[%c1_44] : memref<4xf32, #tpu.memory_space<smem>>
    %645 = vector.broadcast %644 : f32 to vector<2x384xf32>
    %646 = arith.addf %601, %645 : vector<2x384xf32>
    %647 = vector.broadcast %0 : vector<1x384xf32> to vector<2x384xf32>
    %648 = arith.mulf %646, %647 : vector<2x384xf32>
    %cst_45 = arith.constant dense<0.000000e+00> : vector<2xf32>
    %649 = vector.multi_reduction <add>, %648, %cst_45 [1] : vector<2x384xf32> to vector<2xf32>
    %650 = vector.shape_cast %649 : vector<2xf32> to vector<2x1xf32>
    %cst_46 = arith.constant dense<0.000000e+00> : vector<1xf32>
    %651 = vector.multi_reduction <add>, %650, %cst_46 [0] : vector<2x1xf32> to vector<1xf32>
    %652 = vector.shape_cast %651 : vector<1xf32> to vector<1x1xf32>
    %653 = arith.mulf %648, %646 : vector<2x384xf32>
    %cst_47 = arith.constant dense<0.000000e+00> : vector<2xf32>
    %654 = vector.multi_reduction <add>, %653, %cst_47 [1] : vector<2x384xf32> to vector<2xf32>
    %655 = vector.shape_cast %654 : vector<2xf32> to vector<2x1xf32>
    %cst_48 = arith.constant dense<0.000000e+00> : vector<1xf32>
    %656 = vector.multi_reduction <add>, %655, %cst_48 [0] : vector<2x1xf32> to vector<1xf32>
    %657 = vector.shape_cast %656 : vector<1xf32> to vector<1x1xf32>
    %cst_49 = arith.constant 0.001953125 : f32
    %658 = vector.broadcast %cst_49 : f32 to vector<1x1xf32>
    %659 = arith.mulf %652, %658 : vector<1x1xf32>
    %cst_50 = arith.constant 0.001953125 : f32
    %660 = vector.broadcast %cst_50 : f32 to vector<1x1xf32>
    %661 = arith.mulf %657, %660 : vector<1x1xf32>
    %662 = arith.mulf %659, %659 : vector<1x1xf32>
    %663 = arith.subf %661, %662 : vector<1x1xf32>
    %cst_51 = arith.constant 8.000000e-01 : f32
    %664 = vector.broadcast %cst_51 : f32 to vector<1x1xf32>
    %665 = arith.addf %663, %664 : vector<1x1xf32>
    %666 = math.rsqrt %665 : vector<1x1xf32>
    %c1_52 = arith.constant 1 : index
    %667 = memref.load %arg4[%c1_52] : memref<4xf32, #tpu.memory_space<smem>>
    %668 = vector.broadcast %667 : f32 to vector<1x1xf32>
    %669 = arith.mulf %666, %668 : vector<1x1xf32>
    %c1_53 = arith.constant 1 : index
    %670 = memref.load %arg5[%c1_53] : memref<4xf32, #tpu.memory_space<smem>>
    %671 = arith.mulf %659, %669 : vector<1x1xf32>
    %672 = vector.broadcast %670 : f32 to vector<1x1xf32>
    %673 = arith.subf %672, %671 : vector<1x1xf32>
    %674 = vector.broadcast %669 : vector<1x1xf32> to vector<2x384xf32>
    %675 = arith.mulf %646, %674 : vector<2x384xf32>
    %676 = vector.broadcast %673 : vector<1x1xf32> to vector<2x384xf32>
    %677 = arith.addf %675, %676 : vector<2x384xf32>
    %c2_54 = arith.constant 2 : index
    %678 = memref.load %arg3[%c2_54] : memref<4xf32, #tpu.memory_space<smem>>
    %679 = vector.broadcast %678 : f32 to vector<2x384xf32>
    %680 = arith.addf %605, %679 : vector<2x384xf32>
    %681 = vector.broadcast %0 : vector<1x384xf32> to vector<2x384xf32>
    %682 = arith.mulf %680, %681 : vector<2x384xf32>
    %cst_55 = arith.constant dense<0.000000e+00> : vector<2xf32>
    %683 = vector.multi_reduction <add>, %682, %cst_55 [1] : vector<2x384xf32> to vector<2xf32>
    %684 = vector.shape_cast %683 : vector<2xf32> to vector<2x1xf32>
    %cst_56 = arith.constant dense<0.000000e+00> : vector<1xf32>
    %685 = vector.multi_reduction <add>, %684, %cst_56 [0] : vector<2x1xf32> to vector<1xf32>
    %686 = vector.shape_cast %685 : vector<1xf32> to vector<1x1xf32>
    %687 = arith.mulf %682, %680 : vector<2x384xf32>
    %cst_57 = arith.constant dense<0.000000e+00> : vector<2xf32>
    %688 = vector.multi_reduction <add>, %687, %cst_57 [1] : vector<2x384xf32> to vector<2xf32>
    %689 = vector.shape_cast %688 : vector<2xf32> to vector<2x1xf32>
    %cst_58 = arith.constant dense<0.000000e+00> : vector<1xf32>
    %690 = vector.multi_reduction <add>, %689, %cst_58 [0] : vector<2x1xf32> to vector<1xf32>
    %691 = vector.shape_cast %690 : vector<1xf32> to vector<1x1xf32>
    %cst_59 = arith.constant 0.001953125 : f32
    %692 = vector.broadcast %cst_59 : f32 to vector<1x1xf32>
    %693 = arith.mulf %686, %692 : vector<1x1xf32>
    %cst_60 = arith.constant 0.001953125 : f32
    %694 = vector.broadcast %cst_60 : f32 to vector<1x1xf32>
    %695 = arith.mulf %691, %694 : vector<1x1xf32>
    %696 = arith.mulf %693, %693 : vector<1x1xf32>
    %697 = arith.subf %695, %696 : vector<1x1xf32>
    %cst_61 = arith.constant 8.000000e-01 : f32
    %698 = vector.broadcast %cst_61 : f32 to vector<1x1xf32>
    %699 = arith.addf %697, %698 : vector<1x1xf32>
    %700 = math.rsqrt %699 : vector<1x1xf32>
    %c2_62 = arith.constant 2 : index
    %701 = memref.load %arg4[%c2_62] : memref<4xf32, #tpu.memory_space<smem>>
    %702 = vector.broadcast %701 : f32 to vector<1x1xf32>
    %703 = arith.mulf %700, %702 : vector<1x1xf32>
    %c2_63 = arith.constant 2 : index
    %704 = memref.load %arg5[%c2_63] : memref<4xf32, #tpu.memory_space<smem>>
    %705 = arith.mulf %693, %703 : vector<1x1xf32>
    %706 = vector.broadcast %704 : f32 to vector<1x1xf32>
    %707 = arith.subf %706, %705 : vector<1x1xf32>
    %708 = vector.broadcast %703 : vector<1x1xf32> to vector<2x384xf32>
    %709 = arith.mulf %680, %708 : vector<2x384xf32>
    %710 = vector.broadcast %707 : vector<1x1xf32> to vector<2x384xf32>
    %711 = arith.addf %709, %710 : vector<2x384xf32>
    %c3_64 = arith.constant 3 : index
    %712 = memref.load %arg3[%c3_64] : memref<4xf32, #tpu.memory_space<smem>>
    %713 = vector.broadcast %712 : f32 to vector<2x384xf32>
    %714 = arith.addf %609, %713 : vector<2x384xf32>
    %715 = vector.broadcast %0 : vector<1x384xf32> to vector<2x384xf32>
    %716 = arith.mulf %714, %715 : vector<2x384xf32>
    %cst_65 = arith.constant dense<0.000000e+00> : vector<2xf32>
    %717 = vector.multi_reduction <add>, %716, %cst_65 [1] : vector<2x384xf32> to vector<2xf32>
    %718 = vector.shape_cast %717 : vector<2xf32> to vector<2x1xf32>
    %cst_66 = arith.constant dense<0.000000e+00> : vector<1xf32>
    %719 = vector.multi_reduction <add>, %718, %cst_66 [0] : vector<2x1xf32> to vector<1xf32>
    %720 = vector.shape_cast %719 : vector<1xf32> to vector<1x1xf32>
    %721 = arith.mulf %716, %714 : vector<2x384xf32>
    %cst_67 = arith.constant dense<0.000000e+00> : vector<2xf32>
    %722 = vector.multi_reduction <add>, %721, %cst_67 [1] : vector<2x384xf32> to vector<2xf32>
    %723 = vector.shape_cast %722 : vector<2xf32> to vector<2x1xf32>
    %cst_68 = arith.constant dense<0.000000e+00> : vector<1xf32>
    %724 = vector.multi_reduction <add>, %723, %cst_68 [0] : vector<2x1xf32> to vector<1xf32>
    %725 = vector.shape_cast %724 : vector<1xf32> to vector<1x1xf32>
    %cst_69 = arith.constant 0.001953125 : f32
    %726 = vector.broadcast %cst_69 : f32 to vector<1x1xf32>
    %727 = arith.mulf %720, %726 : vector<1x1xf32>
    %cst_70 = arith.constant 0.001953125 : f32
    %728 = vector.broadcast %cst_70 : f32 to vector<1x1xf32>
    %729 = arith.mulf %725, %728 : vector<1x1xf32>
    %730 = arith.mulf %727, %727 : vector<1x1xf32>
    %731 = arith.subf %729, %730 : vector<1x1xf32>
    %cst_71 = arith.constant 8.000000e-01 : f32
    %732 = vector.broadcast %cst_71 : f32 to vector<1x1xf32>
    %733 = arith.addf %731, %732 : vector<1x1xf32>
    %734 = math.rsqrt %733 : vector<1x1xf32>
    %c3_72 = arith.constant 3 : index
    %735 = memref.load %arg4[%c3_72] : memref<4xf32, #tpu.memory_space<smem>>
    %736 = vector.broadcast %735 : f32 to vector<1x1xf32>
    %737 = arith.mulf %734, %736 : vector<1x1xf32>
    %c3_73 = arith.constant 3 : index
    %738 = memref.load %arg5[%c3_73] : memref<4xf32, #tpu.memory_space<smem>>
    %739 = arith.mulf %727, %737 : vector<1x1xf32>
    %740 = vector.broadcast %738 : f32 to vector<1x1xf32>
    %741 = arith.subf %740, %739 : vector<1x1xf32>
    %742 = vector.broadcast %737 : vector<1x1xf32> to vector<2x384xf32>
    %743 = arith.mulf %714, %742 : vector<2x384xf32>
    %744 = vector.broadcast %741 : vector<1x1xf32> to vector<2x384xf32>
    %745 = arith.addf %743, %744 : vector<2x384xf32>
    %cst_74 = arith.constant 0.000000e+00 : f32
    %746 = vector.broadcast %cst_74 : f32 to vector<2x384xf32>
    %747 = arith.cmpf ogt, %643, %746 : vector<2x384xf32>
    %748 = vector.broadcast %1 : f32 to vector<2x384xf32>
    %749 = arith.mulf %643, %748 : vector<2x384xf32>
    %750 = arith.select %747, %643, %749 : vector<2x384xi1>, vector<2x384xf32>
    %751 = vector.broadcast %0 : vector<1x384xf32> to vector<2x384xf32>
    %752 = arith.mulf %750, %751 : vector<2x384xf32>
    %c0_75 = arith.constant 0 : index
    %c0_76 = arith.constant 0 : index
    %753 = vector.load %arg12[%c0_75, %c0_76] : memref<8x384xf32, #tpu.memory_space<vmem>>, vector<2x384xf32>
    tpu.vector_store %arg12[%c0_75, %c0_76], %752 {strides = array<i32>} : memref<8x384xf32, #tpu.memory_space<vmem>>, vector<2x384xf32>,
    %cst_77 = arith.constant 0.000000e+00 : f32
    %754 = vector.broadcast %cst_77 : f32 to vector<2x384xf32>
    %755 = arith.cmpf ogt, %677, %754 : vector<2x384xf32>
    %756 = vector.broadcast %1 : f32 to vector<2x384xf32>
    %757 = arith.mulf %677, %756 : vector<2x384xf32>
    %758 = arith.select %755, %677, %757 : vector<2x384xi1>, vector<2x384xf32>
    %759 = vector.broadcast %0 : vector<1x384xf32> to vector<2x384xf32>
    %760 = arith.mulf %758, %759 : vector<2x384xf32>
    %c2_78 = arith.constant 2 : index
    %c0_79 = arith.constant 0 : index
    %761 = vector.load %arg12[%c2_78, %c0_79] : memref<8x384xf32, #tpu.memory_space<vmem>>, vector<2x384xf32>
    tpu.vector_store %arg12[%c2_78, %c0_79], %760 {strides = array<i32>} : memref<8x384xf32, #tpu.memory_space<vmem>>, vector<2x384xf32>,
    %cst_80 = arith.constant 0.000000e+00 : f32
    %762 = vector.broadcast %cst_80 : f32 to vector<2x384xf32>
    %763 = arith.cmpf ogt, %711, %762 : vector<2x384xf32>
    %764 = vector.broadcast %1 : f32 to vector<2x384xf32>
    %765 = arith.mulf %711, %764 : vector<2x384xf32>
    %766 = arith.select %763, %711, %765 : vector<2x384xi1>, vector<2x384xf32>
    %767 = vector.broadcast %0 : vector<1x384xf32> to vector<2x384xf32>
    %768 = arith.mulf %766, %767 : vector<2x384xf32>
    %c4_81 = arith.constant 4 : index
    %c0_82 = arith.constant 0 : index
    %769 = vector.load %arg12[%c4_81, %c0_82] : memref<8x384xf32, #tpu.memory_space<vmem>>, vector<2x384xf32>
    tpu.vector_store %arg12[%c4_81, %c0_82], %768 {strides = array<i32>} : memref<8x384xf32, #tpu.memory_space<vmem>>, vector<2x384xf32>,
    %cst_83 = arith.constant 0.000000e+00 : f32
    %770 = vector.broadcast %cst_83 : f32 to vector<2x384xf32>
    %771 = arith.cmpf ogt, %745, %770 : vector<2x384xf32>
    %772 = vector.broadcast %1 : f32 to vector<2x384xf32>
    %773 = arith.mulf %745, %772 : vector<2x384xf32>
    %774 = arith.select %771, %745, %773 : vector<2x384xi1>, vector<2x384xf32>
    %775 = vector.broadcast %0 : vector<1x384xf32> to vector<2x384xf32>
    %776 = arith.mulf %774, %775 : vector<2x384xf32>
    %c6_84 = arith.constant 6 : index
    %c0_85 = arith.constant 0 : index
    %777 = vector.load %arg12[%c6_84, %c0_85] : memref<8x384xf32, #tpu.memory_space<vmem>>, vector<2x384xf32>
    tpu.vector_store %arg12[%c6_84, %c0_85], %776 {strides = array<i32>} : memref<8x384xf32, #tpu.memory_space<vmem>>, vector<2x384xf32>,
    %c0_86 = arith.constant 0 : index
    %c0_87 = arith.constant 0 : index
    %778 = vector.load %arg12[%c0_86, %c0_87] : memref<8x384xf32, #tpu.memory_space<vmem>>, vector<2x384xf32>
    %c19_i32_88 = arith.constant 19 : i32
    %779 = tpu.dynamic_rotate %778 by %c19_i32_88 dim 1 : vector<2x384xf32>, i32 -> vector<2x384xf32>
    %c0_89 = arith.constant 0 : index
    %780 = memref.load %arg7[%c0_89] : memref<144xf32, #tpu.memory_space<smem>>
    %781 = vector.broadcast %780 : f32 to vector<2x384xf32>
    %782 = arith.mulf %781, %779 : vector<2x384xf32>
    %c36_90 = arith.constant 36 : index
    %783 = memref.load %arg7[%c36_90] : memref<144xf32, #tpu.memory_space<smem>>
    %784 = vector.broadcast %783 : f32 to vector<2x384xf32>
    %785 = arith.mulf %784, %779 : vector<2x384xf32>
    %c72_91 = arith.constant 72 : index
    %786 = memref.load %arg7[%c72_91] : memref<144xf32, #tpu.memory_space<smem>>
    %787 = vector.broadcast %786 : f32 to vector<2x384xf32>
    %788 = arith.mulf %787, %779 : vector<2x384xf32>
    %c108_92 = arith.constant 108 : index
    %789 = memref.load %arg7[%c108_92] : memref<144xf32, #tpu.memory_space<smem>>
    %790 = vector.broadcast %789 : f32 to vector<2x384xf32>
    %791 = arith.mulf %790, %779 : vector<2x384xf32>
    %c18_i32_93 = arith.constant 18 : i32
    %792 = tpu.dynamic_rotate %778 by %c18_i32_93 dim 1 : vector<2x384xf32>, i32 -> vector<2x384xf32>
    %c1_94 = arith.constant 1 : index
    %793 = memref.load %arg7[%c1_94] : memref<144xf32, #tpu.memory_space<smem>>
    %794 = vector.broadcast %793 : f32 to vector<2x384xf32>
    %795 = arith.mulf %794, %792 : vector<2x384xf32>
    %796 = arith.addf %782, %795 : vector<2x384xf32>
    %c37_95 = arith.constant 37 : index
    %797 = memref.load %arg7[%c37_95] : memref<144xf32, #tpu.memory_space<smem>>
    %798 = vector.broadcast %797 : f32 to vector<2x384xf32>
    %799 = arith.mulf %798, %792 : vector<2x384xf32>
    %800 = arith.addf %785, %799 : vector<2x384xf32>
    %c73_96 = arith.constant 73 : index
    %801 = memref.load %arg7[%c73_96] : memref<144xf32, #tpu.memory_space<smem>>
    %802 = vector.broadcast %801 : f32 to vector<2x384xf32>
    %803 = arith.mulf %802, %792 : vector<2x384xf32>
    %804 = arith.addf %788, %803 : vector<2x384xf32>
    %c109_97 = arith.constant 109 : index
    %805 = memref.load %arg7[%c109_97] : memref<144xf32, #tpu.memory_space<smem>>
    %806 = vector.broadcast %805 : f32 to vector<2x384xf32>
    %807 = arith.mulf %806, %792 : vector<2x384xf32>
    %808 = arith.addf %791, %807 : vector<2x384xf32>
    %c17_i32_98 = arith.constant 17 : i32
    %809 = tpu.dynamic_rotate %778 by %c17_i32_98 dim 1 : vector<2x384xf32>, i32 -> vector<2x384xf32>
    %c2_99 = arith.constant 2 : index
    %810 = memref.load %arg7[%c2_99] : memref<144xf32, #tpu.memory_space<smem>>
    %811 = vector.broadcast %810 : f32 to vector<2x384xf32>
    %812 = arith.mulf %811, %809 : vector<2x384xf32>
    %813 = arith.addf %796, %812 : vector<2x384xf32>
    %c38_100 = arith.constant 38 : index
    %814 = memref.load %arg7[%c38_100] : memref<144xf32, #tpu.memory_space<smem>>
    %815 = vector.broadcast %814 : f32 to vector<2x384xf32>
    %816 = arith.mulf %815, %809 : vector<2x384xf32>
    %817 = arith.addf %800, %816 : vector<2x384xf32>
    %c74_101 = arith.constant 74 : index
    %818 = memref.load %arg7[%c74_101] : memref<144xf32, #tpu.memory_space<smem>>
    %819 = vector.broadcast %818 : f32 to vector<2x384xf32>
    %820 = arith.mulf %819, %809 : vector<2x384xf32>
    %821 = arith.addf %804, %820 : vector<2x384xf32>
    %c110_102 = arith.constant 110 : index
    %822 = memref.load %arg7[%c110_102] : memref<144xf32, #tpu.memory_space<smem>>
    %823 = vector.broadcast %822 : f32 to vector<2x384xf32>
    %824 = arith.mulf %823, %809 : vector<2x384xf32>
    %825 = arith.addf %808, %824 : vector<2x384xf32>
    %c1_i32_103 = arith.constant 1 : i32
    %826 = tpu.dynamic_rotate %778 by %c1_i32_103 dim 1 : vector<2x384xf32>, i32 -> vector<2x384xf32>
    %c3_104 = arith.constant 3 : index
    %827 = memref.load %arg7[%c3_104] : memref<144xf32, #tpu.memory_space<smem>>
    %828 = vector.broadcast %827 : f32 to vector<2x384xf32>
    %829 = arith.mulf %828, %826 : vector<2x384xf32>
    %830 = arith.addf %813, %829 : vector<2x384xf32>
    %c39_105 = arith.constant 39 : index
    %831 = memref.load %arg7[%c39_105] : memref<144xf32, #tpu.memory_space<smem>>
    %832 = vector.broadcast %831 : f32 to vector<2x384xf32>
    %833 = arith.mulf %832, %826 : vector<2x384xf32>
    %834 = arith.addf %817, %833 : vector<2x384xf32>
    %c75_106 = arith.constant 75 : index
    %835 = memref.load %arg7[%c75_106] : memref<144xf32, #tpu.memory_space<smem>>
    %836 = vector.broadcast %835 : f32 to vector<2x384xf32>
    %837 = arith.mulf %836, %826 : vector<2x384xf32>
    %838 = arith.addf %821, %837 : vector<2x384xf32>
    %c111_107 = arith.constant 111 : index
    %839 = memref.load %arg7[%c111_107] : memref<144xf32, #tpu.memory_space<smem>>
    %840 = vector.broadcast %839 : f32 to vector<2x384xf32>
    %841 = arith.mulf %840, %826 : vector<2x384xf32>
    %842 = arith.addf %825, %841 : vector<2x384xf32>
    %c4_108 = arith.constant 4 : index
    %843 = memref.load %arg7[%c4_108] : memref<144xf32, #tpu.memory_space<smem>>
    %844 = vector.broadcast %843 : f32 to vector<2x384xf32>
    %845 = arith.mulf %844, %778 : vector<2x384xf32>
    %846 = arith.addf %830, %845 : vector<2x384xf32>
    %c40_109 = arith.constant 40 : index
    %847 = memref.load %arg7[%c40_109] : memref<144xf32, #tpu.memory_space<smem>>
    %848 = vector.broadcast %847 : f32 to vector<2x384xf32>
    %849 = arith.mulf %848, %778 : vector<2x384xf32>
    %850 = arith.addf %834, %849 : vector<2x384xf32>
    %c76_110 = arith.constant 76 : index
    %851 = memref.load %arg7[%c76_110] : memref<144xf32, #tpu.memory_space<smem>>
    %852 = vector.broadcast %851 : f32 to vector<2x384xf32>
    %853 = arith.mulf %852, %778 : vector<2x384xf32>
    %854 = arith.addf %838, %853 : vector<2x384xf32>
    %c112_111 = arith.constant 112 : index
    %855 = memref.load %arg7[%c112_111] : memref<144xf32, #tpu.memory_space<smem>>
    %856 = vector.broadcast %855 : f32 to vector<2x384xf32>
    %857 = arith.mulf %856, %778 : vector<2x384xf32>
    %858 = arith.addf %842, %857 : vector<2x384xf32>
    %c383_i32_112 = arith.constant 383 : i32
    %859 = tpu.dynamic_rotate %778 by %c383_i32_112 dim 1 : vector<2x384xf32>, i32 -> vector<2x384xf32>
    %c5_113 = arith.constant 5 : index
    %860 = memref.load %arg7[%c5_113] : memref<144xf32, #tpu.memory_space<smem>>
    %861 = vector.broadcast %860 : f32 to vector<2x384xf32>
    %862 = arith.mulf %861, %859 : vector<2x384xf32>
    %863 = arith.addf %846, %862 : vector<2x384xf32>
    %c41_114 = arith.constant 41 : index
    %864 = memref.load %arg7[%c41_114] : memref<144xf32, #tpu.memory_space<smem>>
    %865 = vector.broadcast %864 : f32 to vector<2x384xf32>
    %866 = arith.mulf %865, %859 : vector<2x384xf32>
    %867 = arith.addf %850, %866 : vector<2x384xf32>
    %c77_115 = arith.constant 77 : index
    %868 = memref.load %arg7[%c77_115] : memref<144xf32, #tpu.memory_space<smem>>
    %869 = vector.broadcast %868 : f32 to vector<2x384xf32>
    %870 = arith.mulf %869, %859 : vector<2x384xf32>
    %871 = arith.addf %854, %870 : vector<2x384xf32>
    %c113_116 = arith.constant 113 : index
    %872 = memref.load %arg7[%c113_116] : memref<144xf32, #tpu.memory_space<smem>>
    %873 = vector.broadcast %872 : f32 to vector<2x384xf32>
    %874 = arith.mulf %873, %859 : vector<2x384xf32>
    %875 = arith.addf %858, %874 : vector<2x384xf32>
    %c367_i32_117 = arith.constant 367 : i32
    %876 = tpu.dynamic_rotate %778 by %c367_i32_117 dim 1 : vector<2x384xf32>, i32 -> vector<2x384xf32>
    %c6_118 = arith.constant 6 : index
    %877 = memref.load %arg7[%c6_118] : memref<144xf32, #tpu.memory_space<smem>>
    %878 = vector.broadcast %877 : f32 to vector<2x384xf32>
    %879 = arith.mulf %878, %876 : vector<2x384xf32>
    %880 = arith.addf %863, %879 : vector<2x384xf32>
    %c42_119 = arith.constant 42 : index
    %881 = memref.load %arg7[%c42_119] : memref<144xf32, #tpu.memory_space<smem>>
    %882 = vector.broadcast %881 : f32 to vector<2x384xf32>
    %883 = arith.mulf %882, %876 : vector<2x384xf32>
    %884 = arith.addf %867, %883 : vector<2x384xf32>
    %c78_120 = arith.constant 78 : index
    %885 = memref.load %arg7[%c78_120] : memref<144xf32, #tpu.memory_space<smem>>
    %886 = vector.broadcast %885 : f32 to vector<2x384xf32>
    %887 = arith.mulf %886, %876 : vector<2x384xf32>
    %888 = arith.addf %871, %887 : vector<2x384xf32>
    %c114_121 = arith.constant 114 : index
    %889 = memref.load %arg7[%c114_121] : memref<144xf32, #tpu.memory_space<smem>>
    %890 = vector.broadcast %889 : f32 to vector<2x384xf32>
    %891 = arith.mulf %890, %876 : vector<2x384xf32>
    %892 = arith.addf %875, %891 : vector<2x384xf32>
    %c366_i32_122 = arith.constant 366 : i32
    %893 = tpu.dynamic_rotate %778 by %c366_i32_122 dim 1 : vector<2x384xf32>, i32 -> vector<2x384xf32>
    %c7_123 = arith.constant 7 : index
    %894 = memref.load %arg7[%c7_123] : memref<144xf32, #tpu.memory_space<smem>>
    %895 = vector.broadcast %894 : f32 to vector<2x384xf32>
    %896 = arith.mulf %895, %893 : vector<2x384xf32>
    %897 = arith.addf %880, %896 : vector<2x384xf32>
    %c43_124 = arith.constant 43 : index
    %898 = memref.load %arg7[%c43_124] : memref<144xf32, #tpu.memory_space<smem>>
    %899 = vector.broadcast %898 : f32 to vector<2x384xf32>
    %900 = arith.mulf %899, %893 : vector<2x384xf32>
    %901 = arith.addf %884, %900 : vector<2x384xf32>
    %c79_125 = arith.constant 79 : index
    %902 = memref.load %arg7[%c79_125] : memref<144xf32, #tpu.memory_space<smem>>
    %903 = vector.broadcast %902 : f32 to vector<2x384xf32>
    %904 = arith.mulf %903, %893 : vector<2x384xf32>
    %905 = arith.addf %888, %904 : vector<2x384xf32>
    %c115_126 = arith.constant 115 : index
    %906 = memref.load %arg7[%c115_126] : memref<144xf32, #tpu.memory_space<smem>>
    %907 = vector.broadcast %906 : f32 to vector<2x384xf32>
    %908 = arith.mulf %907, %893 : vector<2x384xf32>
    %909 = arith.addf %892, %908 : vector<2x384xf32>
    %c365_i32_127 = arith.constant 365 : i32
    %910 = tpu.dynamic_rotate %778 by %c365_i32_127 dim 1 : vector<2x384xf32>, i32 -> vector<2x384xf32>
    %c8_128 = arith.constant 8 : index
    %911 = memref.load %arg7[%c8_128] : memref<144xf32, #tpu.memory_space<smem>>
    %912 = vector.broadcast %911 : f32 to vector<2x384xf32>
    %913 = arith.mulf %912, %910 : vector<2x384xf32>
    %914 = arith.addf %897, %913 : vector<2x384xf32>
    %c44_129 = arith.constant 44 : index
    %915 = memref.load %arg7[%c44_129] : memref<144xf32, #tpu.memory_space<smem>>
    %916 = vector.broadcast %915 : f32 to vector<2x384xf32>
    %917 = arith.mulf %916, %910 : vector<2x384xf32>
    %918 = arith.addf %901, %917 : vector<2x384xf32>
    %c80_130 = arith.constant 80 : index
    %919 = memref.load %arg7[%c80_130] : memref<144xf32, #tpu.memory_space<smem>>
    %920 = vector.broadcast %919 : f32 to vector<2x384xf32>
    %921 = arith.mulf %920, %910 : vector<2x384xf32>
    %922 = arith.addf %905, %921 : vector<2x384xf32>
    %c116_131 = arith.constant 116 : index
    %923 = memref.load %arg7[%c116_131] : memref<144xf32, #tpu.memory_space<smem>>
    %924 = vector.broadcast %923 : f32 to vector<2x384xf32>
    %925 = arith.mulf %924, %910 : vector<2x384xf32>
    %926 = arith.addf %909, %925 : vector<2x384xf32>
    %c2_132 = arith.constant 2 : index
    %c0_133 = arith.constant 0 : index
    %927 = vector.load %arg12[%c2_132, %c0_133] : memref<8x384xf32, #tpu.memory_space<vmem>>, vector<2x384xf32>
    %c19_i32_134 = arith.constant 19 : i32
    %928 = tpu.dynamic_rotate %927 by %c19_i32_134 dim 1 : vector<2x384xf32>, i32 -> vector<2x384xf32>
    %c9_135 = arith.constant 9 : index
    %929 = memref.load %arg7[%c9_135] : memref<144xf32, #tpu.memory_space<smem>>
    %930 = vector.broadcast %929 : f32 to vector<2x384xf32>
    %931 = arith.mulf %930, %928 : vector<2x384xf32>
    %932 = arith.addf %914, %931 : vector<2x384xf32>
    %c45_136 = arith.constant 45 : index
    %933 = memref.load %arg7[%c45_136] : memref<144xf32, #tpu.memory_space<smem>>
    %934 = vector.broadcast %933 : f32 to vector<2x384xf32>
    %935 = arith.mulf %934, %928 : vector<2x384xf32>
    %936 = arith.addf %918, %935 : vector<2x384xf32>
    %c81_137 = arith.constant 81 : index
    %937 = memref.load %arg7[%c81_137] : memref<144xf32, #tpu.memory_space<smem>>
    %938 = vector.broadcast %937 : f32 to vector<2x384xf32>
    %939 = arith.mulf %938, %928 : vector<2x384xf32>
    %940 = arith.addf %922, %939 : vector<2x384xf32>
    %c117_138 = arith.constant 117 : index
    %941 = memref.load %arg7[%c117_138] : memref<144xf32, #tpu.memory_space<smem>>
    %942 = vector.broadcast %941 : f32 to vector<2x384xf32>
    %943 = arith.mulf %942, %928 : vector<2x384xf32>
    %944 = arith.addf %926, %943 : vector<2x384xf32>
    %c18_i32_139 = arith.constant 18 : i32
    %945 = tpu.dynamic_rotate %927 by %c18_i32_139 dim 1 : vector<2x384xf32>, i32 -> vector<2x384xf32>
    %c10_140 = arith.constant 10 : index
    %946 = memref.load %arg7[%c10_140] : memref<144xf32, #tpu.memory_space<smem>>
    %947 = vector.broadcast %946 : f32 to vector<2x384xf32>
    %948 = arith.mulf %947, %945 : vector<2x384xf32>
    %949 = arith.addf %932, %948 : vector<2x384xf32>
    %c46_141 = arith.constant 46 : index
    %950 = memref.load %arg7[%c46_141] : memref<144xf32, #tpu.memory_space<smem>>
    %951 = vector.broadcast %950 : f32 to vector<2x384xf32>
    %952 = arith.mulf %951, %945 : vector<2x384xf32>
    %953 = arith.addf %936, %952 : vector<2x384xf32>
    %c82_142 = arith.constant 82 : index
    %954 = memref.load %arg7[%c82_142] : memref<144xf32, #tpu.memory_space<smem>>
    %955 = vector.broadcast %954 : f32 to vector<2x384xf32>
    %956 = arith.mulf %955, %945 : vector<2x384xf32>
    %957 = arith.addf %940, %956 : vector<2x384xf32>
    %c118_143 = arith.constant 118 : index
    %958 = memref.load %arg7[%c118_143] : memref<144xf32, #tpu.memory_space<smem>>
    %959 = vector.broadcast %958 : f32 to vector<2x384xf32>
    %960 = arith.mulf %959, %945 : vector<2x384xf32>
    %961 = arith.addf %944, %960 : vector<2x384xf32>
    %c17_i32_144 = arith.constant 17 : i32
    %962 = tpu.dynamic_rotate %927 by %c17_i32_144 dim 1 : vector<2x384xf32>, i32 -> vector<2x384xf32>
    %c11_145 = arith.constant 11 : index
    %963 = memref.load %arg7[%c11_145] : memref<144xf32, #tpu.memory_space<smem>>
    %964 = vector.broadcast %963 : f32 to vector<2x384xf32>
    %965 = arith.mulf %964, %962 : vector<2x384xf32>
    %966 = arith.addf %949, %965 : vector<2x384xf32>
    %c47_146 = arith.constant 47 : index
    %967 = memref.load %arg7[%c47_146] : memref<144xf32, #tpu.memory_space<smem>>
    %968 = vector.broadcast %967 : f32 to vector<2x384xf32>
    %969 = arith.mulf %968, %962 : vector<2x384xf32>
    %970 = arith.addf %953, %969 : vector<2x384xf32>
    %c83_147 = arith.constant 83 : index
    %971 = memref.load %arg7[%c83_147] : memref<144xf32, #tpu.memory_space<smem>>
    %972 = vector.broadcast %971 : f32 to vector<2x384xf32>
    %973 = arith.mulf %972, %962 : vector<2x384xf32>
    %974 = arith.addf %957, %973 : vector<2x384xf32>
    %c119_148 = arith.constant 119 : index
    %975 = memref.load %arg7[%c119_148] : memref<144xf32, #tpu.memory_space<smem>>
    %976 = vector.broadcast %975 : f32 to vector<2x384xf32>
    %977 = arith.mulf %976, %962 : vector<2x384xf32>
    %978 = arith.addf %961, %977 : vector<2x384xf32>
    %c1_i32_149 = arith.constant 1 : i32
    %979 = tpu.dynamic_rotate %927 by %c1_i32_149 dim 1 : vector<2x384xf32>, i32 -> vector<2x384xf32>
    %c12_150 = arith.constant 12 : index
    %980 = memref.load %arg7[%c12_150] : memref<144xf32, #tpu.memory_space<smem>>
    %981 = vector.broadcast %980 : f32 to vector<2x384xf32>
    %982 = arith.mulf %981, %979 : vector<2x384xf32>
    %983 = arith.addf %966, %982 : vector<2x384xf32>
    %c48_151 = arith.constant 48 : index
    %984 = memref.load %arg7[%c48_151] : memref<144xf32, #tpu.memory_space<smem>>
    %985 = vector.broadcast %984 : f32 to vector<2x384xf32>
    %986 = arith.mulf %985, %979 : vector<2x384xf32>
    %987 = arith.addf %970, %986 : vector<2x384xf32>
    %c84_152 = arith.constant 84 : index
    %988 = memref.load %arg7[%c84_152] : memref<144xf32, #tpu.memory_space<smem>>
    %989 = vector.broadcast %988 : f32 to vector<2x384xf32>
    %990 = arith.mulf %989, %979 : vector<2x384xf32>
    %991 = arith.addf %974, %990 : vector<2x384xf32>
    %c120_153 = arith.constant 120 : index
    %992 = memref.load %arg7[%c120_153] : memref<144xf32, #tpu.memory_space<smem>>
    %993 = vector.broadcast %992 : f32 to vector<2x384xf32>
    %994 = arith.mulf %993, %979 : vector<2x384xf32>
    %995 = arith.addf %978, %994 : vector<2x384xf32>
    %c13_154 = arith.constant 13 : index
    %996 = memref.load %arg7[%c13_154] : memref<144xf32, #tpu.memory_space<smem>>
    %997 = vector.broadcast %996 : f32 to vector<2x384xf32>
    %998 = arith.mulf %997, %927 : vector<2x384xf32>
    %999 = arith.addf %983, %998 : vector<2x384xf32>
    %c49_155 = arith.constant 49 : index
    %1000 = memref.load %arg7[%c49_155] : memref<144xf32, #tpu.memory_space<smem>>
    %1001 = vector.broadcast %1000 : f32 to vector<2x384xf32>
    %1002 = arith.mulf %1001, %927 : vector<2x384xf32>
    %1003 = arith.addf %987, %1002 : vector<2x384xf32>
    %c85_156 = arith.constant 85 : index
    %1004 = memref.load %arg7[%c85_156] : memref<144xf32, #tpu.memory_space<smem>>
    %1005 = vector.broadcast %1004 : f32 to vector<2x384xf32>
    %1006 = arith.mulf %1005, %927 : vector<2x384xf32>
    %1007 = arith.addf %991, %1006 : vector<2x384xf32>
    %c121_157 = arith.constant 121 : index
    %1008 = memref.load %arg7[%c121_157] : memref<144xf32, #tpu.memory_space<smem>>
    %1009 = vector.broadcast %1008 : f32 to vector<2x384xf32>
    %1010 = arith.mulf %1009, %927 : vector<2x384xf32>
    %1011 = arith.addf %995, %1010 : vector<2x384xf32>
    %c383_i32_158 = arith.constant 383 : i32
    %1012 = tpu.dynamic_rotate %927 by %c383_i32_158 dim 1 : vector<2x384xf32>, i32 -> vector<2x384xf32>
    %c14_159 = arith.constant 14 : index
    %1013 = memref.load %arg7[%c14_159] : memref<144xf32, #tpu.memory_space<smem>>
    %1014 = vector.broadcast %1013 : f32 to vector<2x384xf32>
    %1015 = arith.mulf %1014, %1012 : vector<2x384xf32>
    %1016 = arith.addf %999, %1015 : vector<2x384xf32>
    %c50_160 = arith.constant 50 : index
    %1017 = memref.load %arg7[%c50_160] : memref<144xf32, #tpu.memory_space<smem>>
    %1018 = vector.broadcast %1017 : f32 to vector<2x384xf32>
    %1019 = arith.mulf %1018, %1012 : vector<2x384xf32>
    %1020 = arith.addf %1003, %1019 : vector<2x384xf32>
    %c86_161 = arith.constant 86 : index
    %1021 = memref.load %arg7[%c86_161] : memref<144xf32, #tpu.memory_space<smem>>
    %1022 = vector.broadcast %1021 : f32 to vector<2x384xf32>
    %1023 = arith.mulf %1022, %1012 : vector<2x384xf32>
    %1024 = arith.addf %1007, %1023 : vector<2x384xf32>
    %c122_162 = arith.constant 122 : index
    %1025 = memref.load %arg7[%c122_162] : memref<144xf32, #tpu.memory_space<smem>>
    %1026 = vector.broadcast %1025 : f32 to vector<2x384xf32>
    %1027 = arith.mulf %1026, %1012 : vector<2x384xf32>
    %1028 = arith.addf %1011, %1027 : vector<2x384xf32>
    %c367_i32_163 = arith.constant 367 : i32
    %1029 = tpu.dynamic_rotate %927 by %c367_i32_163 dim 1 : vector<2x384xf32>, i32 -> vector<2x384xf32>
    %c15_164 = arith.constant 15 : index
    %1030 = memref.load %arg7[%c15_164] : memref<144xf32, #tpu.memory_space<smem>>
    %1031 = vector.broadcast %1030 : f32 to vector<2x384xf32>
    %1032 = arith.mulf %1031, %1029 : vector<2x384xf32>
    %1033 = arith.addf %1016, %1032 : vector<2x384xf32>
    %c51_165 = arith.constant 51 : index
    %1034 = memref.load %arg7[%c51_165] : memref<144xf32, #tpu.memory_space<smem>>
    %1035 = vector.broadcast %1034 : f32 to vector<2x384xf32>
    %1036 = arith.mulf %1035, %1029 : vector<2x384xf32>
    %1037 = arith.addf %1020, %1036 : vector<2x384xf32>
    %c87_166 = arith.constant 87 : index
    %1038 = memref.load %arg7[%c87_166] : memref<144xf32, #tpu.memory_space<smem>>
    %1039 = vector.broadcast %1038 : f32 to vector<2x384xf32>
    %1040 = arith.mulf %1039, %1029 : vector<2x384xf32>
    %1041 = arith.addf %1024, %1040 : vector<2x384xf32>
    %c123_167 = arith.constant 123 : index
    %1042 = memref.load %arg7[%c123_167] : memref<144xf32, #tpu.memory_space<smem>>
    %1043 = vector.broadcast %1042 : f32 to vector<2x384xf32>
    %1044 = arith.mulf %1043, %1029 : vector<2x384xf32>
    %1045 = arith.addf %1028, %1044 : vector<2x384xf32>
    %c366_i32_168 = arith.constant 366 : i32
    %1046 = tpu.dynamic_rotate %927 by %c366_i32_168 dim 1 : vector<2x384xf32>, i32 -> vector<2x384xf32>
    %c16_169 = arith.constant 16 : index
    %1047 = memref.load %arg7[%c16_169] : memref<144xf32, #tpu.memory_space<smem>>
    %1048 = vector.broadcast %1047 : f32 to vector<2x384xf32>
    %1049 = arith.mulf %1048, %1046 : vector<2x384xf32>
    %1050 = arith.addf %1033, %1049 : vector<2x384xf32>
    %c52_170 = arith.constant 52 : index
    %1051 = memref.load %arg7[%c52_170] : memref<144xf32, #tpu.memory_space<smem>>
    %1052 = vector.broadcast %1051 : f32 to vector<2x384xf32>
    %1053 = arith.mulf %1052, %1046 : vector<2x384xf32>
    %1054 = arith.addf %1037, %1053 : vector<2x384xf32>
    %c88_171 = arith.constant 88 : index
    %1055 = memref.load %arg7[%c88_171] : memref<144xf32, #tpu.memory_space<smem>>
    %1056 = vector.broadcast %1055 : f32 to vector<2x384xf32>
    %1057 = arith.mulf %1056, %1046 : vector<2x384xf32>
    %1058 = arith.addf %1041, %1057 : vector<2x384xf32>
    %c124_172 = arith.constant 124 : index
    %1059 = memref.load %arg7[%c124_172] : memref<144xf32, #tpu.memory_space<smem>>
    %1060 = vector.broadcast %1059 : f32 to vector<2x384xf32>
    %1061 = arith.mulf %1060, %1046 : vector<2x384xf32>
    %1062 = arith.addf %1045, %1061 : vector<2x384xf32>
    %c365_i32_173 = arith.constant 365 : i32
    %1063 = tpu.dynamic_rotate %927 by %c365_i32_173 dim 1 : vector<2x384xf32>, i32 -> vector<2x384xf32>
    %c17_174 = arith.constant 17 : index
    %1064 = memref.load %arg7[%c17_174] : memref<144xf32, #tpu.memory_space<smem>>
    %1065 = vector.broadcast %1064 : f32 to vector<2x384xf32>
    %1066 = arith.mulf %1065, %1063 : vector<2x384xf32>
    %1067 = arith.addf %1050, %1066 : vector<2x384xf32>
    %c53_175 = arith.constant 53 : index
    %1068 = memref.load %arg7[%c53_175] : memref<144xf32, #tpu.memory_space<smem>>
    %1069 = vector.broadcast %1068 : f32 to vector<2x384xf32>
    %1070 = arith.mulf %1069, %1063 : vector<2x384xf32>
    %1071 = arith.addf %1054, %1070 : vector<2x384xf32>
    %c89_176 = arith.constant 89 : index
    %1072 = memref.load %arg7[%c89_176] : memref<144xf32, #tpu.memory_space<smem>>
    %1073 = vector.broadcast %1072 : f32 to vector<2x384xf32>
    %1074 = arith.mulf %1073, %1063 : vector<2x384xf32>
    %1075 = arith.addf %1058, %1074 : vector<2x384xf32>
    %c125_177 = arith.constant 125 : index
    %1076 = memref.load %arg7[%c125_177] : memref<144xf32, #tpu.memory_space<smem>>
    %1077 = vector.broadcast %1076 : f32 to vector<2x384xf32>
    %1078 = arith.mulf %1077, %1063 : vector<2x384xf32>
    %1079 = arith.addf %1062, %1078 : vector<2x384xf32>
    %c4_178 = arith.constant 4 : index
    %c0_179 = arith.constant 0 : index
    %1080 = vector.load %arg12[%c4_178, %c0_179] : memref<8x384xf32, #tpu.memory_space<vmem>>, vector<2x384xf32>
    %c19_i32_180 = arith.constant 19 : i32
    %1081 = tpu.dynamic_rotate %1080 by %c19_i32_180 dim 1 : vector<2x384xf32>, i32 -> vector<2x384xf32>
    %c18_181 = arith.constant 18 : index
    %1082 = memref.load %arg7[%c18_181] : memref<144xf32, #tpu.memory_space<smem>>
    %1083 = vector.broadcast %1082 : f32 to vector<2x384xf32>
    %1084 = arith.mulf %1083, %1081 : vector<2x384xf32>
    %1085 = arith.addf %1067, %1084 : vector<2x384xf32>
    %c54_182 = arith.constant 54 : index
    %1086 = memref.load %arg7[%c54_182] : memref<144xf32, #tpu.memory_space<smem>>
    %1087 = vector.broadcast %1086 : f32 to vector<2x384xf32>
    %1088 = arith.mulf %1087, %1081 : vector<2x384xf32>
    %1089 = arith.addf %1071, %1088 : vector<2x384xf32>
    %c90_183 = arith.constant 90 : index
    %1090 = memref.load %arg7[%c90_183] : memref<144xf32, #tpu.memory_space<smem>>
    %1091 = vector.broadcast %1090 : f32 to vector<2x384xf32>
    %1092 = arith.mulf %1091, %1081 : vector<2x384xf32>
    %1093 = arith.addf %1075, %1092 : vector<2x384xf32>
    %c126_184 = arith.constant 126 : index
    %1094 = memref.load %arg7[%c126_184] : memref<144xf32, #tpu.memory_space<smem>>
    %1095 = vector.broadcast %1094 : f32 to vector<2x384xf32>
    %1096 = arith.mulf %1095, %1081 : vector<2x384xf32>
    %1097 = arith.addf %1079, %1096 : vector<2x384xf32>
    %c18_i32_185 = arith.constant 18 : i32
    %1098 = tpu.dynamic_rotate %1080 by %c18_i32_185 dim 1 : vector<2x384xf32>, i32 -> vector<2x384xf32>
    %c19_186 = arith.constant 19 : index
    %1099 = memref.load %arg7[%c19_186] : memref<144xf32, #tpu.memory_space<smem>>
    %1100 = vector.broadcast %1099 : f32 to vector<2x384xf32>
    %1101 = arith.mulf %1100, %1098 : vector<2x384xf32>
    %1102 = arith.addf %1085, %1101 : vector<2x384xf32>
    %c55_187 = arith.constant 55 : index
    %1103 = memref.load %arg7[%c55_187] : memref<144xf32, #tpu.memory_space<smem>>
    %1104 = vector.broadcast %1103 : f32 to vector<2x384xf32>
    %1105 = arith.mulf %1104, %1098 : vector<2x384xf32>
    %1106 = arith.addf %1089, %1105 : vector<2x384xf32>
    %c91_188 = arith.constant 91 : index
    %1107 = memref.load %arg7[%c91_188] : memref<144xf32, #tpu.memory_space<smem>>
    %1108 = vector.broadcast %1107 : f32 to vector<2x384xf32>
    %1109 = arith.mulf %1108, %1098 : vector<2x384xf32>
    %1110 = arith.addf %1093, %1109 : vector<2x384xf32>
    %c127_189 = arith.constant 127 : index
    %1111 = memref.load %arg7[%c127_189] : memref<144xf32, #tpu.memory_space<smem>>
    %1112 = vector.broadcast %1111 : f32 to vector<2x384xf32>
    %1113 = arith.mulf %1112, %1098 : vector<2x384xf32>
    %1114 = arith.addf %1097, %1113 : vector<2x384xf32>
    %c17_i32_190 = arith.constant 17 : i32
    %1115 = tpu.dynamic_rotate %1080 by %c17_i32_190 dim 1 : vector<2x384xf32>, i32 -> vector<2x384xf32>
    %c20_191 = arith.constant 20 : index
    %1116 = memref.load %arg7[%c20_191] : memref<144xf32, #tpu.memory_space<smem>>
    %1117 = vector.broadcast %1116 : f32 to vector<2x384xf32>
    %1118 = arith.mulf %1117, %1115 : vector<2x384xf32>
    %1119 = arith.addf %1102, %1118 : vector<2x384xf32>
    %c56_192 = arith.constant 56 : index
    %1120 = memref.load %arg7[%c56_192] : memref<144xf32, #tpu.memory_space<smem>>
    %1121 = vector.broadcast %1120 : f32 to vector<2x384xf32>
    %1122 = arith.mulf %1121, %1115 : vector<2x384xf32>
    %1123 = arith.addf %1106, %1122 : vector<2x384xf32>
    %c92_193 = arith.constant 92 : index
    %1124 = memref.load %arg7[%c92_193] : memref<144xf32, #tpu.memory_space<smem>>
    %1125 = vector.broadcast %1124 : f32 to vector<2x384xf32>
    %1126 = arith.mulf %1125, %1115 : vector<2x384xf32>
    %1127 = arith.addf %1110, %1126 : vector<2x384xf32>
    %c128_194 = arith.constant 128 : index
    %1128 = memref.load %arg7[%c128_194] : memref<144xf32, #tpu.memory_space<smem>>
    %1129 = vector.broadcast %1128 : f32 to vector<2x384xf32>
    %1130 = arith.mulf %1129, %1115 : vector<2x384xf32>
    %1131 = arith.addf %1114, %1130 : vector<2x384xf32>
    %c1_i32_195 = arith.constant 1 : i32
    %1132 = tpu.dynamic_rotate %1080 by %c1_i32_195 dim 1 : vector<2x384xf32>, i32 -> vector<2x384xf32>
    %c21_196 = arith.constant 21 : index
    %1133 = memref.load %arg7[%c21_196] : memref<144xf32, #tpu.memory_space<smem>>
    %1134 = vector.broadcast %1133 : f32 to vector<2x384xf32>
    %1135 = arith.mulf %1134, %1132 : vector<2x384xf32>
    %1136 = arith.addf %1119, %1135 : vector<2x384xf32>
    %c57_197 = arith.constant 57 : index
    %1137 = memref.load %arg7[%c57_197] : memref<144xf32, #tpu.memory_space<smem>>
    %1138 = vector.broadcast %1137 : f32 to vector<2x384xf32>
    %1139 = arith.mulf %1138, %1132 : vector<2x384xf32>
    %1140 = arith.addf %1123, %1139 : vector<2x384xf32>
    %c93_198 = arith.constant 93 : index
    %1141 = memref.load %arg7[%c93_198] : memref<144xf32, #tpu.memory_space<smem>>
    %1142 = vector.broadcast %1141 : f32 to vector<2x384xf32>
    %1143 = arith.mulf %1142, %1132 : vector<2x384xf32>
    %1144 = arith.addf %1127, %1143 : vector<2x384xf32>
    %c129_199 = arith.constant 129 : index
    %1145 = memref.load %arg7[%c129_199] : memref<144xf32, #tpu.memory_space<smem>>
    %1146 = vector.broadcast %1145 : f32 to vector<2x384xf32>
    %1147 = arith.mulf %1146, %1132 : vector<2x384xf32>
    %1148 = arith.addf %1131, %1147 : vector<2x384xf32>
    %c22_200 = arith.constant 22 : index
    %1149 = memref.load %arg7[%c22_200] : memref<144xf32, #tpu.memory_space<smem>>
    %1150 = vector.broadcast %1149 : f32 to vector<2x384xf32>
    %1151 = arith.mulf %1150, %1080 : vector<2x384xf32>
    %1152 = arith.addf %1136, %1151 : vector<2x384xf32>
    %c58_201 = arith.constant 58 : index
    %1153 = memref.load %arg7[%c58_201] : memref<144xf32, #tpu.memory_space<smem>>
    %1154 = vector.broadcast %1153 : f32 to vector<2x384xf32>
    %1155 = arith.mulf %1154, %1080 : vector<2x384xf32>
    %1156 = arith.addf %1140, %1155 : vector<2x384xf32>
    %c94_202 = arith.constant 94 : index
    %1157 = memref.load %arg7[%c94_202] : memref<144xf32, #tpu.memory_space<smem>>
    %1158 = vector.broadcast %1157 : f32 to vector<2x384xf32>
    %1159 = arith.mulf %1158, %1080 : vector<2x384xf32>
    %1160 = arith.addf %1144, %1159 : vector<2x384xf32>
    %c130_203 = arith.constant 130 : index
    %1161 = memref.load %arg7[%c130_203] : memref<144xf32, #tpu.memory_space<smem>>
    %1162 = vector.broadcast %1161 : f32 to vector<2x384xf32>
    %1163 = arith.mulf %1162, %1080 : vector<2x384xf32>
    %1164 = arith.addf %1148, %1163 : vector<2x384xf32>
    %c383_i32_204 = arith.constant 383 : i32
    %1165 = tpu.dynamic_rotate %1080 by %c383_i32_204 dim 1 : vector<2x384xf32>, i32 -> vector<2x384xf32>
    %c23_205 = arith.constant 23 : index
    %1166 = memref.load %arg7[%c23_205] : memref<144xf32, #tpu.memory_space<smem>>
    %1167 = vector.broadcast %1166 : f32 to vector<2x384xf32>
    %1168 = arith.mulf %1167, %1165 : vector<2x384xf32>
    %1169 = arith.addf %1152, %1168 : vector<2x384xf32>
    %c59_206 = arith.constant 59 : index
    %1170 = memref.load %arg7[%c59_206] : memref<144xf32, #tpu.memory_space<smem>>
    %1171 = vector.broadcast %1170 : f32 to vector<2x384xf32>
    %1172 = arith.mulf %1171, %1165 : vector<2x384xf32>
    %1173 = arith.addf %1156, %1172 : vector<2x384xf32>
    %c95_207 = arith.constant 95 : index
    %1174 = memref.load %arg7[%c95_207] : memref<144xf32, #tpu.memory_space<smem>>
    %1175 = vector.broadcast %1174 : f32 to vector<2x384xf32>
    %1176 = arith.mulf %1175, %1165 : vector<2x384xf32>
    %1177 = arith.addf %1160, %1176 : vector<2x384xf32>
    %c131_208 = arith.constant 131 : index
    %1178 = memref.load %arg7[%c131_208] : memref<144xf32, #tpu.memory_space<smem>>
    %1179 = vector.broadcast %1178 : f32 to vector<2x384xf32>
    %1180 = arith.mulf %1179, %1165 : vector<2x384xf32>
    %1181 = arith.addf %1164, %1180 : vector<2x384xf32>
    %c367_i32_209 = arith.constant 367 : i32
    %1182 = tpu.dynamic_rotate %1080 by %c367_i32_209 dim 1 : vector<2x384xf32>, i32 -> vector<2x384xf32>
    %c24_210 = arith.constant 24 : index
    %1183 = memref.load %arg7[%c24_210] : memref<144xf32, #tpu.memory_space<smem>>
    %1184 = vector.broadcast %1183 : f32 to vector<2x384xf32>
    %1185 = arith.mulf %1184, %1182 : vector<2x384xf32>
    %1186 = arith.addf %1169, %1185 : vector<2x384xf32>
    %c60_211 = arith.constant 60 : index
    %1187 = memref.load %arg7[%c60_211] : memref<144xf32, #tpu.memory_space<smem>>
    %1188 = vector.broadcast %1187 : f32 to vector<2x384xf32>
    %1189 = arith.mulf %1188, %1182 : vector<2x384xf32>
    %1190 = arith.addf %1173, %1189 : vector<2x384xf32>
    %c96_212 = arith.constant 96 : index
    %1191 = memref.load %arg7[%c96_212] : memref<144xf32, #tpu.memory_space<smem>>
    %1192 = vector.broadcast %1191 : f32 to vector<2x384xf32>
    %1193 = arith.mulf %1192, %1182 : vector<2x384xf32>
    %1194 = arith.addf %1177, %1193 : vector<2x384xf32>
    %c132_213 = arith.constant 132 : index
    %1195 = memref.load %arg7[%c132_213] : memref<144xf32, #tpu.memory_space<smem>>
    %1196 = vector.broadcast %1195 : f32 to vector<2x384xf32>
    %1197 = arith.mulf %1196, %1182 : vector<2x384xf32>
    %1198 = arith.addf %1181, %1197 : vector<2x384xf32>
    %c366_i32_214 = arith.constant 366 : i32
    %1199 = tpu.dynamic_rotate %1080 by %c366_i32_214 dim 1 : vector<2x384xf32>, i32 -> vector<2x384xf32>
    %c25_215 = arith.constant 25 : index
    %1200 = memref.load %arg7[%c25_215] : memref<144xf32, #tpu.memory_space<smem>>
    %1201 = vector.broadcast %1200 : f32 to vector<2x384xf32>
    %1202 = arith.mulf %1201, %1199 : vector<2x384xf32>
    %1203 = arith.addf %1186, %1202 : vector<2x384xf32>
    %c61_216 = arith.constant 61 : index
    %1204 = memref.load %arg7[%c61_216] : memref<144xf32, #tpu.memory_space<smem>>
    %1205 = vector.broadcast %1204 : f32 to vector<2x384xf32>
    %1206 = arith.mulf %1205, %1199 : vector<2x384xf32>
    %1207 = arith.addf %1190, %1206 : vector<2x384xf32>
    %c97_217 = arith.constant 97 : index
    %1208 = memref.load %arg7[%c97_217] : memref<144xf32, #tpu.memory_space<smem>>
    %1209 = vector.broadcast %1208 : f32 to vector<2x384xf32>
    %1210 = arith.mulf %1209, %1199 : vector<2x384xf32>
    %1211 = arith.addf %1194, %1210 : vector<2x384xf32>
    %c133_218 = arith.constant 133 : index
    %1212 = memref.load %arg7[%c133_218] : memref<144xf32, #tpu.memory_space<smem>>
    %1213 = vector.broadcast %1212 : f32 to vector<2x384xf32>
    %1214 = arith.mulf %1213, %1199 : vector<2x384xf32>
    %1215 = arith.addf %1198, %1214 : vector<2x384xf32>
    %c365_i32_219 = arith.constant 365 : i32
    %1216 = tpu.dynamic_rotate %1080 by %c365_i32_219 dim 1 : vector<2x384xf32>, i32 -> vector<2x384xf32>
    %c26_220 = arith.constant 26 : index
    %1217 = memref.load %arg7[%c26_220] : memref<144xf32, #tpu.memory_space<smem>>
    %1218 = vector.broadcast %1217 : f32 to vector<2x384xf32>
    %1219 = arith.mulf %1218, %1216 : vector<2x384xf32>
    %1220 = arith.addf %1203, %1219 : vector<2x384xf32>
    %c62_221 = arith.constant 62 : index
    %1221 = memref.load %arg7[%c62_221] : memref<144xf32, #tpu.memory_space<smem>>
    %1222 = vector.broadcast %1221 : f32 to vector<2x384xf32>
    %1223 = arith.mulf %1222, %1216 : vector<2x384xf32>
    %1224 = arith.addf %1207, %1223 : vector<2x384xf32>
    %c98_222 = arith.constant 98 : index
    %1225 = memref.load %arg7[%c98_222] : memref<144xf32, #tpu.memory_space<smem>>
    %1226 = vector.broadcast %1225 : f32 to vector<2x384xf32>
    %1227 = arith.mulf %1226, %1216 : vector<2x384xf32>
    %1228 = arith.addf %1211, %1227 : vector<2x384xf32>
    %c134_223 = arith.constant 134 : index
    %1229 = memref.load %arg7[%c134_223] : memref<144xf32, #tpu.memory_space<smem>>
    %1230 = vector.broadcast %1229 : f32 to vector<2x384xf32>
    %1231 = arith.mulf %1230, %1216 : vector<2x384xf32>
    %1232 = arith.addf %1215, %1231 : vector<2x384xf32>
    %c6_224 = arith.constant 6 : index
    %c0_225 = arith.constant 0 : index
    %1233 = vector.load %arg12[%c6_224, %c0_225] : memref<8x384xf32, #tpu.memory_space<vmem>>, vector<2x384xf32>
    %c19_i32_226 = arith.constant 19 : i32
    %1234 = tpu.dynamic_rotate %1233 by %c19_i32_226 dim 1 : vector<2x384xf32>, i32 -> vector<2x384xf32>
    %c27_227 = arith.constant 27 : index
    %1235 = memref.load %arg7[%c27_227] : memref<144xf32, #tpu.memory_space<smem>>
    %1236 = vector.broadcast %1235 : f32 to vector<2x384xf32>
    %1237 = arith.mulf %1236, %1234 : vector<2x384xf32>
    %1238 = arith.addf %1220, %1237 : vector<2x384xf32>
    %c63_228 = arith.constant 63 : index
    %1239 = memref.load %arg7[%c63_228] : memref<144xf32, #tpu.memory_space<smem>>
    %1240 = vector.broadcast %1239 : f32 to vector<2x384xf32>
    %1241 = arith.mulf %1240, %1234 : vector<2x384xf32>
    %1242 = arith.addf %1224, %1241 : vector<2x384xf32>
    %c99_229 = arith.constant 99 : index
    %1243 = memref.load %arg7[%c99_229] : memref<144xf32, #tpu.memory_space<smem>>
    %1244 = vector.broadcast %1243 : f32 to vector<2x384xf32>
    %1245 = arith.mulf %1244, %1234 : vector<2x384xf32>
    %1246 = arith.addf %1228, %1245 : vector<2x384xf32>
    %c135_230 = arith.constant 135 : index
    %1247 = memref.load %arg7[%c135_230] : memref<144xf32, #tpu.memory_space<smem>>
    %1248 = vector.broadcast %1247 : f32 to vector<2x384xf32>
    %1249 = arith.mulf %1248, %1234 : vector<2x384xf32>
    %1250 = arith.addf %1232, %1249 : vector<2x384xf32>
    %c18_i32_231 = arith.constant 18 : i32
    %1251 = tpu.dynamic_rotate %1233 by %c18_i32_231 dim 1 : vector<2x384xf32>, i32 -> vector<2x384xf32>
    %c28_232 = arith.constant 28 : index
    %1252 = memref.load %arg7[%c28_232] : memref<144xf32, #tpu.memory_space<smem>>
    %1253 = vector.broadcast %1252 : f32 to vector<2x384xf32>
    %1254 = arith.mulf %1253, %1251 : vector<2x384xf32>
    %1255 = arith.addf %1238, %1254 : vector<2x384xf32>
    %c64_233 = arith.constant 64 : index
    %1256 = memref.load %arg7[%c64_233] : memref<144xf32, #tpu.memory_space<smem>>
    %1257 = vector.broadcast %1256 : f32 to vector<2x384xf32>
    %1258 = arith.mulf %1257, %1251 : vector<2x384xf32>
    %1259 = arith.addf %1242, %1258 : vector<2x384xf32>
    %c100_234 = arith.constant 100 : index
    %1260 = memref.load %arg7[%c100_234] : memref<144xf32, #tpu.memory_space<smem>>
    %1261 = vector.broadcast %1260 : f32 to vector<2x384xf32>
    %1262 = arith.mulf %1261, %1251 : vector<2x384xf32>
    %1263 = arith.addf %1246, %1262 : vector<2x384xf32>
    %c136_235 = arith.constant 136 : index
    %1264 = memref.load %arg7[%c136_235] : memref<144xf32, #tpu.memory_space<smem>>
    %1265 = vector.broadcast %1264 : f32 to vector<2x384xf32>
    %1266 = arith.mulf %1265, %1251 : vector<2x384xf32>
    %1267 = arith.addf %1250, %1266 : vector<2x384xf32>
    %c17_i32_236 = arith.constant 17 : i32
    %1268 = tpu.dynamic_rotate %1233 by %c17_i32_236 dim 1 : vector<2x384xf32>, i32 -> vector<2x384xf32>
    %c29_237 = arith.constant 29 : index
    %1269 = memref.load %arg7[%c29_237] : memref<144xf32, #tpu.memory_space<smem>>
    %1270 = vector.broadcast %1269 : f32 to vector<2x384xf32>
    %1271 = arith.mulf %1270, %1268 : vector<2x384xf32>
    %1272 = arith.addf %1255, %1271 : vector<2x384xf32>
    %c65_238 = arith.constant 65 : index
    %1273 = memref.load %arg7[%c65_238] : memref<144xf32, #tpu.memory_space<smem>>
    %1274 = vector.broadcast %1273 : f32 to vector<2x384xf32>
    %1275 = arith.mulf %1274, %1268 : vector<2x384xf32>
    %1276 = arith.addf %1259, %1275 : vector<2x384xf32>
    %c101_239 = arith.constant 101 : index
    %1277 = memref.load %arg7[%c101_239] : memref<144xf32, #tpu.memory_space<smem>>
    %1278 = vector.broadcast %1277 : f32 to vector<2x384xf32>
    %1279 = arith.mulf %1278, %1268 : vector<2x384xf32>
    %1280 = arith.addf %1263, %1279 : vector<2x384xf32>
    %c137_240 = arith.constant 137 : index
    %1281 = memref.load %arg7[%c137_240] : memref<144xf32, #tpu.memory_space<smem>>
    %1282 = vector.broadcast %1281 : f32 to vector<2x384xf32>
    %1283 = arith.mulf %1282, %1268 : vector<2x384xf32>
    %1284 = arith.addf %1267, %1283 : vector<2x384xf32>
    %c1_i32_241 = arith.constant 1 : i32
    %1285 = tpu.dynamic_rotate %1233 by %c1_i32_241 dim 1 : vector<2x384xf32>, i32 -> vector<2x384xf32>
    %c30_242 = arith.constant 30 : index
    %1286 = memref.load %arg7[%c30_242] : memref<144xf32, #tpu.memory_space<smem>>
    %1287 = vector.broadcast %1286 : f32 to vector<2x384xf32>
    %1288 = arith.mulf %1287, %1285 : vector<2x384xf32>
    %1289 = arith.addf %1272, %1288 : vector<2x384xf32>
    %c66_243 = arith.constant 66 : index
    %1290 = memref.load %arg7[%c66_243] : memref<144xf32, #tpu.memory_space<smem>>
    %1291 = vector.broadcast %1290 : f32 to vector<2x384xf32>
    %1292 = arith.mulf %1291, %1285 : vector<2x384xf32>
    %1293 = arith.addf %1276, %1292 : vector<2x384xf32>
    %c102_244 = arith.constant 102 : index
    %1294 = memref.load %arg7[%c102_244] : memref<144xf32, #tpu.memory_space<smem>>
    %1295 = vector.broadcast %1294 : f32 to vector<2x384xf32>
    %1296 = arith.mulf %1295, %1285 : vector<2x384xf32>
    %1297 = arith.addf %1280, %1296 : vector<2x384xf32>
    %c138_245 = arith.constant 138 : index
    %1298 = memref.load %arg7[%c138_245] : memref<144xf32, #tpu.memory_space<smem>>
    %1299 = vector.broadcast %1298 : f32 to vector<2x384xf32>
    %1300 = arith.mulf %1299, %1285 : vector<2x384xf32>
    %1301 = arith.addf %1284, %1300 : vector<2x384xf32>
    %c31_246 = arith.constant 31 : index
    %1302 = memref.load %arg7[%c31_246] : memref<144xf32, #tpu.memory_space<smem>>
    %1303 = vector.broadcast %1302 : f32 to vector<2x384xf32>
    %1304 = arith.mulf %1303, %1233 : vector<2x384xf32>
    %1305 = arith.addf %1289, %1304 : vector<2x384xf32>
    %c67_247 = arith.constant 67 : index
    %1306 = memref.load %arg7[%c67_247] : memref<144xf32, #tpu.memory_space<smem>>
    %1307 = vector.broadcast %1306 : f32 to vector<2x384xf32>
    %1308 = arith.mulf %1307, %1233 : vector<2x384xf32>
    %1309 = arith.addf %1293, %1308 : vector<2x384xf32>
    %c103_248 = arith.constant 103 : index
    %1310 = memref.load %arg7[%c103_248] : memref<144xf32, #tpu.memory_space<smem>>
    %1311 = vector.broadcast %1310 : f32 to vector<2x384xf32>
    %1312 = arith.mulf %1311, %1233 : vector<2x384xf32>
    %1313 = arith.addf %1297, %1312 : vector<2x384xf32>
    %c139_249 = arith.constant 139 : index
    %1314 = memref.load %arg7[%c139_249] : memref<144xf32, #tpu.memory_space<smem>>
    %1315 = vector.broadcast %1314 : f32 to vector<2x384xf32>
    %1316 = arith.mulf %1315, %1233 : vector<2x384xf32>
    %1317 = arith.addf %1301, %1316 : vector<2x384xf32>
    %c383_i32_250 = arith.constant 383 : i32
    %1318 = tpu.dynamic_rotate %1233 by %c383_i32_250 dim 1 : vector<2x384xf32>, i32 -> vector<2x384xf32>
    %c32_251 = arith.constant 32 : index
    %1319 = memref.load %arg7[%c32_251] : memref<144xf32, #tpu.memory_space<smem>>
    %1320 = vector.broadcast %1319 : f32 to vector<2x384xf32>
    %1321 = arith.mulf %1320, %1318 : vector<2x384xf32>
    %1322 = arith.addf %1305, %1321 : vector<2x384xf32>
    %c68_252 = arith.constant 68 : index
    %1323 = memref.load %arg7[%c68_252] : memref<144xf32, #tpu.memory_space<smem>>
    %1324 = vector.broadcast %1323 : f32 to vector<2x384xf32>
    %1325 = arith.mulf %1324, %1318 : vector<2x384xf32>
    %1326 = arith.addf %1309, %1325 : vector<2x384xf32>
    %c104_253 = arith.constant 104 : index
    %1327 = memref.load %arg7[%c104_253] : memref<144xf32, #tpu.memory_space<smem>>
    %1328 = vector.broadcast %1327 : f32 to vector<2x384xf32>
    %1329 = arith.mulf %1328, %1318 : vector<2x384xf32>
    %1330 = arith.addf %1313, %1329 : vector<2x384xf32>
    %c140_254 = arith.constant 140 : index
    %1331 = memref.load %arg7[%c140_254] : memref<144xf32, #tpu.memory_space<smem>>
    %1332 = vector.broadcast %1331 : f32 to vector<2x384xf32>
    %1333 = arith.mulf %1332, %1318 : vector<2x384xf32>
    %1334 = arith.addf %1317, %1333 : vector<2x384xf32>
    %c367_i32_255 = arith.constant 367 : i32
    %1335 = tpu.dynamic_rotate %1233 by %c367_i32_255 dim 1 : vector<2x384xf32>, i32 -> vector<2x384xf32>
    %c33_256 = arith.constant 33 : index
    %1336 = memref.load %arg7[%c33_256] : memref<144xf32, #tpu.memory_space<smem>>
    %1337 = vector.broadcast %1336 : f32 to vector<2x384xf32>
    %1338 = arith.mulf %1337, %1335 : vector<2x384xf32>
    %1339 = arith.addf %1322, %1338 : vector<2x384xf32>
    %c69_257 = arith.constant 69 : index
    %1340 = memref.load %arg7[%c69_257] : memref<144xf32, #tpu.memory_space<smem>>
    %1341 = vector.broadcast %1340 : f32 to vector<2x384xf32>
    %1342 = arith.mulf %1341, %1335 : vector<2x384xf32>
    %1343 = arith.addf %1326, %1342 : vector<2x384xf32>
    %c105_258 = arith.constant 105 : index
    %1344 = memref.load %arg7[%c105_258] : memref<144xf32, #tpu.memory_space<smem>>
    %1345 = vector.broadcast %1344 : f32 to vector<2x384xf32>
    %1346 = arith.mulf %1345, %1335 : vector<2x384xf32>
    %1347 = arith.addf %1330, %1346 : vector<2x384xf32>
    %c141_259 = arith.constant 141 : index
    %1348 = memref.load %arg7[%c141_259] : memref<144xf32, #tpu.memory_space<smem>>
    %1349 = vector.broadcast %1348 : f32 to vector<2x384xf32>
    %1350 = arith.mulf %1349, %1335 : vector<2x384xf32>
    %1351 = arith.addf %1334, %1350 : vector<2x384xf32>
    %c366_i32_260 = arith.constant 366 : i32
    %1352 = tpu.dynamic_rotate %1233 by %c366_i32_260 dim 1 : vector<2x384xf32>, i32 -> vector<2x384xf32>
    %c34_261 = arith.constant 34 : index
    %1353 = memref.load %arg7[%c34_261] : memref<144xf32, #tpu.memory_space<smem>>
    %1354 = vector.broadcast %1353 : f32 to vector<2x384xf32>
    %1355 = arith.mulf %1354, %1352 : vector<2x384xf32>
    %1356 = arith.addf %1339, %1355 : vector<2x384xf32>
    %c70_262 = arith.constant 70 : index
    %1357 = memref.load %arg7[%c70_262] : memref<144xf32, #tpu.memory_space<smem>>
    %1358 = vector.broadcast %1357 : f32 to vector<2x384xf32>
    %1359 = arith.mulf %1358, %1352 : vector<2x384xf32>
    %1360 = arith.addf %1343, %1359 : vector<2x384xf32>
    %c106_263 = arith.constant 106 : index
    %1361 = memref.load %arg7[%c106_263] : memref<144xf32, #tpu.memory_space<smem>>
    %1362 = vector.broadcast %1361 : f32 to vector<2x384xf32>
    %1363 = arith.mulf %1362, %1352 : vector<2x384xf32>
    %1364 = arith.addf %1347, %1363 : vector<2x384xf32>
    %c142_264 = arith.constant 142 : index
    %1365 = memref.load %arg7[%c142_264] : memref<144xf32, #tpu.memory_space<smem>>
    %1366 = vector.broadcast %1365 : f32 to vector<2x384xf32>
    %1367 = arith.mulf %1366, %1352 : vector<2x384xf32>
    %1368 = arith.addf %1351, %1367 : vector<2x384xf32>
    %c365_i32_265 = arith.constant 365 : i32
    %1369 = tpu.dynamic_rotate %1233 by %c365_i32_265 dim 1 : vector<2x384xf32>, i32 -> vector<2x384xf32>
    %c35_266 = arith.constant 35 : index
    %1370 = memref.load %arg7[%c35_266] : memref<144xf32, #tpu.memory_space<smem>>
    %1371 = vector.broadcast %1370 : f32 to vector<2x384xf32>
    %1372 = arith.mulf %1371, %1369 : vector<2x384xf32>
    %1373 = arith.addf %1356, %1372 : vector<2x384xf32>
    %c71_267 = arith.constant 71 : index
    %1374 = memref.load %arg7[%c71_267] : memref<144xf32, #tpu.memory_space<smem>>
    %1375 = vector.broadcast %1374 : f32 to vector<2x384xf32>
    %1376 = arith.mulf %1375, %1369 : vector<2x384xf32>
    %1377 = arith.addf %1360, %1376 : vector<2x384xf32>
    %c107_268 = arith.constant 107 : index
    %1378 = memref.load %arg7[%c107_268] : memref<144xf32, #tpu.memory_space<smem>>
    %1379 = vector.broadcast %1378 : f32 to vector<2x384xf32>
    %1380 = arith.mulf %1379, %1369 : vector<2x384xf32>
    %1381 = arith.addf %1364, %1380 : vector<2x384xf32>
    %c143_269 = arith.constant 143 : index
    %1382 = memref.load %arg7[%c143_269] : memref<144xf32, #tpu.memory_space<smem>>
    %1383 = vector.broadcast %1382 : f32 to vector<2x384xf32>
    %1384 = arith.mulf %1383, %1369 : vector<2x384xf32>
    %1385 = arith.addf %1368, %1384 : vector<2x384xf32>
    %c0_270 = arith.constant 0 : index
    %1386 = memref.load %arg8[%c0_270] : memref<4xf32, #tpu.memory_space<smem>>
    %1387 = vector.broadcast %1386 : f32 to vector<2x384xf32>
    %1388 = arith.addf %1373, %1387 : vector<2x384xf32>
    %1389 = vector.broadcast %0 : vector<1x384xf32> to vector<2x384xf32>
    %1390 = arith.mulf %1388, %1389 : vector<2x384xf32>
    %cst_271 = arith.constant dense<0.000000e+00> : vector<2xf32>
    %1391 = vector.multi_reduction <add>, %1390, %cst_271 [1] : vector<2x384xf32> to vector<2xf32>
    %1392 = vector.shape_cast %1391 : vector<2xf32> to vector<2x1xf32>
    %cst_272 = arith.constant dense<0.000000e+00> : vector<1xf32>
    %1393 = vector.multi_reduction <add>, %1392, %cst_272 [0] : vector<2x1xf32> to vector<1xf32>
    %1394 = vector.shape_cast %1393 : vector<1xf32> to vector<1x1xf32>
    %1395 = arith.mulf %1390, %1388 : vector<2x384xf32>
    %cst_273 = arith.constant dense<0.000000e+00> : vector<2xf32>
    %1396 = vector.multi_reduction <add>, %1395, %cst_273 [1] : vector<2x384xf32> to vector<2xf32>
    %1397 = vector.shape_cast %1396 : vector<2xf32> to vector<2x1xf32>
    %cst_274 = arith.constant dense<0.000000e+00> : vector<1xf32>
    %1398 = vector.multi_reduction <add>, %1397, %cst_274 [0] : vector<2x1xf32> to vector<1xf32>
    %1399 = vector.shape_cast %1398 : vector<1xf32> to vector<1x1xf32>
    %cst_275 = arith.constant 0.001953125 : f32
    %1400 = vector.broadcast %cst_275 : f32 to vector<1x1xf32>
    %1401 = arith.mulf %1394, %1400 : vector<1x1xf32>
    %cst_276 = arith.constant 0.001953125 : f32
    %1402 = vector.broadcast %cst_276 : f32 to vector<1x1xf32>
    %1403 = arith.mulf %1399, %1402 : vector<1x1xf32>
    %1404 = arith.mulf %1401, %1401 : vector<1x1xf32>
    %1405 = arith.subf %1403, %1404 : vector<1x1xf32>
    %cst_277 = arith.constant 8.000000e-01 : f32
    %1406 = vector.broadcast %cst_277 : f32 to vector<1x1xf32>
    %1407 = arith.addf %1405, %1406 : vector<1x1xf32>
    %1408 = math.rsqrt %1407 : vector<1x1xf32>
    %c0_278 = arith.constant 0 : index
    %1409 = memref.load %arg9[%c0_278] : memref<4xf32, #tpu.memory_space<smem>>
    %1410 = vector.broadcast %1409 : f32 to vector<1x1xf32>
    %1411 = arith.mulf %1408, %1410 : vector<1x1xf32>
    %c0_279 = arith.constant 0 : index
    %1412 = memref.load %arg10[%c0_279] : memref<4xf32, #tpu.memory_space<smem>>
    %1413 = arith.mulf %1401, %1411 : vector<1x1xf32>
    %1414 = vector.broadcast %1412 : f32 to vector<1x1xf32>
    %1415 = arith.subf %1414, %1413 : vector<1x1xf32>
    %1416 = vector.broadcast %1411 : vector<1x1xf32> to vector<2x384xf32>
    %1417 = arith.mulf %1388, %1416 : vector<2x384xf32>
    %1418 = vector.broadcast %1415 : vector<1x1xf32> to vector<2x384xf32>
    %1419 = arith.addf %1417, %1418 : vector<2x384xf32>
    %c1_280 = arith.constant 1 : index
    %1420 = memref.load %arg8[%c1_280] : memref<4xf32, #tpu.memory_space<smem>>
    %1421 = vector.broadcast %1420 : f32 to vector<2x384xf32>
    %1422 = arith.addf %1377, %1421 : vector<2x384xf32>
    %1423 = vector.broadcast %0 : vector<1x384xf32> to vector<2x384xf32>
    %1424 = arith.mulf %1422, %1423 : vector<2x384xf32>
    %cst_281 = arith.constant dense<0.000000e+00> : vector<2xf32>
    %1425 = vector.multi_reduction <add>, %1424, %cst_281 [1] : vector<2x384xf32> to vector<2xf32>
    %1426 = vector.shape_cast %1425 : vector<2xf32> to vector<2x1xf32>
    %cst_282 = arith.constant dense<0.000000e+00> : vector<1xf32>
    %1427 = vector.multi_reduction <add>, %1426, %cst_282 [0] : vector<2x1xf32> to vector<1xf32>
    %1428 = vector.shape_cast %1427 : vector<1xf32> to vector<1x1xf32>
    %1429 = arith.mulf %1424, %1422 : vector<2x384xf32>
    %cst_283 = arith.constant dense<0.000000e+00> : vector<2xf32>
    %1430 = vector.multi_reduction <add>, %1429, %cst_283 [1] : vector<2x384xf32> to vector<2xf32>
    %1431 = vector.shape_cast %1430 : vector<2xf32> to vector<2x1xf32>
    %cst_284 = arith.constant dense<0.000000e+00> : vector<1xf32>
    %1432 = vector.multi_reduction <add>, %1431, %cst_284 [0] : vector<2x1xf32> to vector<1xf32>
    %1433 = vector.shape_cast %1432 : vector<1xf32> to vector<1x1xf32>
    %cst_285 = arith.constant 0.001953125 : f32
    %1434 = vector.broadcast %cst_285 : f32 to vector<1x1xf32>
    %1435 = arith.mulf %1428, %1434 : vector<1x1xf32>
    %cst_286 = arith.constant 0.001953125 : f32
    %1436 = vector.broadcast %cst_286 : f32 to vector<1x1xf32>
    %1437 = arith.mulf %1433, %1436 : vector<1x1xf32>
    %1438 = arith.mulf %1435, %1435 : vector<1x1xf32>
    %1439 = arith.subf %1437, %1438 : vector<1x1xf32>
    %cst_287 = arith.constant 8.000000e-01 : f32
    %1440 = vector.broadcast %cst_287 : f32 to vector<1x1xf32>
    %1441 = arith.addf %1439, %1440 : vector<1x1xf32>
    %1442 = math.rsqrt %1441 : vector<1x1xf32>
    %c1_288 = arith.constant 1 : index
    %1443 = memref.load %arg9[%c1_288] : memref<4xf32, #tpu.memory_space<smem>>
    %1444 = vector.broadcast %1443 : f32 to vector<1x1xf32>
    %1445 = arith.mulf %1442, %1444 : vector<1x1xf32>
    %c1_289 = arith.constant 1 : index
    %1446 = memref.load %arg10[%c1_289] : memref<4xf32, #tpu.memory_space<smem>>
    %1447 = arith.mulf %1435, %1445 : vector<1x1xf32>
    %1448 = vector.broadcast %1446 : f32 to vector<1x1xf32>
    %1449 = arith.subf %1448, %1447 : vector<1x1xf32>
    %1450 = vector.broadcast %1445 : vector<1x1xf32> to vector<2x384xf32>
    %1451 = arith.mulf %1422, %1450 : vector<2x384xf32>
    %1452 = vector.broadcast %1449 : vector<1x1xf32> to vector<2x384xf32>
    %1453 = arith.addf %1451, %1452 : vector<2x384xf32>
    %c2_290 = arith.constant 2 : index
    %1454 = memref.load %arg8[%c2_290] : memref<4xf32, #tpu.memory_space<smem>>
    %1455 = vector.broadcast %1454 : f32 to vector<2x384xf32>
    %1456 = arith.addf %1381, %1455 : vector<2x384xf32>
    %1457 = vector.broadcast %0 : vector<1x384xf32> to vector<2x384xf32>
    %1458 = arith.mulf %1456, %1457 : vector<2x384xf32>
    %cst_291 = arith.constant dense<0.000000e+00> : vector<2xf32>
    %1459 = vector.multi_reduction <add>, %1458, %cst_291 [1] : vector<2x384xf32> to vector<2xf32>
    %1460 = vector.shape_cast %1459 : vector<2xf32> to vector<2x1xf32>
    %cst_292 = arith.constant dense<0.000000e+00> : vector<1xf32>
    %1461 = vector.multi_reduction <add>, %1460, %cst_292 [0] : vector<2x1xf32> to vector<1xf32>
    %1462 = vector.shape_cast %1461 : vector<1xf32> to vector<1x1xf32>
    %1463 = arith.mulf %1458, %1456 : vector<2x384xf32>
    %cst_293 = arith.constant dense<0.000000e+00> : vector<2xf32>
    %1464 = vector.multi_reduction <add>, %1463, %cst_293 [1] : vector<2x384xf32> to vector<2xf32>
    %1465 = vector.shape_cast %1464 : vector<2xf32> to vector<2x1xf32>
    %cst_294 = arith.constant dense<0.000000e+00> : vector<1xf32>
    %1466 = vector.multi_reduction <add>, %1465, %cst_294 [0] : vector<2x1xf32> to vector<1xf32>
    %1467 = vector.shape_cast %1466 : vector<1xf32> to vector<1x1xf32>
    %cst_295 = arith.constant 0.001953125 : f32
    %1468 = vector.broadcast %cst_295 : f32 to vector<1x1xf32>
    %1469 = arith.mulf %1462, %1468 : vector<1x1xf32>
    %cst_296 = arith.constant 0.001953125 : f32
    %1470 = vector.broadcast %cst_296 : f32 to vector<1x1xf32>
    %1471 = arith.mulf %1467, %1470 : vector<1x1xf32>
    %1472 = arith.mulf %1469, %1469 : vector<1x1xf32>
    %1473 = arith.subf %1471, %1472 : vector<1x1xf32>
    %cst_297 = arith.constant 8.000000e-01 : f32
    %1474 = vector.broadcast %cst_297 : f32 to vector<1x1xf32>
    %1475 = arith.addf %1473, %1474 : vector<1x1xf32>
    %1476 = math.rsqrt %1475 : vector<1x1xf32>
    %c2_298 = arith.constant 2 : index
    %1477 = memref.load %arg9[%c2_298] : memref<4xf32, #tpu.memory_space<smem>>
    %1478 = vector.broadcast %1477 : f32 to vector<1x1xf32>
    %1479 = arith.mulf %1476, %1478 : vector<1x1xf32>
    %c2_299 = arith.constant 2 : index
    %1480 = memref.load %arg10[%c2_299] : memref<4xf32, #tpu.memory_space<smem>>
    %1481 = arith.mulf %1469, %1479 : vector<1x1xf32>
    %1482 = vector.broadcast %1480 : f32 to vector<1x1xf32>
    %1483 = arith.subf %1482, %1481 : vector<1x1xf32>
    %1484 = vector.broadcast %1479 : vector<1x1xf32> to vector<2x384xf32>
    %1485 = arith.mulf %1456, %1484 : vector<2x384xf32>
    %1486 = vector.broadcast %1483 : vector<1x1xf32> to vector<2x384xf32>
    %1487 = arith.addf %1485, %1486 : vector<2x384xf32>
    %c3_300 = arith.constant 3 : index
    %1488 = memref.load %arg8[%c3_300] : memref<4xf32, #tpu.memory_space<smem>>
    %1489 = vector.broadcast %1488 : f32 to vector<2x384xf32>
    %1490 = arith.addf %1385, %1489 : vector<2x384xf32>
    %1491 = vector.broadcast %0 : vector<1x384xf32> to vector<2x384xf32>
    %1492 = arith.mulf %1490, %1491 : vector<2x384xf32>
    %cst_301 = arith.constant dense<0.000000e+00> : vector<2xf32>
    %1493 = vector.multi_reduction <add>, %1492, %cst_301 [1] : vector<2x384xf32> to vector<2xf32>
    %1494 = vector.shape_cast %1493 : vector<2xf32> to vector<2x1xf32>
    %cst_302 = arith.constant dense<0.000000e+00> : vector<1xf32>
    %1495 = vector.multi_reduction <add>, %1494, %cst_302 [0] : vector<2x1xf32> to vector<1xf32>
    %1496 = vector.shape_cast %1495 : vector<1xf32> to vector<1x1xf32>
    %1497 = arith.mulf %1492, %1490 : vector<2x384xf32>
    %cst_303 = arith.constant dense<0.000000e+00> : vector<2xf32>
    %1498 = vector.multi_reduction <add>, %1497, %cst_303 [1] : vector<2x384xf32> to vector<2xf32>
    %1499 = vector.shape_cast %1498 : vector<2xf32> to vector<2x1xf32>
    %cst_304 = arith.constant dense<0.000000e+00> : vector<1xf32>
    %1500 = vector.multi_reduction <add>, %1499, %cst_304 [0] : vector<2x1xf32> to vector<1xf32>
    %1501 = vector.shape_cast %1500 : vector<1xf32> to vector<1x1xf32>
    %cst_305 = arith.constant 0.001953125 : f32
    %1502 = vector.broadcast %cst_305 : f32 to vector<1x1xf32>
    %1503 = arith.mulf %1496, %1502 : vector<1x1xf32>
    %cst_306 = arith.constant 0.001953125 : f32
    %1504 = vector.broadcast %cst_306 : f32 to vector<1x1xf32>
    %1505 = arith.mulf %1501, %1504 : vector<1x1xf32>
    %1506 = arith.mulf %1503, %1503 : vector<1x1xf32>
    %1507 = arith.subf %1505, %1506 : vector<1x1xf32>
    %cst_307 = arith.constant 8.000000e-01 : f32
    %1508 = vector.broadcast %cst_307 : f32 to vector<1x1xf32>
    %1509 = arith.addf %1507, %1508 : vector<1x1xf32>
    %1510 = math.rsqrt %1509 : vector<1x1xf32>
    %c3_308 = arith.constant 3 : index
    %1511 = memref.load %arg9[%c3_308] : memref<4xf32, #tpu.memory_space<smem>>
    %1512 = vector.broadcast %1511 : f32 to vector<1x1xf32>
    %1513 = arith.mulf %1510, %1512 : vector<1x1xf32>
    %c3_309 = arith.constant 3 : index
    %1514 = memref.load %arg10[%c3_309] : memref<4xf32, #tpu.memory_space<smem>>
    %1515 = arith.mulf %1503, %1513 : vector<1x1xf32>
    %1516 = vector.broadcast %1514 : f32 to vector<1x1xf32>
    %1517 = arith.subf %1516, %1515 : vector<1x1xf32>
    %1518 = vector.broadcast %1513 : vector<1x1xf32> to vector<2x384xf32>
    %1519 = arith.mulf %1490, %1518 : vector<2x384xf32>
    %1520 = vector.broadcast %1517 : vector<1x1xf32> to vector<2x384xf32>
    %1521 = arith.addf %1519, %1520 : vector<2x384xf32>
    %c0_310 = arith.constant 0 : index
    %c0_311 = arith.constant 0 : index
    %1522 = vector.load %arg0[%c0_310, %c0_311] : memref<8x384xf32, #tpu.memory_space<vmem>>, vector<2x384xf32>
    %1523 = arith.addf %1522, %1419 : vector<2x384xf32>
    %c0_312 = arith.constant 0 : index
    %c0_313 = arith.constant 0 : index
    %1524 = vector.load %arg11[%c0_312, %c0_313] : memref<8x384xf32, #tpu.memory_space<vmem>>, vector<2x384xf32>
    tpu.vector_store %arg11[%c0_312, %c0_313], %1523 {strides = array<i32>} : memref<8x384xf32, #tpu.memory_space<vmem>>, vector<2x384xf32>,
    %c2_314 = arith.constant 2 : index
    %c0_315 = arith.constant 0 : index
    %1525 = vector.load %arg0[%c2_314, %c0_315] : memref<8x384xf32, #tpu.memory_space<vmem>>, vector<2x384xf32>
    %1526 = arith.addf %1525, %1453 : vector<2x384xf32>
    %c2_316 = arith.constant 2 : index
    %c0_317 = arith.constant 0 : index
    %1527 = vector.load %arg11[%c2_316, %c0_317] : memref<8x384xf32, #tpu.memory_space<vmem>>, vector<2x384xf32>
    tpu.vector_store %arg11[%c2_316, %c0_317], %1526 {strides = array<i32>} : memref<8x384xf32, #tpu.memory_space<vmem>>, vector<2x384xf32>,
    %c4_318 = arith.constant 4 : index
    %c0_319 = arith.constant 0 : index
    %1528 = vector.load %arg0[%c4_318, %c0_319] : memref<8x384xf32, #tpu.memory_space<vmem>>, vector<2x384xf32>
    %1529 = arith.addf %1528, %1487 : vector<2x384xf32>
    %c4_320 = arith.constant 4 : index
    %c0_321 = arith.constant 0 : index
    %1530 = vector.load %arg11[%c4_320, %c0_321] : memref<8x384xf32, #tpu.memory_space<vmem>>, vector<2x384xf32>
    tpu.vector_store %arg11[%c4_320, %c0_321], %1529 {strides = array<i32>} : memref<8x384xf32, #tpu.memory_space<vmem>>, vector<2x384xf32>,
    %c6_322 = arith.constant 6 : index
    %c0_323 = arith.constant 0 : index
    %1531 = vector.load %arg0[%c6_322, %c0_323] : memref<8x384xf32, #tpu.memory_space<vmem>>, vector<2x384xf32>
    %1532 = arith.addf %1531, %1521 : vector<2x384xf32>
    %c6_324 = arith.constant 6 : index
    %c0_325 = arith.constant 0 : index
    %1533 = vector.load %arg11[%c6_324, %c0_325] : memref<8x384xf32, #tpu.memory_space<vmem>>, vector<2x384xf32>
    tpu.vector_store %arg11[%c6_324, %c0_325], %1532 {strides = array<i32>} : memref<8x384xf32, #tpu.memory_space<vmem>>, vector<2x384xf32>,
    return
  }
}

</mosaic_0001>

<bundles_post_ra>
// kernel: tpu_custom_call.1
= control target key start
LH: loop header
LB: loop body
LE: loop exit
PB: predicated region body
PF: predicated region fallthrough
CT: control target
= control target key end

     0   :  { %s8326_s0 = inlined_call_operand.hbm [shape: f32[8,384], index: 0, kind: input, shape index: {}]   ;;  %s8327_s1 = inlined_call_operand.vmem [shape: f32[1,384], index: 1, kind: input, shape index: {}]   ;;  %s8328_s2 = inlined_call_operand.vmem [shape: f32[144], index: 2, kind: input, shape index: {}]   ;;  %s8329_s3 = inlined_call_operand.hbm [shape: f32[4], index: 3, kind: input, shape index: {}]   ;;  %s8330_s4 = inlined_call_operand.vmem [shape: f32[4], index: 4, kind: input, shape index: {}]   ;;  %s8331_s5 = inlined_call_operand.vmem [shape: f32[4], index: 5, kind: input, shape index: {}]   ;;  %s8332_s6 = inlined_call_operand.<no memory space> [shape: f32[1], index: 6, kind: input, shape index: {}]   ;;  %s8333_s7 = inlined_call_operand.vmem [shape: f32[144], index: 7, kind: input, shape index: {}]   ;;  %s8334_s8 = inlined_call_operand.vmem [shape: f32[4], index: 8, kind: input, shape index: {}]   ;;  %s8335_s9 = inlined_call_operand.vmem [shape: f32[4], index: 9, kind: input, shape index: {}]   ;;  %s8336_s10 = inlined_call_operand.vmem [shape: f32[4], index: 10, kind: input, shape index: {}]   ;;  %s8337_s11 = inlined_call_operand.hbm [shape: f32[8,384], index: 11, kind: output, shape index: {}]  }
   0x1   :  { %8540 = sst [smem:[#allocation152_spill]] %s8327_s1 }
   0x2   :  { %8541 = sst [smem:[#allocation153_spill]] %s8332_s6 }
   0x3   :  { %8542 = sst [smem:[#allocation154_spill]] %s8337_s11 }
   0x4   :  { %17 = vsyncpa [#allocation5], 0 }
   0x5   :  { %18 = vsyncpa [#allocation8], 0 }
   0x6   :  { %19 = vsyncpa [#allocation7], 0 }
   0x7   :  { %20 = vsyncpa [#allocation12], 0 }
   0x8   :  { %21 = vsyncpa [#allocation15], 0 }
   0x9   :  { %22 = vsyncpa [#allocation18], 0  ;;  %s60_s19 = sshll.u32 %s8330_s4, 4  ;;  %s61_s19 = int_to_ptr.vmem [resolvable:$true] %s60_s19 }
   0xa   :  { %23 = vsyncpa [#allocation6], 0  ;;  %s82_s22 = sshll.u32 %s8333_s7, 4  ;;  %s4302_s23 = scalar_lea.vmem %s61_s19, 16  ;;  %s83_s22 = int_to_ptr.vmem [resolvable:$true] %s82_s22 }
   0xb   :  { %p4303_p0 = scmp.ne.s32.totalorder %s61_s19, %s4302_s23  ;;  %p4307_p1 = scmp.lt.s32.totalorder %s61_s19, %s61_s19 }
   0xc   :  { %p4308_p2 = scmp.lt.s32.totalorder %s4302_s23, %s4302_s23 }
   0xe   :  { %p4309_p3 = por %p4308_p2, %p4307_p1 }
  0x10   :  { %p4310_p4 = pnand %p4309_p3, %p4303_p0 }
  0x12   :  { %4313 = shalt.err (!%p4310_p4)
}
  0x13   :  { %s4448_s24 = smov [#allocation11]   ;;  %s4314_s25 = scalar_lea.vmem %s83_s22, 32 }
  0x14   :  { %63 = dma.vmem_to_smem %s61_s19, 16, %s4448_s24, [#allocation12]  }
  0x15   :  { %p4315_p5 = scmp.ne.s32.totalorder %s83_s22, %s4314_s25  ;;  %p4319_p6 = scmp.lt.s32.totalorder %s83_s22, %s83_s22 }
  0x16   :  { %p4320_p7 = scmp.lt.s32.totalorder %s4314_s25, %s4314_s25 }
  0x18   :  { %p4321_p8 = por %p4320_p7, %p4319_p6 }
  0x1a   :  { %p4322_p9 = pnand %p4321_p8, %p4315_p5 }
  0x1c   :  { %4325 = shalt.err (!%p4322_p9)
}
  0x1d   :  { %s4449_s4 = smov [#allocation14]   ;;  %s102_s27 = sshll.u32 %s8335_s9, 4  ;;  %s103_s27 = int_to_ptr.vmem [resolvable:$true] %s102_s27 }
  0x1e   :  { %85 = dma.vmem_to_smem %s83_s22, 32, %s4449_s4, [#allocation15]  }
  0x1f   :  { %s4326_s28 = scalar_lea.vmem %s103_s27, 16  ;;  %p4331_p11 = scmp.lt.s32.totalorder %s103_s27, %s103_s27 }
  0x20   :  { %p4327_p10 = scmp.ne.s32.totalorder %s103_s27, %s4326_s28  ;;  %p4332_p12 = scmp.lt.s32.totalorder %s4326_s28, %s4326_s28 }
  0x22   :  { %p4333_p13 = por %p4332_p12, %p4331_p11 }
  0x24   :  { %p4334_p0 = pnand %p4333_p13, %p4327_p10 }
  0x26   :  { %4337 = shalt.err (!%p4334_p0)
}
  0x27   :  { %s4450_s29 = smov [#allocation17]   ;;  %s4451_s30 = smov [#allocation4]  }
  0x28   :  { %105 = dma.vmem_to_smem %s103_s27, 16, %s4450_s29, [#allocation18]  }
  0x29   :  { %s30_s12 = sshll.u32 %s4451_s30, 4  ;;  %s42_s15 = sshll.u32 %s8328_s2, 4  ;;  %s31_s12 = int_to_ptr.vmem [resolvable:$true] %s30_s12  ;;  %s43_s15 = int_to_ptr.vmem [resolvable:$true] %s42_s15 }
  0x2a   :  { %s4346_s16 = scalar_lea.vmem %s31_s12, 384  ;;  %p4351_p2 = scmp.lt.s32.totalorder %s31_s12, %s31_s12 }
  0x2b   :  { %p4347_p1 = scmp.ne.s32.totalorder %s31_s12, %s4346_s16  ;;  %p4352_p3 = scmp.lt.s32.totalorder %s4346_s16, %s4346_s16 }
  0x2d   :  { %p4353_p4 = por %p4352_p3, %p4351_p2 }
  0x2f   :  { %p4354_p5 = pnand %p4353_p4, %p4347_p1 }
  0x31   :  { %4357 = shalt.err (!%p4354_p5)
}
  0x32   :  { %33 = dma.hbm_to_vmem [thread:$0]  %s8326_s0, 384, %s31_s12, [#allocation5]  }
  0x33   :  { %s4358_s18 = scalar_lea.vmem %s43_s15, 32  ;;  %p4363_p7 = scmp.lt.s32.totalorder %s43_s15, %s43_s15 }
  0x34   :  { %p4359_p6 = scmp.ne.s32.totalorder %s43_s15, %s4358_s18  ;;  %p4364_p8 = scmp.lt.s32.totalorder %s4358_s18, %s4358_s18 }
  0x36   :  { %p4365_p9 = por %p4364_p8, %p4363_p7 }
  0x38   :  { %p4366_p10 = pnand %p4365_p9, %p4359_p6 }
  0x3a   :  { %4369 = shalt.err (!%p4366_p10)
}
  0x3b   :  { %s4452_s2 = smov [#allocation9]   ;;  %s4453_s19 = smov [#allocation10]  }
  0x3c   :  { %45 = dma.vmem_to_smem %s43_s15, 32, %s4452_s2, [#allocation8]  }
  0x3d   :  { %53 = dma.hbm_to_smem %s8329_s3, 16, %s4453_s19, [#allocation7]  }
  0x3e   :  { %s70_s24 = sshll.u32 %s8331_s5, 4  ;;  %s92_s4 = sshll.u32 %s8334_s8, 4  ;;  %s71_s24 = int_to_ptr.vmem [resolvable:$true] %s70_s24  ;;  %s93_s4 = int_to_ptr.vmem [resolvable:$true] %s92_s4 }
  0x3f   :  { %s4378_s7 = scalar_lea.vmem %s71_s24, 16  ;;  %p4383_p12 = scmp.lt.s32.totalorder %s71_s24, %s71_s24 }
  0x40   :  { %p4379_p11 = scmp.ne.s32.totalorder %s71_s24, %s4378_s7  ;;  %p4384_p13 = scmp.lt.s32.totalorder %s4378_s7, %s4378_s7 }
  0x42   :  { %p4385_p0 = por %p4384_p13, %p4383_p12 }
  0x44   :  { %p4386_p1 = pnand %p4385_p0, %p4379_p11 }
  0x46   :  { %4389 = shalt.err (!%p4386_p1)
}
  0x47   :  { %s4454_s26 = smov [#allocation13]   ;;  %s4390_s3 = scalar_lea.vmem %s93_s4, 16 }
  0x48   :  { %73 = dma.vmem_to_smem %s71_s24, 16, %s4454_s26, [#allocation12]  }
  0x49   :  { %p4391_p2 = scmp.ne.s32.totalorder %s93_s4, %s4390_s3  ;;  %p4395_p3 = scmp.lt.s32.totalorder %s93_s4, %s93_s4 }
  0x4a   :  { %p4396_p4 = scmp.lt.s32.totalorder %s4390_s3, %s4390_s3 }
  0x4c   :  { %p4397_p5 = por %p4396_p4, %p4395_p3 }
  0x4e   :  { %p4398_p6 = pnand %p4397_p5, %p4391_p2 }
  0x50   :  { %4401 = shalt.err (!%p4398_p6)
}
  0x51   :  { %s4455_s5 = smov [#allocation16]   ;;  %s112_s28 = sshll.u32 %s8336_s10, 4  ;;  %s113_s28 = int_to_ptr.vmem [resolvable:$true] %s112_s28 }
  0x52   :  { %95 = dma.vmem_to_smem %s93_s4, 16, %s4455_s5, [#allocation15]  }
  0x53   :  { %s4402_s29 = scalar_lea.vmem %s113_s28, 16  ;;  %p4407_p8 = scmp.lt.s32.totalorder %s113_s28, %s113_s28 }
  0x54   :  { %p4403_p7 = scmp.ne.s32.totalorder %s113_s28, %s4402_s29  ;;  %p4408_p9 = scmp.lt.s32.totalorder %s4402_s29, %s4402_s29 }
  0x56   :  { %p4409_p10 = por %p4408_p9, %p4407_p8 }
  0x58   :  { %p4410_p11 = pnand %p4409_p10, %p4403_p7 }
  0x5a   :  { %4413 = shalt.err (!%p4410_p11)
}
  0x5b   :  { %s4456_s30 = smov [#allocation19]  }
  0x5c   :  { %115 = dma.vmem_to_smem %s113_s28, 16, %s4456_s30, [#allocation18]  }
  0x5d   :  { %4434 = dma.done.wait [#allocation5], 384  }
  0x5e   :  { %4435 = vsyncadd [#allocation5], 4294966912 }
  0x5f   :  { %4436 = dma.done.wait [#allocation8], 32  }
  0x60   :  { %4437 = vsyncadd [#allocation8], 4294967264 }
  0x61   :  { %4438 = dma.done.wait [#allocation7], 16  }
  0x62   :  { %4439 = vsyncadd [#allocation7], 4294967280 }
  0x63   :  { %4440 = dma.done.wait [#allocation12], 32  }
  0x64   :  { %4441 = vsyncadd [#allocation12], 4294967264 }
  0x65   :  { %4442 = dma.done.wait [#allocation15], 48  }
  0x66   :  { %4443 = vsyncadd [#allocation15], 4294967248 }
  0x67   :  { %4444 = dma.done.wait [#allocation18], 32  }
  0x68   :  { %4445 = vsyncadd [#allocation18], 4294967264 }
  0x69   :  { %143 = sfence }
  0x6a   :  { %v4553_v0 = vld [vmem:[#allocation4 + $0x10] sm:$0x3]  ;;  %v4555_v1 = vld [vmem:[#allocation4] sm:$0x3]  ;;  %s8346_s10 = smov 19   ;;  %s8350_s12 = smov 18   ;;  %v8359_v9 = vlaneseq }
  0x6b   :  { %153 = vrot.lane.b32.xlu1 %v4553_v0, %s8346_s10  ;;  %149 = vrot.lane.b32.xlu0 %v4555_v1, %s8346_s10  ;;  %v4561_v2 = vld [vmem:[#allocation4 + $0x8] sm:$0x3]  ;;  %s8352_s13 = smov 17   ;;  %s8348_s14 = smov 1   ;;  %v4615_v3 = vld [vmem:[#allocation4 + $0x8] sm:$0xc] }
  0x6c   :  { %s8344_s15 = smov 127   ;;  %s8342_s16 = smov 111   ;;  %v4617_v4 = vld [vmem:[#allocation4] sm:$0xc]  ;;  %v4630_v5 = vrot.slane %v4615_v3, 2  ;;  %v4779_v13 = vand.u32 127, %v8359_v9 }
  0x6d   :  { %s4595_s9 = sld [smem:[#allocation9]]  ;;  %s8340_s17 = smov 110   ;;  %v4633_v6 = vrot.slane %v4617_v4, 2  ;;  %v4637_v7 = vld [vmem:[#allocation4 + $0x10] sm:$0xc]  ;;  %vm1755_vm8 = vcmask 1041408  }
  0x6e   :  { %s4601_s18 = sld [smem:[#allocation9 + $0x24]]  ;;  %s8338_s21 = smov 109   ;;  %v4650_v8 = vrot.slane %v4637_v7, 2  ;;  %v916_v10 = vld [vmem:[#allocation4 + $0x8] sm:$0x30]  ;;  %vm157_vm0 = vcmp.lt.s32.totalorder %v4779_v13, 19 }
  0x6f   :  { %181 = vrot.lane.b32.xlu1 %v4555_v1, %s8350_s12  ;;  %151 = vrot.lane.b32.xlu0 %v4561_v2, %s8346_s10  ;;  %s4603_s2 = sld [smem:[#allocation9 + $0x48]]  ;;  %s8551_s1 = smov 1   ;;  %v4774_v11 = vld [vmem:[#allocation4] sm:$0x30]  ;;  %v917_v12 = vld [vmem:[#allocation4 + $0x10] sm:$0x30] }
  0x70   :  { %s4605_s19 = sld [smem:[#allocation9 + $0x6c]]  ;;  %v4783_v14 = vrot.slane %v916_v10, 4  ;;  %v4801_v18 = vrot.slane %v4774_v11, 4  ;;  %v4803_v19 = vrot.slane %v917_v12, 4  ;;  %v1324_v26 = vld [vmem:[#allocation4 + $0x8] sm:$0xc0] }
  0x71   :  { %s4607_s20 = sld [smem:[#allocation9 + $0x1]]  ;;  %v1323_v27 = vld [vmem:[#allocation4] sm:$0xc0]  ;;  %v4859_v38 = vrot.slane %v1324_v26, 6  ;;  %v1325_v60 = vld [vmem:[#allocation4 + $0x10] sm:$0xc0] }
  0x72   :  { %s4613_s22 = sld [smem:[#allocation9 + $0x25]]  ;;  %v4861_v39 = vrot.slane %v1323_v27, 6  ;;  %v4972_v12 = vrot.slane %v1325_v60, 6  ;;  %vm187_vm1 = vcmp.lt.s32.totalorder %v4779_v13, 18  ;;  %vm229_vm2 = vcmp.lt.s32.totalorder %v4779_v13, 17 }
  0x73   :  { %185 = vrot.lane.b32.xlu1 %v4553_v0, %s8350_s12  ;;  %183 = vrot.lane.b32.xlu0 %v4561_v2, %s8350_s12  ;;  %s4619_s23 = sld [smem:[#allocation9 + $0x49]]  ;;  %v4786_v15 = vstv %s4595_s9  ;;  %vm271_vm3 = vcmp.lt.s32.totalorder %v4779_v13, 1  ;;  %vm345_vm4 = vcmp.lt.s32.totalorder %v4779_v13, 127  ;;  %vm387_vm5 = vcmp.lt.s32.totalorder %v4779_v13, 111 }
  0x74   :  { %s4621_s24 = sld [smem:[#allocation9 + $0x6d]]  ;;  %v4789_v16 = vstv %s4601_s18  ;;  %vm429_vm6 = vcmp.lt.s32.totalorder %v4779_v13, 110  ;;  %vm471_vm7 = vcmp.lt.s32.totalorder %v4779_v13, 109 }
  0x75   :  { %s4623_s0 = sld [smem:[#allocation9 + $0x2]]  ;;  %v4792_v17 = vstv %s4603_s2 }
  0x76   :  { %s4635_s25 = sld [smem:[#allocation9 + $0x26]]  ;;  %v4806_v20 = vstv %s4605_s19 }
  0x77   :  { %225 = vrot.lane.b32.xlu1 %v4561_v2, %s8352_s13  ;;  %223 = vrot.lane.b32.xlu0 %v4555_v1, %s8352_s13  ;;  %s4639_s4 = sld [smem:[#allocation9 + $0x4a]]  ;;  %v4809_v21 = vstv %s4607_s20  ;;  %s8575_s20 = smov 19  }
  0x78   :  { %s4641_s7 = sld [smem:[#allocation9 + $0x6e]]  ;;  %v4814_v22 = vstv %s4613_s22 }
  0x79   :  { %s4643_s26 = sld [smem:[#allocation9 + $0x3]]  ;;  %v4817_v23 = vstv %s4619_s23 }
  0x7a   :  { %s4652_s3 = sld [smem:[#allocation9 + $0x27]]  ;;  %v4820_v24 = vstv %s4621_s24 }
  0x7b   :  { %265 = vrot.lane.b32.xlu1 %v4555_v1, %s8348_s14  ;;  %227 = vrot.lane.b32.xlu0 %v4553_v0, %s8352_s13  ;;  %s4654_s5 = sld [smem:[#allocation9 + $0x4b]]  ;;  %v4823_v25 = vstv %s4623_s0 }
  0x7c   :  { %s4656_s8 = sld [smem:[#allocation9 + $0x6f]]  ;;  %v4828_v28 = vstv %s4635_s25 }
  0x7d   :  { %s4658_s27 = sld [smem:[#allocation9 + $0x4]]  ;;  %v4831_v29 = vstv %s4639_s4 }
  0x7e   :  { %s4664_s28 = sld [smem:[#allocation9 + $0x28]]  ;;  %v4834_v30 = vstv %s4641_s7 }
  0x7f   :  { %269 = vrot.lane.b32.xlu1 %v4553_v0, %s8348_s14  ;;  %267 = vrot.lane.b32.xlu0 %v4561_v2, %s8348_s14  ;;  %s4666_s29 = sld [smem:[#allocation9 + $0x4c]]  ;;  %v4840_v32 = vstv %s4643_s26 }
  0x80   :  { %s4668_s30 = sld [smem:[#allocation9 + $0x70]]  ;;  %v4843_v33 = vstv %s4652_s3 }
  0x81   :  { %s4688_s14 = sld [smem:[#allocation9 + $0x2a]]  ;;  %v4854_v36 = vstv %s4654_s5 }
  0x82   :  { %s4690_s11 = sld [smem:[#allocation9 + $0x4e]]  ;;  %v4857_v37 = vstv %s4656_s8 }
  0x83   :  { %341 = vrot.lane.b32.xlu1 %v4561_v2, %s8344_s15  ;;  %339 = vrot.lane.b32.xlu0 %v4555_v1, %s8344_s15  ;;  %s4692_s6 = sld [smem:[#allocation9 + $0x72]]  ;;  %v308_v31 = vstv %s4658_s27 }
  0x84   :  { %s4811_s9 = sld [smem:[#allocation9 + $0x32]]  ;;  %v316_v34 = vstv %s4664_s28  ;;  %v4867_v41 = vmul.f32 %v308_v31, %v4555_v1  ;;  %v4870_v42 = vmul.f32 %v308_v31, %v4561_v2  ;;  %v4873_v43 = vmul.f32 %v308_v31, %v4553_v0 }
  0x85   :  { %s4825_s18 = sld [smem:[#allocation9 + $0x56]]  ;;  %v324_v35 = vstv %s4666_s29  ;;  %v4878_v44 = vmul.f32 %v316_v34, %v4555_v1  ;;  %v4884_v46 = vmul.f32 %v316_v34, %v4561_v2  ;;  %v4887_v47 = vmul.f32 %v316_v34, %v4553_v0  ;;  %s8591_s29 = smov 18  }
  0x86   :  { %s4837_s2 = sld [smem:[#allocation9 + $0x7a]]  ;;  %v332_v40 = vstv %s4668_s30  ;;  %v4881_v45 = vmul.f32 %v324_v35, %v4555_v1  ;;  %v4898_v50 = vmul.f32 %v324_v35, %v4561_v2  ;;  %v4901_v51 = vmul.f32 %v324_v35, %v4553_v0 }
  0x87   :  { %381 = vrot.lane.b32.xlu1 %v4555_v1, %s8342_s16  ;;  %343 = vrot.lane.b32.xlu0 %v4553_v0, %s8344_s15  ;;  %s4680_s15 = sld [smem:[#allocation9 + $0x71]]  ;;  %8582 = vst [vmem:[#allocation55_spill] sm:$0xff] %v4887_v47  ;;  %v4916_v54 = vmul.f32 %v332_v40, %v4555_v1  ;;  %v4919_v55 = vmul.f32 %v332_v40, %v4561_v2 }
  0x88   :  { %8547 = sst [smem:[#allocation32_spill]] %s4688_s14  ;;  %8586 = vst [vmem:[#allocation56_spill] sm:$0xff] %v4898_v50  ;;  %8588 = vst [vmem:[#allocation57_spill] sm:$0xff] %v4901_v51  ;;  %v4970_v10 = vmul.f32 %v332_v40, %v4553_v0 }
  0x89   :  { %8548 = sst [smem:[#allocation33_spill]] %s4690_s11  ;;  %8597 = vst [vmem:[#allocation58_spill] sm:$0xff] %v4919_v55 }
  0x8a   :  { %8549 = sst [smem:[#allocation34_spill]] %s4692_s6  ;;  %8617 = vst [vmem:[#allocation71_spill] sm:$0xff] %v4970_v10 }
  0x8b   :  { %385 = vrot.lane.b32.xlu1 %v4553_v0, %s8342_s16  ;;  %383 = vrot.lane.b32.xlu0 %v4561_v2, %s8342_s16  ;;  %s4678_s16 = sld [smem:[#allocation9 + $0x4d]] }
  0x8c   :  { %s4714_s6 = sld [smem:[#allocation9 + $0x50]] }
  0x8d   :  { %8545 = sst [smem:[#allocation30_spill]] %s4680_s15 }
  0x8e   :  { %s4702_s15 = sld [smem:[#allocation9 + $0x4f]] }
  0x8f   :  { %425 = vrot.lane.b32.xlu1 %v4561_v2, %s8340_s17  ;;  %423 = vrot.lane.b32.xlu0 %v4555_v1, %s8340_s17  ;;  %s4716_s11 = sld [smem:[#allocation9 + $0x74]] }
  0x90   :  { %s4742_s14 = sld [smem:[#allocation9 + $0xb]] }
  0x91   :  { %8544 = sst [smem:[#allocation29_spill]] %s4678_s16 }
  0x92   :  { %s4704_s16 = sld [smem:[#allocation9 + $0x73]] }
  0x93   :  { %465 = vrot.lane.b32.xlu1 %v4555_v1, %s8338_s21  ;;  %427 = vrot.lane.b32.xlu0 %v4553_v0, %s8340_s17  ;;  %s4676_s17 = sld [smem:[#allocation9 + $0x29]] }
  0x94   :  { %8553 = sst [smem:[#allocation37_spill]] %s4702_s15 }
  0x95   :  { %8557 = sst [smem:[#allocation41_spill]] %s4714_s6 }
  0x96   :  { %8558 = sst [smem:[#allocation42_spill]] %s4716_s11 }
  0x97   :  { %469 = vrot.lane.b32.xlu1 %v4553_v0, %s8338_s21  ;;  %467 = vrot.lane.b32.xlu0 %v4561_v2, %s8338_s21  ;;  %s4670_s21 = sld [smem:[#allocation9 + $0x5]] }
  0x98   :  { %8554 = sst [smem:[#allocation38_spill]] %s4704_s16 }
  0x99   :  { %8543 = sst [smem:[#allocation28_spill]] %s4676_s17 }
  0x9a   :  { %s4706_s17 = sld [smem:[#allocation9 + $0x8]] }
  0x9b   :  { %521 = vrot.lane.b32.xlu1 %v4630_v5, %s8346_s10  ;;  %519 = vrot.lane.b32.xlu0 %v4633_v6, %s8346_s10  ;;  %s4726_s16 = sld [smem:[#allocation9 + $0x51]] }
  0x9c   :  { %s4728_s15 = sld [smem:[#allocation9 + $0x75]] }
  0x9d   :  { %s4738_s11 = sld [smem:[#allocation9 + $0x52]]  ;;  %v4892_v48 = vstv %s4670_s21 }
  0x9e   :  { %s4740_s6 = sld [smem:[#allocation9 + $0x76]] }
  0x9f   :  { %560 = vrot.lane.b32.xlu1 %v4633_v6, %s8350_s12  ;;  %523 = vrot.lane.b32.xlu0 %v4650_v8, %s8346_s10  ;;  %s4682_s10 = sld [smem:[#allocation9 + $0x6]] }
  0xa0   :  { %8555 = sst [smem:[#allocation39_spill]] %s4706_s17 }
  0xa1   :  { %s4724_s17 = sld [smem:[#allocation9 + $0x2d]] }
  0xa2   :  { %8561 = sst [smem:[#allocation44_spill]] %s4726_s16 }
  0xa3   :  { %564 = vrot.lane.b32.xlu1 %v4650_v8, %s8350_s12  ;;  %562 = vrot.lane.b32.xlu0 %v4630_v5, %s8350_s12  ;;  %s4694_s12 = sld [smem:[#allocation9 + $0x7]]  ;;  %v4999_v60 = vstv %s4738_s11 }
  0xa4   :  { %8562 = sst [smem:[#allocation45_spill]] %s4728_s15  ;;  %8626 = vst [vmem:[#allocation78_spill] sm:$0xff] %v4999_v60 }
  0xa5   :  { %8546 = sst [smem:[#allocation31_spill]] %s4682_s10 }
  0xa6   :  { %s4700_s10 = sld [smem:[#allocation9 + $0x2b]] }
  0xa7   :  { %603 = vrot.lane.b32.xlu1 %v4630_v5, %s8352_s13  ;;  %601 = vrot.lane.b32.xlu0 %v4633_v6, %s8352_s13  ;;  %8566 = sst [smem:[#allocation48_spill]] %s4740_s6  ;;  %v4981_v31 = vstv %s4724_s17 }
  0xa8   :  { %8567 = sst [smem:[#allocation49_spill]] %s4742_s14  ;;  %8620 = vst [vmem:[#allocation73_spill] sm:$0xff] %v4981_v31 }
  0xa9   :  { %8550 = sst [smem:[#allocation35_spill]] %s4694_s12 }
  0xaa   :  { %s4712_s12 = sld [smem:[#allocation9 + $0x2c]] }
  0xab   :  { %642 = vrot.lane.b32.xlu1 %v4633_v6, %s8551_s1  ;;  %605 = vrot.lane.b32.xlu0 %v4650_v8, %s8352_s13  ;;  %s4718_s13 = sld [smem:[#allocation9 + $0x9]] }
  0xac   :  { %8552 = sst [smem:[#allocation36_spill]] %s4700_s10  ;;  %s8560_s10 = smov 127  }
  0xad   :  { %s4750_s15 = sld [smem:[#allocation9 + $0x53]] }
  0xae   :  { %s4752_s16 = sld [smem:[#allocation9 + $0x77]] }
  0xaf   :  { %646 = vrot.lane.b32.xlu1 %v4650_v8, %s8551_s1  ;;  %644 = vrot.lane.b32.xlu0 %v4630_v5, %s8551_s1  ;;  %s4730_s1 = sld [smem:[#allocation9 + $0xa]] }
  0xb0   :  { %8556 = sst [smem:[#allocation40_spill]] %s4712_s12  ;;  %s8564_s12 = smov 111  }
  0xb1   :  { %8559 = sst [smem:[#allocation43_spill]] %s4718_s13 }
  0xb2   :  { %s4736_s13 = sld [smem:[#allocation9 + $0x2e]] }
  0xb3   :  { %753 = vrot.lane.b32.xlu1 %v4630_v5, %s8560_s10  ;;  %751 = vrot.lane.b32.xlu0 %v4633_v6, %s8560_s10  ;;  %8568 = sst [smem:[#allocation50_spill]] %s4750_s15 }
  0xb4   :  { %8569 = sst [smem:[#allocation51_spill]] %s4752_s16  ;;  %s8574_s16 = smov 109  }
  0xb5   :  { %8563 = sst [smem:[#allocation46_spill]] %s4730_s1 }
  0xb6   :  { %s4748_s1 = sld [smem:[#allocation9 + $0x2f]] }
  0xb7   :  { %792 = vrot.lane.b32.xlu1 %v4633_v6, %s8564_s12  ;;  %755 = vrot.lane.b32.xlu0 %v4650_v8, %s8560_s10  ;;  %s4754_s10 = sld [smem:[#allocation9 + $0xc]] }
  0xb8   :  { %8565 = sst [smem:[#allocation47_spill]] %s4736_s13  ;;  %s8571_s13 = smov 110  }
  0xb9   :  { %s4760_s14 = sld [smem:[#allocation9 + $0x30]] }
  0xba   :  { %s4762_s6 = sld [smem:[#allocation9 + $0x54]] }
  0xbb   :  { %796 = vrot.lane.b32.xlu1 %v4650_v8, %s8564_s12  ;;  %794 = vrot.lane.b32.xlu0 %v4630_v5, %s8564_s12  ;;  %s4764_s12 = sld [smem:[#allocation9 + $0x78]] }
  0xbc   :  { %s4766_s15 = sld [smem:[#allocation9 + $0xd]]  ;;  %v5022_v60 = vstv %s4748_s1 }
  0xbd   :  { %8570 = sst [smem:[#allocation52_spill]] %s4754_s10  ;;  %8634 = vst [vmem:[#allocation82_spill] sm:$0xff] %v5022_v60 }
  0xbe   :  { %s4772_s10 = sld [smem:[#allocation9 + $0x31]] }
  0xbf   :  { %835 = vrot.lane.b32.xlu1 %v4630_v5, %s8571_s13  ;;  %833 = vrot.lane.b32.xlu0 %v4633_v6, %s8571_s13  ;;  %s4847_s19 = sld [smem:[#allocation9 + $0xf]] }
  0xc0   :  { %8572 = sst [smem:[#allocation53_spill]] %s4762_s6 }
  0xc1   :  { %8573 = sst [smem:[#allocation54_spill]] %s4764_s12 }
  0xc2   :  { %s4776_s6 = sld [smem:[#allocation9 + $0x55]]  ;;  %v684_v27 = vstv %s4766_s15 }
  0xc3   :  { %874 = vrot.lane.b32.xlu1 %v4633_v6, %s8574_s16  ;;  %837 = vrot.lane.b32.xlu0 %v4650_v8, %s8571_s13  ;;  %s4781_s12 = sld [smem:[#allocation9 + $0x79]]  ;;  %v5045_v60 = vmul.f32 %v684_v27, %v4637_v7 }
  0xc4   :  { %s4794_s13 = sld [smem:[#allocation9 + $0xe]]  ;;  %v701_v9 = vstv %s4772_s10 }
  0xc5   :  { %s8576_s22 = sld [smem:[#allocation28_spill]]  ;;  %8642 = vst [vmem:[#allocation89_spill] sm:$0xff] %v5045_v60 }
  0xc6   :  { %s4863_s23 = sld [smem:[#allocation9 + $0x33]] }
  0xc7   :  { %878 = vrot.lane.b32.xlu1 %v4650_v8, %s8574_s16  ;;  %876 = vrot.lane.b32.xlu0 %v4630_v5, %s8574_s16  ;;  %s8577_s24 = sld [smem:[#allocation29_spill]] }
  0xc8   :  { %s8578_s0 = sld [smem:[#allocation30_spill]] }
  0xc9   :  { %s4875_s25 = sld [smem:[#allocation9 + $0x57]] }
  0xca   :  { %s8580_s4 = sld [smem:[#allocation31_spill]] }
  0xcb   :  { %929 = vrot.lane.b32.xlu1 %v4783_v14, %s8575_s20  ;;  %927 = vrot.lane.b32.xlu0 %v4801_v18, %s8575_s20  ;;  %s8581_s7 = sld [smem:[#allocation32_spill]]  ;;  %v4895_v49 = vstv %s8576_s22 }
  0xcc   :  { %s8583_s26 = sld [smem:[#allocation33_spill]] }
  0xcd   :  { %s4889_s3 = sld [smem:[#allocation9 + $0x7b]]  ;;  %v4910_v52 = vstv %s8577_s24 }
  0xce   :  { %s8585_s5 = sld [smem:[#allocation34_spill]]  ;;  %v4913_v53 = vstv %s8578_s0 }
  0xcf   :  { %8579 = sst [smem:[#allocation28_spill]] %s4875_s25  ;;  %968 = vrot.lane.b32.xlu1 %v4801_v18, %s8591_s29  ;;  %931 = vrot.lane.b32.xlu0 %v4803_v19, %s8575_s20 }
  0xd0   :  { %s8587_s8 = sld [smem:[#allocation35_spill]]  ;;  %v4924_v56 = vstv %s8580_s4 }
  0xd1   :  { %s8589_s27 = sld [smem:[#allocation36_spill]]  ;;  %8599 = vst [vmem:[#allocation59_spill] sm:$0xff] %v4924_v56  ;;  %v4927_v57 = vstv %s8581_s7 }
  0xd2   :  { %s4903_s28 = sld [smem:[#allocation9 + $0x10]]  ;;  %8600 = vst [vmem:[#allocation60_spill] sm:$0xff] %v4927_v57  ;;  %v4930_v58 = vstv %s8583_s26 }
  0xd3   :  { %8584 = sst [smem:[#allocation29_spill]] %s4889_s3  ;;  %8601 = vst [vmem:[#allocation61_spill] sm:$0xff] %v4930_v58  ;;  %972 = vrot.lane.b32.xlu1 %v4803_v19, %s8591_s29  ;;  %970 = vrot.lane.b32.xlu0 %v4783_v14, %s8591_s29 }
  0xd4   :  { %s8592_s30 = sld [smem:[#allocation37_spill]]  ;;  %v4933_v59 = vstv %s8585_s5 }
  0xd5   :  { %s8593_s21 = sld [smem:[#allocation38_spill]]  ;;  %8602 = vst [vmem:[#allocation62_spill] sm:$0xff] %v4933_v59 }
  0xd6   :  { %s8594_s22 = sld [smem:[#allocation39_spill]]  ;;  %v4938_v61 = vstv %s8587_s8 }
  0xd7   :  { %s8595_s16 = sld [smem:[#allocation40_spill]]  ;;  %8604 = vst [vmem:[#allocation63_spill] sm:$0xff] %v4938_v61  ;;  %v4941_v62 = vstv %s8589_s27 }
  0xd8   :  { %8590 = sst [smem:[#allocation30_spill]] %s4903_s28  ;;  %8605 = vst [vmem:[#allocation64_spill] sm:$0xff] %v4941_v62 }
  0xd9   :  { %s8596_s3 = sld [smem:[#allocation41_spill]] }
  0xda   :  { %s8598_s28 = sld [smem:[#allocation42_spill]]  ;;  %v4944_v63 = vstv %s8592_s30 }
  0xdb   :  { %s4921_s25 = sld [smem:[#allocation9 + $0x34]]  ;;  %8606 = vst [vmem:[#allocation65_spill] sm:$0xff] %v4944_v63  ;;  %v4947_v1 = vstv %s8593_s21 }
  0xdc   :  { %s8603_s24 = sld [smem:[#allocation43_spill]]  ;;  %8608 = vst [vmem:[#allocation66_spill] sm:$0xff] %v4947_v1  ;;  %v4952_v2 = vstv %s8594_s22  ;;  %v5056_v1 = vmul.f32 %v701_v9, %v4615_v3 }
  0xdd   :  { %s4935_s0 = sld [smem:[#allocation9 + $0x58]]  ;;  %8610 = vst [vmem:[#allocation67_spill] sm:$0xff] %v4952_v2  ;;  %v4955_v5 = vstv %s8595_s16  ;;  %v154_v63 = vpop.permute.xlu1 %153 }
  0xde   :  { %s8607_s4 = sld [smem:[#allocation44_spill]]  ;;  %8611 = vst [vmem:[#allocation68_spill] sm:$0xff] %v4955_v5  ;;  %8645 = vst [vmem:[#allocation92_spill] sm:$0xff] %v5056_v1 }
  0xdf   :  { %s8609_s7 = sld [smem:[#allocation45_spill]]  ;;  %v4958_v6 = vstv %s8596_s3 }
  0xe0   :  { %s4949_s26 = sld [smem:[#allocation9 + $0x7c]]  ;;  %8613 = vst [vmem:[#allocation69_spill] sm:$0xff] %v4958_v6  ;;  %v4961_v8 = vstv %s8598_s28 }
  0xe1   :  { %s8612_s5 = sld [smem:[#allocation46_spill]]  ;;  %8615 = vst [vmem:[#allocation70_spill] sm:$0xff] %v4961_v8  ;;  %v735_v8 = vstv %s4781_s12 }
  0xe2   :  { %s8614_s8 = sld [smem:[#allocation47_spill]]  ;;  %v4975_v26 = vstv %s8603_s24  ;;  %s8632_s24 = smov 17   ;;  %v5053_v2 = vmul.f32 %v735_v8, %v4617_v4  ;;  %v5096_v61 = vmul.f32 %v735_v8, %v4615_v3  ;;  %v5113_v60 = vmul.f32 %v735_v8, %v4637_v7 }
  0xe3   :  { %s4963_s27 = sld [smem:[#allocation9 + $0x11]]  ;;  %8619 = vst [vmem:[#allocation72_spill] sm:$0xff] %v4975_v26  ;;  %v718_v26 = vstv %s4776_s6  ;;  %1011 = vrot.lane.b32.xlu1 %v4783_v14, %s8632_s24  ;;  %1009 = vrot.lane.b32.xlu0 %v4801_v18, %s8632_s24 }
  0xe4   :  { %s8616_s30 = sld [smem:[#allocation48_spill]]  ;;  %v4984_v34 = vstv %s8607_s4  ;;  %v5042_v5 = vmul.f32 %v718_v26, %v4617_v4  ;;  %8644 = vst [vmem:[#allocation91_spill] sm:$0xff] %v5053_v2  ;;  %8654 = vst [vmem:[#allocation100_spill] sm:$0xff] %v5096_v61 }
  0xe5   :  { %s8618_s16 = sld [smem:[#allocation49_spill]]  ;;  %8621 = vst [vmem:[#allocation74_spill] sm:$0xff] %v4984_v34  ;;  %v4987_v35 = vstv %s8609_s7  ;;  %s8650_s7 = smov 1   ;;  %8660 = vst [vmem:[#allocation103_spill] sm:$0xff] %v5113_v60 }
  0xe6   :  { %s4978_s3 = sld [smem:[#allocation9 + $0x35]]  ;;  %8622 = vst [vmem:[#allocation75_spill] sm:$0xff] %v4987_v35  ;;  %v5011_v35 = vmul.f32 %v684_v27, %v4617_v4  ;;  %8641 = vst [vmem:[#allocation88_spill] sm:$0xff] %v5042_v5 }
  0xe7   :  { %s8623_s28 = sld [smem:[#allocation50_spill]]  ;;  %v4993_v0 = vstv %s8612_s5  ;;  %1050 = vrot.lane.b32.xlu1 %v4801_v18, %s8650_s7  ;;  %1013 = vrot.lane.b32.xlu0 %v4803_v19, %s8632_s24 }
  0xe8   :  { %s4990_s21 = sld [smem:[#allocation9 + $0x59]]  ;;  %8624 = vst [vmem:[#allocation76_spill] sm:$0xff] %v4993_v0  ;;  %v4996_v40 = vstv %s8614_s8  ;;  %8631 = vst [vmem:[#allocation81_spill] sm:$0xff] %v5011_v35  ;;  %v5086_v35 = vmul.f32 %v718_v26, %v4637_v7 }
  0xe9   :  { %8625 = vst [vmem:[#allocation77_spill] sm:$0xff] %v4996_v40  ;;  %s8627_s15 = sld [smem:[#allocation51_spill]]  ;;  %v5031_v40 = vmul.f32 %v684_v27, %v4615_v3 }
  0xea   :  { %s8628_s22 = sld [smem:[#allocation52_spill]]  ;;  %v5005_v31 = vstv %s8616_s30  ;;  %8652 = vst [vmem:[#allocation98_spill] sm:$0xff] %v5086_v35  ;;  %v5151_v35 = vstv %s4963_s27 }
  0xeb   :  { %s5002_s17 = sld [smem:[#allocation9 + $0x7d]]  ;;  %8629 = vst [vmem:[#allocation79_spill] sm:$0xff] %v5005_v31  ;;  %v5008_v34 = vstv %s8618_s16  ;;  %v5028_v31 = vmul.f32 %v701_v9, %v4617_v4  ;;  %8638 = vst [vmem:[#allocation85_spill] sm:$0xff] %v5031_v40  ;;  %v5102_v40 = vstv %s4825_s18  ;;  %1054 = vrot.lane.b32.xlu1 %v4803_v19, %s8650_s7  ;;  %1052 = vrot.lane.b32.xlu0 %v4783_v14, %s8650_s7 }
  0xec   :  { %8630 = vst [vmem:[#allocation80_spill] sm:$0xff] %v5008_v34  ;;  %s5014_s10 = sld [smem:[#allocation9 + $0x12]]  ;;  %8657 = vst [vmem:[#allocation101_spill] sm:$0xff] %v5102_v40 }
  0xed   :  { %s8633_s6 = sld [smem:[#allocation53_spill]]  ;;  %v5025_v34 = vstv %s8623_s28  ;;  %8637 = vst [vmem:[#allocation84_spill] sm:$0xff] %v5028_v31  ;;  %8669 = vst [vmem:[#allocation112_spill] sm:$0xff] %v5151_v35 }
  0xee   :  { %s8635_s11 = sld [smem:[#allocation54_spill]]  ;;  %8636 = vst [vmem:[#allocation83_spill] sm:$0xff] %v5025_v34  ;;  %v5050_v34 = vstv %s4760_s14  ;;  %v5157_v8 = vstv %s4990_s21 }
  0xef   :  { %s5033_s12 = sld [smem:[#allocation9 + $0x36]]  ;;  %v5036_v0 = vstv %s8627_s15  ;;  %8643 = vst [vmem:[#allocation90_spill] sm:$0xff] %v5050_v34  ;;  %v5071_v34 = vmul.f32 %v718_v26, %v4615_v3  ;;  %v150_v26 = vpop.permute.xlu0 %149  ;;  %v5109_v3 = vstv %s4837_s2  ;;  %8671 = vst [vmem:[#allocation114_spill] sm:$0xff] %v5157_v8  ;;  %s8687_s15 = smov 110  }
  0xf0   :  { %8639 = vst [vmem:[#allocation86_spill] sm:$0xff] %v5036_v0  ;;  %v5039_v6 = vstv %s8628_s22  ;;  %s5047_s1 = sld [smem:[#allocation9 + $0x5a]]  ;;  %v5059_v0 = vmul.f32 %v701_v9, %v4637_v7  ;;  %v5082_v9 = vstv %s4794_s13  ;;  %8659 = vst [vmem:[#allocation102_spill] sm:$0xff] %v5109_v3  ;;  %s8690_s22 = smov 109  }
  0xf1   :  { %8640 = vst [vmem:[#allocation87_spill] sm:$0xff] %v5039_v6  ;;  %s5061_s4 = sld [smem:[#allocation9 + $0x7e]]  ;;  %8649 = vst [vmem:[#allocation96_spill] sm:$0xff] %v5071_v34  ;;  %v5154_v34 = vstv %s4978_s3 }
  0xf2   :  { %8646 = vst [vmem:[#allocation93_spill] sm:$0xff] %v5059_v0  ;;  %s5073_s14 = sld [smem:[#allocation9 + $0x13]]  ;;  %8651 = vst [vmem:[#allocation97_spill] sm:$0xff] %v5082_v9  ;;  %v5116_v9 = vstv %s4847_s19 }
  0xf3   :  { %v5064_v6 = vstv %s8633_s6  ;;  %s5088_s5 = sld [smem:[#allocation9 + $0x37]]  ;;  %8661 = vst [vmem:[#allocation104_spill] sm:$0xff] %v5116_v9  ;;  %v5148_v9 = vstv %s4949_s26  ;;  %8670 = vst [vmem:[#allocation113_spill] sm:$0xff] %v5154_v34  ;;  %s8683_s26 = smov 111  }
  0xf4   :  { %8647 = vst [vmem:[#allocation94_spill] sm:$0xff] %v5064_v6  ;;  %v5067_v27 = vstv %s8635_s11  ;;  %v5092_v6 = vstv %s4811_s9  ;;  %s5098_s13 = sld [smem:[#allocation9 + $0x5b]]  ;;  %8668 = vst [vmem:[#allocation111_spill] sm:$0xff] %v5148_v9 }
  0xf5   :  { %8648 = vst [vmem:[#allocation95_spill] sm:$0xff] %v5067_v27  ;;  %8653 = vst [vmem:[#allocation99_spill] sm:$0xff] %v5092_v6  ;;  %s8655_s8 = sld [smem:[#allocation28_spill]]  ;;  %v5124_v27 = vstv %s4863_s23  ;;  %v5141_v6 = vstv %s4921_s25  ;;  %v5168_v61 = vstv %s5033_s12  ;;  %s8675_s23 = smov 127  }
  0xf6   :  { %s8656_s30 = sld [smem:[#allocation29_spill]]  ;;  %8662 = vst [vmem:[#allocation105_spill] sm:$0xff] %v5124_v27  ;;  %8666 = vst [vmem:[#allocation109_spill] sm:$0xff] %v5141_v6  ;;  %v5144_v27 = vstv %s4935_s0  ;;  %v160_v6 = vsel %vm157_vm0, %v154_v63, %v150_v26  ;;  %1161 = vrot.lane.b32.xlu1 %v4783_v14, %s8675_s23  ;;  %v5176_v35 = vstv %s5047_s1  ;;  %1159 = vrot.lane.b32.xlu0 %v4801_v18, %s8675_s23 }
  0xf7   :  { %s8658_s9 = sld [smem:[#allocation30_spill]]  ;;  %8667 = vst [vmem:[#allocation110_spill] sm:$0xff] %v5144_v27  ;;  %v5162_v27 = vstv %s5002_s17  ;;  %8674 = vst [vmem:[#allocation117_spill] sm:$0xff] %v5168_v61  ;;  %v5179_v8 = vstv %s5061_s4  ;;  %v178_v60 = vmul.f32 %v4806_v20, %v160_v6 }
  0xf8   :  { %s5106_s16 = sld [smem:[#allocation9 + $0x7f]]  ;;  %8672 = vst [vmem:[#allocation115_spill] sm:$0xff] %v5162_v27  ;;  %8676 = vst [vmem:[#allocation118_spill] sm:$0xff] %v5176_v35  ;;  %v5182_v9 = vstv %s5073_s14  ;;  %v173_v27 = vmul.f32 %v4792_v17, %v160_v6 }
  0xf9   :  { %s5118_s18 = sld [smem:[#allocation9 + $0x14]]  ;;  %8677 = vst [vmem:[#allocation119_spill] sm:$0xff] %v5179_v8  ;;  %8678 = vst [vmem:[#allocation120_spill] sm:$0xff] %v5182_v9  ;;  %v5193_v34 = vstv %s5088_s5  ;;  %v163_v8 = vmul.f32 %v4786_v15, %v160_v6  ;;  %v168_v9 = vmul.f32 %v4789_v16, %v160_v6 }
  0xfa   :  { %s5132_s2 = sld [smem:[#allocation9 + $0x38]]  ;;  %8679 = vst [vmem:[#allocation121_spill] sm:$0xff] %v5193_v34  ;;  %v5196_v35 = vstv %s5098_s13  ;;  %1200 = vrot.lane.b32.xlu1 %v4801_v18, %s8683_s26  ;;  %1163 = vrot.lane.b32.xlu0 %v4803_v19, %s8675_s23 }
  0xfb   :  { %v5127_v4 = vstv %s8655_s8  ;;  %s5170_s19 = sld [smem:[#allocation9 + $0x5c]]  ;;  %8680 = vst [vmem:[#allocation122_spill] sm:$0xff] %v5196_v35 }
  0xfc   :  { %8663 = vst [vmem:[#allocation106_spill] sm:$0xff] %v5127_v4  ;;  %v5130_v7 = vstv %s8656_s30  ;;  %v182_v4 = vpop.permute.xlu1 %181  ;;  %s5184_s25 = sld [smem:[#allocation9 + $0x80]] }
  0xfd   :  { %8664 = vst [vmem:[#allocation107_spill] sm:$0xff] %v5130_v7  ;;  %v5138_v62 = vstv %s8658_s9  ;;  %v152_v7 = vpop.permute.xlu0 %151  ;;  %s5212_s0 = sld [smem:[#allocation9 + $0x15]] }
  0xfe   :  { %8665 = vst [vmem:[#allocation108_spill] sm:$0xff] %v5138_v62  ;;  %v5165_v62 = vstv %s5014_s10  ;;  %v158_v61 = vsel %vm157_vm0, %v152_v7, %v154_v63  ;;  %v5207_v34 = vstv %s5106_s16  ;;  %s5223_s27 = sld [smem:[#allocation9 + $0x39]]  ;;  %1204 = vrot.lane.b32.xlu1 %v4803_v19, %s8683_s26  ;;  %1202 = vrot.lane.b32.xlu0 %v4783_v14, %s8683_s26 }
  0xff   :  { %8673 = vst [vmem:[#allocation116_spill] sm:$0xff] %v5165_v62  ;;  %v159_v62 = vsel %vm157_vm0, %v150_v26, %v152_v7  ;;  %8681 = vst [vmem:[#allocation123_spill] sm:$0xff] %v5207_v34  ;;  %v5210_v35 = vstv %s5118_s18  ;;  %v165_v3 = vmul.f32 %v4786_v15, %v158_v61  ;;  %s5231_s3 = sld [smem:[#allocation9 + $0x5d]]  ;;  %v175_v59 = vmul.f32 %v4792_v17, %v158_v61 }
 0x100   :  { %v186_v63 = vpop.permute.xlu1 %185  ;;  %8682 = vst [vmem:[#allocation124_spill] sm:$0xff] %v5210_v35  ;;  %v164_v1 = vmul.f32 %v4786_v15, %v159_v62  ;;  %v5221_v40 = vstv %s5132_s2  ;;  %v170_v15 = vmul.f32 %v4789_v16, %v158_v61  ;;  %s5237_s28 = sld [smem:[#allocation9 + $0x81]]  ;;  %v179_v58 = vmul.f32 %v4806_v20, %v159_v62 }
 0x101   :  { %v184_v0 = vpop.permute.xlu0 %183  ;;  %v190_v26 = vsel %vm187_vm1, %v186_v63, %v182_v4  ;;  %8684 = vst [vmem:[#allocation125_spill] sm:$0xff] %v5221_v40  ;;  %s5244_s21 = sld [smem:[#allocation9 + $0x16]]  ;;  %v5251_v10 = vstv %s5170_s19 }
 0x102   :  { %v189_v7 = vsel %vm187_vm1, %v182_v4, %v184_v0  ;;  %v188_v6 = vsel %vm187_vm1, %v184_v0, %v186_v63  ;;  %v169_v4 = vmul.f32 %v4789_v16, %v159_v62  ;;  %v193_v35 = vmul.f32 %v4809_v21, %v190_v26  ;;  %8685 = vst [vmem:[#allocation126_spill] sm:$0xff] %v5251_v10  ;;  %s5794_s17 = sld [smem:[#allocation9 + $0x3a]] }
 0x103   :  { %v201_v34 = vmul.f32 %v4814_v22, %v190_v26  ;;  %v209_v2 = vmul.f32 %v4817_v23, %v190_v26  ;;  %v174_v0 = vmul.f32 %v4792_v17, %v159_v62  ;;  %v217_v63 = vmul.f32 %v4820_v24, %v190_v26  ;;  %1243 = vrot.lane.b32.xlu1 %v4783_v14, %s8687_s15  ;;  %s5799_s10 = sld [smem:[#allocation9 + $0x5e]] }
 0x104   :  { %v194_v40 = vmul.f32 %v4809_v21, %v189_v7  ;;  %v226_v5 = vpop.permute.xlu1 %225  ;;  %v195_v57 = vmul.f32 %v4809_v21, %v188_v6  ;;  %v202_v16 = vmul.f32 %v4814_v22, %v189_v7  ;;  %v180_v26 = vmul.f32 %v4806_v20, %v158_v61  ;;  %1241 = vrot.lane.b32.xlu0 %v4801_v18, %s8687_s15  ;;  %s5807_s6 = sld [smem:[#allocation9 + $0x82]] }
 0x105   :  { %v224_v31 = vpop.permute.xlu0 %223  ;;  %v203_v56 = vmul.f32 %v4814_v22, %v188_v6  ;;  %v5254_v17 = vstv %s5184_s25  ;;  %v196_v62 = vadd.f32 %v193_v35, %v163_v8  ;;  %v204_v55 = vadd.f32 %v201_v34, %v168_v9  ;;  %s5820_s11 = sld [smem:[#allocation9 + $0x17]] }
 0x106   :  { %8686 = vst [vmem:[#allocation127_spill] sm:$0xff] %v5254_v17  ;;  %v5256_v21 = vadd.f32 %v209_v2, %v173_v27  ;;  %v231_v51 = vsel %vm229_vm2, %v224_v31, %v226_v5  ;;  %v220_v20 = vadd.f32 %v217_v63, %v178_v60  ;;  %v197_v61 = vadd.f32 %v194_v40, %v164_v1  ;;  %s5826_s12 = sld [smem:[#allocation9 + $0x3b]] }
 0x107   :  { %v210_v22 = vmul.f32 %v4817_v23, %v189_v7  ;;  %v211_v50 = vmul.f32 %v4817_v23, %v188_v6  ;;  %v198_v35 = vadd.f32 %v195_v57, %v165_v3  ;;  %v205_v34 = vadd.f32 %v202_v16, %v169_v4  ;;  %1282 = vrot.lane.b32.xlu1 %v4801_v18, %s8690_s22  ;;  %s5829_s1 = sld [smem:[#allocation9 + $0x5f]] }
 0x108   :  { %v266_v10 = vpop.permute.xlu1 %265  ;;  %v218_v2 = vmul.f32 %v4820_v24, %v189_v7  ;;  %v219_v27 = vmul.f32 %v4820_v24, %v188_v6  ;;  %v206_v9 = vadd.f32 %v203_v56, %v170_v15  ;;  %v236_v8 = vmul.f32 %v4823_v25, %v231_v51  ;;  %1245 = vrot.lane.b32.xlu0 %v4803_v19, %s8687_s15  ;;  %s5835_s4 = sld [smem:[#allocation9 + $0x83]] }
 0x109   :  { %v228_v17 = vpop.permute.xlu0 %227  ;;  %v244_v1 = vmul.f32 %v4828_v28, %v231_v51  ;;  %v252_v40 = vmul.f32 %v4831_v29, %v231_v51  ;;  %v260_v23 = vmul.f32 %v4834_v30, %v231_v51  ;;  %v5277_v24 = vstv %s5212_s0  ;;  %s5864_s14 = sld [smem:[#allocation9 + $0x18]] }
 0x10a   :  { %v232_v57 = vsel %vm229_vm2, %v228_v17, %v224_v31  ;;  %8688 = vst [vmem:[#allocation128_spill] sm:$0xff] %v5277_v24  ;;  %v5280_v56 = vstv %s5223_s27  ;;  %v213_v60 = vadd.f32 %v210_v22, %v174_v0  ;;  %v214_v3 = vadd.f32 %v211_v50, %v175_v59  ;;  %s5868_s5 = sld [smem:[#allocation9 + $0x3c]] }
 0x10b   :  { %8689 = vst [vmem:[#allocation129_spill] sm:$0xff] %v5280_v56  ;;  %v230_v7 = vsel %vm229_vm2, %v226_v5, %v228_v17  ;;  %v5285_v15 = vstv %s5231_s3  ;;  %v221_v51 = vadd.f32 %v218_v2, %v179_v58  ;;  %v222_v63 = vadd.f32 %v219_v27, %v180_v26  ;;  %1286 = vrot.lane.b32.xlu1 %v4803_v19, %s8690_s22  ;;  %s5871_s13 = sld [smem:[#allocation9 + $0x60]] }
 0x10c   :  { %v270_v6 = vpop.permute.xlu1 %269  ;;  %v5289_v31 = vstv %s5237_s28  ;;  %v5292_v16 = vstv %s5244_s21  ;;  %v239_v24 = vadd.f32 %v236_v8, %v197_v61  ;;  %v247_v47 = vadd.f32 %v244_v1, %v205_v34  ;;  %1284 = vrot.lane.b32.xlu0 %v4783_v14, %s8690_s22  ;;  %s5874_s8 = sld [smem:[#allocation9 + $0x84]] }
 0x10d   :  { %v268_v4 = vpop.permute.xlu0 %267  ;;  %v255_v56 = vadd.f32 %v252_v40, %v213_v60  ;;  %v235_v50 = vmul.f32 %v4823_v25, %v232_v57  ;;  %v263_v59 = vadd.f32 %v260_v23, %v221_v51  ;;  %v237_v5 = vmul.f32 %v4823_v25, %v230_v7  ;;  %s5896_s30 = sld [smem:[#allocation9 + $0x19]] }
 0x10e   :  { %v243_v58 = vmul.f32 %v4828_v28, %v232_v57  ;;  %v245_v0 = vmul.f32 %v4828_v28, %v230_v7  ;;  %v251_v26 = vmul.f32 %v4831_v29, %v232_v57  ;;  %v259_v17 = vmul.f32 %v4834_v30, %v232_v57  ;;  %s5901_s9 = sld [smem:[#allocation9 + $0x3d]] }
 0x10f   :  { %v274_v61 = vsel %vm271_vm3, %v270_v6, %v266_v10  ;;  %v273_v18 = vsel %vm271_vm3, %v266_v10, %v268_v4  ;;  %v253_v25 = vmul.f32 %v4831_v29, %v230_v7  ;;  %v272_v27 = vsel %vm271_vm3, %v268_v4, %v270_v6  ;;  %1337 = vrot.lane.b32.xlu1 %v4859_v38, %s8575_s20  ;;  %s5908_s16 = sld [smem:[#allocation9 + $0x61]] }
 0x110   :  { %v342_v22 = vpop.permute.xlu1 %341  ;;  %v277_v2 = vmul.f32 %v4840_v32, %v274_v61  ;;  %v285_v28 = vmul.f32 %v4843_v33, %v274_v61  ;;  %v238_v8 = vadd.f32 %v235_v50, %v196_v62  ;;  %v261_v1 = vmul.f32 %v4834_v30, %v230_v7  ;;  %1335 = vrot.lane.b32.xlu0 %v4861_v39, %s8575_s20  ;;  %s5918_s18 = sld [smem:[#allocation9 + $0x85]] }
 0x111   :  { %v340_v34 = vpop.permute.xlu0 %339  ;;  %v293_v40 = vmul.f32 %v4854_v36, %v274_v61  ;;  %v301_v23 = vmul.f32 %v4857_v37, %v274_v61  ;;  %v240_v10 = vadd.f32 %v237_v5, %v198_v35  ;;  %v246_v57 = vadd.f32 %v243_v58, %v204_v55  ;;  %s5924_s2 = sld [smem:[#allocation9 + $0x1a]] }
 0x112   :  { %v248_v29 = vadd.f32 %v245_v0, %v206_v9  ;;  %v278_v60 = vmul.f32 %v4840_v32, %v273_v18  ;;  %v254_v6 = vadd.f32 %v251_v26, %v5256_v21  ;;  %v262_v62 = vadd.f32 %v259_v17, %v220_v20  ;;  %s5928_s19 = sld [smem:[#allocation9 + $0x3e]] }
 0x113   :  { %v279_v30 = vmul.f32 %v4840_v32, %v272_v27  ;;  %v286_v7 = vmul.f32 %v4843_v33, %v273_v18  ;;  %v280_v50 = vadd.f32 %v277_v2, %v238_v8  ;;  %v288_v19 = vadd.f32 %v285_v28, %v246_v57  ;;  %1376 = vrot.lane.b32.xlu1 %v4861_v39, %s8591_s29  ;;  %v8692_v57 = vld [vmem:[#allocation56_spill] sm:$0xff]  ;;  %s5937_s25 = sld [smem:[#allocation9 + $0x62]] }
 0x114   :  { %v5324_v4 = vpop.permute.xlu1 %381  ;;  %v287_v55 = vmul.f32 %v4843_v33, %v272_v27  ;;  %v294_v35 = vmul.f32 %v4854_v36, %v273_v18  ;;  %v296_v9 = vadd.f32 %v293_v40, %v254_v6  ;;  %v304_v5 = vadd.f32 %v301_v23, %v262_v62  ;;  %1339 = vrot.lane.b32.xlu0 %v4972_v12, %s8575_s20  ;;  %v8691_v23 = vld [vmem:[#allocation55_spill] sm:$0xff]  ;;  %v8694_v62 = vld [vmem:[#allocation58_spill] sm:$0xff]  ;;  %s5944_s0 = sld [smem:[#allocation9 + $0x86]] }
 0x115   :  { %v344_v51 = vpop.permute.xlu0 %343  ;;  %v295_v14 = vmul.f32 %v4854_v36, %v272_v27  ;;  %v302_v21 = vmul.f32 %v4857_v37, %v273_v18  ;;  %v256_v32 = vadd.f32 %v253_v25, %v214_v3  ;;  %v264_v20 = vadd.f32 %v261_v1, %v222_v63  ;;  %s5954_s27 = sld [smem:[#allocation9 + $0x1b]] }
 0x116   :  { %v281_v58 = vadd.f32 %v278_v60, %v239_v24  ;;  %v303_v0 = vmul.f32 %v4857_v37, %v272_v27  ;;  %v282_v33 = vadd.f32 %v279_v30, %v240_v10  ;;  %v289_v26 = vadd.f32 %v286_v7, %v247_v47  ;;  %v8693_v60 = vld [vmem:[#allocation57_spill] sm:$0xff]  ;;  %s5957_s3 = sld [smem:[#allocation9 + $0x3f]] }
 0x117   :  { %v347_v36 = vsel %vm345_vm4, %v340_v34, %v342_v22  ;;  %v5340_v18 = vmul.f32 %v5292_v16, %v4774_v11  ;;  %v290_v2 = vadd.f32 %v287_v55, %v248_v29  ;;  %v297_v3 = vadd.f32 %v294_v35, %v255_v56  ;;  %1380 = vrot.lane.b32.xlu1 %v4972_v12, %s8591_s29  ;;  %s5965_s28 = sld [smem:[#allocation9 + $0x63]] }
 0x118   :  { %v386_v17 = vpop.permute.xlu1 %385  ;;  %v312_v24 = vadd.f32 %v4867_v41, %v280_v50  ;;  %v320_v37 = vadd.f32 %v4878_v44, %v288_v19  ;;  %v298_v63 = vadd.f32 %v295_v14, %v256_v32  ;;  %v305_v25 = vadd.f32 %v302_v21, %v263_v59  ;;  %1378 = vrot.lane.b32.xlu0 %v4859_v38, %s8591_s29  ;;  %s5968_s21 = sld [smem:[#allocation9 + $0x87]] }
 0x119   :  { %v384_v61 = vpop.permute.xlu0 %383  ;;  %v328_v28 = vadd.f32 %v4881_v45, %v296_v9  ;;  %v336_v47 = vadd.f32 %v4916_v54, %v304_v5  ;;  %v306_v27 = vadd.f32 %v303_v0, %v264_v20  ;;  %v351_v8 = vmul.f32 %v4892_v48, %v347_v36  ;;  %v8695_v5 = vld [vmem:[#allocation71_spill] sm:$0xff] }
 0x11a   :  { %v359_v11 = vmul.f32 %v4895_v49, %v347_v36  ;;  %v313_v56 = vadd.f32 %v4870_v42, %v281_v58  ;;  %v367_v41 = vmul.f32 %v4910_v52, %v347_v36  ;;  %v375_v44 = vmul.f32 %v4913_v53, %v347_v36 }
 0x11b   :  { %v346_v45 = vsel %vm345_vm4, %v342_v22, %v344_v51  ;;  %v348_v54 = vsel %vm345_vm4, %v344_v51, %v340_v34  ;;  %v314_v42 = vadd.f32 %v4873_v43, %v282_v33  ;;  %v321_v40 = vadd.f32 %v4884_v46, %v289_v26  ;;  %1419 = vrot.lane.b32.xlu1 %v4859_v38, %s8632_s24 }
 0x11c   :  { %v426_v59 = vpop.permute.xlu1 %425  ;;  %v322_v10 = vadd.f32 %v8691_v23, %v290_v2  ;;  %v329_v29 = vadd.f32 %v8692_v57, %v297_v3  ;;  %v330_v6 = vadd.f32 %v8693_v60, %v298_v63  ;;  %v337_v30 = vadd.f32 %v8694_v62, %v305_v25  ;;  %1417 = vrot.lane.b32.xlu0 %v4861_v39, %s8632_s24  ;;  %v8696_v2 = vld [vmem:[#allocation59_spill] sm:$0xff]  ;;  %v8699_v25 = vld [vmem:[#allocation62_spill] sm:$0xff] }
 0x11d   :  { %v5360_v1 = vpop.permute.xlu0 %423  ;;  %v352_v22 = vmul.f32 %v4892_v48, %v346_v45  ;;  %v353_v7 = vmul.f32 %v4892_v48, %v348_v54  ;;  %v360_v34 = vmul.f32 %v4895_v49, %v346_v45  ;;  %v361_v43 = vmul.f32 %v4895_v49, %v348_v54 }
 0x11e   :  { %v368_v46 = vmul.f32 %v4910_v52, %v346_v45  ;;  %v369_v51 = vmul.f32 %v4910_v52, %v348_v54  ;;  %v354_v50 = vadd.f32 %v351_v8, %v312_v24  ;;  %v362_v19 = vadd.f32 %v359_v11, %v320_v37  ;;  %v8697_v24 = vld [vmem:[#allocation60_spill] sm:$0xff]  ;;  %v8698_v37 = vld [vmem:[#allocation61_spill] sm:$0xff] }
 0x11f   :  { %v370_v55 = vadd.f32 %v367_v41, %v328_v28  ;;  %v378_v35 = vadd.f32 %v375_v44, %v336_v47  ;;  %v338_v14 = vadd.f32 %v8695_v5, %v306_v27  ;;  %v376_v21 = vmul.f32 %v4913_v53, %v346_v45  ;;  %1458 = vrot.lane.b32.xlu1 %v4861_v39, %s8650_s7  ;;  %v8702_v5 = vld [vmem:[#allocation65_spill] sm:$0xff] }
 0x120   :  { %v5378_v9 = vpop.permute.xlu1 %465  ;;  %v377_v49 = vmul.f32 %v4913_v53, %v348_v54  ;;  %v390_v52 = vsel %vm387_vm5, %v386_v17, %v5324_v4  ;;  %v355_v32 = vadd.f32 %v352_v22, %v313_v56  ;;  %v356_v20 = vadd.f32 %v353_v7, %v314_v42  ;;  %1421 = vrot.lane.b32.xlu0 %v4972_v12, %s8632_s24  ;;  %v8700_v7 = vld [vmem:[#allocation63_spill] sm:$0xff] }
 0x121   :  { %v428_v48 = vpop.permute.xlu0 %427  ;;  %v388_v58 = vsel %vm387_vm5, %v384_v61, %v386_v17  ;;  %v389_v0 = vsel %vm387_vm5, %v5324_v4, %v384_v61  ;;  %v363_v33 = vadd.f32 %v360_v34, %v321_v40  ;;  %v364_v53 = vadd.f32 %v361_v43, %v322_v10 }
 0x122   :  { %v371_v26 = vadd.f32 %v368_v46, %v329_v29  ;;  %v372_v36 = vadd.f32 %v369_v51, %v330_v6  ;;  %v395_v3 = vmul.f32 %v8696_v2, %v390_v52  ;;  %v403_v17 = vmul.f32 %v8697_v24, %v390_v52  ;;  %v8701_v46 = vld [vmem:[#allocation64_spill] sm:$0xff] }
 0x123   :  { %v411_v63 = vmul.f32 %v8698_v37, %v390_v52  ;;  %v419_v4 = vmul.f32 %v8699_v25, %v390_v52  ;;  %v379_v47 = vadd.f32 %v376_v21, %v337_v30  ;;  %v393_v27 = vmul.f32 %v8696_v2, %v389_v0  ;;  %1462 = vrot.lane.b32.xlu1 %v4972_v12, %s8650_s7 }
 0x124   :  { %v470_v61 = vpop.permute.xlu1 %469  ;;  %v394_v8 = vmul.f32 %v8696_v2, %v388_v58  ;;  %v401_v11 = vmul.f32 %v8697_v24, %v389_v0  ;;  %v380_v56 = vadd.f32 %v377_v49, %v338_v14  ;;  %v402_v41 = vmul.f32 %v8697_v24, %v388_v58  ;;  %1460 = vrot.lane.b32.xlu0 %v4859_v38, %s8650_s7 }
 0x125   :  { %v468_v28 = vpop.permute.xlu0 %467  ;;  %v431_v44 = vsel %vm429_vm6, %v5360_v1, %v426_v59  ;;  %v430_v45 = vsel %vm429_vm6, %v426_v59, %v428_v48  ;;  %v409_v54 = vmul.f32 %v8698_v37, %v389_v0  ;;  %v410_v42 = vmul.f32 %v8698_v37, %v388_v58  ;;  %v8704_v37 = vld [vmem:[#allocation67_spill] sm:$0xff] }
 0x126   :  { %v417_v40 = vmul.f32 %v8699_v25, %v389_v0  ;;  %v418_v23 = vmul.f32 %v8699_v25, %v388_v58  ;;  %v398_v10 = vadd.f32 %v395_v3, %v356_v20  ;;  %v406_v57 = vadd.f32 %v403_v17, %v364_v53 }
 0x127   :  { %v414_v29 = vadd.f32 %v411_v63, %v372_v36  ;;  %v422_v60 = vadd.f32 %v419_v4, %v380_v56  ;;  %v396_v62 = vadd.f32 %v393_v27, %v354_v50  ;;  %v397_v30 = vadd.f32 %v394_v8, %v355_v32  ;;  %1569 = vrot.lane.b32.xlu1 %v4859_v38, %s8675_s23  ;;  %v8705_v8 = vld [vmem:[#allocation68_spill] sm:$0xff]  ;;  %v8706_v56 = vld [vmem:[#allocation69_spill] sm:$0xff] }
 0x128   :  { %v5417_v6 = vpop.permute.xlu1 %521  ;;  %v404_v22 = vadd.f32 %v401_v11, %v362_v19  ;;  %v435_v34 = vmul.f32 %v8700_v7, %v431_v44  ;;  %v405_v43 = vadd.f32 %v402_v41, %v363_v33  ;;  %v443_v51 = vmul.f32 %v8701_v46, %v431_v44  ;;  %v8703_v19 = vld [vmem:[#allocation66_spill] sm:$0xff]  ;;  %1567 = vrot.lane.b32.xlu0 %v4861_v39, %s8675_s23 }
 0x129   :  { %v5419_v59 = vpop.permute.xlu0 %519  ;;  %v451_v14 = vmul.f32 %v8702_v5, %v431_v44  ;;  %v432_v21 = vsel %vm429_vm6, %v428_v48, %v5360_v1  ;;  %v412_v49 = vadd.f32 %v409_v54, %v370_v55  ;;  %v413_v52 = vadd.f32 %v410_v42, %v371_v26 }
 0x12a   :  { %v420_v20 = vadd.f32 %v417_v40, %v378_v35  ;;  %v421_v50 = vadd.f32 %v418_v23, %v379_v47  ;;  %v459_v32 = vmul.f32 %v8703_v19, %v431_v44  ;;  %v436_v58 = vmul.f32 %v8700_v7, %v430_v45 }
 0x12b   :  { %v444_v0 = vmul.f32 %v8701_v46, %v430_v45  ;;  %v452_v33 = vmul.f32 %v8702_v5, %v430_v45  ;;  %v438_v48 = vadd.f32 %v435_v34, %v396_v62  ;;  %v437_v55 = vmul.f32 %v8700_v7, %v432_v21  ;;  %v8707_v62 = vld [vmem:[#allocation70_spill] sm:$0xff]  ;;  %1608 = vrot.lane.b32.xlu1 %v4861_v39, %s8683_s26 }
 0x12c   :  { %v5435_v53 = vpop.permute.xlu1 %560  ;;  %v445_v35 = vmul.f32 %v8701_v46, %v432_v21  ;;  %v474_v26 = vsel %vm471_vm7, %v470_v61, %v5378_v9  ;;  %v446_v36 = vadd.f32 %v443_v51, %v404_v22  ;;  %v454_v2 = vadd.f32 %v451_v14, %v412_v49  ;;  %1571 = vrot.lane.b32.xlu0 %v4972_v12, %s8675_s23 }
 0x12d   :  { %v524_v1 = vpop.permute.xlu0 %523  ;;  %v453_v3 = vmul.f32 %v8702_v5, %v432_v21  ;;  %v460_v24 = vmul.f32 %v8703_v19, %v430_v45  ;;  %v461_v17 = vmul.f32 %v8703_v19, %v432_v21  ;;  %v479_v63 = vmul.f32 %v8704_v37, %v474_v26 }
 0x12e   :  { %v472_v25 = vsel %vm471_vm7, %v468_v28, %v470_v61  ;;  %v473_v4 = vsel %vm471_vm7, %v5378_v9, %v468_v28  ;;  %v462_v47 = vadd.f32 %v459_v32, %v420_v20  ;;  %v439_v27 = vadd.f32 %v436_v58, %v397_v30  ;;  %v8708_v58 = vld [vmem:[#allocation72_spill] sm:$0xff] }
 0x12f   :  { %v487_v11 = vmul.f32 %v8705_v8, %v474_v26  ;;  %v495_v41 = vmul.f32 %v8706_v56, %v474_v26  ;;  %v440_v54 = vadd.f32 %v437_v55, %v398_v10  ;;  %v447_v42 = vadd.f32 %v444_v0, %v405_v43  ;;  %1612 = vrot.lane.b32.xlu1 %v4972_v12, %s8683_s26 }
 0x130   :  { %v5457_v44 = vpop.permute.xlu1 %564  ;;  %v448_v61 = vadd.f32 %v445_v35, %v406_v57  ;;  %v455_v40 = vadd.f32 %v452_v33, %v413_v52  ;;  %v456_v23 = vadd.f32 %v453_v3, %v414_v29  ;;  %v503_v9 = vmul.f32 %v8707_v62, %v474_v26  ;;  %v8709_v33 = vld [vmem:[#allocation73_spill] sm:$0xff]  ;;  %v8710_v35 = vld [vmem:[#allocation74_spill] sm:$0xff]  ;;  %1610 = vrot.lane.b32.xlu0 %v4859_v38, %s8683_s26  ;;  %v8711_v3 = vld [vmem:[#allocation75_spill] sm:$0xff] }
 0x131   :  { %v5459_v45 = vpop.permute.xlu0 %562  ;;  %v477_v28 = vmul.f32 %v8704_v37, %v473_v4  ;;  %v478_v22 = vmul.f32 %v8704_v37, %v472_v25  ;;  %v463_v30 = vadd.f32 %v460_v24, %v421_v50  ;;  %v464_v7 = vadd.f32 %v461_v17, %v422_v60 }
 0x132   :  { %v482_v34 = vadd.f32 %v479_v63, %v440_v54  ;;  %v485_v46 = vmul.f32 %v8705_v8, %v473_v4  ;;  %v490_v10 = vadd.f32 %v487_v11, %v448_v61  ;;  %v498_v57 = vadd.f32 %v495_v41, %v456_v23 }
 0x133   :  { %v486_v29 = vmul.f32 %v8705_v8, %v472_v25  ;;  %v526_v43 = vsel %vm157_vm0, %v5419_v59, %v5417_v6  ;;  %v493_v60 = vmul.f32 %v8706_v56, %v473_v4  ;;  %v494_v14 = vmul.f32 %v8706_v56, %v472_v25  ;;  %1651 = vrot.lane.b32.xlu1 %v4859_v38, %s8687_s15 }
 0x134   :  { %v5474_v51 = vpop.permute.xlu1 %603  ;;  %v502_v21 = vmul.f32 %v8707_v62, %v472_v25  ;;  %v527_v49 = vsel %vm157_vm0, %v524_v1, %v5419_v59  ;;  %v506_v52 = vadd.f32 %v503_v9, %v464_v7  ;;  %v480_v20 = vadd.f32 %v477_v28, %v438_v48  ;;  %1649 = vrot.lane.b32.xlu0 %v4861_v39, %s8687_s15 }
 0x135   :  { %v5476_v5 = vpop.permute.xlu0 %601  ;;  %v481_v50 = vadd.f32 %v478_v22, %v439_v27  ;;  %v525_v19 = vsel %vm157_vm0, %v5417_v6, %v524_v1  ;;  %v501_v32 = vmul.f32 %v8707_v62, %v473_v4  ;;  %v531_v0 = vmul.f32 %v8708_v58, %v526_v43 }
 0x136   :  { %v539_v55 = vmul.f32 %v8709_v33, %v526_v43  ;;  %v547_v26 = vmul.f32 %v8710_v35, %v526_v43  ;;  %v488_v59 = vadd.f32 %v485_v46, %v446_v36  ;;  %v489_v48 = vadd.f32 %v486_v29, %v447_v42 }
 0x137   :  { %v555_v24 = vmul.f32 %v8711_v3, %v526_v43  ;;  %v530_v6 = vmul.f32 %v8708_v58, %v527_v49  ;;  %v496_v37 = vadd.f32 %v493_v60, %v454_v2  ;;  %v497_v63 = vadd.f32 %v494_v14, %v455_v40  ;;  %1690 = vrot.lane.b32.xlu1 %v4861_v39, %s8690_s22 }
 0x138   :  { %v5497_v1 = vpop.permute.xlu1 %642  ;;  %v505_v25 = vadd.f32 %v502_v21, %v463_v30  ;;  %v532_v4 = vmul.f32 %v8708_v58, %v525_v19  ;;  %v538_v27 = vmul.f32 %v8709_v33, %v527_v49  ;;  %v540_v8 = vmul.f32 %v8709_v33, %v525_v19  ;;  %v8714_v21 = vld [vmem:[#allocation78_spill] sm:$0xff]  ;;  %1653 = vrot.lane.b32.xlu0 %v4972_v12, %s8687_s15 }
 0x139   :  { %v5499_v17 = vpop.permute.xlu0 %605  ;;  %v546_v36 = vmul.f32 %v8710_v35, %v527_v49  ;;  %v568_v11 = vsel %vm187_vm1, %v5457_v44, %v5435_v53  ;;  %v504_v56 = vadd.f32 %v501_v32, %v462_v47  ;;  %v534_v2 = vadd.f32 %v531_v0, %v481_v50  ;;  %v8712_v47 = vld [vmem:[#allocation76_spill] sm:$0xff] }
 0x13a   :  { %v542_v41 = vadd.f32 %v539_v55, %v489_v48  ;;  %v550_v54 = vadd.f32 %v547_v26, %v497_v63  ;;  %v558_v42 = vadd.f32 %v555_v24, %v505_v25  ;;  %v533_v61 = vadd.f32 %v530_v6, %v480_v20  ;;  %v8715_v20 = vld [vmem:[#allocation79_spill] sm:$0xff]  ;;  %v8716_v63 = vld [vmem:[#allocation80_spill] sm:$0xff] }
 0x13b   :  { %v548_v40 = vmul.f32 %v8710_v35, %v525_v19  ;;  %v554_v23 = vmul.f32 %v8711_v3, %v527_v49  ;;  %v535_v28 = vadd.f32 %v532_v4, %v482_v34  ;;  %v556_v22 = vmul.f32 %v8711_v3, %v525_v19  ;;  %v8713_v34 = vld [vmem:[#allocation77_spill] sm:$0xff]  ;;  %1694 = vrot.lane.b32.xlu1 %v4972_v12, %s8690_s22 }
 0x13c   :  { %v5515_v62 = vpop.permute.xlu1 %646  ;;  %v571_v30 = vmul.f32 %v8712_v47, %v568_v11  ;;  %v566_v7 = vsel %vm187_vm1, %v5459_v45, %v5457_v44  ;;  %v541_v46 = vadd.f32 %v538_v27, %v488_v59  ;;  %v543_v29 = vadd.f32 %v540_v8, %v490_v10  ;;  %1692 = vrot.lane.b32.xlu0 %v4859_v38, %s8690_s22 }
 0x13d   :  { %v5517_v9 = vpop.permute.xlu0 %644  ;;  %v549_v43 = vadd.f32 %v546_v36, %v496_v37  ;;  %v567_v60 = vsel %vm187_vm1, %v5435_v53, %v5459_v45  ;;  %v579_v14 = vmul.f32 %v8713_v34, %v568_v11  ;;  %v587_v49 = vmul.f32 %v8714_v21, %v568_v11  ;;  %v8717_v36 = vld [vmem:[#allocation82_spill] sm:$0xff] }
 0x13e   :  { %v595_v50 = vmul.f32 %v8715_v20, %v568_v11  ;;  %v573_v19 = vmul.f32 %v8712_v47, %v566_v7  ;;  %v551_v44 = vadd.f32 %v548_v40, %v498_v57  ;;  %v557_v10 = vadd.f32 %v554_v23, %v504_v56  ;;  %v8718_v56 = vld [vmem:[#allocation83_spill] sm:$0xff] }
 0x13f   :  { %v572_v32 = vmul.f32 %v8712_v47, %v567_v60  ;;  %v581_v53 = vmul.f32 %v8713_v34, %v566_v7  ;;  %v559_v58 = vadd.f32 %v556_v22, %v506_v52  ;;  %v574_v0 = vadd.f32 %v571_v30, %v533_v61  ;;  %v8719_v22 = vld [vmem:[#allocation86_spill] sm:$0xff] }
 0x140   :  { %v5539_v45 = vpop.permute.xlu1 %753  ;;  %v580_v33 = vmul.f32 %v8713_v34, %v567_v60  ;;  %v588_v55 = vmul.f32 %v8714_v21, %v567_v60  ;;  %v589_v35 = vmul.f32 %v8714_v21, %v566_v7  ;;  %v596_v26 = vmul.f32 %v8715_v20, %v567_v60 }
 0x141   :  { %v5541_v39 = vpop.permute.xlu0 %751  ;;  %v597_v57 = vmul.f32 %v8715_v20, %v566_v7  ;;  %v608_v59 = vsel %vm229_vm2, %v5476_v5, %v5474_v51  ;;  %v582_v52 = vadd.f32 %v579_v14, %v541_v46  ;;  %v590_v48 = vadd.f32 %v587_v49, %v549_v43  ;;  %v8720_v14 = vld [vmem:[#allocation87_spill] sm:$0xff]  ;;  %v8721_v49 = vld [vmem:[#allocation90_spill] sm:$0xff] }
 0x142   :  { %v598_v3 = vadd.f32 %v595_v50, %v557_v10  ;;  %v576_v24 = vadd.f32 %v573_v19, %v535_v28  ;;  %v575_v6 = vadd.f32 %v572_v32, %v534_v2  ;;  %v584_v37 = vadd.f32 %v581_v53, %v543_v29  ;;  %v8722_v53 = vld [vmem:[#allocation94_spill] sm:$0xff] }
 0x143   :  { %v613_v25 = vmul.f32 %v8716_v63, %v608_v59  ;;  %v607_v4 = vsel %vm229_vm2, %v5474_v51, %v5499_v17  ;;  %v583_v12 = vadd.f32 %v580_v33, %v542_v41  ;;  %v621_v11 = vmul.f32 %v8717_v36, %v608_v59 }
 0x144   :  { %v5561_v27 = vpop.permute.xlu1 %792  ;;  %v629_v61 = vmul.f32 %v8718_v56, %v608_v59  ;;  %v609_v38 = vsel %vm229_vm2, %v5499_v17, %v5476_v5  ;;  %v591_v2 = vadd.f32 %v588_v55, %v550_v54  ;;  %v592_v40 = vadd.f32 %v589_v35, %v551_v44  ;;  %v8723_v35 = vld [vmem:[#allocation95_spill] sm:$0xff] }
 0x145   :  { %v5563_v8 = vpop.permute.xlu0 %755  ;;  %v599_v23 = vadd.f32 %v596_v26, %v558_v42  ;;  %v600_v28 = vadd.f32 %v597_v57, %v559_v58  ;;  %v637_v51 = vmul.f32 %v8719_v22, %v608_v59  ;;  %v614_v47 = vmul.f32 %v8716_v63, %v607_v4 }
 0x146   :  { %v622_v30 = vmul.f32 %v8717_v36, %v607_v4  ;;  %v630_v41 = vmul.f32 %v8718_v56, %v607_v4  ;;  %v616_v7 = vadd.f32 %v613_v25, %v575_v6  ;;  %v612_v46 = vmul.f32 %v8716_v63, %v609_v38 }
 0x147   :  { %v620_v29 = vmul.f32 %v8717_v36, %v609_v38  ;;  %v650_v5 = vsel %vm271_vm3, %v5515_v62, %v5497_v1  ;;  %v624_v42 = vadd.f32 %v621_v11, %v583_v12  ;;  %v632_v43 = vadd.f32 %v629_v61, %v591_v2 }
 0x148   :  { %v5581_v17 = vpop.permute.xlu1 %796  ;;  %v628_v60 = vmul.f32 %v8718_v56, %v609_v38  ;;  %v636_v34 = vmul.f32 %v8719_v22, %v609_v38  ;;  %v653_v21 = vmul.f32 %v8720_v14, %v650_v5  ;;  %v661_v20 = vmul.f32 %v8721_v49, %v650_v5 }
 0x149   :  { %v5583_v54 = vpop.permute.xlu0 %794  ;;  %v648_v50 = vsel %vm271_vm3, %v5517_v9, %v5515_v62  ;;  %v649_v19 = vsel %vm271_vm3, %v5497_v1, %v5517_v9  ;;  %v640_v44 = vadd.f32 %v637_v51, %v599_v23  ;;  %v617_v10 = vadd.f32 %v614_v47, %v576_v24 }
 0x14a   :  { %v638_v32 = vmul.f32 %v8719_v22, %v607_v4  ;;  %v669_v58 = vmul.f32 %v8722_v53, %v650_v5  ;;  %v615_v33 = vadd.f32 %v612_v46, %v574_v0  ;;  %v623_v55 = vadd.f32 %v620_v29, %v582_v52  ;;  %v8724_v46 = vld [vmem:[#allocation81_spill] sm:$0xff] }
 0x14b   :  { %v677_v26 = vmul.f32 %v8723_v35, %v650_v5  ;;  %v654_v57 = vmul.f32 %v8720_v14, %v649_v19  ;;  %v631_v59 = vadd.f32 %v628_v60, %v590_v48  ;;  %v639_v6 = vadd.f32 %v636_v34, %v598_v3  ;;  %v8726_v60 = vld [vmem:[#allocation84_spill] sm:$0xff] }
 0x14c   :  { %v655_v62 = vmul.f32 %v8720_v14, %v648_v50  ;;  %v662_v63 = vmul.f32 %v8721_v49, %v649_v19  ;;  %v5603_v25 = vpop.permute.xlu1 %835  ;;  %v656_v1 = vadd.f32 %v653_v21, %v615_v33  ;;  %v664_v9 = vadd.f32 %v661_v20, %v623_v55  ;;  %v8730_v21 = vld [vmem:[#allocation91_spill] sm:$0xff]  ;;  %v8736_v55 = vld [vmem:[#allocation101_spill] sm:$0xff] }
 0x14d   :  { %v663_v24 = vmul.f32 %v8721_v49, %v648_v50  ;;  %v670_v4 = vmul.f32 %v8722_v53, %v649_v19  ;;  %v5607_v0 = vpop.permute.xlu0 %833  ;;  %v672_v52 = vadd.f32 %v669_v58, %v631_v59  ;;  %v671_v12 = vmul.f32 %v8722_v53, %v648_v50 }
 0x14e   :  { %v678_v48 = vmul.f32 %v8723_v35, %v649_v19  ;;  %v679_v3 = vmul.f32 %v8723_v35, %v648_v50  ;;  %v625_v36 = vadd.f32 %v622_v30, %v584_v37  ;;  %v633_v11 = vadd.f32 %v630_v41, %v592_v40  ;;  %v8728_v41 = vld [vmem:[#allocation88_spill] sm:$0xff]  ;;  %v8732_v50 = vld [vmem:[#allocation97_spill] sm:$0xff]  ;;  %v8737_v35 = vld [vmem:[#allocation102_spill] sm:$0xff] }
 0x14f   :  { %v680_v56 = vadd.f32 %v677_v26, %v639_v6  ;;  %v657_v61 = vadd.f32 %v654_v57, %v616_v7  ;;  %v641_v38 = vadd.f32 %v638_v32, %v600_v28  ;;  %v658_v2 = vadd.f32 %v655_v62, %v617_v10  ;;  %v8734_v32 = vld [vmem:[#allocation85_spill] sm:$0xff] }
 0x150   :  { %v665_v23 = vadd.f32 %v662_v63, %v624_v42  ;;  %v758_v22 = vsel %vm345_vm4, %v5541_v39, %v5539_v45  ;;  %v666_v51 = vadd.f32 %v663_v24, %v625_v36  ;;  %v673_v47 = vadd.f32 %v670_v4, %v632_v43  ;;  %v5622_v42 = vpop.permute.xlu1 %874  ;;  %v8733_v43 = vld [vmem:[#allocation99_spill] sm:$0xff]  ;;  %v8738_v6 = vld [vmem:[#allocation89_spill] sm:$0xff] }
 0x151   :  { %v8725_v29 = vrot.slane %v8724_v46, 2  ;;  %v8727_v34 = vrot.slane %v8726_v60, 2  ;;  %v674_v37 = vadd.f32 %v671_v12, %v633_v11  ;;  %v681_v40 = vadd.f32 %v678_v48, %v640_v44  ;;  %v5630_v33 = vpop.permute.xlu0 %837  ;;  %v8742_v4 = vld [vmem:[#allocation93_spill] sm:$0xff]  ;;  %v8744_v48 = vld [vmem:[#allocation96_spill] sm:$0xff]  ;;  %v8746_v11 = vld [vmem:[#allocation98_spill] sm:$0xff] }
 0x152   :  { %v682_v30 = vadd.f32 %v679_v3, %v641_v38  ;;  %v8729_v28 = vrot.slane %v8728_v41, 2  ;;  %v8731_v49 = vrot.slane %v8730_v21, 2  ;;  %v762_v19 = vmul.f32 %v8732_v50, %v758_v22  ;;  %v8750_v41 = vld [vmem:[#allocation103_spill] sm:$0xff] }
 0x153   :  { %v697_v5 = vadd.f32 %v8725_v29, %v656_v1  ;;  %v714_v14 = vadd.f32 %v8727_v34, %v664_v9  ;;  %v770_v10 = vmul.f32 %v8733_v43, %v758_v22  ;;  %v8735_v53 = vrot.slane %v8734_v32, 2  ;;  %v8740_v1 = vld [vmem:[#allocation92_spill] sm:$0xff] }
 0x154   :  { %v731_v7 = vadd.f32 %v8729_v28, %v672_v52  ;;  %v748_v20 = vadd.f32 %v8731_v49, %v680_v56  ;;  %v778_v44 = vmul.f32 %v8736_v55, %v758_v22  ;;  %v786_v26 = vmul.f32 %v8737_v35, %v758_v22 }
 0x155   :  { %v698_v58 = vadd.f32 %v8735_v53, %v657_v61  ;;  %v757_v57 = vsel %vm345_vm4, %v5539_v45, %v5563_v8  ;;  %v759_v59 = vsel %vm345_vm4, %v5563_v8, %v5541_v39  ;;  %v8739_v62 = vrot.slane %v8738_v6, 2  ;;  %v8748_v61 = vld [vmem:[#allocation100_spill] sm:$0xff] }
 0x156   :  { %v8741_v9 = vrot.slane %v8740_v1, 2  ;;  %v8743_v52 = vrot.slane %v8742_v4, 2  ;;  %v8745_v3 = vrot.slane %v8744_v48, 2  ;;  %v8747_v56 = vrot.slane %v8746_v11, 2  ;;  %v8752_v53 = vld [vmem:[#allocation104_spill] sm:$0xff] }
 0x157   :  { %v699_v63 = vadd.f32 %v8739_v62, %v658_v2  ;;  %v8749_v38 = vrot.slane %v8748_v61, 2  ;;  %v763_v39 = vmul.f32 %v8732_v50, %v757_v57  ;;  %v764_v8 = vmul.f32 %v8732_v50, %v759_v59 }
 0x158   :  { %v715_v24 = vadd.f32 %v8741_v9, %v665_v23  ;;  %v716_v12 = vadd.f32 %v8743_v52, %v666_v51  ;;  %v732_v36 = vadd.f32 %v8745_v3, %v673_v47  ;;  %v733_v45 = vadd.f32 %v8747_v56, %v674_v37  ;;  %v5660_v37 = vpop.permute.xlu1 %878 }
 0x159   :  { %v749_v22 = vadd.f32 %v8749_v38, %v681_v40  ;;  %v771_v2 = vmul.f32 %v8733_v43, %v757_v57  ;;  %v772_v23 = vmul.f32 %v8733_v43, %v759_v59  ;;  %v779_v46 = vmul.f32 %v8736_v55, %v757_v57  ;;  %v877_v43 = vpop.permute.xlu0 %876 }
 0x15a   :  { %v780_v51 = vmul.f32 %v8736_v55, %v759_v59  ;;  %v765_v29 = vadd.f32 %v762_v19, %v697_v5  ;;  %v773_v47 = vadd.f32 %v770_v10, %v714_v14  ;;  %v781_v60 = vadd.f32 %v778_v44, %v731_v7  ;;  %v8753_v44 = vld [vmem:[#allocation105_spill] sm:$0xff] }
 0x15b   :  { %v789_v34 = vadd.f32 %v786_v26, %v748_v20  ;;  %v8751_v40 = vrot.slane %v8750_v41, 2  ;;  %v787_v21 = vmul.f32 %v8737_v35, %v757_v57  ;;  %v788_v49 = vmul.f32 %v8737_v35, %v759_v59  ;;  %v8755_v57 = vld [vmem:[#allocation107_spill] sm:$0xff] }
 0x15c   :  { %v800_v50 = vsel %vm387_vm5, %v5581_v17, %v5561_v27  ;;  %v766_v32 = vadd.f32 %v763_v39, %v698_v58  ;;  %v767_v5 = vadd.f32 %v764_v8, %v699_v63  ;;  %v798_v14 = vsel %vm387_vm5, %v5583_v54, %v5581_v17  ;;  %v8754_v58 = vld [vmem:[#allocation106_spill] sm:$0xff] }
 0x15d   :  { %v750_v28 = vadd.f32 %v8751_v40, %v682_v30  ;;  %v799_v30 = vsel %vm387_vm5, %v5561_v27, %v5583_v54  ;;  %v774_v7 = vadd.f32 %v771_v2, %v715_v24  ;;  %v775_v20 = vadd.f32 %v772_v23, %v716_v12  ;;  %v5694_v24 = vpop.permute.xlu1 %929  ;;  %v5700_v3 = vpop.permute.xlu0 %927  ;;  %v8757_v2 = vld [vmem:[#allocation109_spill] sm:$0xff] }
 0x15e   :  { %v782_v19 = vadd.f32 %v779_v46, %v732_v36  ;;  %v783_v10 = vadd.f32 %v780_v51, %v733_v45  ;;  %v805_v55 = vmul.f32 %v8752_v53, %v800_v50  ;;  %v813_v35 = vmul.f32 %v8753_v44, %v800_v50  ;;  %v8758_v46 = vld [vmem:[#allocation110_spill] sm:$0xff] }
 0x15f   :  { %v821_v26 = vmul.f32 %v8754_v58, %v800_v50  ;;  %v829_v59 = vmul.f32 %v8755_v57, %v800_v50  ;;  %v790_v6 = vadd.f32 %v787_v21, %v749_v22  ;;  %v803_v17 = vmul.f32 %v8752_v53, %v799_v30  ;;  %v8759_v50 = vld [vmem:[#allocation111_spill] sm:$0xff] }
 0x160   :  { %v804_v62 = vmul.f32 %v8752_v53, %v798_v14  ;;  %v811_v63 = vmul.f32 %v8753_v44, %v799_v30  ;;  %v791_v27 = vadd.f32 %v788_v49, %v750_v28  ;;  %v812_v54 = vmul.f32 %v8753_v44, %v798_v14 }
 0x161   :  { %v840_v1 = vsel %vm429_vm6, %v5607_v0, %v5603_v25  ;;  %v839_v9 = vsel %vm429_vm6, %v5603_v25, %v5630_v33  ;;  %v819_v4 = vmul.f32 %v8754_v58, %v799_v30  ;;  %v820_v52 = vmul.f32 %v8754_v58, %v798_v14  ;;  %v8756_v25 = vld [vmem:[#allocation108_spill] sm:$0xff] }
 0x162   :  { %v827_v12 = vmul.f32 %v8755_v57, %v799_v30  ;;  %v828_v48 = vmul.f32 %v8755_v57, %v798_v14  ;;  %v808_v36 = vadd.f32 %v805_v55, %v767_v5  ;;  %v816_v11 = vadd.f32 %v813_v35, %v775_v20  ;;  %v5713_v14 = vpop.permute.xlu1 %968  ;;  %v8760_v55 = vld [vmem:[#allocation112_spill] sm:$0xff] }
 0x163   :  { %v824_v56 = vadd.f32 %v821_v26, %v783_v10  ;;  %v832_v45 = vadd.f32 %v829_v59, %v791_v27  ;;  %v806_v61 = vadd.f32 %v803_v17, %v765_v29  ;;  %v807_v38 = vadd.f32 %v804_v62, %v766_v32 }
 0x164   :  { %v814_v22 = vadd.f32 %v811_v63, %v773_v47  ;;  %v844_v39 = vmul.f32 %v8756_v25, %v840_v1  ;;  %v815_v8 = vadd.f32 %v812_v54, %v774_v7  ;;  %v852_v23 = vmul.f32 %v8757_v2, %v840_v1  ;;  %v8762_v54 = vld [vmem:[#allocation114_spill] sm:$0xff] }
 0x165   :  { %v860_v51 = vmul.f32 %v8758_v46, %v840_v1  ;;  %v841_v41 = vsel %vm429_vm6, %v5630_v33, %v5607_v0  ;;  %v822_v40 = vadd.f32 %v819_v4, %v781_v60  ;;  %v823_v28 = vadd.f32 %v820_v52, %v782_v19  ;;  %v932_v33 = vpop.permute.xlu0 %931  ;;  %v8763_v4 = vld [vmem:[#allocation115_spill] sm:$0xff] }
 0x166   :  { %v830_v21 = vadd.f32 %v827_v12, %v789_v34  ;;  %v831_v49 = vadd.f32 %v828_v48, %v790_v6  ;;  %v868_v29 = vmul.f32 %v8759_v50, %v840_v1  ;;  %v845_v47 = vmul.f32 %v8756_v25, %v839_v9  ;;  %v8761_v6 = vld [vmem:[#allocation113_spill] sm:$0xff]  ;;  %v973_v48 = vpop.permute.xlu1 %972 }
 0x167   :  { %v853_v32 = vmul.f32 %v8757_v2, %v839_v9  ;;  %v861_v5 = vmul.f32 %v8758_v46, %v839_v9  ;;  %v847_v30 = vadd.f32 %v844_v39, %v806_v61  ;;  %v846_v7 = vmul.f32 %v8756_v25, %v841_v41 }
 0x168   :  { %v854_v20 = vmul.f32 %v8757_v2, %v841_v41  ;;  %v882_v0 = vsel %vm471_vm7, %v5660_v37, %v5622_v42  ;;  %v855_v60 = vadd.f32 %v852_v23, %v814_v22  ;;  %v863_v34 = vadd.f32 %v860_v51, %v822_v40  ;;  %v8764_v40 = vld [vmem:[#allocation116_spill] sm:$0xff] }
 0x169   :  { %v862_v19 = vmul.f32 %v8758_v46, %v841_v41  ;;  %v869_v10 = vmul.f32 %v8759_v50, %v839_v9  ;;  %v870_v53 = vmul.f32 %v8759_v50, %v841_v41  ;;  %v887_v44 = vmul.f32 %v8760_v55, %v882_v0  ;;  %v971_v22 = vpop.permute.xlu0 %970  ;;  %v8766_v50 = vld [vmem:[#allocation118_spill] sm:$0xff] }
 0x16a   :  { %v880_v35 = vsel %vm471_vm7, %v877_v43, %v5660_v37  ;;  %v881_v58 = vsel %vm471_vm7, %v5622_v42, %v877_v43  ;;  %v871_v26 = vadd.f32 %v868_v29, %v830_v21  ;;  %v848_v57 = vadd.f32 %v845_v47, %v807_v38  ;;  %v8765_v21 = vld [vmem:[#allocation117_spill] sm:$0xff] }
 0x16b   :  { %v856_v59 = vadd.f32 %v853_v32, %v815_v8  ;;  %v895_v17 = vmul.f32 %v8761_v6, %v882_v0  ;;  %v849_v62 = vadd.f32 %v846_v7, %v808_v36  ;;  %v857_v63 = vadd.f32 %v854_v20, %v816_v11  ;;  %v8767_v20 = vld [vmem:[#allocation119_spill] sm:$0xff] }
 0x16c   :  { %v864_v27 = vadd.f32 %v861_v5, %v823_v28  ;;  %v903_v1 = vmul.f32 %v8762_v54, %v882_v0  ;;  %v865_v9 = vadd.f32 %v862_v19, %v824_v56  ;;  %v911_v52 = vmul.f32 %v8763_v4, %v882_v0  ;;  %v1012_v0 = vpop.permute.xlu1 %1011 }
 0x16d   :  { %v885_v12 = vmul.f32 %v8760_v55, %v881_v58  ;;  %v886_v37 = vmul.f32 %v8760_v55, %v880_v35  ;;  %v872_v61 = vadd.f32 %v869_v10, %v831_v49  ;;  %v873_v42 = vadd.f32 %v870_v53, %v832_v45  ;;  %v1010_v55 = vpop.permute.xlu0 %1009 }
 0x16e   :  { %v890_v43 = vadd.f32 %v887_v44, %v849_v62  ;;  %v893_v38 = vmul.f32 %v8761_v6, %v881_v58  ;;  %v898_v25 = vadd.f32 %v895_v17, %v857_v63  ;;  %v894_v36 = vmul.f32 %v8761_v6, %v880_v35  ;;  %v8768_v63 = vld [vmem:[#allocation120_spill] sm:$0xff] }
 0x16f   :  { %v901_v11 = vmul.f32 %v8762_v54, %v881_v58  ;;  %v934_v56 = vsel %vm157_vm0, %v5700_v3, %v5694_v24  ;;  %v906_v39 = vadd.f32 %v903_v1, %v865_v9  ;;  %v902_v8 = vmul.f32 %v8762_v54, %v880_v35  ;;  %v8769_v54 = vld [vmem:[#allocation121_spill] sm:$0xff] }
 0x170   :  { %v909_v2 = vmul.f32 %v8763_v4, %v881_v58  ;;  %v910_v45 = vmul.f32 %v8763_v4, %v880_v35  ;;  %v914_v23 = vadd.f32 %v911_v52, %v873_v42  ;;  %v888_v46 = vadd.f32 %v885_v12, %v847_v30 }
 0x171   :  { %v889_v51 = vadd.f32 %v886_v37, %v848_v57  ;;  %v935_v41 = vsel %vm157_vm0, %v932_v33, %v5700_v3  ;;  %v939_v28 = vmul.f32 %v8764_v40, %v934_v56  ;;  %v947_v49 = vmul.f32 %v8765_v21, %v934_v56 }
 0x172   :  { %v955_v29 = vmul.f32 %v8766_v50, %v934_v56  ;;  %v933_v47 = vsel %vm157_vm0, %v5694_v24, %v932_v33  ;;  %v896_v32 = vadd.f32 %v893_v38, %v855_v60  ;;  %v897_v5 = vadd.f32 %v894_v36, %v856_v59  ;;  %v8770_v38 = vld [vmem:[#allocation122_spill] sm:$0xff] }
 0x173   :  { %v904_v7 = vadd.f32 %v901_v11, %v863_v34  ;;  %v963_v30 = vmul.f32 %v8767_v20, %v934_v56  ;;  %v905_v19 = vadd.f32 %v902_v8, %v864_v27  ;;  %v912_v10 = vadd.f32 %v909_v2, %v871_v26  ;;  %v8771_v11 = vld [vmem:[#allocation123_spill] sm:$0xff]  ;;  %v1014_v2 = vpop.permute.xlu0 %1013 }
 0x174   :  { %v913_v53 = vadd.f32 %v910_v45, %v872_v61  ;;  %v938_v3 = vmul.f32 %v8764_v40, %v935_v41  ;;  %v940_v44 = vmul.f32 %v8764_v40, %v933_v47  ;;  %v946_v35 = vmul.f32 %v8765_v21, %v935_v41  ;;  %v1051_v61 = vpop.permute.xlu1 %1050 }
 0x175   :  { %v948_v58 = vmul.f32 %v8765_v21, %v933_v47  ;;  %v976_v24 = vsel %vm187_vm1, %v973_v48, %v5713_v14  ;;  %v942_v33 = vadd.f32 %v939_v28, %v889_v51  ;;  %v950_v60 = vadd.f32 %v947_v49, %v897_v5  ;;  %v8773_v5 = vld [vmem:[#allocation125_spill] sm:$0xff] }
 0x176   :  { %v958_v34 = vadd.f32 %v955_v29, %v905_v19  ;;  %v954_v57 = vmul.f32 %v8766_v50, %v935_v41  ;;  %v966_v26 = vadd.f32 %v963_v30, %v913_v53  ;;  %v956_v59 = vmul.f32 %v8766_v50, %v933_v47  ;;  %v8774_v53 = vld [vmem:[#allocation126_spill] sm:$0xff] }
 0x177   :  { %v962_v6 = vmul.f32 %v8767_v20, %v935_v41  ;;  %v964_v17 = vmul.f32 %v8767_v20, %v933_v47  ;;  %v941_v62 = vadd.f32 %v938_v3, %v888_v46  ;;  %v979_v27 = vmul.f32 %v8768_v63, %v976_v24  ;;  %v8772_v47 = vld [vmem:[#allocation124_spill] sm:$0xff] }
 0x178   :  { %v987_v1 = vmul.f32 %v8769_v54, %v976_v24  ;;  %v974_v9 = vsel %vm187_vm1, %v971_v22, %v973_v48  ;;  %v943_v4 = vadd.f32 %v940_v44, %v890_v43  ;;  %v949_v52 = vadd.f32 %v946_v35, %v896_v32  ;;  %v1055_v30 = vpop.permute.xlu1 %1054  ;;  %v1053_v35 = vpop.permute.xlu0 %1052 }
 0x179   :  { %v951_v12 = vadd.f32 %v948_v58, %v898_v25  ;;  %v975_v37 = vsel %vm187_vm1, %v5713_v14, %v971_v22  ;;  %v957_v42 = vadd.f32 %v954_v57, %v904_v7  ;;  %v995_v36 = vmul.f32 %v8770_v38, %v976_v24 }
 0x17a   :  { %v1003_v56 = vmul.f32 %v8771_v11, %v976_v24  ;;  %v981_v8 = vmul.f32 %v8768_v63, %v974_v9  ;;  %v959_v45 = vadd.f32 %v956_v59, %v906_v39  ;;  %v965_v46 = vadd.f32 %v962_v6, %v912_v10  ;;  %v8775_v59 = vld [vmem:[#allocation127_spill] sm:$0xff] }
 0x17b   :  { %v967_v51 = vadd.f32 %v964_v17, %v914_v23  ;;  %v989_v48 = vmul.f32 %v8769_v54, %v974_v9  ;;  %v982_v43 = vadd.f32 %v979_v27, %v941_v62  ;;  %v990_v25 = vadd.f32 %v987_v1, %v949_v52  ;;  %v8776_v52 = vld [vmem:[#allocation128_spill] sm:$0xff] }
 0x17c   :  { %v980_v41 = vmul.f32 %v8768_v63, %v975_v37  ;;  %v988_v14 = vmul.f32 %v8769_v54, %v975_v37  ;;  %v996_v22 = vmul.f32 %v8770_v38, %v975_v37  ;;  %v997_v40 = vmul.f32 %v8770_v38, %v974_v9 }
 0x17d   :  { %v1004_v28 = vmul.f32 %v8771_v11, %v975_v37  ;;  %v1016_v21 = vsel %vm229_vm2, %v1010_v55, %v1012_v0  ;;  %v998_v39 = vadd.f32 %v995_v36, %v957_v42  ;;  %v1006_v49 = vadd.f32 %v1003_v56, %v965_v46  ;;  %v5815_v42 = vpop.permute.xlu1 %1161 }
 0x17e   :  { %v984_v23 = vadd.f32 %v981_v8, %v943_v4  ;;  %v1005_v50 = vmul.f32 %v8771_v11, %v974_v9  ;;  %v992_v29 = vadd.f32 %v989_v48, %v951_v12  ;;  %v1021_v32 = vmul.f32 %v8772_v47, %v1016_v21  ;;  %v8777_v11 = vld [vmem:[#allocation129_spill] sm:$0xff] }
 0x17f   :  { %v1029_v7 = vmul.f32 %v8773_v5, %v1016_v21  ;;  %v1015_v20 = vsel %vm229_vm2, %v1012_v0, %v1014_v2  ;;  %v983_v19 = vadd.f32 %v980_v41, %v942_v33  ;;  %v991_v10 = vadd.f32 %v988_v14, %v950_v60 }
 0x180   :  { %v1037_v3 = vmul.f32 %v8774_v53, %v1016_v21  ;;  %v1017_v44 = vsel %vm229_vm2, %v1014_v2, %v1010_v55  ;;  %v999_v58 = vadd.f32 %v996_v22, %v958_v34  ;;  %v1000_v24 = vadd.f32 %v997_v40, %v959_v45  ;;  %v5822_v2 = vpop.permute.xlu0 %1159 }
 0x181   :  { %v1007_v57 = vadd.f32 %v1004_v28, %v966_v26  ;;  %v1045_v6 = vmul.f32 %v8775_v59, %v1016_v21  ;;  %v1008_v17 = vadd.f32 %v1005_v50, %v967_v51  ;;  %v1022_v62 = vmul.f32 %v8772_v47, %v1015_v20 }
 0x182   :  { %v1030_v0 = vmul.f32 %v8773_v5, %v1015_v20  ;;  %v1038_v33 = vmul.f32 %v8774_v53, %v1015_v20  ;;  %v1024_v60 = vadd.f32 %v1021_v32, %v983_v19  ;;  %v1032_v63 = vadd.f32 %v1029_v7, %v991_v10  ;;  %v4296_v32 = vld [vmem:[#allocation4] sm:$0x30]  ;;  %v5841_v7 = vpop.permute.xlu1 %1200 }
 0x183   :  { %v1020_v55 = vmul.f32 %v8772_v47, %v1017_v44  ;;  %v1058_v34 = vsel %vm271_vm3, %v1055_v30, %v1051_v61  ;;  %v1040_v26 = vadd.f32 %v1037_v3, %v999_v58  ;;  %v1028_v27 = vmul.f32 %v8773_v5, %v1017_v44 }
 0x184   :  { %v1036_v54 = vmul.f32 %v8774_v53, %v1017_v44  ;;  %v1044_v1 = vmul.f32 %v8775_v59, %v1017_v44  ;;  %v5809_v9 = vadd.f32 %v1045_v6, %v1007_v57  ;;  %v1046_v4 = vmul.f32 %v8775_v59, %v1015_v20  ;;  %v1164_v53 = vpop.permute.xlu0 %1163 }
 0x185   :  { %v1061_v12 = vmul.f32 %v8776_v52, %v1058_v34  ;;  %v1057_v37 = vsel %vm271_vm3, %v1051_v61, %v1053_v35  ;;  %v1025_v38 = vadd.f32 %v1022_v62, %v984_v23  ;;  %v1033_v36 = vadd.f32 %v1030_v0, %v992_v29 }
 0x186   :  { %v1069_v56 = vmul.f32 %v8777_v11, %v1058_v34  ;;  %v1056_v8 = vsel %vm271_vm3, %v1053_v35, %v1055_v30  ;;  %v1023_v45 = vadd.f32 %v1020_v55, %v982_v43  ;;  %v1041_v46 = vadd.f32 %v1038_v33, %v1000_v24 }
 0x187   :  { %v1077_v51 = vmul.f32 %v5285_v15, %v1058_v34  ;;  %v1085_v61 = vmul.f32 %v5289_v31, %v1058_v34  ;;  %v1031_v48 = vadd.f32 %v1028_v27, %v990_v25  ;;  %v1039_v41 = vadd.f32 %v1036_v54, %v998_v39  ;;  %v4297_v27 = vld [vmem:[#allocation4 + $0x8] sm:$0x30] }
 0x188   :  { %v1047_v14 = vadd.f32 %v1044_v1, %v1006_v49  ;;  %v1062_v22 = vmul.f32 %v8776_v52, %v1057_v37  ;;  %v5831_v40 = vadd.f32 %v1046_v4, %v1008_v17  ;;  %v1064_v28 = vadd.f32 %v1061_v12, %v1023_v45  ;;  %v5862_v1 = vpop.permute.xlu1 %1204 }
 0x189   :  { %v1063_v43 = vmul.f32 %v8776_v52, %v1056_v8  ;;  %v1070_v21 = vmul.f32 %v8777_v11, %v1057_v37  ;;  %v1072_v23 = vadd.f32 %v1069_v56, %v1031_v48  ;;  %v1071_v50 = vmul.f32 %v8777_v11, %v1056_v8 }
 0x18a   :  { %v1109_v25 = vstv %s5794_s17  ;;  %v1126_v39 = vstv %s5799_s10  ;;  %v1080_v49 = vadd.f32 %v1077_v51, %v1039_v41  ;;  %v1088_v29 = vadd.f32 %v1085_v61, %v1047_v14  ;;  %s5980_s17 = sld [smem:[#allocation9 + $0x1c]] }
 0x18b   :  { %v1078_v47 = vmul.f32 %v5285_v15, %v1057_v37  ;;  %v1110_v5 = vmul.f32 %v4296_v32, %v1109_v25  ;;  %v5843_v20 = vadd.f32 %v1062_v22, %v1024_v60  ;;  %v1079_v30 = vmul.f32 %v5285_v15, %v1056_v8  ;;  %s5987_s10 = sld [smem:[#allocation9 + $0x40]] }
 0x18c   :  { %v1127_v19 = vmul.f32 %v4296_v32, %v1126_v39  ;;  %v1143_v10 = vstv %s5807_s6  ;;  %v1066_v3 = vadd.f32 %v1063_v43, %v1025_v38  ;;  %v1073_v44 = vadd.f32 %v1070_v21, %v1032_v63  ;;  %v5866_v38 = vpop.permute.xlu0 %1202  ;;  %s5989_s6 = sld [smem:[#allocation9 + $0x64]] }
 0x18d   :  { %v1099_v35 = vrot.slane %v5340_v18, 4  ;;  %v1144_v58 = vmul.f32 %v4296_v32, %v1143_v10  ;;  %v1074_v24 = vadd.f32 %v1071_v50, %v1033_v36  ;;  %v1086_v57 = vmul.f32 %v5289_v31, %v1057_v37 }
 0x18e   :  { %v1087_v59 = vmul.f32 %v5289_v31, %v1056_v8  ;;  %v1116_v6 = vrot.slane %v1110_v5, 4  ;;  %v1081_v17 = vadd.f32 %v1078_v47, %v1040_v26  ;;  %v1133_v62 = vrot.slane %v1127_v19, 4  ;;  %v4298_v31 = vld [vmem:[#allocation4 + $0x10] sm:$0x30] }
 0x18f   :  { %v1169_v15 = vstv %s5820_s11  ;;  %v1166_v0 = vsel %vm345_vm4, %v5822_v2, %v5815_v42  ;;  %v1082_v33 = vadd.f32 %v1079_v30, %v1041_v46  ;;  %v1150_v60 = vrot.slane %v1144_v58, 4  ;;  %s5996_s11 = sld [smem:[#allocation9 + $0x88]] }
 0x190   :  { %v1177_v63 = vstv %s5826_s12  ;;  %v1185_v55 = vstv %s5829_s1  ;;  %v5858_v18 = vstv %s5835_s4  ;;  %v1105_v34 = vadd.f32 %v1099_v35, %v1064_v28  ;;  %s6007_s12 = sld [smem:[#allocation9 + $0x1d]] }
 0x191   :  { %v1094_v54 = vmul.f32 %v4297_v27, %v5292_v16  ;;  %v1095_v26 = vmul.f32 %v4298_v31, %v5292_v16  ;;  %v1122_v4 = vadd.f32 %v1116_v6, %v1072_v23  ;;  %v1170_v52 = vmul.f32 %v1169_v15, %v1166_v0  ;;  %s6012_s1 = sld [smem:[#allocation9 + $0x41]] }
 0x192   :  { %v1111_v12 = vmul.f32 %v4297_v27, %v1109_v25  ;;  %v1112_v37 = vmul.f32 %v4298_v31, %v1109_v25  ;;  %v1139_v36 = vadd.f32 %v1133_v62, %v1080_v49  ;;  %v1178_v11 = vmul.f32 %v1177_v63, %v1166_v0  ;;  %v5882_v49 = vpop.permute.xlu1 %1243  ;;  %s6018_s4 = sld [smem:[#allocation9 + $0x65]] }
 0x193   :  { %v1128_v56 = vmul.f32 %v4297_v27, %v1126_v39  ;;  %v1129_v8 = vmul.f32 %v4298_v31, %v1126_v39  ;;  %v1156_v45 = vadd.f32 %v1150_v60, %v1088_v29  ;;  %v1186_v46 = vmul.f32 %v1185_v55, %v1166_v0 }
 0x194   :  { %v1194_v16 = vmul.f32 %v5858_v18, %v1166_v0  ;;  %v1145_v51 = vmul.f32 %v4297_v27, %v1143_v10  ;;  %v1100_v61 = vrot.slane %v1094_v54, 4  ;;  %v1101_v48 = vrot.slane %v1095_v26, 4 }
 0x195   :  { %v1117_v41 = vrot.slane %v1111_v12, 4  ;;  %v1146_v14 = vmul.f32 %v4298_v31, %v1143_v10  ;;  %v1089_v22 = vadd.f32 %v1086_v57, %v5809_v9  ;;  %v1118_v28 = vrot.slane %v1112_v37, 4 }
 0x196   :  { %v1134_v43 = vrot.slane %v1128_v56, 4  ;;  %v1135_v21 = vrot.slane %v1129_v8, 4  ;;  %v1090_v23 = vadd.f32 %v1087_v59, %v5831_v40  ;;  %v5877_v50 = vadd.f32 %v1170_v52, %v1105_v34  ;;  %v5893_v40 = vpop.permute.xlu0 %1241 }
 0x197   :  { %v1151_v25 = vrot.slane %v1145_v51, 4  ;;  %v1165_v39 = vsel %vm345_vm4, %v5815_v42, %v1164_v53  ;;  %v5884_v29 = vadd.f32 %v1178_v11, %v1122_v4  ;;  %v5886_v47 = vadd.f32 %v1186_v46, %v1139_v36 }
 0x198   :  { %v5888_v9 = vadd.f32 %v1194_v16, %v1156_v45  ;;  %v1167_v32 = vsel %vm345_vm4, %v1164_v53, %v5822_v2  ;;  %v1106_v5 = vadd.f32 %v1100_v61, %v5843_v20  ;;  %v1107_v42 = vadd.f32 %v1101_v48, %v1066_v3 }
 0x199   :  { %v1123_v30 = vadd.f32 %v1117_v41, %v1073_v44  ;;  %v1152_v19 = vrot.slane %v1146_v14, 4  ;;  %v1124_v10 = vadd.f32 %v1118_v28, %v1074_v24  ;;  %v1140_v35 = vadd.f32 %v1134_v43, %v1081_v17  ;;  %v5910_v17 = vpop.permute.xlu1 %1282 }
 0x19a   :  { %v1141_v58 = vadd.f32 %v1135_v21, %v1082_v33  ;;  %v1171_v57 = vmul.f32 %v1169_v15, %v1165_v39  ;;  %v1157_v59 = vadd.f32 %v1151_v25, %v1089_v22  ;;  %v1172_v6 = vmul.f32 %v1169_v15, %v1167_v32  ;;  %v1246_v27 = vpop.permute.xlu0 %1245 }
 0x19b   :  { %v1179_v62 = vmul.f32 %v1177_v63, %v1165_v39  ;;  %v1180_v0 = vmul.f32 %v1177_v63, %v1167_v32  ;;  %v1187_v2 = vmul.f32 %v1185_v55, %v1165_v39  ;;  %v1210_v53 = vstv %s5864_s14  ;;  %s6025_s14 = sld [smem:[#allocation9 + $0x89]] }
 0x19c   :  { %v1218_v60 = vstv %s5868_s5  ;;  %v1226_v34 = vstv %s5871_s13  ;;  %v1158_v20 = vadd.f32 %v1152_v19, %v1090_v23  ;;  %v1188_v3 = vmul.f32 %v1185_v55, %v1167_v32  ;;  %s6029_s5 = sld [smem:[#allocation9 + $0x1e]] }
 0x19d   :  { %v1195_v44 = vmul.f32 %v5858_v18, %v1165_v39  ;;  %v1208_v24 = vsel %vm387_vm5, %v5862_v1, %v5841_v7  ;;  %v1174_v15 = vadd.f32 %v1171_v57, %v1106_v5  ;;  %v1196_v33 = vmul.f32 %v5858_v18, %v1167_v32  ;;  %v1287_v48 = vpop.permute.xlu1 %1286  ;;  %s6033_s13 = sld [smem:[#allocation9 + $0x42]] }
 0x19e   :  { %v1234_v63 = vstv %s5874_s8  ;;  %v1207_v55 = vsel %vm387_vm5, %v5841_v7, %v5866_v38  ;;  %v1213_v54 = vmul.f32 %v1210_v53, %v1208_v24  ;;  %v1221_v31 = vmul.f32 %v1218_v60, %v1208_v24  ;;  %v1285_v43 = vpop.permute.xlu0 %1284  ;;  %s6035_s8 = sld [smem:[#allocation9 + $0x66]] }
 0x19f   :  { %v1229_v26 = vmul.f32 %v1226_v34, %v1208_v24  ;;  %v1206_v4 = vsel %vm387_vm5, %v5866_v38, %v5862_v1  ;;  %v1175_v52 = vadd.f32 %v1172_v6, %v1107_v42  ;;  %v1182_v12 = vadd.f32 %v1179_v62, %v1123_v30 }
 0x1a0   :  { %v1183_v18 = vadd.f32 %v1180_v0, %v1124_v10  ;;  %v1190_v37 = vadd.f32 %v1187_v2, %v1140_v35  ;;  %v1191_v36 = vadd.f32 %v1188_v3, %v1141_v58  ;;  %v1198_v11 = vadd.f32 %v1195_v44, %v1157_v59 }
 0x1a1   :  { %v1237_v56 = vmul.f32 %v1234_v63, %v1208_v24  ;;  %v1211_v7 = vmul.f32 %v1210_v53, %v1207_v55  ;;  %v1199_v8 = vadd.f32 %v1196_v33, %v1158_v20  ;;  %v1212_v45 = vmul.f32 %v1210_v53, %v1206_v4  ;;  %v5952_v53 = vpop.permute.xlu1 %1337 }
 0x1a2   :  { %v1219_v46 = vmul.f32 %v1218_v60, %v1207_v55  ;;  %v1220_v16 = vmul.f32 %v1218_v60, %v1206_v4  ;;  %v1216_v51 = vadd.f32 %v1213_v54, %v1175_v52  ;;  %v1224_v61 = vadd.f32 %v1221_v31, %v1183_v18 }
 0x1a3   :  { %v5926_v1 = vadd.f32 %v1229_v26, %v1191_v36  ;;  %v1227_v38 = vmul.f32 %v1226_v34, %v1207_v55  ;;  %v1228_v41 = vmul.f32 %v1226_v34, %v1206_v4  ;;  %v1235_v14 = vmul.f32 %v1234_v63, %v1207_v55 }
 0x1a4   :  { %v1251_v22 = vstv %s5896_s30  ;;  %v1259_v28 = vstv %s5901_s9  ;;  %v1240_v21 = vadd.f32 %v1237_v56, %v1199_v8  ;;  %v1214_v23 = vadd.f32 %v1211_v7, %v5877_v50  ;;  %s6045_s30 = sld [smem:[#allocation9 + $0x8a]] }
 0x1a5   :  { %v1236_v25 = vmul.f32 %v1234_v63, %v1206_v4  ;;  %v1248_v39 = vsel %vm429_vm6, %v5893_v40, %v5882_v49  ;;  %v1215_v32 = vadd.f32 %v1212_v45, %v1174_v15  ;;  %v1267_v5 = vstv %s5908_s16  ;;  %v5976_v56 = vpop.permute.xlu1 %1376  ;;  %s6050_s9 = sld [smem:[#allocation9 + $0x1f]] }
 0x1a6   :  { %v1275_v42 = vstv %s5918_s18  ;;  %v1247_v30 = vsel %vm429_vm6, %v5882_v49, %v1246_v27  ;;  %v1222_v19 = vadd.f32 %v1219_v46, %v5884_v29  ;;  %v1252_v50 = vmul.f32 %v1251_v22, %v1248_v39  ;;  %s6052_s16 = sld [smem:[#allocation9 + $0x43]] }
 0x1a7   :  { %v1260_v10 = vmul.f32 %v1259_v28, %v1248_v39  ;;  %v1249_v35 = vsel %vm429_vm6, %v1246_v27, %v5893_v40  ;;  %v1223_v58 = vadd.f32 %v1220_v16, %v1182_v12  ;;  %v1230_v57 = vadd.f32 %v1227_v38, %v5886_v47  ;;  %v5959_v47 = vpop.permute.xlu0 %1335  ;;  %s6060_s18 = sld [smem:[#allocation9 + $0x67]] }
 0x1a8   :  { %v1231_v59 = vadd.f32 %v1228_v41, %v1190_v37  ;;  %v1238_v6 = vadd.f32 %v1235_v14, %v5888_v9  ;;  %v1239_v62 = vadd.f32 %v1236_v25, %v1198_v11  ;;  %v1268_v49 = vmul.f32 %v1267_v5, %v1248_v39 }
 0x1a9   :  { %v1276_v0 = vmul.f32 %v1275_v42, %v1248_v39  ;;  %v1253_v2 = vmul.f32 %v1251_v22, %v1247_v30  ;;  %v1254_v29 = vmul.f32 %v1251_v22, %v1249_v35  ;;  %v1261_v60 = vmul.f32 %v1259_v28, %v1247_v30 }
 0x1aa   :  { %v1262_v34 = vmul.f32 %v1259_v28, %v1249_v35  ;;  %v1292_v40 = vstv %s5924_s2  ;;  %v1255_v20 = vadd.f32 %v1252_v50, %v1214_v23  ;;  %v1263_v9 = vadd.f32 %v1260_v10, %v1222_v19  ;;  %v1381_v50 = vpop.permute.xlu1 %1380  ;;  %s6062_s2 = sld [smem:[#allocation9 + $0x8b]] }
 0x1ab   :  { %v1300_v3 = vstv %s5928_s19  ;;  %v1290_v44 = vsel %vm471_vm7, %v1287_v48, %v5910_v17  ;;  %v1269_v24 = vmul.f32 %v1267_v5, %v1247_v30  ;;  %v1270_v15 = vmul.f32 %v1267_v5, %v1249_v35  ;;  %v1340_v16 = vpop.permute.xlu0 %1339  ;;  %s6070_s19 = sld [smem:[#allocation9 + $0x20]] }
 0x1ac   :  { %v1277_v33 = vmul.f32 %v1275_v42, %v1247_v30  ;;  %v1278_v63 = vmul.f32 %v1275_v42, %v1249_v35  ;;  %v1271_v55 = vadd.f32 %v1268_v49, %v1230_v57  ;;  %v1279_v27 = vadd.f32 %v1276_v0, %v1238_v6 }
 0x1ad   :  { %v1256_v54 = vadd.f32 %v1253_v2, %v1215_v32  ;;  %v1308_v31 = vstv %s5937_s25  ;;  %v1316_v26 = vstv %s5944_s0  ;;  %v1295_v4 = vmul.f32 %v1292_v40, %v1290_v44  ;;  %s6074_s25 = sld [smem:[#allocation9 + $0x44]] }
 0x1ae   :  { %v1303_v52 = vmul.f32 %v1300_v3, %v1290_v44  ;;  %v1289_v12 = vsel %vm471_vm7, %v5910_v17, %v1285_v43  ;;  %v1257_v18 = vadd.f32 %v1254_v29, %v1216_v51  ;;  %v1264_v37 = vadd.f32 %v1261_v60, %v1223_v58  ;;  %s6080_s0 = sld [smem:[#allocation9 + $0x68]] }
 0x1af   :  { %v1265_v36 = vadd.f32 %v1262_v34, %v1224_v61  ;;  %v1288_v11 = vsel %vm471_vm7, %v1285_v43, %v1287_v48  ;;  %v1272_v7 = vadd.f32 %v1269_v24, %v1231_v59  ;;  %v1273_v8 = vadd.f32 %v1270_v15, %v5926_v1  ;;  %v1379_v59 = vpop.permute.xlu0 %1378 }
 0x1b0   :  { %v1280_v45 = vadd.f32 %v1277_v33, %v1239_v62  ;;  %v1281_v46 = vadd.f32 %v1278_v63, %v1240_v21  ;;  %v1311_v38 = vmul.f32 %v1308_v31, %v1290_v44  ;;  %v1319_v41 = vmul.f32 %v1316_v26, %v1290_v44 }
 0x1b1   :  { %v1293_v14 = vmul.f32 %v1292_v40, %v1289_v12  ;;  %v1345_v17 = vstv %s5954_s27  ;;  %v5982_v51 = vadd.f32 %v1295_v4, %v1257_v18  ;;  %v5984_v61 = vadd.f32 %v1303_v52, %v1265_v36  ;;  %s6082_s27 = sld [smem:[#allocation9 + $0x8c]] }
 0x1b2   :  { %v1294_v48 = vmul.f32 %v1292_v40, %v1288_v11  ;;  %v1353_v22 = vstv %s5957_s3  ;;  %v1301_v1 = vmul.f32 %v1300_v3, %v1289_v12  ;;  %v1302_v28 = vmul.f32 %v1300_v3, %v1288_v11  ;;  %s6095_s3 = sld [smem:[#allocation9 + $0x21]] }
 0x1b3   :  { %v1309_v43 = vmul.f32 %v1308_v31, %v1289_v12  ;;  %v1310_v21 = vmul.f32 %v1308_v31, %v1288_v11  ;;  %v1317_v23 = vmul.f32 %v1316_v26, %v1289_v12  ;;  %v1318_v25 = vmul.f32 %v1316_v26, %v1288_v11  ;;  %v1418_v52 = vpop.permute.xlu0 %1417 }
 0x1b4   :  { %v1361_v39 = vstv %s5965_s28  ;;  %v1342_v32 = vsel %vm157_vm0, %v5959_v47, %v5952_v53  ;;  %v1314_v5 = vadd.f32 %v1311_v38, %v1273_v8  ;;  %v1322_v42 = vadd.f32 %v1319_v41, %v1281_v46  ;;  %s6097_s28 = sld [smem:[#allocation9 + $0x45]] }
 0x1b5   :  { %v1296_v30 = vadd.f32 %v1293_v14, %v1255_v20  ;;  %v1369_v19 = vstv %s5968_s21  ;;  %v1347_v10 = vmul.f32 %v1345_v17, %v1342_v32  ;;  %v1355_v35 = vmul.f32 %v1353_v22, %v1342_v32  ;;  %s6099_s21 = sld [smem:[#allocation9 + $0x69]] }
 0x1b6   :  { %v1363_v58 = vmul.f32 %v1361_v39, %v1342_v32  ;;  %v1341_v57 = vsel %vm157_vm0, %v5952_v53, %v1340_v16  ;;  %v1297_v6 = vadd.f32 %v1294_v48, %v1256_v54  ;;  %v1304_v62 = vadd.f32 %v1301_v1, %v1263_v9  ;;  %v1420_v54 = vpop.permute.xlu1 %1419 }
 0x1b7   :  { %v1305_v49 = vadd.f32 %v1302_v28, %v1264_v37  ;;  %v1343_v0 = vsel %vm157_vm0, %v1340_v16, %v5959_v47  ;;  %v1312_v2 = vadd.f32 %v1309_v43, %v1271_v55  ;;  %v1313_v29 = vadd.f32 %v1310_v21, %v1272_v7 }
 0x1b8   :  { %v1320_v60 = vadd.f32 %v1317_v23, %v1279_v27  ;;  %v1321_v34 = vadd.f32 %v1318_v25, %v1280_v45  ;;  %v1371_v40 = vmul.f32 %v1369_v19, %v1342_v32  ;;  %v1348_v20 = vmul.f32 %v1345_v17, %v1341_v57 }
 0x1b9   :  { %v1356_v3 = vmul.f32 %v1353_v22, %v1341_v57  ;;  %v1364_v53 = vmul.f32 %v1361_v39, %v1341_v57  ;;  %v1350_v44 = vadd.f32 %v1347_v10, %v1297_v6  ;;  %v1358_v24 = vadd.f32 %v1355_v35, %v1305_v49 }
 0x1ba   :  { %v6005_v9 = vadd.f32 %v1363_v58, %v1313_v29  ;;  %v1346_v15 = vmul.f32 %v1345_v17, %v1343_v0  ;;  %v1354_v33 = vmul.f32 %v1353_v22, %v1343_v0  ;;  %v1386_v47 = vstv %s5980_s17  ;;  %v6031_v21 = vpop.permute.xlu1 %1458  ;;  %s6101_s17 = sld [smem:[#allocation9 + $0x8d]] }
 0x1bb   :  { %v1394_v63 = vstv %s5987_s10  ;;  %v1402_v55 = vstv %s5989_s6  ;;  %v1362_v27 = vmul.f32 %v1361_v39, %v1343_v0  ;;  %v1370_v31 = vmul.f32 %v1369_v19, %v1343_v0  ;;  %v1422_v39 = vpop.permute.xlu0 %1421  ;;  %s6118_s10 = sld [smem:[#allocation9 + $0x22]] }
 0x1bc   :  { %v1410_v26 = vstv %s5996_s11  ;;  %v1384_v4 = vsel %vm187_vm1, %v1381_v50, %v5976_v56  ;;  %v1374_v12 = vadd.f32 %v1371_v40, %v1321_v34  ;;  %v1372_v18 = vmul.f32 %v1369_v19, %v1341_v57  ;;  %s6120_s6 = sld [smem:[#allocation9 + $0x46]] }
 0x1bd   :  { %v1382_v37 = vsel %vm187_vm1, %v1379_v59, %v1381_v50  ;;  %v1383_v36 = vsel %vm187_vm1, %v5976_v56, %v1379_v59  ;;  %v1387_v11 = vmul.f32 %v1386_v47, %v1384_v4  ;;  %v1395_v7 = vmul.f32 %v1394_v63, %v1384_v4  ;;  %s6125_s11 = sld [smem:[#allocation9 + $0x6a]] }
 0x1be   :  { %v1403_v8 = vmul.f32 %v1402_v55, %v1384_v4  ;;  %v1411_v45 = vmul.f32 %v1410_v26, %v1384_v4  ;;  %v1349_v46 = vadd.f32 %v1346_v15, %v1296_v30  ;;  %v1351_v16 = vadd.f32 %v1348_v20, %v5982_v51  ;;  %v1463_v20 = vpop.permute.xlu1 %1462 }
 0x1bf   :  { %v1359_v38 = vadd.f32 %v1356_v3, %v5984_v61  ;;  %v1367_v41 = vadd.f32 %v1364_v53, %v1314_v5  ;;  %v1357_v14 = vadd.f32 %v1354_v33, %v1304_v62  ;;  %v1365_v17 = vadd.f32 %v1362_v27, %v1312_v2 }
 0x1c0   :  { %v1373_v48 = vadd.f32 %v1370_v31, %v1320_v60  ;;  %v1388_v22 = vmul.f32 %v1386_v47, %v1383_v36  ;;  %v1375_v56 = vadd.f32 %v1372_v18, %v1322_v42  ;;  %v1389_v1 = vmul.f32 %v1386_v47, %v1382_v37 }
 0x1c1   :  { %v1396_v28 = vmul.f32 %v1394_v63, %v1383_v36  ;;  %v1397_v43 = vmul.f32 %v1394_v63, %v1382_v37  ;;  %v1390_v51 = vadd.f32 %v1387_v11, %v1349_v46  ;;  %v1398_v61 = vadd.f32 %v1395_v7, %v1357_v14 }
 0x1c2   :  { %v1406_v23 = vadd.f32 %v1403_v8, %v1365_v17  ;;  %v1414_v25 = vadd.f32 %v1411_v45, %v1373_v48  ;;  %v1404_v32 = vmul.f32 %v1402_v55, %v1383_v36  ;;  %v1405_v5 = vmul.f32 %v1402_v55, %v1382_v37 }
 0x1c3   :  { %v1412_v42 = vmul.f32 %v1410_v26, %v1383_v36  ;;  %v1427_v30 = vstv %s6007_s12  ;;  %v1391_v19 = vadd.f32 %v1388_v22, %v1350_v44  ;;  %v1413_v50 = vmul.f32 %v1410_v26, %v1382_v37  ;;  %s6130_s12 = sld [smem:[#allocation9 + $0x8e]] }
 0x1c4   :  { %v1435_v10 = vstv %s6012_s1  ;;  %v1424_v35 = vsel %vm229_vm2, %v1418_v52, %v1420_v54  ;;  %v1392_v58 = vadd.f32 %v1389_v1, %v1351_v16  ;;  %v1443_v57 = vstv %s6018_s4  ;;  %s6136_s1 = sld [smem:[#allocation9 + $0x23]] }
 0x1c5   :  { %v1451_v59 = vstv %s6025_s14  ;;  %v1425_v6 = vsel %vm229_vm2, %v1422_v39, %v1418_v52  ;;  %v1399_v62 = vadd.f32 %v1396_v28, %v1358_v24  ;;  %v1400_v49 = vadd.f32 %v1397_v43, %v1359_v38  ;;  %s6148_s4 = sld [smem:[#allocation9 + $0x47]] }
 0x1c6   :  { %v1429_v0 = vmul.f32 %v1427_v30, %v1424_v35  ;;  %v1423_v2 = vsel %vm229_vm2, %v1420_v54, %v1422_v39  ;;  %v1407_v29 = vadd.f32 %v1404_v32, %v6005_v9  ;;  %v1408_v60 = vadd.f32 %v1405_v5, %v1367_v41  ;;  %s6153_s14 = sld [smem:[#allocation9 + $0x6b]] }
 0x1c7   :  { %v1415_v34 = vadd.f32 %v1412_v42, %v1374_v12  ;;  %v1437_v40 = vmul.f32 %v1435_v10, %v1424_v35  ;;  %v1416_v3 = vadd.f32 %v1413_v50, %v1375_v56  ;;  %v1445_v53 = vmul.f32 %v1443_v57, %v1424_v35  ;;  %v1461_v12 = vpop.permute.xlu0 %1460 }
 0x1c8   :  { %v1453_v44 = vmul.f32 %v1451_v59, %v1424_v35  ;;  %v1428_v24 = vmul.f32 %v1427_v30, %v1425_v6  ;;  %v1430_v15 = vmul.f32 %v1427_v30, %v1423_v2  ;;  %v1436_v33 = vmul.f32 %v1435_v10, %v1425_v6 }
 0x1c9   :  { %v1438_v47 = vmul.f32 %v1435_v10, %v1423_v2  ;;  %v1468_v63 = vstv %s6029_s5  ;;  %v1432_v9 = vadd.f32 %v1429_v0, %v1391_v19  ;;  %v1476_v55 = vstv %s6033_s13  ;;  %v4299_v19 = vld [vmem:[#allocation4] sm:$0xc0]  ;;  %s6156_s5 = sld [smem:[#allocation9 + $0x8f]] }
 0x1ca   :  { %v1484_v54 = vstv %s6035_s8  ;;  %v1466_v27 = vsel %vm271_vm3, %v1463_v20, %v6031_v21  ;;  %v1440_v31 = vadd.f32 %v1437_v40, %v1399_v62  ;;  %v1444_v26 = vmul.f32 %v1443_v57, %v1425_v6  ;;  %s6161_s13 = sld [smem:[#allocation10 + $0x1]] }
 0x1cb   :  { %v1446_v4 = vmul.f32 %v1443_v57, %v1423_v2  ;;  %v1452_v52 = vmul.f32 %v1451_v59, %v1425_v6  ;;  %v1448_v18 = vadd.f32 %v1445_v53, %v1407_v29  ;;  %v6064_v37 = vadd.f32 %v1453_v44, %v1415_v34  ;;  %v6084_v30 = vpop.permute.xlu0 %1567  ;;  %v1570_v6 = vpop.permute.xlu1 %1569  ;;  %s6163_s8 = sld [smem:[#allocation10]] }
 0x1cc   :  { %v1431_v36 = vadd.f32 %v1428_v24, %v1390_v51  ;;  %v1454_v11 = vmul.f32 %v1451_v59, %v1423_v2  ;;  %v1492_v7 = vstv %s6045_s30  ;;  %v1469_v8 = vmul.f32 %v1468_v63, %v1466_v27  ;;  %s6168_s30 = sld [smem:[#allocation10 + $0x2]] }
 0x1cd   :  { %v1477_v45 = vmul.f32 %v1476_v55, %v1466_v27  ;;  %v1485_v46 = vmul.f32 %v1484_v54, %v1466_v27  ;;  %v1433_v16 = vadd.f32 %v1430_v15, %v1392_v58  ;;  %v1439_v38 = vadd.f32 %v1436_v33, %v1398_v61 }
 0x1ce   :  { %v1441_v41 = vadd.f32 %v1438_v47, %v1400_v49  ;;  %v1465_v14 = vsel %vm271_vm3, %v6031_v21, %v1461_v12  ;;  %v1447_v17 = vadd.f32 %v1444_v26, %v1406_v23  ;;  %v1449_v48 = vadd.f32 %v1446_v4, %v1408_v60 }
 0x1cf   :  { %v1455_v22 = vadd.f32 %v1452_v52, %v1414_v25  ;;  %v1464_v56 = vsel %vm271_vm3, %v1461_v12, %v1463_v20  ;;  %v6076_v1 = vadd.f32 %v1454_v11, %v1416_v3  ;;  %v1493_v28 = vmul.f32 %v1492_v7, %v1466_v27  ;;  %v4301_v52 = vld [vmem:[#allocation4 + $0x10] sm:$0xc0] }
 0x1d0   :  { %v1500_v43 = vstv %s6050_s9  ;;  %v1517_v51 = vstv %s6052_s16  ;;  %v1472_v21 = vadd.f32 %v1469_v8, %v1431_v36  ;;  %v1480_v61 = vadd.f32 %v1477_v45, %v1439_v38  ;;  %s4107_s9 = sld [smem:[#allocation10 + $0x3]] }
 0x1d1   :  { %v1488_v39 = vadd.f32 %v1485_v46, %v1447_v17  ;;  %v1470_v23 = vmul.f32 %v1468_v63, %v1465_v14  ;;  %v1471_v25 = vmul.f32 %v1468_v63, %v1464_v56  ;;  %v1478_v32 = vmul.f32 %v1476_v55, %v1465_v14  ;;  %s6413_s16 = sld [smem:[#allocation14 + $0x3a]] }
 0x1d2   :  { %v1479_v5 = vmul.f32 %v1476_v55, %v1464_v56  ;;  %v1486_v42 = vmul.f32 %v1484_v54, %v1465_v14  ;;  %v1501_v50 = vmul.f32 %v4299_v19, %v1500_v43  ;;  %v1518_v10 = vmul.f32 %v4299_v19, %v1517_v51 }
 0x1d3   :  { %v1534_v35 = vstv %s6060_s18  ;;  %v1551_v58 = vstv %s6062_s2  ;;  %v1496_v57 = vadd.f32 %v1493_v28, %v1455_v22  ;;  %v1487_v59 = vmul.f32 %v1484_v54, %v1464_v56  ;;  %v1572_v54 = vpop.permute.xlu0 %1571  ;;  %s8779_s2 = sld [smem:[#allocation152_spill]] }
 0x1d4   :  { %v1535_v62 = vmul.f32 %v4299_v19, %v1534_v35  ;;  %v1552_v49 = vmul.f32 %v4299_v19, %v1551_v58  ;;  %v1473_v0 = vadd.f32 %v1470_v23, %v1432_v9  ;;  %v1494_v2 = vmul.f32 %v1492_v7, %v1465_v14  ;;  %v4300_v9 = vld [vmem:[#allocation4 + $0x8] sm:$0xc0]  ;;  %s6415_s18 = sld [smem:[#allocation14 + $0x5e]] }
 0x1d5   :  { %v1495_v29 = vmul.f32 %v1492_v7, %v1464_v56  ;;  %v1507_v60 = vrot.slane %v1501_v50, 6  ;;  %v1474_v34 = vadd.f32 %v1471_v25, %v1433_v16  ;;  %v1481_v40 = vadd.f32 %v1478_v32, %v1440_v31 }
 0x1d6   :  { %v1482_v20 = vadd.f32 %v1479_v5, %v1441_v41  ;;  %v1524_v3 = vrot.slane %v1518_v10, 6  ;;  %v1489_v53 = vadd.f32 %v1486_v42, %v1448_v18  ;;  %v1541_v44 = vrot.slane %v1535_v62, 6  ;;  %v1609_v18 = vpop.permute.xlu1 %1608 }
 0x1d7   :  { %v1577_v24 = vstv %s6070_s19  ;;  %v1574_v15 = vsel %vm345_vm4, %v6084_v30, %v1570_v6  ;;  %v1490_v33 = vadd.f32 %v1487_v59, %v1449_v48  ;;  %v1558_v47 = vrot.slane %v1552_v49, 6  ;;  %s1793_s19 = sld [smem:[#allocation11]] }
 0x1d8   :  { %v1585_v63 = vstv %s6074_s25  ;;  %v1502_v55 = vmul.f32 %v4300_v9, %v1500_v43  ;;  %v1593_v27 = vstv %s6080_s0  ;;  %v1601_v26 = vstv %s6082_s27  ;;  %s1796_s25 = sld [smem:[#allocation13]] }
 0x1d9   :  { %v1513_v4 = vadd.f32 %v1507_v60, %v1472_v21  ;;  %v1503_v31 = vmul.f32 %v4301_v52, %v1500_v43  ;;  %v1530_v12 = vadd.f32 %v1524_v3, %v1480_v61  ;;  %v1578_v36 = vmul.f32 %v1577_v24, %v1574_v15  ;;  %s4102_s0 = sld [smem:[#allocation11 + $0x1]] }
 0x1da   :  { %v1519_v11 = vmul.f32 %v4300_v9, %v1517_v51  ;;  %v1520_v7 = vmul.f32 %v4301_v52, %v1517_v51  ;;  %v1547_v8 = vadd.f32 %v1541_v44, %v1488_v39  ;;  %v1586_v45 = vmul.f32 %v1585_v63, %v1574_v15  ;;  %v1611_v39 = vpop.permute.xlu0 %1610  ;;  %v1613_v10 = vpop.permute.xlu1 %1612  ;;  %s6294_s27 = sld [smem:[#allocation13 + $0x1]] }
 0x1db   :  { %v1536_v46 = vmul.f32 %v4300_v9, %v1534_v35  ;;  %v1537_v16 = vmul.f32 %v4301_v52, %v1534_v35  ;;  %v1564_v38 = vadd.f32 %v1558_v47, %v1496_v57  ;;  %v1594_v41 = vmul.f32 %v1593_v27, %v1574_v15 }
 0x1dc   :  { %v1602_v14 = vmul.f32 %v1601_v26, %v1574_v15  ;;  %v1508_v17 = vrot.slane %v1502_v55, 6  ;;  %v1509_v48 = vrot.slane %v1503_v31, 6  ;;  %v1525_v22 = vrot.slane %v1519_v11, 6 }
 0x1dd   :  { %v1526_v56 = vrot.slane %v1520_v7, 6  ;;  %v1553_v28 = vmul.f32 %v4300_v9, %v1551_v58  ;;  %v1497_v43 = vadd.f32 %v1494_v2, %v6064_v37  ;;  %v1542_v51 = vrot.slane %v1536_v46, 6 }
 0x1de   :  { %v1543_v21 = vrot.slane %v1537_v16, 6  ;;  %v1554_v61 = vmul.f32 %v4301_v52, %v1551_v58  ;;  %v1498_v23 = vadd.f32 %v1495_v29, %v6076_v1  ;;  %v6105_v25 = vadd.f32 %v1578_v36, %v1513_v4  ;;  %v1652_v55 = vpop.permute.xlu1 %1651 }
 0x1df   :  { %v6107_v32 = vadd.f32 %v1586_v45, %v1530_v12  ;;  %v1573_v5 = vsel %vm345_vm4, %v1570_v6, %v1572_v54  ;;  %v6111_v42 = vadd.f32 %v1594_v41, %v1547_v8  ;;  %v6113_v19 = vadd.f32 %v1602_v14, %v1564_v38 }
 0x1e0   :  { %v1514_v50 = vadd.f32 %v1508_v17, %v1473_v0  ;;  %v1575_v37 = vsel %vm345_vm4, %v1572_v54, %v6084_v30  ;;  %v1515_v35 = vadd.f32 %v1509_v48, %v1474_v34  ;;  %v1531_v1 = vadd.f32 %v1525_v22, %v1481_v40 }
 0x1e1   :  { %v1532_v58 = vadd.f32 %v1526_v56, %v1482_v20  ;;  %v1559_v57 = vrot.slane %v1553_v28, 6  ;;  %v1548_v59 = vadd.f32 %v1542_v51, %v1489_v53  ;;  %v1549_v62 = vadd.f32 %v1543_v21, %v1490_v33  ;;  %v1650_v20 = vpop.permute.xlu0 %1649 }
 0x1e2   :  { %v1560_v6 = vrot.slane %v1554_v61, 6  ;;  %v1579_v49 = vmul.f32 %v1577_v24, %v1573_v5  ;;  %v1580_v0 = vmul.f32 %v1577_v24, %v1575_v37  ;;  %v1587_v2 = vmul.f32 %v1585_v63, %v1573_v5  ;;  %v1691_v21 = vpop.permute.xlu1 %1690 }
 0x1e3   :  { %v1588_v29 = vmul.f32 %v1585_v63, %v1575_v37  ;;  %v1595_v60 = vmul.f32 %v1593_v27, %v1573_v5  ;;  %v1596_v30 = vmul.f32 %v1593_v27, %v1575_v37  ;;  %v1618_v34 = vstv %s6095_s3  ;;  %s6296_s3 = sld [smem:[#allocation11 + $0x2]] }
 0x1e4   :  { %v1626_v3 = vstv %s6097_s28  ;;  %v1634_v40 = vstv %s6099_s21  ;;  %v1603_v53 = vmul.f32 %v1601_v26, %v1573_v5  ;;  %v1604_v44 = vmul.f32 %v1601_v26, %v1575_v37  ;;  %s6298_s28 = sld [smem:[#allocation13 + $0x2]] }
 0x1e5   :  { %v1642_v15 = vstv %s6101_s17  ;;  %v1616_v33 = vsel %vm387_vm5, %v1613_v10, %v1609_v18  ;;  %v1565_v24 = vadd.f32 %v1559_v57, %v1497_v43  ;;  %v1566_v47 = vadd.f32 %v1560_v6, %v1498_v23  ;;  %v1654_v41 = vpop.permute.xlu0 %1653  ;;  %s6301_s21 = sld [smem:[#allocation11 + $0x3]] }
 0x1e6   :  { %v1614_v63 = vsel %vm387_vm5, %v1611_v39, %v1613_v10  ;;  %v1615_v9 = vsel %vm387_vm5, %v1609_v18, %v1611_v39  ;;  %v1621_v54 = vmul.f32 %v1618_v34, %v1616_v33  ;;  %v1629_v27 = vmul.f32 %v1626_v3, %v1616_v33  ;;  %s6446_s17 = sld [smem:[#allocation14 + $0x6c]] }
 0x1e7   :  { %v1637_v4 = vmul.f32 %v1634_v40, %v1616_v33  ;;  %v1645_v52 = vmul.f32 %v1642_v15, %v1616_v33  ;;  %v1582_v26 = vadd.f32 %v1579_v49, %v1514_v50  ;;  %v1583_v31 = vadd.f32 %v1580_v0, %v1515_v35 }
 0x1e8   :  { %v1590_v12 = vadd.f32 %v1587_v2, %v1531_v1  ;;  %v1591_v36 = vadd.f32 %v1588_v29, %v1532_v58  ;;  %v1598_v11 = vadd.f32 %v1595_v60, %v1548_v59  ;;  %v1599_v7 = vadd.f32 %v1596_v30, %v1549_v62 }
 0x1e9   :  { %v1606_v8 = vadd.f32 %v1603_v53, %v1565_v24  ;;  %v1607_v45 = vadd.f32 %v1604_v44, %v1566_v47  ;;  %v1619_v46 = vmul.f32 %v1618_v34, %v1615_v9  ;;  %v1620_v16 = vmul.f32 %v1618_v34, %v1614_v63  ;;  %v1693_v33 = vpop.permute.xlu0 %1692 }
 0x1ea   :  { %v1627_v18 = vmul.f32 %v1626_v3, %v1615_v9  ;;  %v1628_v38 = vmul.f32 %v1626_v3, %v1614_v63  ;;  %v1624_v14 = vadd.f32 %v1621_v54, %v1583_v31  ;;  %v1632_v17 = vadd.f32 %v1629_v27, %v1591_v36 }
 0x1eb   :  { %v1640_v48 = vadd.f32 %v1637_v4, %v1599_v7  ;;  %v6138_v22 = vadd.f32 %v1645_v52, %v1607_v45  ;;  %v1635_v56 = vmul.f32 %v1634_v40, %v1615_v9  ;;  %v1636_v28 = vmul.f32 %v1634_v40, %v1614_v63 }
 0x1ec   :  { %v1659_v43 = vstv %s6118_s10  ;;  %v1667_v51 = vstv %s6120_s6  ;;  %v1675_v61 = vstv %s6125_s11  ;;  %v1683_v39 = vstv %s6130_s12  ;;  %s8783_s6 = sld [smem:[#allocation153_spill]] }
 0x1ed   :  { %v1656_v23 = vsel %vm429_vm6, %v1650_v20, %v1652_v55  ;;  %v1655_v5 = vsel %vm429_vm6, %v1652_v55, %v1654_v41  ;;  %v1622_v50 = vadd.f32 %v1619_v46, %v6105_v25  ;;  %v1643_v37 = vmul.f32 %v1642_v15, %v1615_v9  ;;  %s6321_s11 = sld [smem:[#allocation13 + $0x3]] }
 0x1ee   :  { %v1644_v10 = vmul.f32 %v1642_v15, %v1614_v63  ;;  %v1657_v35 = vsel %vm429_vm6, %v1654_v41, %v1650_v20  ;;  %v1623_v1 = vadd.f32 %v1620_v16, %v1582_v26  ;;  %v1630_v58 = vadd.f32 %v1627_v18, %v6107_v32  ;;  %v1695_v32 = vpop.permute.xlu1 %1694  ;;  %s6385_s12 = sld [smem:[#allocation14 + $0x4]] }
 0x1ef   :  { %v1631_v57 = vadd.f32 %v1628_v38, %v1590_v12  ;;  %v1660_v59 = vmul.f32 %v1659_v43, %v1656_v23  ;;  %v1668_v62 = vmul.f32 %v1667_v51, %v1656_v23  ;;  %v1676_v6 = vmul.f32 %v1675_v61, %v1656_v23  ;;  %8784 = sst [smem:[#allocation31_spill]] %s6446_s17 }
 0x1f0   :  { %v1684_v49 = vmul.f32 %v1683_v39, %v1656_v23  ;;  %v1661_v0 = vmul.f32 %v1659_v43, %v1655_v5  ;;  %v1638_v25 = vadd.f32 %v1635_v56, %v6111_v42  ;;  %v1639_v2 = vadd.f32 %v1636_v28, %v1598_v11  ;;  %s6452_s10 = sld [smem:[#allocation14 + $0x1]] }
 0x1f1   :  { %v1662_v29 = vmul.f32 %v1659_v43, %v1657_v35  ;;  %v1669_v60 = vmul.f32 %v1667_v51, %v1655_v5  ;;  %v1646_v30 = vadd.f32 %v1643_v37, %v6113_v19  ;;  %v1647_v34 = vadd.f32 %v1644_v10, %v1606_v8  ;;  %s6469_s17 = sld [smem:[#allocation14 + $0x2]] }
 0x1f2   :  { %v1670_v3 = vmul.f32 %v1667_v51, %v1657_v35  ;;  %v1700_v40 = vstv %s6136_s1  ;;  %v1663_v20 = vadd.f32 %v1660_v59, %v1622_v50  ;;  %v1677_v53 = vmul.f32 %v1675_v61, %v1655_v5  ;;  %s6389_s1 = sld [smem:[#allocation14 + $0x28]] }
 0x1f3   :  { %v1678_v44 = vmul.f32 %v1675_v61, %v1657_v35  ;;  %v1685_v15 = vmul.f32 %v1683_v39, %v1655_v5  ;;  %v1671_v24 = vadd.f32 %v1668_v62, %v1630_v58  ;;  %v1679_v42 = vadd.f32 %v1676_v6, %v1638_v25 }
 0x1f4   :  { %v1687_v47 = vadd.f32 %v1684_v49, %v1646_v30  ;;  %v1664_v63 = vadd.f32 %v1661_v0, %v1623_v1  ;;  %v1665_v19 = vadd.f32 %v1662_v29, %v1624_v14  ;;  %v1672_v9 = vadd.f32 %v1669_v60, %v1631_v57  ;;  %v144_v49 = vld [vmem:[%s8779_s2] sm:$0x7]  ;;  %s6417_s2 = sld [smem:[#allocation14 + $0x82]] }
 0x1f5   :  { %v1708_v55 = vstv %s6148_s4  ;;  %v1698_v54 = vsel %vm471_vm7, %v1695_v32, %v1691_v21  ;;  %v1673_v27 = vadd.f32 %v1670_v3, %v1632_v17  ;;  %v1686_v4 = vmul.f32 %v1683_v39, %v1657_v35  ;;  %s6391_s4 = sld [smem:[#allocation14 + $0x4c]] }
 0x1f6   :  { %v1716_v52 = vstv %s6153_s14  ;;  %v1696_v26 = vsel %vm471_vm7, %v1693_v33, %v1695_v32  ;;  %v1680_v31 = vadd.f32 %v1677_v53, %v1639_v2  ;;  %v1681_v12 = vadd.f32 %v1678_v44, %v1640_v48  ;;  %s6393_s14 = sld [smem:[#allocation14 + $0x70]] }
 0x1f7   :  { %v1688_v36 = vadd.f32 %v1685_v15, %v1647_v34  ;;  %v1724_v11 = vstv %s6156_s5  ;;  %v1703_v7 = vmul.f32 %v1700_v40, %v1698_v54  ;;  %v1711_v8 = vmul.f32 %v1708_v55, %v1698_v54  ;;  %s6397_s5 = sld [smem:[#allocation14 + $0xd]] }
 0x1f8   :  { %v1697_v45 = vsel %vm471_vm7, %v1691_v21, %v1693_v33  ;;  %v1702_v46 = vmul.f32 %v1700_v40, %v1696_v26  ;;  %v1710_v38 = vmul.f32 %v1708_v55, %v1696_v26  ;;  %v1689_v14 = vadd.f32 %v1686_v4, %v6138_v22  ;;  %8785 = sst [smem:[#allocation32_spill]] %s6452_s10 }
 0x1f9   :  { %v1701_v16 = vmul.f32 %v1700_v40, %v1697_v45  ;;  %v1709_v18 = vmul.f32 %v1708_v55, %v1697_v45  ;;  %v1717_v41 = vmul.f32 %v1716_v52, %v1697_v45  ;;  %v1719_v17 = vmul.f32 %v1716_v52, %v1698_v54  ;;  %8789 = sst [smem:[#allocation36_spill]] %s6469_s17 }
 0x1fa   :  { %v1718_v56 = vmul.f32 %v1716_v52, %v1696_v26  ;;  %v1725_v48 = vmul.f32 %v1724_v11, %v1697_v45  ;;  %v1705_v43 = vadd.f32 %v1702_v46, %v1664_v63  ;;  %v1726_v61 = vmul.f32 %v1724_v11, %v1696_v26  ;;  %s6473_s10 = sld [smem:[#allocation14 + $0x26]] }
 0x1fb   :  { %v1704_v28 = vadd.f32 %v1701_v16, %v1663_v20  ;;  %v1712_v51 = vadd.f32 %v1709_v18, %v1671_v24  ;;  %v1706_v39 = vadd.f32 %v1703_v7, %v1665_v19  ;;  %v1727_v23 = vmul.f32 %v1724_v11, %v1698_v54  ;;  %s6490_s17 = sld [smem:[#allocation14 + $0x4b]] }
 0x1fc   :  { %v1807_v21 = vstv %s6161_s13  ;;  %v1732_v5 = vstv %s6163_s8  ;;  %v1714_v50 = vadd.f32 %v1711_v8, %v1673_v27  ;;  %v1865_v37 = vstv %s6168_s30  ;;  %s6401_s13 = sld [smem:[#allocation14 + $0x31]] }
 0x1fd   :  { %v1713_v10 = vadd.f32 %v1710_v38, %v1672_v9  ;;  %v1720_v35 = vadd.f32 %v1717_v41, %v1679_v42  ;;  %v1923_v1 = vstv %s4107_s9  ;;  %v1721_v58 = vadd.f32 %v1718_v56, %v1680_v31  ;;  %s6403_s8 = sld [smem:[#allocation14 + $0x55]] }
 0x1fe   :  { %v1728_v57 = vadd.f32 %v1725_v48, %v1687_v47  ;;  %v8778_v59 = vlaneseq  ;;  %v1729_v62 = vadd.f32 %v1726_v61, %v1688_v36  ;;  %v6181_v6 = vadd.f32 %v1807_v21, %v1712_v51  ;;  %s6405_s30 = sld [smem:[#allocation14 + $0x79]] }
 0x1ff   :  { %v6186_v0 = vadd.f32 %v1732_v5, %v1704_v28  ;;  %v6188_v25 = vadd.f32 %v1732_v5, %v1705_v43  ;;  %v6190_v2 = vadd.f32 %v1732_v5, %v1706_v39  ;;  %v1722_v34 = vadd.f32 %v1719_v17, %v1681_v12  ;;  %s6409_s9 = sld [smem:[#allocation14 + $0x16]] }
 0x200   :  { %v1738_v22 = vshrl.u32 %v8778_v59, 7  ;;  %v6192_v3 = vadd.f32 %v1807_v21, %v1713_v10  ;;  %v6194_v40 = vadd.f32 %v1865_v37, %v1720_v35  ;;  %v6196_v32 = vadd.f32 %v1807_v21, %v1714_v50  ;;  %8790 = sst [smem:[#allocation37_spill]] %s6473_s10 }
 0x201   :  { %v6198_v20 = vadd.f32 %v1865_v37, %v1721_v58  ;;  %v1730_v33 = vadd.f32 %v1727_v23, %v1689_v14  ;;  %v6206_v24 = vadd.f32 %v1923_v1, %v1728_v57  ;;  %v6208_v42 = vadd.f32 %v1923_v1, %v1729_v62  ;;  %8795 = sst [smem:[#allocation42_spill]] %s6490_s17 }
 0x202   :  { %v1739_v29 = vsub.s32 0, %v1738_v22  ;;  %v1743_v60 = vsub.s32 1, %v1738_v22  ;;  %v1747_v30 = vsub.s32 2, %v1738_v22  ;;  %v6222_v27 = vadd.f32 %v1865_v37, %v1722_v34  ;;  %s6492_s10 = sld [smem:[#allocation14 + $0x6f]] }
 0x203   :  { %v6237_v18 = vadd.f32 %v1923_v1, %v1730_v33  ;;  %s6508_s17 = sld [smem:[#allocation14 + $0x6]] }
 0x204   :  { %v6200_v53 = vrot.slane %v144_v49, %v1739_v29  ;;  %v6202_v44 = vrot.slane %v144_v49, %v1743_v60  ;;  %v6204_v15 = vrot.slane %v144_v49, %v1747_v30 }
 0x206   :  { %8780 = vst [vmem:[#allocation55_spill] sm:$0xff] %v6200_v53  ;;  %8781 = vst [vmem:[#allocation56_spill] sm:$0xff] %v6202_v44  ;;  %v1752_v47 = vmul.f32 %v6200_v53, %v6186_v0  ;;  %v1753_v63 = vmul.f32 %v6202_v44, %v6188_v25  ;;  %v1754_v19 = vmul.f32 %v6204_v15, %v6190_v2 }
 0x207   :  { %8782 = vst [vmem:[#allocation57_spill] sm:$0xff] %v6204_v15  ;;  %v1811_v9 = vmul.f32 %v6181_v6, %v6200_v53  ;;  %v1812_v55 = vmul.f32 %v6192_v3, %v6202_v44  ;;  %v1813_v54 = vmul.f32 %v6196_v32, %v6204_v15  ;;  %v1869_v4 = vmul.f32 %v6194_v40, %v6200_v53 }
 0x208   :  { %v1756_v52 = vsel %vm1755_vm8, %v1752_v47, 0.0  ;;  %v1757_v26 = vsel %vm1755_vm8, %v1753_v63, 0.0  ;;  %v1770_v31 = vmul.f32 %v1752_v47, %v6186_v0  ;;  %v1870_v12 = vmul.f32 %v6198_v20, %v6202_v44  ;;  %8796 = sst [smem:[#allocation43_spill]] %s6492_s10 }
 0x209   :  { %v1758_v36 = vadd.f32 %v1757_v26, %v1756_v52  ;;  %v1771_v11 = vmul.f32 %v1753_v63, %v6188_v25  ;;  %v1772_v7 = vmul.f32 %v1754_v19, %v6190_v2  ;;  %v1814_v8 = vsel %vm1755_vm8, %v1811_v9, 0.0  ;;  %8799 = sst [smem:[#allocation46_spill]] %s6508_s17 }
 0x20a   :  { %v1759_v45 = vsel %vm1755_vm8, %v1754_v19, 0.0  ;;  %v1773_v46 = vsel %vm1755_vm8, %v1770_v31, 0.0  ;;  %v1815_v16 = vsel %vm1755_vm8, %v1812_v55, 0.0  ;;  %v1871_v17 = vmul.f32 %v6222_v27, %v6204_v15  ;;  %s6512_s10 = sld [smem:[#allocation14 + $0x2a]] }
 0x20b   :  { %v1760_v38 = vadd.f32 %v1759_v45, %v1758_v36  ;;  %v1774_v41 = vsel %vm1755_vm8, %v1771_v11, 0.0  ;;  %v1816_v14 = vadd.f32 %v1815_v16, %v1814_v8  ;;  %v1817_v48 = vsel %vm1755_vm8, %v1813_v54, 0.0  ;;  %s6524_s17 = sld [smem:[#allocation14 + $0x2b]] }
 0x20c   :  { %v1775_v56 = vadd.f32 %v1774_v41, %v1773_v46  ;;  %v1872_v28 = vsel %vm1755_vm8, %v1869_v4, 0.0  ;;  %v1873_v43 = vsel %vm1755_vm8, %v1870_v12, 0.0  ;;  %v1776_v51 = vsel %vm1755_vm8, %v1772_v7, 0.0 }
 0x20d   :  { %1761 = vadd.xlane.f32.xlu0 %v1760_v38  ;;  %v1874_v61 = vadd.f32 %v1873_v43, %v1872_v28  ;;  %v1828_v39 = vmul.f32 %v1811_v9, %v6181_v6  ;;  %v1829_v23 = vmul.f32 %v1812_v55, %v6192_v3  ;;  %v1830_v5 = vmul.f32 %v1813_v54, %v6196_v32 }
 0x20e   :  { %v1777_v21 = vadd.f32 %v1776_v51, %v1775_v56  ;;  %v1927_v50 = vmul.f32 %v6206_v24, %v6200_v53  ;;  %v1928_v37 = vmul.f32 %v6208_v42, %v6202_v44  ;;  %v1818_v10 = vadd.f32 %v1817_v48, %v1816_v14 }
 0x20f   :  { %v1875_v35 = vsel %vm1755_vm8, %v1871_v17, 0.0  ;;  %v1831_v1 = vsel %vm1755_vm8, %v1828_v39, 0.0  ;;  %v1832_v58 = vsel %vm1755_vm8, %v1829_v23, 0.0  ;;  %v1834_v49 = vsel %vm1755_vm8, %v1830_v5, 0.0 }
 0x210   :  { %1778 = vadd.xlane.f32.xlu1 %v1777_v21  ;;  %v1876_v57 = vadd.f32 %v1875_v35, %v1874_v61  ;;  %v1833_v59 = vadd.f32 %v1832_v58, %v1831_v1  ;;  %v1930_v22 = vsel %vm1755_vm8, %v1927_v50, 0.0  ;;  %v1931_v62 = vsel %vm1755_vm8, %v1928_v37, 0.0  ;;  %8800 = sst [smem:[#allocation47_spill]] %s6512_s10 }
 0x211   :  { %1819 = vadd.xlane.f32.xlu0 %v1818_v10  ;;  %v1929_v29 = vmul.f32 %v6237_v18, %v6204_v15  ;;  %v1886_v60 = vmul.f32 %v1869_v4, %v6194_v40  ;;  %v1887_v30 = vmul.f32 %v1870_v12, %v6198_v20  ;;  %v1932_v34 = vadd.f32 %v1931_v62, %v1930_v22  ;;  %8803 = sst [smem:[#allocation50_spill]] %s6524_s17 }
 0x212   :  { %v1888_v33 = vmul.f32 %v1871_v17, %v6222_v27  ;;  %v1944_v47 = vmul.f32 %v1927_v50, %v6206_v24  ;;  %v1945_v63 = vmul.f32 %v1928_v37, %v6208_v42  ;;  %v1835_v19 = vadd.f32 %v1834_v49, %v1833_v59  ;;  %s6528_s10 = sld [smem:[#allocation14 + $0x73]] }
 0x213   :  { %v1889_v9 = vsel %vm1755_vm8, %v1886_v60, 0.0  ;;  %v1890_v55 = vsel %vm1755_vm8, %v1887_v30, 0.0  ;;  %v1933_v26 = vsel %vm1755_vm8, %v1929_v29, 0.0  ;;  %v1946_v36 = vmul.f32 %v1929_v29, %v6237_v18  ;;  %s6540_s17 = sld [smem:[#allocation14 + $0x74]] }
 0x214   :  { %1877 = vadd.xlane.f32.xlu1 %v1876_v57  ;;  %v1891_v54 = vadd.f32 %v1890_v55, %v1889_v9  ;;  %v1947_v52 = vsel %vm1755_vm8, %v1944_v47, 0.0  ;;  %v1948_v4 = vsel %vm1755_vm8, %v1945_v63, 0.0  ;;  %v1934_v31 = vadd.f32 %v1933_v26, %v1932_v34 }
 0x215   :  { %1836 = vadd.xlane.f32.xlu0 %v1835_v19  ;;  %v1892_v12 = vsel %vm1755_vm8, %v1888_v33, 0.0  ;;  %v1949_v7 = vadd.f32 %v1948_v4, %v1947_v52  ;;  %v1950_v8 = vsel %vm1755_vm8, %v1946_v36, 0.0 }
 0x216   :  { %v1893_v11 = vadd.f32 %v1892_v12, %v1891_v54 }
 0x217   :  { %v1951_v45 = vadd.f32 %v1950_v8, %v1949_v7 }
 0x218   :  { %1935 = vadd.xlane.f32.xlu1 %v1934_v31  ;;  %8804 = sst [smem:[#allocation51_spill]] %s6528_s10 }
 0x219   :  { %1894 = vadd.xlane.f32.xlu0 %v1893_v11  ;;  %s6544_s10 = sld [smem:[#allocation14 + $0x9]] }
 0x21d   :  { %1952 = vadd.xlane.f32.xlu0 %v1951_v45 }
 0x296   :  { %v1762_v46 = vpop.xlane.xlu0 %1761 }
 0x297   :  { %v1763_v16 = vsel %vm1755_vm8, %v1762_v46, 0.0 }
 0x298   :  { %v1764_v38 = vrot.slane %v1763_v16, 4 }
 0x299   :  { %v1779_v41 = vpop.xlane.xlu1 %1778 }
 0x29a   :  { %v1765_v14 = vadd.f32 %v1764_v38, %v1763_v16  ;;  %v1780_v17 = vsel %vm1755_vm8, %v1779_v41, 0.0  ;;  %v1820_v56 = vpop.xlane.xlu0 %1819 }
 0x29b   :  { %v1781_v48 = vrot.slane %v1780_v17, 4  ;;  %v1821_v28 = vsel %vm1755_vm8, %v1820_v56, 0.0 }
 0x29c   :  { %v1766_v43 = vrot.slane %v1765_v14, 2  ;;  %v1822_v51 = vrot.slane %v1821_v28, 4 }
 0x29d   :  { %v1782_v61 = vadd.f32 %v1781_v48, %v1780_v17  ;;  %v1878_v39 = vpop.xlane.xlu1 %1877 }
 0x29e   :  { %v1767_v23 = vadd.f32 %v1766_v43, %v1765_v14  ;;  %v1823_v21 = vadd.f32 %v1822_v51, %v1821_v28  ;;  %v1879_v5 = vsel %vm1755_vm8, %v1878_v39, 0.0  ;;  %v1837_v50 = vpop.xlane.xlu0 %1836 }
 0x29f   :  { %v1783_v37 = vrot.slane %v1782_v61, 2  ;;  %v1880_v10 = vrot.slane %v1879_v5, 4  ;;  %v1838_v35 = vsel %vm1755_vm8, %v1837_v50, 0.0 }
 0x2a0   :  { %v1768_v1 = vrot.slane %v1767_v23, 1  ;;  %v1824_v58 = vrot.slane %v1823_v21, 2  ;;  %v1839_v57 = vrot.slane %v1838_v35, 4 }
 0x2a1   :  { %v1784_v59 = vadd.f32 %v1783_v37, %v1782_v61  ;;  %v1881_v22 = vadd.f32 %v1880_v10, %v1879_v5  ;;  %v1936_v62 = vpop.xlane.xlu1 %1935 }
 0x2a2   :  { %v1769_v49 = vadd.f32 %v1768_v1, %v1767_v23  ;;  %v1825_v29 = vadd.f32 %v1824_v58, %v1823_v21  ;;  %v1840_v60 = vadd.f32 %v1839_v57, %v1838_v35  ;;  %v1937_v30 = vsel %vm1755_vm8, %v1936_v62, 0.0  ;;  %v1895_v34 = vpop.xlane.xlu0 %1894 }
 0x2a3   :  { %v1785_v33 = vrot.slane %v1784_v59, 1  ;;  %v1882_v47 = vrot.slane %v1881_v22, 2  ;;  %v1938_v63 = vrot.slane %v1937_v30, 4  ;;  %v1896_v19 = vsel %vm1755_vm8, %v1895_v34, 0.0 }
 0x2a4   :  { %v6281_v9 = vmul.f32 0.001953125, %v1769_v49  ;;  %v1826_v55 = vrot.slane %v1825_v29, 1  ;;  %v1841_v54 = vrot.slane %v1840_v60, 2  ;;  %v1897_v52 = vrot.slane %v1896_v19, 4 }
 0x2a5   :  { %v1786_v4 = vadd.f32 %v1785_v33, %v1784_v59  ;;  %v1883_v26 = vadd.f32 %v1882_v47, %v1881_v22  ;;  %v1939_v31 = vadd.f32 %v1938_v63, %v1937_v30 }
 0x2a6   :  { %v1789_v12 = vmul.f32 %v6281_v9, %v6281_v9  ;;  %v1827_v36 = vadd.f32 %v1826_v55, %v1825_v29  ;;  %v1842_v11 = vadd.f32 %v1841_v54, %v1840_v60  ;;  %v1898_v7 = vadd.f32 %v1897_v52, %v1896_v19  ;;  %v1953_v8 = vpop.xlane.xlu0 %1952 }
 0x2a7   :  { %v1788_v45 = vmul.f32 0.001953125, %v1786_v4  ;;  %v1884_v46 = vrot.slane %v1883_v26, 1  ;;  %v1940_v16 = vrot.slane %v1939_v31, 2  ;;  %v1954_v38 = vsel %vm1755_vm8, %v1953_v8, 0.0 }
 0x2a8   :  { %v1845_v41 = vmul.f32 0.001953125, %v1827_v36  ;;  %v1843_v14 = vrot.slane %v1842_v11, 1  ;;  %v1899_v17 = vrot.slane %v1898_v7, 2  ;;  %v1955_v56 = vrot.slane %v1954_v38, 4 }
 0x2a9   :  { %v1790_v48 = vsub.f32 %v1788_v45, %v1789_v12  ;;  %v1885_v28 = vadd.f32 %v1884_v46, %v1883_v26  ;;  %v1941_v43 = vadd.f32 %v1940_v16, %v1939_v31  ;;  %v1794_v55 = vstv %s1793_s19  ;;  %s6421_s19 = sld [smem:[#allocation14 + $0x1f]] }
 0x2aa   :  { %v1844_v51 = vadd.f32 %v1843_v14, %v1842_v11  ;;  %v1900_v61 = vadd.f32 %v1899_v17, %v1898_v7  ;;  %v1956_v39 = vadd.f32 %v1955_v56, %v1954_v38  ;;  %v1847_v50 = vmul.f32 %v1845_v41, %v1845_v41 }
 0x2ab   :  { %v1791_v23 = vadd.f32 0.8, %v1790_v48  ;;  %v6286_v21 = vmul.f32 0.001953125, %v1885_v28  ;;  %v1942_v5 = vrot.slane %v1941_v43, 1  ;;  %v1798_v26 = vstv %s1796_s25  ;;  %s6425_s25 = sld [smem:[#allocation14 + $0x43]] }
 0x2ac   :  { %v1846_v37 = vmul.f32 0.001953125, %v1844_v51  ;;  %v1901_v10 = vrot.slane %v1900_v61, 1  ;;  %v1957_v35 = vrot.slane %v1956_v39, 2  ;;  %v1852_v12 = vstv %s4102_s0  ;;  %s6427_s0 = sld [smem:[#allocation14 + $0x67]] }
 0x2ad   :  { %4280 = vrsqrt.f32 %v1791_v23  ;;  %v1943_v1 = vadd.f32 %v1942_v5, %v1941_v43  ;;  %v1905_v22 = vmul.f32 %v6286_v21, %v6286_v21  ;;  %v6309_v46 = vstv %s8783_s6  ;;  %s6456_s6 = sld [smem:[#allocation14 + $0x25]] }
 0x2ae   :  { %v1848_v58 = vsub.f32 %v1846_v37, %v1847_v50  ;;  %v1902_v57 = vadd.f32 %v1901_v10, %v1900_v61  ;;  %v1958_v59 = vadd.f32 %v1957_v35, %v1956_v39  ;;  %v1856_v16 = vstv %s6294_s27  ;;  %s6429_s27 = sld [smem:[#allocation14 + $0x8b]] }
 0x2af   :  { %v6290_v49 = vmul.f32 0.001953125, %v1943_v1  ;;  %v1910_v56 = vstv %s6296_s3  ;;  %v1968_v50 = vstv %s6301_s21  ;;  %s6435_s3 = sld [smem:[#allocation14]] }
 0x2b0   :  { %v1849_v62 = vadd.f32 0.8, %v1848_v58  ;;  %v1904_v29 = vmul.f32 0.001953125, %v1902_v57  ;;  %v1959_v60 = vrot.slane %v1958_v59, 1  ;;  %s6441_s21 = sld [smem:[#allocation14 + $0x48]] }
 0x2b1   :  { %v1963_v33 = vmul.f32 %v6290_v49, %v6290_v49 }
 0x2b2   :  { %4282 = vrsqrt.f32 %v1849_v62  ;;  %v1906_v30 = vsub.f32 %v1904_v29, %v1905_v22  ;;  %v1960_v34 = vadd.f32 %v1959_v60, %v1958_v59 }
 0x2b3   :  { %8786 = sst [smem:[#allocation33_spill]] %s6456_s6 }
 0x2b4   :  { %v1907_v47 = vadd.f32 0.8, %v1906_v30  ;;  %v1962_v63 = vmul.f32 0.001953125, %v1960_v34  ;;  %s6480_s6 = sld [smem:[#allocation14 + $0x6e]] }
 0x2b6   :  { %4284 = vrsqrt.f32 %v1907_v47  ;;  %v1964_v19 = vsub.f32 %v1962_v63, %v1963_v33 }
 0x2b8   :  { %v1965_v54 = vadd.f32 0.8, %v1964_v19 }
 0x2ba   :  { %v4281_v52 = vpop.eup %4280  ;;  %4286 = vrsqrt.f32 %v1965_v54  ;;  %8792 = sst [smem:[#allocation39_spill]] %s6480_s6 }
 0x2bb   :  { %v1795_v4 = vmul.f32 %v4281_v52, %v1794_v55  ;;  %s6504_s6 = sld [smem:[#allocation14 + $0x71]] }
 0x2bd   :  { %v1797_v31 = vmul.f32 %v1795_v4, %v6281_v9  ;;  %v1800_v7 = vmul.f32 %v1795_v4, %v6186_v0  ;;  %v1801_v8 = vmul.f32 %v1795_v4, %v6188_v25  ;;  %v1802_v45 = vmul.f32 %v1795_v4, %v6190_v2 }
 0x2be   :  { %v1914_v0 = vstv %s6298_s28  ;;  %s6439_s28 = sld [smem:[#allocation14 + $0x24]] }
 0x2bf   :  { %v4283_v36 = vpop.eup %4282  ;;  %v1799_v11 = vsub.f32 %v1798_v26, %v1797_v31 }
 0x2c0   :  { %v1853_v38 = vmul.f32 %v4283_v36, %v1852_v12  ;;  %v1972_v12 = vstv %s6321_s11  ;;  %s6458_s11 = sld [smem:[#allocation14 + $0x49]] }
 0x2c1   :  { %v1803_v9 = vadd.f32 %v1800_v7, %v1799_v11  ;;  %v1804_v14 = vadd.f32 %v1801_v8, %v1799_v11  ;;  %v1805_v17 = vadd.f32 %v1802_v45, %v1799_v11 }
 0x2c2   :  { %v1855_v48 = vmul.f32 %v1853_v38, %v1845_v41  ;;  %v1858_v28 = vmul.f32 %v1853_v38, %v6181_v6  ;;  %v1859_v5 = vmul.f32 %v1853_v38, %v6192_v3  ;;  %v1860_v41 = vmul.f32 %v1853_v38, %v6196_v32 }
 0x2c3   :  { %v4285_v43 = vpop.eup %4284  ;;  %vm1980_vm9 = vcmp.gt.f32.partialorder %v1803_v9, 0.0  ;;  %vm1981_vm10 = vcmp.gt.f32.partialorder %v1804_v14, 0.0  ;;  %vm1982_vm11 = vcmp.gt.f32.partialorder %v1805_v17, 0.0  ;;  %v1984_v25 = vmul.f32 %v6309_v46, %v1803_v9 }
 0x2c4   :  { %v1985_v2 = vmul.f32 %v6309_v46, %v1804_v14  ;;  %v1986_v51 = vmul.f32 %v6309_v46, %v1805_v17  ;;  %v1857_v61 = vsub.f32 %v1856_v16, %v1855_v48  ;;  %v1911_v39 = vmul.f32 %v4285_v43, %v1910_v56 }
 0x2c5   :  { %v1987_v23 = vsel %vm1980_vm9, %v1803_v9, %v1984_v25 }
 0x2c6   :  { %v1988_v6 = vsel %vm1981_vm10, %v1804_v14, %v1985_v2  ;;  %v1989_v37 = vsel %vm1982_vm11, %v1805_v17, %v1986_v51  ;;  %v1990_v10 = vmul.f32 %v1987_v23, %v6200_v53  ;;  %v1861_v35 = vadd.f32 %v1858_v28, %v1857_v61  ;;  %8787 = sst [smem:[#allocation34_spill]] %s6458_s11 }
 0x2c7   :  { %v1991_v1 = vmul.f32 %v1988_v6, %v6202_v44  ;;  %v1992_v58 = vmul.f32 %v1989_v37, %v6204_v15  ;;  %v1862_v57 = vadd.f32 %v1859_v5, %v1857_v61  ;;  %v1863_v59 = vadd.f32 %v1860_v41, %v1857_v61  ;;  %v4287_v22 = vpop.eup %4286  ;;  %s6478_s11 = sld [smem:[#allocation14 + $0x4a]] }
 0x2c8   :  { %1993 = vst [vmem:[#allocation2 + $0x10] sm:$0x3] %v1990_v10  ;;  %vm1996_vm12 = vcmp.gt.f32.partialorder %v1861_v35, 0.0  ;;  %v1999_v3 = vmul.f32 %v6309_v46, %v1861_v35  ;;  %v1913_v32 = vmul.f32 %v1911_v39, %v6286_v21  ;;  %v1916_v62 = vmul.f32 %v1911_v39, %v6194_v40 }
 0x2c9   :  { %1994 = vst [vmem:[#allocation2] sm:$0x3] %v1991_v1  ;;  %1995 = vst [vmem:[#allocation2 + $0x8] sm:$0x3] %v1992_v58  ;;  %vm1997_vm13 = vcmp.gt.f32.partialorder %v1862_v57, 0.0  ;;  %vm1998_vm14 = vcmp.gt.f32.partialorder %v1863_v59, 0.0  ;;  %v2000_v29 = vmul.f32 %v6309_v46, %v1862_v57  ;;  %v2001_v60 = vmul.f32 %v6309_v46, %v1863_v59 }
 0x2ca   :  { %v2002_v30 = vsel %vm1996_vm12, %v1861_v35, %v1999_v3  ;;  %v1915_v34 = vsub.f32 %v1914_v0, %v1913_v32  ;;  %v1917_v33 = vmul.f32 %v1911_v39, %v6198_v20  ;;  %v1918_v47 = vmul.f32 %v1911_v39, %v6222_v27 }
 0x2cb   :  { %v2003_v63 = vsel %vm1997_vm13, %v1862_v57, %v2000_v29  ;;  %v2004_v19 = vsel %vm1998_vm14, %v1863_v59, %v2001_v60  ;;  %v2005_v21 = vmul.f32 %v2002_v30, %v6200_v53  ;;  %v1969_v40 = vmul.f32 %v4287_v22, %v1968_v50 }
 0x2cc   :  { %v2006_v55 = vmul.f32 %v2003_v63, %v6202_v44  ;;  %v2007_v54 = vmul.f32 %v2004_v19, %v6204_v15  ;;  %v1919_v52 = vadd.f32 %v1916_v62, %v1915_v34  ;;  %v1920_v4 = vadd.f32 %v1917_v33, %v1915_v34 }
 0x2cd   :  { %v2011_v26 = vrot.slane %v2005_v21, 6  ;;  %v1921_v31 = vadd.f32 %v1918_v47, %v1915_v34  ;;  %v1971_v36 = vmul.f32 %v1969_v40, %v6290_v49  ;;  %v1974_v38 = vmul.f32 %v1969_v40, %v6206_v24  ;;  %8791 = sst [smem:[#allocation38_spill]] %s6478_s11 }
 0x2ce   :  { %v2012_v11 = vrot.slane %v2006_v55, 6  ;;  %v2013_v20 = vrot.slane %v2007_v54, 6  ;;  %vm2020_vm15 = vcmp.gt.f32.partialorder %v1919_v52, 0.0  ;;  %vm2021_vm9 = vcmp.gt.f32.partialorder %v1920_v4, 0.0  ;;  %s6496_s11 = sld [smem:[#allocation14 + $0x5]] }
 0x2cf   :  { %2017 = vst [vmem:[#allocation2 + $0x10] sm:$0xc] %v2011_v26  ;;  %vm2022_vm10 = vcmp.gt.f32.partialorder %v1921_v31, 0.0  ;;  %v2023_v27 = vmul.f32 %v6309_v46, %v1919_v52  ;;  %v2024_v7 = vmul.f32 %v6309_v46, %v1920_v4  ;;  %v2025_v8 = vmul.f32 %v6309_v46, %v1921_v31  ;;  %v6341_v45 = vld [vmem:[#allocation2 + $0x10] sm:$0x3] }
 0x2d0   :  { %2018 = vst [vmem:[#allocation2] sm:$0xc] %v2012_v11  ;;  %2019 = vst [vmem:[#allocation2 + $0x8] sm:$0xc] %v2013_v20  ;;  %v1973_v16 = vsub.f32 %v1972_v12, %v1971_v36  ;;  %v1975_v49 = vmul.f32 %v1969_v40, %v6208_v42  ;;  %v6345_v9 = vld [vmem:[#allocation2] sm:$0x3]  ;;  %2071 = vrot.lane.b32.xlu1 %v6341_v45, %s8575_s20  ;;  %v1976_v48 = vmul.f32 %v1969_v40, %v6237_v18 }
 0x2d1   :  { %v2026_v14 = vsel %vm2020_vm15, %v1919_v52, %v2023_v27  ;;  %v2027_v17 = vsel %vm2021_vm9, %v1920_v4, %v2024_v7  ;;  %v2028_v56 = vsel %vm2022_vm10, %v1921_v31, %v2025_v8  ;;  %2073 = vrot.lane.b32.xlu0 %v6345_v9, %s8575_s20  ;;  %v6355_v2 = vld [vmem:[#allocation2 + $0x8] sm:$0x3]  ;;  %v2224_v29 = vstv %s6385_s12  ;;  %s6565_s12 = sld [smem:[#allocation14 + $0xa]] }
 0x2d2   :  { %v2029_v28 = vmul.f32 %v2026_v14, %v6200_v53  ;;  %v2030_v0 = vmul.f32 %v2027_v17, %v6202_v44  ;;  %v2031_v24 = vmul.f32 %v2028_v56, %v6204_v15  ;;  %v1977_v42 = vadd.f32 %v1974_v38, %v1973_v16 }
 0x2d3   :  { %v1978_v43 = vadd.f32 %v1975_v49, %v1973_v16  ;;  %v1979_v25 = vadd.f32 %v1976_v48, %v1973_v16  ;;  %v2232_v60 = vstv %s6389_s1  ;;  %v6555_v30 = vstv %s6391_s4  ;;  %s8807_s1 = sld [smem:[#allocation31_spill]] }
 0x2d4   :  { %v2035_v51 = vrot.slane %v2029_v28, 4  ;;  %v2036_v61 = vrot.slane %v2030_v0, 4  ;;  %v2037_v39 = vrot.slane %v2031_v24, 4  ;;  %vm2044_vm11 = vcmp.gt.f32.partialorder %v1977_v42, 0.0  ;;  %2075 = vrot.lane.b32.xlu1 %v6355_v2, %s8575_s20  ;;  %8797 = sst [smem:[#allocation44_spill]] %s6496_s11 }
 0x2d5   :  { %vm2045_vm12 = vcmp.gt.f32.partialorder %v1978_v43, 0.0  ;;  %vm2046_vm13 = vcmp.gt.f32.partialorder %v1979_v25, 0.0  ;;  %v2047_v18 = vmul.f32 %v6309_v46, %v1977_v42  ;;  %v2048_v23 = vmul.f32 %v6309_v46, %v1978_v43  ;;  %2102 = vrot.lane.b32.xlu0 %v6345_v9, %s8591_s29  ;;  %s6514_s11 = sld [smem:[#allocation14 + $0x4e]] }
 0x2d6   :  { %2041 = vst [vmem:[#allocation2 + $0x10] sm:$0x30] %v2035_v51  ;;  %2042 = vst [vmem:[#allocation2] sm:$0x30] %v2036_v61  ;;  %v2049_v5 = vmul.f32 %v6309_v46, %v1979_v25  ;;  %v6433_v46 = vld [vmem:[#allocation2 + $0x10] sm:$0xc]  ;;  %v6558_v34 = vstv %s6393_s14  ;;  %v2596_v33 = vstv %s6397_s5  ;;  %v6568_v47 = vstv %s6401_s13 }
 0x2d7   :  { %2043 = vst [vmem:[#allocation2 + $0x8] sm:$0x30] %v2037_v39  ;;  %v2050_v41 = vsel %vm2044_vm11, %v1977_v42, %v2047_v18  ;;  %v2051_v50 = vsel %vm2045_vm12, %v1978_v43, %v2048_v23  ;;  %v6444_v59 = vrot.slane %v6433_v46, 2  ;;  %v6450_v22 = vld [vmem:[#allocation2 + $0x8] sm:$0xc]  ;;  %v6571_v63 = vstv %s6403_s8  ;;  %s6578_s4 = sld [smem:[#allocation14 + $0x2e]] }
 0x2d8   :  { %v2052_v6 = vsel %vm2046_vm13, %v1979_v25, %v2049_v5  ;;  %v2053_v37 = vmul.f32 %v2050_v41, %v6200_v53  ;;  %v2054_v10 = vmul.f32 %v2051_v50, %v6202_v44  ;;  %2100 = vrot.lane.b32.xlu1 %v6341_v45, %s8591_s29  ;;  %v6461_v3 = vrot.slane %v6450_v22, 2  ;;  %v6463_v32 = vld [vmem:[#allocation2] sm:$0xc]  ;;  %s8808_s14 = sld [smem:[#allocation32_spill]] }
 0x2d9   :  { %v2055_v35 = vmul.f32 %v2052_v6, %v6204_v15  ;;  %2141 = vrot.lane.b32.xlu0 %v6341_v45, %s8632_s24  ;;  %v6476_v62 = vrot.slane %v6463_v32, 2  ;;  %v6574_v19 = vstv %s6405_s30  ;;  %v6581_v21 = vstv %s6409_s9  ;;  %s8809_s5 = sld [smem:[#allocation33_spill]] }
 0x2da   :  { %v2059_v1 = vrot.slane %v2053_v37, 2  ;;  %v2060_v58 = vrot.slane %v2054_v10, 2  ;;  %v6584_v40 = vstv %s6413_s16  ;;  %v6587_v55 = vstv %s6415_s18  ;;  %s6589_s13 = sld [smem:[#allocation14 + $0x52]] }
 0x2db   :  { %v2061_v57 = vrot.slane %v2055_v35, 2  ;;  %s8810_s8 = sld [smem:[#allocation34_spill]]  ;;  %v6592_v54 = vstv %s6417_s2  ;;  %v6595_v52 = vstv %s6421_s19  ;;  %v6598_v4 = vstv %s6425_s25  ;;  %s8815_s19 = smov 110  }
 0x2dc   :  { %2065 = vst [vmem:[#allocation2 + $0x10] sm:$0xc0] %v2059_v1  ;;  %2066 = vst [vmem:[#allocation2] sm:$0xc0] %v2060_v58  ;;  %2104 = vrot.lane.b32.xlu1 %v6355_v2, %s8591_s29  ;;  %v6601_v26 = vstv %s6427_s0  ;;  %s8813_s9 = sld [smem:[#allocation37_spill]]  ;;  %v6604_v31 = vstv %s6435_s3  ;;  %v6607_v12 = vstv %s6439_s28  ;;  %v6650_v17 = vmul.f32 %v2224_v29, %v6355_v2 }
 0x2dd   :  { %2067 = vst [vmem:[#allocation2 + $0x8] sm:$0xc0] %v2061_v57  ;;  %2145 = vrot.lane.b32.xlu0 %v6355_v2, %s8632_s24  ;;  %s8814_s16 = sld [smem:[#allocation38_spill]]  ;;  %v6610_v36 = vstv %s6441_s21  ;;  %v6615_v11 = vstv %s6429_s27  ;;  %v6620_v20 = vstv %s8807_s1  ;;  %v6653_v56 = vmul.f32 %v2232_v60, %v6355_v2  ;;  %v6657_v48 = vld [vmem:[#allocation2 + $0x10] sm:$0x30] }
 0x2de   :  { %s6612_s18 = sld [smem:[#allocation14 + $0x76]]  ;;  %v6623_v27 = vstv %s8808_s14  ;;  %v6661_v28 = vmul.f32 %v6555_v30, %v6355_v2  ;;  %v6665_v0 = vmul.f32 %v6558_v34, %v6355_v2  ;;  %v6670_v24 = vmul.f32 %v2596_v33, %v6450_v22  ;;  %v6678_v43 = vld [vmem:[#allocation2 + $0x8] sm:$0x30]  ;;  %v6680_v25 = vld [vmem:[#allocation2] sm:$0x30] }
 0x2df   :  { %v6626_v7 = vstv %s8809_s5  ;;  %s6628_s2 = sld [smem:[#allocation14 + $0xb]]  ;;  %v6674_v42 = vmul.f32 %v6568_v47, %v6450_v22  ;;  %v6692_v61 = vmul.f32 %v6571_v63, %v6450_v22  ;;  %v6696_v39 = vmul.f32 %v6574_v19, %v6450_v22 }
 0x2e0   :  { %2143 = vrot.lane.b32.xlu1 %v6345_v9, %s8632_s24  ;;  %s8816_s25 = sld [smem:[#allocation39_spill]]  ;;  %8817 = vst [vmem:[#allocation58_spill] sm:$0xff] %v6670_v24  ;;  %v6701_v18 = vmul.f32 %v2232_v60, %v6345_v9  ;;  %v6705_v23 = vmul.f32 %v6555_v30, %v6345_v9  ;;  %v6709_v5 = vmul.f32 %v6558_v34, %v6345_v9  ;;  %v6717_v50 = vrot.slane %v6657_v48, 4 }
 0x2e1   :  { %2184 = vrot.lane.b32.xlu0 %v6345_v9, %s8650_s7  ;;  %v6633_v8 = vstv %s8810_s8  ;;  %s6641_s0 = sld [smem:[#allocation14 + $0x2f]]  ;;  %8818 = vst [vmem:[#allocation71_spill] sm:$0xff] %v6674_v42  ;;  %8819 = vst [vmem:[#allocation59_spill] sm:$0xff] %v6692_v61  ;;  %v6712_v41 = vmul.f32 %v2224_v29, %v6341_v45  ;;  %v6720_v6 = vmul.f32 %v2232_v60, %v6341_v45  ;;  %v6731_v10 = vrot.slane %v6678_v43, 4 }
 0x2e2   :  { %v6644_v49 = vstv %s8813_s9  ;;  %s6655_s27 = sld [smem:[#allocation14 + $0x53]]  ;;  %8820 = vst [vmem:[#allocation60_spill] sm:$0xff] %v6696_v39  ;;  %8821 = vst [vmem:[#allocation61_spill] sm:$0xff] %v6709_v5  ;;  %v6725_v37 = vmul.f32 %v2596_v33, %v6433_v46  ;;  %v6734_v35 = vrot.slane %v6680_v25, 4  ;;  %v6746_v22 = vmul.f32 %v6555_v30, %v6341_v45  ;;  %s8828_s9 = smov 109  }
 0x2e3   :  { %v6647_v14 = vstv %s8814_s16  ;;  %s6688_s3 = sld [smem:[#allocation14 + $0xc]]  ;;  %v6742_v57 = vld [vmem:[#allocation2 + $0x10] sm:$0xc0]  ;;  %v6766_v30 = vmul.f32 %v6558_v34, %v6341_v45  ;;  %v6776_v15 = vmul.f32 %v6568_v47, %v6463_v32  ;;  %v6788_v34 = vmul.f32 %v6571_v63, %v6463_v32 }
 0x2e4   :  { %2182 = vrot.lane.b32.xlu1 %v6341_v45, %s8650_s7  ;;  %s6714_s28 = sld [smem:[#allocation14 + $0x30]]  ;;  %8823 = vst [vmem:[#allocation62_spill] sm:$0xff] %v6725_v37  ;;  %v6768_v60 = vld [vmem:[#allocation2 + $0x8] sm:$0xc0]  ;;  %v6794_v39 = vrot.slane %v6742_v57, 6  ;;  %v6804_v44 = vmul.f32 %v6574_v19, %v6463_v32  ;;  %v6871_v61 = vmul.f32 %v6581_v21, %v6680_v25  ;;  %v6875_v5 = vmul.f32 %v6584_v40, %v6657_v48 }
 0x2e5   :  { %2255 = vrot.lane.b32.xlu0 %v6341_v45, %s8675_s23  ;;  %s6722_s21 = sld [smem:[#allocation14 + $0x54]]  ;;  %8831 = vst [vmem:[#allocation65_spill] sm:$0xff] %v6776_v15  ;;  %8834 = vst [vmem:[#allocation67_spill] sm:$0xff] %v6788_v34  ;;  %v6846_v15 = vmul.f32 %v6592_v54, %v6678_v43  ;;  %v6893_v34 = vmul.f32 %v6587_v55, %v6657_v48  ;;  %v6901_v24 = vmul.f32 %v6592_v54, %v6657_v48 }
 0x2e6   :  { %v6683_v51 = vstv %s8816_s25  ;;  %s6736_s5 = sld [smem:[#allocation14 + $0x78]]  ;;  %8838 = vst [vmem:[#allocation69_spill] sm:$0xff] %v6804_v44  ;;  %8851 = vst [vmem:[#allocation76_spill] sm:$0xff] %v6871_v61  ;;  %v6915_v44 = vmul.f32 %v6598_v4, %v6768_v60 }
 0x2e7   :  { %s8826_s8 = sld [smem:[#allocation42_spill]]  ;;  %8847 = vst [vmem:[#allocation74_spill] sm:$0xff] %v6846_v15  ;;  %8852 = vst [vmem:[#allocation77_spill] sm:$0xff] %v6875_v5  ;;  %v6974_v5 = vmul.f32 %v6601_v26, %v6742_v57 }
 0x2e8   :  { %2186 = vrot.lane.b32.xlu1 %v6355_v2, %s8650_s7  ;;  %s8829_s16 = sld [smem:[#allocation43_spill]]  ;;  %8856 = vst [vmem:[#allocation79_spill] sm:$0xff] %v6893_v34  ;;  %8858 = vst [vmem:[#allocation82_spill] sm:$0xff] %v6901_v24 }
 0x2e9   :  { %2259 = vrot.lane.b32.xlu0 %v6355_v2, %s8675_s23  ;;  %s6772_s25 = sld [smem:[#allocation14 + $0x32]]  ;;  %8862 = vst [vmem:[#allocation87_spill] sm:$0xff] %v6915_v44  ;;  %8882 = vst [vmem:[#allocation97_spill] sm:$0xff] %v6974_v5  ;;  %v7054_v5 = vstv %s6589_s13 }
 0x2ea   :  { %8904 = vst [vmem:[#allocation111_spill] sm:$0xff] %v7054_v5  ;;  %v7078_v5 = vstv %s6688_s3 }
 0x2eb   :  { %8914 = vst [vmem:[#allocation117_spill] sm:$0xff] %v7078_v5 }
 0x2ec   :  { %2257 = vrot.lane.b32.xlu1 %v6345_v9, %s8675_s23 }
 0x2ed   :  { %2298 = vrot.lane.b32.xlu0 %v6345_v9, %s8683_s26  ;;  %v6791_v53 = vstv %s8826_s8 }
 0x2ef   :  { %8830 = sst [smem:[#allocation54_spill]] %s6772_s25  ;;  %s8885_s25 = smov 17  }
 0x2f0   :  { %2296 = vrot.lane.b32.xlu1 %v6341_v45, %s8683_s26 }
 0x2f1   :  { %2337 = vrot.lane.b32.xlu0 %v6341_v45, %s8687_s15 }
 0x2f4   :  { %2300 = vrot.lane.b32.xlu1 %v6355_v2, %s8683_s26 }
 0x2f5   :  { %2341 = vrot.lane.b32.xlu0 %v6355_v2, %s8687_s15 }
 0x2f8   :  { %2339 = vrot.lane.b32.xlu1 %v6345_v9, %s8687_s15  ;;  %s6465_s15 = sld [smem:[#allocation14 + $0x6d]] }
 0x2f9   :  { %2380 = vrot.lane.b32.xlu0 %v6345_v9, %s8690_s22 }
 0x2fc   :  { %2378 = vrot.lane.b32.xlu1 %v6341_v45, %s8690_s22  ;;  %v6784_v45 = vmul.f32 %v6571_v63, %v6433_v46  ;;  %v6809_v63 = vstv %s8829_s16  ;;  %s6823_s16 = sld [smem:[#allocation14 + $0x33]] }
 0x2fd   :  { %2431 = vrot.lane.b32.xlu0 %v6444_v59, %s8575_s20 }
 0x2fe   :  { %8788 = sst [smem:[#allocation35_spill]] %s6465_s15  ;;  %8833 = vst [vmem:[#allocation66_spill] sm:$0xff] %v6784_v45  ;;  %v6897_v45 = vmul.f32 %v6587_v55, %v6680_v25 }
 0x2ff   :  { %s6484_s15 = sld [smem:[#allocation14 + $0x3]] }
 0x300   :  { %2382 = vrot.lane.b32.xlu1 %v6355_v2, %s8690_s22  ;;  %s6488_s22 = sld [smem:[#allocation14 + $0x27]]  ;;  %v6686_v2 = vmul.f32 %v2224_v29, %v6345_v9  ;;  %v6728_v9 = vmul.f32 %v2596_v33, %v6463_v32  ;;  %v6754_v33 = vmul.f32 %v6568_v47, %v6433_v46  ;;  %v6770_v29 = vld [vmem:[#allocation2] sm:$0xc0]  ;;  %v6800_v47 = vmul.f32 %v6574_v19, %v6433_v46 }
 0x301   :  { %2435 = vrot.lane.b32.xlu0 %v6461_v3, %s8575_s20  ;;  %s8811_s30 = sld [smem:[#allocation35_spill]]  ;;  %v6831_v19 = vmul.f32 %v6584_v40, %v6678_v43  ;;  %v6835_v46 = vmul.f32 %v6587_v55, %v6678_v43  ;;  %v6861_v32 = vstv %s6504_s6  ;;  %8857 = vst [vmem:[#allocation80_spill] sm:$0xff] %v6897_v45  ;;  %v6919_v55 = vmul.f32 %v6601_v26, %v6768_v60 }
 0x302   :  { %8825 = vst [vmem:[#allocation63_spill] sm:$0xff] %v6728_v9  ;;  %8827 = vst [vmem:[#allocation64_spill] sm:$0xff] %v6754_v33  ;;  %v6815_v9 = vrot.slane %v6770_v29, 6  ;;  %8842 = sst [smem:[#allocation31_spill]] %s6823_s16  ;;  %v7068_v45 = vstv %s6655_s27 }
 0x303   :  { %8837 = vst [vmem:[#allocation68_spill] sm:$0xff] %v6800_v47  ;;  %8844 = vst [vmem:[#allocation72_spill] sm:$0xff] %v6831_v19  ;;  %v6886_v47 = vmul.f32 %v6584_v40, %v6680_v25  ;;  %s6888_s6 = sld [smem:[#allocation14 + $0x58]]  ;;  %v6907_v40 = vmul.f32 %v6592_v54, %v6680_v25  ;;  %v6978_v25 = vmul.f32 %v6601_v26, %v6770_v29  ;;  %v7059_v19 = vstv %s6612_s18  ;;  %s8919_s18 = smov 1  }
 0x304   :  { %2433 = vrot.lane.b32.xlu1 %v6476_v62, %s8575_s20  ;;  %s6500_s20 = sld [smem:[#allocation14 + $0x29]]  ;;  %8845 = vst [vmem:[#allocation73_spill] sm:$0xff] %v6835_v46  ;;  %8863 = vst [vmem:[#allocation90_spill] sm:$0xff] %v6919_v55  ;;  %v6939_v46 = vmul.f32 %v6595_v52, %v6742_v57 }
 0x305   :  { %8793 = sst [smem:[#allocation40_spill]] %s6484_s15  ;;  %2474 = vrot.lane.b32.xlu0 %v6476_v62, %s8591_s29  ;;  %8854 = vst [vmem:[#allocation78_spill] sm:$0xff] %v6886_v47  ;;  %8860 = vst [vmem:[#allocation83_spill] sm:$0xff] %v6907_v40  ;;  %v6956_v47 = vmul.f32 %v6598_v4, %v6770_v29 }
 0x306   :  { %8794 = sst [smem:[#allocation41_spill]] %s6488_s22  ;;  %8869 = vst [vmem:[#allocation95_spill] sm:$0xff] %v6939_v46  ;;  %8884 = vst [vmem:[#allocation99_spill] sm:$0xff] %v6978_v25  ;;  %v7033_v46 = vstv %s6544_s10 }
 0x307   :  { %s6502_s15 = sld [smem:[#allocation14 + $0x4d]]  ;;  %v6636_v16 = vstv %s8811_s30  ;;  %8874 = vst [vmem:[#allocation88_spill] sm:$0xff] %v6956_v47  ;;  %v7025_v47 = vstv %s6540_s17  ;;  %8898 = vst [vmem:[#allocation105_spill] sm:$0xff] %v7033_v46 }
 0x308   :  { %2472 = vrot.lane.b32.xlu1 %v6444_v59, %s8591_s29  ;;  %s6516_s22 = sld [smem:[#allocation14 + $0x72]]  ;;  %8897 = vst [vmem:[#allocation104_spill] sm:$0xff] %v7025_v47  ;;  %8905 = vst [vmem:[#allocation112_spill] sm:$0xff] %v7059_v19  ;;  %v7081_v19 = vstv %s6714_s28 }
 0x309   :  { %2513 = vrot.lane.b32.xlu0 %v6444_v59, %s8632_s24  ;;  %s8822_s1 = sld [smem:[#allocation40_spill]]  ;;  %8909 = vst [vmem:[#allocation115_spill] sm:$0xff] %v7068_v45  ;;  %8915 = vst [vmem:[#allocation118_spill] sm:$0xff] %v7081_v19  ;;  %v7087_v45 = vmul.f32 %v6615_v11, %v6742_v57 }
 0x30a   :  { %s8824_s14 = sld [smem:[#allocation41_spill]]  ;;  %v6849_v37 = vstv %s6500_s20 }
 0x30b   :  { %s6750_s30 = sld [smem:[#allocation14 + $0xe]]  ;;  %8918 = vst [vmem:[#allocation119_spill] sm:$0xff] %v7087_v45 }
 0x30c   :  { %2476 = vrot.lane.b32.xlu1 %v6461_v3, %s8591_s29  ;;  %s6526_s29 = sld [smem:[#allocation14 + $0x4f]] }
 0x30d   :  { %8798 = sst [smem:[#allocation45_spill]] %s6502_s15  ;;  %2517 = vrot.lane.b32.xlu0 %v6461_v3, %s8632_s24 }
 0x30e   :  { %8801 = sst [smem:[#allocation48_spill]] %s6516_s22 }
 0x30f   :  { %s6520_s15 = sld [smem:[#allocation14 + $0x7]]  ;;  %v6759_v58 = vstv %s8822_s1 }
 0x310   :  { %2515 = vrot.lane.b32.xlu1 %v6476_v62, %s8632_s24  ;;  %s6532_s24 = sld [smem:[#allocation14 + $0x8]]  ;;  %v6762_v1 = vstv %s8824_s14 }
 0x311   :  { %2556 = vrot.lane.b32.xlu0 %v6476_v62, %s8650_s7  ;;  %s6538_s22 = sld [smem:[#allocation14 + $0x50]]  ;;  %v7098_v5 = vstv %s6750_s30 }
 0x312   :  { %s8835_s1 = sld [smem:[#allocation44_spill]]  ;;  %8925 = vst [vmem:[#allocation122_spill] sm:$0xff] %v7098_v5 }
 0x313   :  { %s6796_s14 = sld [smem:[#allocation14 + $0x7a]] }
 0x314   :  { %2554 = vrot.lane.b32.xlu1 %v6444_v59, %s8650_s7  ;;  %s8839_s8 = sld [smem:[#allocation45_spill]] }
 0x315   :  { %8802 = sst [smem:[#allocation49_spill]] %s6520_s15  ;;  %2663 = vrot.lane.b32.xlu0 %v6444_v59, %s8675_s23 }
 0x316   :  { %8805 = sst [smem:[#allocation52_spill]] %s6532_s24 }
 0x317   :  { %s6536_s15 = sld [smem:[#allocation14 + $0x2c]]  ;;  %v7022_v44 = vstv %s6538_s22 }
 0x318   :  { %2558 = vrot.lane.b32.xlu1 %v6461_v3, %s8650_s7  ;;  %s6548_s24 = sld [smem:[#allocation14 + $0x2d]]  ;;  %v6838_v33 = vstv %s8835_s1  ;;  %8896 = vst [vmem:[#allocation103_spill] sm:$0xff] %v7022_v44 }
 0x319   :  { %2667 = vrot.lane.b32.xlu0 %v6461_v3, %s8675_s23  ;;  %s6560_s7 = sld [smem:[#allocation14 + $0x75]] }
 0x31a   :  { %8836 = sst [smem:[#allocation29_spill]] %s6796_s14  ;;  %s8841_s14 = smov 19   ;;  %v6852_v42 = vstv %s8839_s8 }
 0x31b   :  { %s6856_s1 = sld [smem:[#allocation14 + $0x7b]] }
 0x31c   :  { %2665 = vrot.lane.b32.xlu1 %v6476_v62, %s8675_s23  ;;  %s8812_s23 = sld [smem:[#allocation36_spill]] }
 0x31d   :  { %8806 = sst [smem:[#allocation53_spill]] %s6536_s15  ;;  %2706 = vrot.lane.b32.xlu0 %v6476_v62, %s8683_s26 }
 0x31e   :  { %s6551_s15 = sld [smem:[#allocation14 + $0x51]]  ;;  %v7036_v40 = vstv %s6548_s24 }
 0x31f   :  { %s6879_s20 = sld [smem:[#allocation14 + $0x34]]  ;;  %8899 = vst [vmem:[#allocation106_spill] sm:$0xff] %v7036_v40  ;;  %v7045_v34 = vstv %s6560_s7 }
 0x320   :  { %2704 = vrot.lane.b32.xlu1 %v6444_v59, %s8683_s26  ;;  %8855 = sst [smem:[#allocation36_spill]] %s6888_s6  ;;  %8901 = vst [vmem:[#allocation108_spill] sm:$0xff] %v7045_v34 }
 0x321   :  { %2745 = vrot.lane.b32.xlu0 %v6444_v59, %s8815_s19  ;;  %8848 = sst [smem:[#allocation33_spill]] %s6856_s1 }
 0x322   :  { %v6639_v38 = vstv %s8812_s23  ;;  %s6667_s23 = sld [smem:[#allocation14 + $0x77]] }
 0x323   :  { %s6903_s8 = sld [smem:[#allocation14 + $0x7c]] }
 0x324   :  { %2708 = vrot.lane.b32.xlu1 %v6461_v3, %s8683_s26  ;;  %s6818_s26 = sld [smem:[#allocation14 + $0xf]]  ;;  %v7039_v24 = vstv %s6551_s15 }
 0x325   :  { %2749 = vrot.lane.b32.xlu0 %v6461_v3, %s8815_s19  ;;  %8853 = sst [smem:[#allocation35_spill]] %s6879_s20  ;;  %8900 = vst [vmem:[#allocation107_spill] sm:$0xff] %v7039_v24  ;;  %v7065_v24 = vstv %s6641_s0 }
 0x326   :  { %s6934_s6 = sld [smem:[#allocation14 + $0x35]]  ;;  %8907 = vst [vmem:[#allocation114_spill] sm:$0xff] %v7065_v24  ;;  %v7092_v24 = vstv %s6722_s21 }
 0x327   :  { %s8868_s20 = sld [smem:[#allocation46_spill]]  ;;  %8922 = vst [vmem:[#allocation120_spill] sm:$0xff] %v7092_v24 }
 0x328   :  { %2747 = vrot.lane.b32.xlu1 %v6476_v62, %s8815_s19  ;;  %s6778_s19 = sld [smem:[#allocation14 + $0x56]]  ;;  %v7075_v25 = vstv %s6667_s23 }
 0x329   :  { %2788 = vrot.lane.b32.xlu0 %v6476_v62, %s8828_s9  ;;  %v6812_v62 = vrot.slane %v6768_v60, 6  ;;  %8859 = sst [smem:[#allocation37_spill]] %s6903_s8  ;;  %s8866_s8 = smov 18   ;;  %8913 = vst [vmem:[#allocation116_spill] sm:$0xff] %v7075_v25  ;;  %v7095_v25 = vstv %s6736_s5 }
 0x32a   :  { %8840 = sst [smem:[#allocation30_spill]] %s6818_s26  ;;  %8923 = vst [vmem:[#allocation121_spill] sm:$0xff] %v7095_v25 }
 0x32b   :  { %s6842_s26 = sld [smem:[#allocation14 + $0x57]] }
 0x32c   :  { %2786 = vrot.lane.b32.xlu1 %v6444_v59, %s8828_s9  ;;  %v6827_v59 = vmul.f32 %v6581_v21, %v6678_v43  ;;  %v6867_v43 = vmul.f32 %v6581_v21, %v6657_v48  ;;  %v6911_v21 = vmul.f32 %v6595_v52, %v6768_v60  ;;  %8867 = sst [smem:[#allocation39_spill]] %s6934_s6  ;;  %v6943_v48 = vmul.f32 %v6595_v52, %v6770_v29 }
 0x32d   :  { %2839 = vrot.lane.b32.xlu0 %v6717_v50, %s8841_s14  ;;  %s8873_s6 = sld [smem:[#allocation47_spill]]  ;;  %v6967_v15 = vstv %s8868_s20 }
 0x32e   :  { %8832 = sst [smem:[#allocation28_spill]] %s6778_s19  ;;  %8843 = vst [vmem:[#allocation70_spill] sm:$0xff] %v6827_v59  ;;  %8850 = vst [vmem:[#allocation75_spill] sm:$0xff] %v6867_v43  ;;  %v7048_v43 = vstv %s6565_s12  ;;  %v7062_v59 = vstv %s6628_s2 }
 0x32f   :  { %8861 = vst [vmem:[#allocation86_spill] sm:$0xff] %v6911_v21  ;;  %8870 = vst [vmem:[#allocation81_spill] sm:$0xff] %v6943_v48  ;;  %s8879_s1 = sld [smem:[#allocation50_spill]]  ;;  %v7051_v48 = vstv %s6578_s4 }
 0x330   :  { %2790 = vrot.lane.b32.xlu1 %v6461_v3, %s8828_s9  ;;  %s6923_s9 = sld [smem:[#allocation14 + $0x11]]  ;;  %v6930_v3 = vmul.f32 %v6615_v11, %v6768_v60  ;;  %v6947_v60 = vmul.f32 %v6598_v4, %v6742_v57  ;;  %8878 = vst [vmem:[#allocation91_spill] sm:$0xff] %v6967_v15  ;;  %v7006_v4 = vstv %s6526_s29  ;;  %8902 = vst [vmem:[#allocation109_spill] sm:$0xff] %v7048_v43 }
 0x331   :  { %8846 = sst [smem:[#allocation32_spill]] %s6842_s26  ;;  %2843 = vrot.lane.b32.xlu0 %v6731_v10, %s8841_s14  ;;  %8892 = vst [vmem:[#allocation93_spill] sm:$0xff] %v7006_v4  ;;  %8903 = vst [vmem:[#allocation110_spill] sm:$0xff] %v7051_v48  ;;  %v7104_v57 = vmul.f32 %v6615_v11, %v6770_v29 }
 0x332   :  { %s6863_s26 = sld [smem:[#allocation14 + $0x10]]  ;;  %8865 = vst [vmem:[#allocation94_spill] sm:$0xff] %v6930_v3  ;;  %8871 = vst [vmem:[#allocation84_spill] sm:$0xff] %v6947_v60  ;;  %v6991_v3 = vstv %s6514_s11 }
 0x333   :  { %s6969_s16 = sld [smem:[#allocation14 + $0x12]]  ;;  %v6983_v61 = vstv %s8873_s6  ;;  %8888 = vst [vmem:[#allocation101_spill] sm:$0xff] %v6991_v3  ;;  %8906 = vst [vmem:[#allocation113_spill] sm:$0xff] %v7062_v59 }
 0x334   :  { %2841 = vrot.lane.b32.xlu1 %v6734_v35, %s8841_s14  ;;  %s6949_s14 = sld [smem:[#allocation14 + $0x59]]  ;;  %8886 = vst [vmem:[#allocation85_spill] sm:$0xff] %v6983_v61  ;;  %8928 = vst [vmem:[#allocation123_spill] sm:$0xff] %v7104_v57 }
 0x335   :  { %2882 = vrot.lane.b32.xlu0 %v6734_v35, %s8866_s8  ;;  %s8883_s19 = sld [smem:[#allocation52_spill]]  ;;  %v7003_v21 = vstv %s8879_s1  ;;  %s8945_s1 = smov 127  }
 0x336   :  { %8864 = sst [smem:[#allocation38_spill]] %s6923_s9  ;;  %8891 = vst [vmem:[#allocation92_spill] sm:$0xff] %v7003_v21 }
 0x337   :  { %s6958_s9 = sld [smem:[#allocation14 + $0x7d]] }
 0x338   :  { %8849 = sst [smem:[#allocation34_spill]] %s6863_s26  ;;  %2880 = vrot.lane.b32.xlu1 %v6717_v50, %s8866_s8 }
 0x339   :  { %s8877_s26 = sld [smem:[#allocation49_spill]]  ;;  %2921 = vrot.lane.b32.xlu0 %v6717_v50, %s8885_s25 }
 0x33a   :  { %8872 = sst [smem:[#allocation40_spill]] %s6949_s14 }
 0x33b   :  { %s8876_s14 = sld [smem:[#allocation48_spill]]  ;;  %v7012_v54 = vstv %s8883_s19 }
 0x33c   :  { %8880 = sst [smem:[#allocation42_spill]] %s6969_s16  ;;  %8894 = vst [vmem:[#allocation98_spill] sm:$0xff] %v7012_v54  ;;  %2884 = vrot.lane.b32.xlu1 %v6731_v10, %s8866_s8 }
 0x33d   :  { %8875 = sst [smem:[#allocation41_spill]] %s6958_s9  ;;  %2925 = vrot.lane.b32.xlu0 %v6731_v10, %s8885_s25 }
 0x33e   :  { %s8881_s9 = sld [smem:[#allocation51_spill]] }
 0x33f   :  { %s8887_s20 = sld [smem:[#allocation53_spill]]  ;;  %v6997_v55 = vstv %s8877_s26 }
 0x340   :  { %s6985_s16 = sld [smem:[#allocation14 + $0x36]]  ;;  %8890 = vst [vmem:[#allocation89_spill] sm:$0xff] %v6997_v55  ;;  %2923 = vrot.lane.b32.xlu1 %v6734_v35, %s8885_s25 }
 0x341   :  { %v6994_v26 = vstv %s8876_s14  ;;  %s6999_s6 = sld [smem:[#allocation14 + $0x5a]]  ;;  %2964 = vrot.lane.b32.xlu0 %v6734_v35, %s8919_s18 }
 0x342   :  { %8889 = vst [vmem:[#allocation102_spill] sm:$0xff] %v6994_v26  ;;  %s7014_s11 = sld [smem:[#allocation14 + $0x7e]]  ;;  %v2072_v19 = vpop.permute.xlu1 %2071 }
 0x343   :  { %s7027_s29 = sld [smem:[#allocation14 + $0x13]]  ;;  %v2074_v5 = vpop.permute.xlu0 %2073 }
 0x344   :  { %v7009_v52 = vstv %s8881_s9  ;;  %s7041_s26 = sld [smem:[#allocation14 + $0x37]]  ;;  %2962 = vrot.lane.b32.xlu1 %v6717_v50, %s8919_s18 }
 0x345   :  { %8893 = vst [vmem:[#allocation96_spill] sm:$0xff] %v7009_v52  ;;  %v7019_v60 = vstv %s8887_s20  ;;  %s7056_s24 = sld [smem:[#allocation14 + $0x5b]]  ;;  %3071 = vrot.lane.b32.xlu0 %v6717_v50, %s8945_s1 }
 0x346   :  { %8895 = vst [vmem:[#allocation100_spill] sm:$0xff] %v7019_v60  ;;  %s8908_s15 = sld [smem:[#allocation54_spill]]  ;;  %v7165_v34 = vstv %s6985_s16 }
 0x347   :  { %s8910_s7 = sld [smem:[#allocation28_spill]]  ;;  %8951 = vst [vmem:[#allocation140_spill] sm:$0xff] %v7165_v34 }
 0x348   :  { %s7070_s22 = sld [smem:[#allocation14 + $0x7f]]  ;;  %2966 = vrot.lane.b32.xlu1 %v6731_v10, %s8919_s18 }
 0x349   :  { %s8911_s17 = sld [smem:[#allocation29_spill]]  ;;  %v7178_v57 = vstv %s7027_s29  ;;  %3075 = vrot.lane.b32.xlu0 %v6731_v10, %s8945_s1 }
 0x34a   :  { %s8912_s10 = sld [smem:[#allocation30_spill]]  ;;  %8954 = vst [vmem:[#allocation143_spill] sm:$0xff] %v7178_v57  ;;  %v7185_v34 = vstv %s7041_s26  ;;  %s8964_s26 = smov 110  }
 0x34b   :  { %s8916_s12 = sld [smem:[#allocation31_spill]]  ;;  %8955 = vst [vmem:[#allocation144_spill] sm:$0xff] %v7185_v34 }
 0x34c   :  { %s7083_s4 = sld [smem:[#allocation14 + $0x14]]  ;;  %v7107_v59 = vstv %s8908_s15  ;;  %3073 = vrot.lane.b32.xlu1 %v6734_v35, %s8945_s1 }
 0x34d   :  { %s8917_s13 = sld [smem:[#allocation32_spill]]  ;;  %8929 = vst [vmem:[#allocation124_spill] sm:$0xff] %v7107_v59  ;;  %v7110_v48 = vstv %s8910_s7 }
 0x34e   :  { %s8920_s2 = sld [smem:[#allocation33_spill]]  ;;  %8931 = vst [vmem:[#allocation125_spill] sm:$0xff] %v7110_v48 }
 0x34f   :  { %s8921_s19 = sld [smem:[#allocation34_spill]]  ;;  %v7113_v24 = vstv %s8911_s17  ;;  %s8966_s17 = smov 19  }
 0x350   :  { %s8924_s0 = sld [smem:[#allocation35_spill]]  ;;  %8933 = vst [vmem:[#allocation126_spill] sm:$0xff] %v7113_v24  ;;  %v7116_v25 = vstv %s8912_s10 }
 0x351   :  { %s8926_s27 = sld [smem:[#allocation36_spill]]  ;;  %8935 = vst [vmem:[#allocation127_spill] sm:$0xff] %v7116_v25  ;;  %v7121_v43 = vstv %s8916_s12 }
 0x352   :  { %s7100_s23 = sld [smem:[#allocation14 + $0x38]]  ;;  %8936 = vst [vmem:[#allocation128_spill] sm:$0xff] %v7121_v43  ;;  %v7203_v34 = vstv %s7083_s4 }
 0x353   :  { %s8927_s3 = sld [smem:[#allocation37_spill]]  ;;  %v7124_v11 = vstv %s8917_s13  ;;  %8958 = vst [vmem:[#allocation147_spill] sm:$0xff] %v7203_v34 }
 0x354   :  { %s8930_s28 = sld [smem:[#allocation38_spill]]  ;;  %8938 = vst [vmem:[#allocation129_spill] sm:$0xff] %v7124_v11  ;;  %v7127_v29 = vstv %s8920_s2 }
 0x355   :  { %s8932_s21 = sld [smem:[#allocation39_spill]]  ;;  %8940 = vst [vmem:[#allocation130_spill] sm:$0xff] %v7127_v29  ;;  %v7130_v59 = vstv %s8921_s19 }
 0x356   :  { %s8934_s5 = sld [smem:[#allocation40_spill]]  ;;  %8941 = vst [vmem:[#allocation131_spill] sm:$0xff] %v7130_v59  ;;  %v7135_v24 = vstv %s8924_s0 }
 0x357   :  { %s7118_s30 = sld [smem:[#allocation14 + $0x5c]]  ;;  %8942 = vst [vmem:[#allocation132_spill] sm:$0xff] %v7135_v24  ;;  %v7138_v25 = vstv %s8926_s27  ;;  %v2076_v24 = vpop.permute.xlu1 %2075 }
 0x358   :  { %s8937_s9 = sld [smem:[#allocation41_spill]]  ;;  %8943 = vst [vmem:[#allocation133_spill] sm:$0xff] %v7138_v25  ;;  %v7175_v25 = vstv %s7014_s11  ;;  %s8961_s11 = smov 111  }
 0x359   :  { %s8939_s14 = sld [smem:[#allocation42_spill]]  ;;  %v7141_v48 = vstv %s8927_s3  ;;  %8953 = vst [vmem:[#allocation142_spill] sm:$0xff] %v7175_v25  ;;  %3114 = vrot.lane.b32.xlu0 %v6734_v35, %s8961_s11  ;;  %3112 = vrot.lane.b32.xlu1 %v6717_v50, %s8961_s11 }
 0x35a   :  { %8944 = vst [vmem:[#allocation134_spill] sm:$0xff] %v7141_v48  ;;  %v7147_v29 = vstv %s8930_s28  ;;  %v2078_v48 = vsel %vm157_vm0, %v2072_v19, %v2074_v5  ;;  %s7167_s20 = sld [smem:[#allocation14 + $0x80]] }
 0x35b   :  { %8946 = vst [vmem:[#allocation135_spill] sm:$0xff] %v7147_v29  ;;  %v7150_v59 = vstv %s8932_s21  ;;  %v7172_v29 = vstv %s6999_s6  ;;  %v2088_v25 = vmul.f32 %v6607_v12, %v2078_v48  ;;  %v2093_v40 = vmul.f32 %v6610_v36, %v2078_v48  ;;  %s7199_s16 = sld [smem:[#allocation14 + $0x15]] }
 0x35c   :  { %8947 = vst [vmem:[#allocation136_spill] sm:$0xff] %v7150_v59  ;;  %v7153_v11 = vstv %s8934_s5  ;;  %v2079_v59 = vsel %vm157_vm0, %v2076_v24, %v2072_v19  ;;  %8952 = vst [vmem:[#allocation141_spill] sm:$0xff] %v7172_v29  ;;  %v7191_v19 = vstv %s7070_s22  ;;  %v2083_v29 = vmul.f32 %v6604_v31, %v2078_v48  ;;  %s7222_s6 = sld [smem:[#allocation14 + $0x39]]  ;;  %s8965_s22 = smov 109  }
 0x35d   :  { %8948 = vst [vmem:[#allocation137_spill] sm:$0xff] %v7153_v11  ;;  %v2103_v11 = vpop.permute.xlu0 %2102  ;;  %8957 = vst [vmem:[#allocation146_spill] sm:$0xff] %v7191_v19  ;;  %v2098_v57 = vmul.f32 %v6620_v20, %v2078_v48  ;;  %v7209_v19 = vstv %s7118_s30  ;;  %v2087_v47 = vmul.f32 %v6607_v12, %v2079_v59  ;;  %s7250_s29 = sld [smem:[#allocation14 + $0x5d]]  ;;  %3153 = vrot.lane.b32.xlu0 %v6717_v50, %s8964_s26  ;;  %3116 = vrot.lane.b32.xlu1 %v6731_v10, %s8961_s11 }
 0x35e   :  { %v7159_v43 = vstv %s8937_s9  ;;  %8960 = vst [vmem:[#allocation149_spill] sm:$0xff] %v7209_v19  ;;  %v2097_v19 = vmul.f32 %v6620_v20, %v2079_v59  ;;  %s7260_s15 = sld [smem:[#allocation14 + $0x17]] }
 0x35f   :  { %8949 = vst [vmem:[#allocation138_spill] sm:$0xff] %v7159_v43  ;;  %v7162_v45 = vstv %s8939_s14  ;;  %v7188_v43 = vstv %s7056_s24  ;;  %s7258_s24 = sld [smem:[#allocation14 + $0x81]] }
 0x360   :  { %8950 = vst [vmem:[#allocation139_spill] sm:$0xff] %v7162_v45  ;;  %v2077_v45 = vsel %vm157_vm0, %v2074_v5, %v2076_v24  ;;  %8956 = vst [vmem:[#allocation145_spill] sm:$0xff] %v7188_v43  ;;  %v2082_v24 = vmul.f32 %v6604_v31, %v2079_v59  ;;  %v2101_v5 = vpop.permute.xlu1 %2100  ;;  %v7206_v43 = vstv %s7100_s23  ;;  %v7233_v3 = vstv %s7167_s20  ;;  %s7279_s7 = sld [smem:[#allocation14 + $0x3b]] }
 0x361   :  { %8959 = vst [vmem:[#allocation148_spill] sm:$0xff] %v7206_v43  ;;  %v2084_v46 = vmul.f32 %v6604_v31, %v2077_v45  ;;  %v2089_v48 = vmul.f32 %v6607_v12, %v2077_v45  ;;  %v2107_v44 = vsel %vm187_vm1, %v2101_v5, %v2103_v11  ;;  %v2142_v60 = vpop.permute.xlu0 %2141  ;;  %v2092_v31 = vmul.f32 %v6610_v36, %v2079_v59  ;;  %s7873_s10 = sld [smem:[#allocation14 + $0x18]] }
 0x362   :  { %v2112_v54 = vmul.f32 %v6623_v27, %v2107_v44  ;;  %v2120_v52 = vmul.f32 %v6626_v7, %v2107_v44  ;;  %v2128_v34 = vmul.f32 %v6633_v8, %v2107_v44  ;;  %v2136_v43 = vmul.f32 %v6636_v16, %v2107_v44  ;;  %8962 = vst [vmem:[#allocation150_spill] sm:$0xff] %v7233_v3  ;;  %s7879_s12 = sld [smem:[#allocation14 + $0x3c]] }
 0x363   :  { %v2094_v12 = vmul.f32 %v6610_v36, %v2077_v45  ;;  %v2099_v4 = vmul.f32 %v6620_v20, %v2077_v45  ;;  %v7242_v20 = vstv %s7199_s16  ;;  %3157 = vrot.lane.b32.xlu0 %v6731_v10, %s8964_s26  ;;  %3155 = vrot.lane.b32.xlu1 %v6734_v35, %s8964_s26  ;;  %s7883_s4 = sld [smem:[#allocation14 + $0x60]] }
 0x364   :  { %v2115_v21 = vadd.f32 %v2112_v54, %v2083_v29  ;;  %v2123_v55 = vadd.f32 %v2120_v52, %v2088_v25  ;;  %v7230_v44 = vadd.f32 %v2128_v34, %v2093_v40  ;;  %v2105_v26 = vpop.permute.xlu1 %2104  ;;  %v7235_v61 = vadd.f32 %v2136_v43, %v2098_v57  ;;  %8963 = vst [vmem:[#allocation151_spill] sm:$0xff] %v7242_v20  ;;  %s7895_s13 = sld [smem:[#allocation14 + $0x84]] }
 0x365   :  { %v2106_v15 = vsel %vm187_vm1, %v2103_v11, %v2105_v26  ;;  %v2108_v36 = vsel %vm187_vm1, %v2105_v26, %v2101_v5  ;;  %v2146_v59 = vpop.permute.xlu0 %2145  ;;  %s7929_s2 = sld [smem:[#allocation14 + $0x3d]] }
 0x366   :  { %v2111_v45 = vmul.f32 %v6623_v27, %v2108_v36  ;;  %v2113_v54 = vmul.f32 %v6623_v27, %v2106_v15  ;;  %v2119_v34 = vmul.f32 %v6626_v7, %v2108_v36  ;;  %v2121_v40 = vmul.f32 %v6626_v7, %v2106_v15  ;;  %s7931_s19 = sld [smem:[#allocation14 + $0x61]] }
 0x367   :  { %v2127_v43 = vmul.f32 %v6633_v8, %v2108_v36  ;;  %v2129_v25 = vmul.f32 %v6633_v8, %v2106_v15  ;;  %v2135_v52 = vmul.f32 %v6636_v16, %v2108_v36  ;;  %v2137_v26 = vmul.f32 %v6636_v16, %v2106_v15  ;;  %3196 = vrot.lane.b32.xlu0 %v6734_v35, %s8965_s22  ;;  %s7933_s0 = sld [smem:[#allocation14 + $0x85]] }
 0x368   :  { %v2114_v27 = vadd.f32 %v2111_v45, %v2082_v24  ;;  %v2116_v7 = vadd.f32 %v2113_v54, %v2084_v46  ;;  %v2122_v57 = vadd.f32 %v2119_v34, %v2087_v47  ;;  %v2124_v11 = vadd.f32 %v2121_v40, %v2089_v48  ;;  %v2144_v29 = vpop.permute.xlu1 %2143  ;;  %3194 = vrot.lane.b32.xlu1 %v6717_v50, %s8965_s22  ;;  %s7950_s27 = sld [smem:[#allocation14 + $0x1a]] }
 0x369   :  { %v2130_v5 = vadd.f32 %v2127_v43, %v2092_v31  ;;  %v2132_v20 = vadd.f32 %v2129_v25, %v2094_v12  ;;  %v2138_v8 = vadd.f32 %v2135_v52, %v2097_v19  ;;  %v2140_v3 = vadd.f32 %v2137_v26, %v2099_v4  ;;  %v2185_v36 = vpop.permute.xlu0 %2184  ;;  %s7954_s23 = sld [smem:[#allocation14 + $0x3e]] }
 0x36a   :  { %v2149_v15 = vsel %vm229_vm2, %v2146_v59, %v2142_v60  ;;  %v2147_v16 = vsel %vm229_vm2, %v2144_v29, %v2146_v59  ;;  %v2148_v24 = vsel %vm229_vm2, %v2142_v60, %v2144_v29  ;;  %v7271_v47 = vstv %s7222_s6  ;;  %s7962_s3 = sld [smem:[#allocation14 + $0x62]] }
 0x36b   :  { %v2152_v46 = vmul.f32 %v6639_v38, %v2149_v15  ;;  %v2160_v19 = vmul.f32 %v6644_v49, %v2149_v15  ;;  %v2168_v4 = vmul.f32 %v6647_v14, %v2149_v15  ;;  %v2176_v48 = vmul.f32 %v6683_v51, %v2149_v15  ;;  %3247 = vrot.lane.b32.xlu0 %v6794_v39, %s8966_s17  ;;  %s7966_s28 = sld [smem:[#allocation14 + $0x86]] }
 0x36c   :  { %v2153_v60 = vmul.f32 %v6639_v38, %v2148_v24  ;;  %v2154_v31 = vmul.f32 %v6639_v38, %v2147_v16  ;;  %v2161_v12 = vmul.f32 %v6644_v49, %v2148_v24  ;;  %v2162_v59 = vmul.f32 %v6644_v49, %v2147_v16  ;;  %v2183_v45 = vpop.permute.xlu1 %2182  ;;  %3198 = vrot.lane.b32.xlu1 %v6731_v10, %s8965_s22  ;;  %s7979_s21 = sld [smem:[#allocation14 + $0x1b]] }
 0x36d   :  { %v2155_v54 = vadd.f32 %v2152_v46, %v2114_v27  ;;  %v2163_v34 = vadd.f32 %v2160_v19, %v2122_v57  ;;  %v2171_v40 = vadd.f32 %v2168_v4, %v2130_v5  ;;  %v2179_v43 = vadd.f32 %v2176_v48, %v2138_v8  ;;  %v7285_v25 = vpop.permute.xlu0 %2255  ;;  %s7981_s5 = sld [smem:[#allocation14 + $0x3f]] }
 0x36e   :  { %v2156_v52 = vadd.f32 %v2153_v60, %v2115_v21  ;;  %v2157_v26 = vadd.f32 %v2154_v31, %v2116_v7  ;;  %v2164_v29 = vadd.f32 %v2161_v12, %v2123_v55  ;;  %v2165_v15 = vadd.f32 %v2162_v59, %v2124_v11  ;;  %s7983_s30 = sld [smem:[#allocation14 + $0x63]] }
 0x36f   :  { %v2169_v38 = vmul.f32 %v6647_v14, %v2148_v24  ;;  %v2170_v49 = vmul.f32 %v6647_v14, %v2147_v16  ;;  %v2177_v27 = vmul.f32 %v6683_v51, %v2148_v24  ;;  %v2178_v57 = vmul.f32 %v6683_v51, %v2147_v16  ;;  %3251 = vrot.lane.b32.xlu0 %v6812_v62, %s8966_s17  ;;  %s7992_s9 = sld [smem:[#allocation14 + $0x87]] }
 0x370   :  { %v2189_v21 = vsel %vm271_vm3, %v2183_v45, %v2185_v36  ;;  %v2187_v7 = vpop.permute.xlu1 %2186  ;;  %v7298_v55 = vstv %s7250_s29  ;;  %v7301_v11 = vstv %s7258_s24  ;;  %v7304_v5 = vstv %s7260_s15  ;;  %3249 = vrot.lane.b32.xlu1 %v6815_v9, %s8966_s17  ;;  %s7997_s14 = sld [smem:[#allocation14 + $0x1c]] }
 0x371   :  { %v2172_v14 = vadd.f32 %v2169_v38, %v7230_v44  ;;  %v2173_v8 = vadd.f32 %v2170_v49, %v2132_v20  ;;  %v2180_v24 = vadd.f32 %v2177_v27, %v7235_v61  ;;  %v2181_v51 = vadd.f32 %v2178_v57, %v2140_v3  ;;  %v2260_v16 = vpop.permute.xlu0 %2259  ;;  %s8003_s20 = sld [smem:[#allocation14 + $0x64]] }
 0x372   :  { %v2194_v35 = vmul.f32 %v6759_v58, %v2189_v21  ;;  %v2202_v46 = vmul.f32 %v6762_v1, %v2189_v21  ;;  %v2210_v19 = vmul.f32 %v6791_v53, %v2189_v21  ;;  %v2218_v4 = vmul.f32 %v6809_v63, %v2189_v21  ;;  %s8007_s16 = sld [smem:[#allocation14 + $0x88]] }
 0x373   :  { %v2188_v48 = vsel %vm271_vm3, %v2185_v36, %v2187_v7  ;;  %v2190_v44 = vsel %vm271_vm3, %v2187_v7, %v2183_v45  ;;  %v2263_v61 = vsel %vm345_vm4, %v2260_v16, %v7285_v25  ;;  %v7324_v3 = vstv %s7279_s7  ;;  %3290 = vrot.lane.b32.xlu0 %v6815_v9, %s8866_s8  ;;  %s8019_s6 = sld [smem:[#allocation14 + $0x1d]] }
 0x374   :  { %v2197_v20 = vadd.f32 %v2194_v35, %v2156_v52  ;;  %v2205_v60 = vadd.f32 %v2202_v46, %v2164_v29  ;;  %v2213_v31 = vadd.f32 %v2210_v19, %v2172_v14  ;;  %v2221_v12 = vadd.f32 %v2218_v4, %v2180_v24  ;;  %v2258_v50 = vpop.permute.xlu1 %2257  ;;  %3288 = vrot.lane.b32.xlu1 %v6794_v39, %s8866_s8  ;;  %s8025_s29 = sld [smem:[#allocation14 + $0x65]] }
 0x375   :  { %v2193_v59 = vmul.f32 %v6759_v58, %v2190_v44  ;;  %v2195_v36 = vmul.f32 %v6759_v58, %v2188_v48  ;;  %v2201_v45 = vmul.f32 %v6762_v1, %v2190_v44  ;;  %v2203_v38 = vmul.f32 %v6762_v1, %v2188_v48  ;;  %v2299_v49 = vpop.permute.xlu0 %2298  ;;  %s8042_s24 = sld [smem:[#allocation14 + $0x1e]] }
 0x376   :  { %v2209_v27 = vmul.f32 %v6791_v53, %v2190_v44  ;;  %v2211_v57 = vmul.f32 %v6791_v53, %v2188_v48  ;;  %v2217_v21 = vmul.f32 %v6809_v63, %v2190_v44  ;;  %v2219_v52 = vmul.f32 %v6809_v63, %v2188_v48  ;;  %s8044_s15 = sld [smem:[#allocation14 + $0x42]] }
 0x377   :  { %v2196_v29 = vadd.f32 %v2193_v59, %v2155_v54  ;;  %v2198_v7 = vadd.f32 %v2195_v36, %v2157_v26  ;;  %v2204_v14 = vadd.f32 %v2201_v45, %v2163_v34  ;;  %v2206_v58 = vadd.f32 %v2203_v38, %v2165_v15  ;;  %v8967_v36 = vld [vmem:[#allocation61_spill] sm:$0xff]  ;;  %3329 = vrot.lane.b32.xlu0 %v6794_v39, %s8885_s25  ;;  %s8052_s7 = sld [smem:[#allocation14 + $0x66]] }
 0x378   :  { %v2212_v1 = vadd.f32 %v2209_v27, %v2171_v40  ;;  %v2214_v24 = vadd.f32 %v2211_v57, %v2173_v8  ;;  %v2220_v35 = vadd.f32 %v2217_v21, %v2179_v43  ;;  %v2222_v46 = vadd.f32 %v2219_v52, %v2181_v51  ;;  %v2297_v19 = vpop.permute.xlu1 %2296  ;;  %3292 = vrot.lane.b32.xlu1 %v6812_v62, %s8866_s8  ;;  %s7839_s8 = sld [smem:[#allocation14 + $0x83]] }
 0x379   :  { %v2230_v53 = vadd.f32 %v6650_v17, %v2198_v7  ;;  %v2238_v4 = vadd.f32 %v6653_v56, %v2206_v58  ;;  %v2268_v63 = vmul.f32 %v6838_v33, %v2263_v61  ;;  %v2276_v10 = vmul.f32 %v6849_v37, %v2263_v61  ;;  %v7342_v54 = vpop.permute.xlu0 %2337  ;;  %v8969_v58 = vld [vmem:[#allocation85_spill] sm:$0xff]  ;;  %s8063_s17 = sld [smem:[#allocation14 + $0x20]] }
 0x37a   :  { %v2246_v34 = vadd.f32 %v6661_v28, %v2214_v24  ;;  %v2254_v26 = vadd.f32 %v6665_v0, %v2222_v46  ;;  %v2284_v40 = vmul.f32 %v6852_v42, %v2263_v61  ;;  %v2292_v43 = vmul.f32 %v6861_v32, %v2263_v61  ;;  %v8970_v24 = vld [vmem:[#allocation101_spill] sm:$0xff] }
 0x37b   :  { %v7350_v17 = vadd.f32 %v2268_v63, %v2230_v53  ;;  %v7352_v56 = vadd.f32 %v2276_v10, %v2238_v4  ;;  %v2228_v15 = vadd.f32 %v6712_v41, %v2196_v29  ;;  %v2229_v8 = vadd.f32 %v6686_v2, %v2197_v20  ;;  %3333 = vrot.lane.b32.xlu0 %v6812_v62, %s8885_s25 }
 0x37c   :  { %v7358_v28 = vadd.f32 %v2284_v40, %v2246_v34  ;;  %v7360_v0 = vadd.f32 %v2292_v43, %v2254_v26  ;;  %v2236_v51 = vadd.f32 %v6720_v6, %v2204_v14  ;;  %v2237_v48 = vadd.f32 %v6701_v18, %v2205_v60  ;;  %v2301_v44 = vpop.permute.xlu1 %2300  ;;  %v8968_v14 = vld [vmem:[#allocation91_spill] sm:$0xff]  ;;  %3331 = vrot.lane.b32.xlu1 %v6815_v9, %s8885_s25  ;;  %s7834_s25 = sld [smem:[#allocation14 + $0x5f]] }
 0x37d   :  { %v2244_v61 = vadd.f32 %v6746_v22, %v2212_v1  ;;  %v2245_v59 = vadd.f32 %v6705_v23, %v2213_v31  ;;  %v2252_v41 = vadd.f32 %v6766_v30, %v2220_v35  ;;  %v2253_v2 = vadd.f32 %v8967_v36, %v2221_v12  ;;  %v2342_v20 = vpop.permute.xlu0 %2341  ;;  %v8971_v35 = vld [vmem:[#allocation102_spill] sm:$0xff] }
 0x37e   :  { %v2261_v45 = vsel %vm345_vm4, %v2258_v50, %v2260_v16  ;;  %v2262_v38 = vsel %vm345_vm4, %v7285_v25, %v2258_v50  ;;  %v2303_v18 = vsel %vm387_vm5, %v2297_v19, %v2299_v49  ;;  %v2302_v6 = vsel %vm387_vm5, %v2299_v49, %v2301_v44 }
 0x37f   :  { %v2266_v23 = vmul.f32 %v6838_v33, %v2262_v38  ;;  %v2267_v22 = vmul.f32 %v6838_v33, %v2261_v45  ;;  %v2274_v30 = vmul.f32 %v6849_v37, %v2262_v38  ;;  %v2275_v16 = vmul.f32 %v6849_v37, %v2261_v45  ;;  %3372 = vrot.lane.b32.xlu0 %v6815_v9, %s8919_s18 }
 0x380   :  { %v2282_v25 = vmul.f32 %v6852_v42, %v2262_v38  ;;  %v2283_v60 = vmul.f32 %v6852_v42, %v2261_v45  ;;  %v2290_v31 = vmul.f32 %v6861_v32, %v2262_v38  ;;  %v2291_v12 = vmul.f32 %v6861_v32, %v2261_v45  ;;  %v2340_v50 = vpop.permute.xlu1 %2339  ;;  %3370 = vrot.lane.b32.xlu1 %v6794_v39, %s8919_s18 }
 0x381   :  { %v2269_v49 = vadd.f32 %v2266_v23, %v2228_v15  ;;  %v2270_v27 = vadd.f32 %v2267_v22, %v2229_v8  ;;  %v2277_v57 = vadd.f32 %v2274_v30, %v2236_v51  ;;  %v2278_v33 = vadd.f32 %v2275_v16, %v2237_v48  ;;  %v7389_v21 = vpop.permute.xlu0 %2380  ;;  %v8972_v16 = vld [vmem:[#allocation89_spill] sm:$0xff] }
 0x382   :  { %v2285_v52 = vadd.f32 %v2282_v25, %v2244_v61  ;;  %v2286_v37 = vadd.f32 %v2283_v60, %v2245_v59  ;;  %v2293_v29 = vadd.f32 %v2290_v31, %v2252_v41  ;;  %v2294_v7 = vadd.f32 %v2291_v12, %v2253_v2 }
 0x383   :  { %v2307_v42 = vmul.f32 %v8968_v14, %v2303_v18  ;;  %v2315_v1 = vmul.f32 %v8969_v58, %v2303_v18  ;;  %v2323_v32 = vmul.f32 %v8970_v24, %v2303_v18  ;;  %v2331_v46 = vmul.f32 %v8971_v35, %v2303_v18  ;;  %3479 = vrot.lane.b32.xlu0 %v6794_v39, %s8945_s1 }
 0x384   :  { %v2304_v53 = vsel %vm387_vm5, %v2301_v44, %v2297_v19  ;;  %v2308_v4 = vmul.f32 %v8968_v14, %v2302_v6  ;;  %v2316_v63 = vmul.f32 %v8969_v58, %v2302_v6  ;;  %v2324_v10 = vmul.f32 %v8970_v24, %v2302_v6  ;;  %v2379_v34 = vpop.permute.xlu1 %2378  ;;  %3374 = vrot.lane.b32.xlu1 %v6812_v62, %s8919_s18  ;;  %s7901_s18 = sld [smem:[#allocation14 + $0x19]] }
 0x385   :  { %v2310_v26 = vadd.f32 %v2307_v42, %v2269_v49  ;;  %v2318_v40 = vadd.f32 %v2315_v1, %v2277_v57  ;;  %v2326_v43 = vadd.f32 %v2323_v32, %v2285_v52  ;;  %v2334_v15 = vadd.f32 %v2331_v46, %v2293_v29  ;;  %v7404_v8 = vpop.permute.xlu0 %2431  ;;  %v8975_v49 = vld [vmem:[#allocation96_spill] sm:$0xff] }
 0x386   :  { %v2309_v51 = vmul.f32 %v8968_v14, %v2304_v53  ;;  %v2311_v48 = vadd.f32 %v2308_v4, %v2270_v27  ;;  %v2317_v61 = vmul.f32 %v8969_v58, %v2304_v53  ;;  %v2319_v59 = vadd.f32 %v2316_v63, %v2278_v33 }
 0x387   :  { %v2325_v19 = vmul.f32 %v8970_v24, %v2304_v53  ;;  %v2327_v44 = vadd.f32 %v2324_v10, %v2286_v37  ;;  %v2332_v41 = vmul.f32 %v8971_v35, %v2302_v6  ;;  %v2333_v36 = vmul.f32 %v8971_v35, %v2304_v53  ;;  %3483 = vrot.lane.b32.xlu0 %v6812_v62, %s8945_s1 }
 0x388   :  { %v2312_v2 = vadd.f32 %v2309_v51, %v7350_v17  ;;  %v2320_v45 = vadd.f32 %v2317_v61, %v7352_v56  ;;  %v2345_v38 = vsel %vm429_vm6, %v2342_v20, %v7342_v54  ;;  %v2343_v18 = vsel %vm429_vm6, %v2340_v50, %v2342_v20  ;;  %v2383_v23 = vpop.permute.xlu1 %2382  ;;  %v8973_v17 = vld [vmem:[#allocation92_spill] sm:$0xff]  ;;  %v8974_v56 = vld [vmem:[#allocation93_spill] sm:$0xff]  ;;  %3481 = vrot.lane.b32.xlu1 %v6815_v9, %s8945_s1  ;;  %s8001_s1 = sld [smem:[#allocation14 + $0x40]] }
 0x389   :  { %v2328_v22 = vadd.f32 %v2325_v19, %v7358_v28  ;;  %v2335_v6 = vadd.f32 %v2332_v41, %v2294_v7  ;;  %v2336_v30 = vadd.f32 %v2333_v36, %v7360_v0  ;;  %v2350_v25 = vmul.f32 %v8972_v16, %v2345_v38  ;;  %v7425_v60 = vpop.permute.xlu0 %2435  ;;  %v8978_v41 = vld [vmem:[#allocation103_spill] sm:$0xff] }
 0x38a   :  { %v2358_v31 = vmul.f32 %v8973_v17, %v2345_v38  ;;  %v2366_v12 = vmul.f32 %v8974_v56, %v2345_v38  ;;  %v2374_v27 = vmul.f32 %v8975_v49, %v2345_v38  ;;  %v2344_v20 = vsel %vm429_vm6, %v7342_v54, %v2340_v50 }
 0x38b   :  { %v2353_v28 = vadd.f32 %v2350_v25, %v2312_v2  ;;  %v2348_v0 = vmul.f32 %v8972_v16, %v2344_v20  ;;  %v2349_v57 = vmul.f32 %v8972_v16, %v2343_v18  ;;  %v2356_v33 = vmul.f32 %v8973_v17, %v2344_v20  ;;  %v8979_v2 = vld [vmem:[#allocation104_spill] sm:$0xff]  ;;  %3522 = vrot.lane.b32.xlu0 %v6815_v9, %s8961_s11 }
 0x38c   :  { %v2361_v52 = vadd.f32 %v2358_v31, %v2320_v45  ;;  %v2369_v37 = vadd.f32 %v2366_v12, %v2328_v22  ;;  %v2377_v29 = vadd.f32 %v2374_v27, %v2336_v30  ;;  %v2357_v7 = vmul.f32 %v8973_v17, %v2343_v18  ;;  %v7441_v14 = vpop.permute.xlu1 %2433  ;;  %3520 = vrot.lane.b32.xlu1 %v6794_v39, %s8961_s11 }
 0x38d   :  { %v2351_v54 = vadd.f32 %v2348_v0, %v2310_v26  ;;  %v2352_v50 = vadd.f32 %v2349_v57, %v2311_v48  ;;  %v2359_v42 = vadd.f32 %v2356_v33, %v2318_v40  ;;  %v2364_v58 = vmul.f32 %v8974_v56, %v2344_v20  ;;  %v7444_v1 = vpop.permute.xlu0 %2474  ;;  %v8976_v48 = vld [vmem:[#allocation98_spill] sm:$0xff] }
 0x38e   :  { %v2360_v24 = vadd.f32 %v2357_v7, %v2319_v59  ;;  %v2365_v32 = vmul.f32 %v8974_v56, %v2343_v18  ;;  %v2372_v35 = vmul.f32 %v8975_v49, %v2344_v20  ;;  %v2373_v46 = vmul.f32 %v8975_v49, %v2343_v18  ;;  %v8977_v59 = vld [vmem:[#allocation100_spill] sm:$0xff] }
 0x38f   :  { %v2367_v53 = vadd.f32 %v2364_v58, %v2326_v43  ;;  %v2385_v4 = vsel %vm471_vm7, %v2379_v34, %v7389_v21  ;;  %v2384_v63 = vsel %vm471_vm7, %v7389_v21, %v2383_v23  ;;  %v2386_v10 = vsel %vm471_vm7, %v2383_v23, %v2379_v34  ;;  %3561 = vrot.lane.b32.xlu0 %v6794_v39, %s8964_s26 }
 0x390   :  { %v2368_v26 = vadd.f32 %v2365_v32, %v2327_v44  ;;  %v2375_v40 = vadd.f32 %v2372_v35, %v2334_v15  ;;  %v2376_v51 = vadd.f32 %v2373_v46, %v2335_v6  ;;  %v2389_v61 = vmul.f32 %v8976_v48, %v2385_v4  ;;  %v7462_v43 = vpop.permute.xlu1 %2472  ;;  %v8983_v32 = vld [vmem:[#allocation108_spill] sm:$0xff]  ;;  %3524 = vrot.lane.b32.xlu1 %v6812_v62, %s8961_s11  ;;  %s8023_s11 = sld [smem:[#allocation14 + $0x41]] }
 0x391   :  { %v2397_v19 = vmul.f32 %v8977_v59, %v2385_v4  ;;  %v2405_v36 = vmul.f32 %v8978_v41, %v2385_v4  ;;  %v2413_v45 = vmul.f32 %v8979_v2, %v2385_v4  ;;  %v2390_v21 = vmul.f32 %v8976_v48, %v2384_v63  ;;  %v7468_v38 = vpop.permute.xlu0 %2513 }
 0x392   :  { %v2392_v34 = vadd.f32 %v2389_v61, %v2351_v54  ;;  %v2391_v18 = vmul.f32 %v8976_v48, %v2386_v10  ;;  %v2398_v15 = vmul.f32 %v8977_v59, %v2384_v63  ;;  %v2399_v44 = vmul.f32 %v8977_v59, %v2386_v10  ;;  %v8982_v54 = vld [vmem:[#allocation107_spill] sm:$0xff] }
 0x393   :  { %v2400_v23 = vadd.f32 %v2397_v19, %v2359_v42  ;;  %v2408_v22 = vadd.f32 %v2405_v36, %v2367_v53  ;;  %v2416_v6 = vadd.f32 %v2413_v45, %v2375_v40  ;;  %v2393_v30 = vadd.f32 %v2390_v21, %v2352_v50  ;;  %3565 = vrot.lane.b32.xlu0 %v6812_v62, %s8964_s26 }
 0x394   :  { %v2394_v16 = vadd.f32 %v2391_v18, %v2353_v28  ;;  %v2401_v25 = vadd.f32 %v2398_v15, %v2360_v24  ;;  %v2402_v17 = vadd.f32 %v2399_v44, %v2361_v52  ;;  %v2406_v31 = vmul.f32 %v8978_v41, %v2384_v63  ;;  %v2477_v56 = vpop.permute.xlu1 %2476  ;;  %v8980_v28 = vld [vmem:[#allocation105_spill] sm:$0xff]  ;;  %v8981_v52 = vld [vmem:[#allocation106_spill] sm:$0xff]  ;;  %3563 = vrot.lane.b32.xlu1 %v6815_v9, %s8964_s26  ;;  %s8031_s26 = sld [smem:[#allocation14 + $0x89]] }
 0x395   :  { %v2407_v12 = vmul.f32 %v8978_v41, %v2386_v10  ;;  %v2414_v49 = vmul.f32 %v8979_v2, %v2384_v63  ;;  %v2415_v27 = vmul.f32 %v8979_v2, %v2386_v10  ;;  %v2439_v20 = vsel %vm157_vm0, %v7425_v60, %v7404_v8  ;;  %v7485_v0 = vpop.permute.xlu0 %2517 }
 0x396   :  { %v2409_v57 = vadd.f32 %v2406_v31, %v2368_v26  ;;  %v2442_v33 = vmul.f32 %v8980_v28, %v2439_v20  ;;  %v2450_v7 = vmul.f32 %v8981_v52, %v2439_v20  ;;  %v2458_v50 = vmul.f32 %v8982_v54, %v2439_v20 }
 0x397   :  { %v2410_v42 = vadd.f32 %v2407_v12, %v2369_v37  ;;  %v2417_v58 = vadd.f32 %v2414_v49, %v2376_v51  ;;  %v2418_v24 = vadd.f32 %v2415_v27, %v2377_v29  ;;  %v2466_v35 = vmul.f32 %v8983_v32, %v2439_v20  ;;  %v8987_v12 = vld [vmem:[#allocation112_spill] sm:$0xff]  ;;  %3604 = vrot.lane.b32.xlu0 %v6815_v9, %s8965_s22 }
 0x398   :  { %v2445_v46 = vadd.f32 %v2442_v33, %v2392_v34  ;;  %v2453_v53 = vadd.f32 %v2450_v7, %v2400_v23  ;;  %v2461_v4 = vadd.f32 %v2458_v50, %v2408_v22  ;;  %v2437_v63 = vsel %vm157_vm0, %v7441_v14, %v7425_v60  ;;  %v7499_v10 = vpop.permute.xlu1 %2515  ;;  %3602 = vrot.lane.b32.xlu1 %v6794_v39, %s8965_s22  ;;  %v8989_v39 = vld [vmem:[#allocation114_spill] sm:$0xff] }
 0x399   :  { %v2469_v26 = vadd.f32 %v2466_v35, %v2416_v6  ;;  %v2438_v37 = vsel %vm157_vm0, %v7404_v8, %v7441_v14  ;;  %v2444_v29 = vmul.f32 %v8980_v28, %v2437_v63  ;;  %v2452_v40 = vmul.f32 %v8981_v52, %v2437_v63  ;;  %v7507_v51 = vpop.permute.xlu0 %2556  ;;  %v8984_v6 = vld [vmem:[#allocation109_spill] sm:$0xff] }
 0x39a   :  { %v2443_v48 = vmul.f32 %v8980_v28, %v2438_v37  ;;  %v2451_v61 = vmul.f32 %v8981_v52, %v2438_v37  ;;  %v2459_v60 = vmul.f32 %v8982_v54, %v2438_v37  ;;  %v2460_v59 = vmul.f32 %v8982_v54, %v2437_v63 }
 0x39b   :  { %v2447_v19 = vadd.f32 %v2444_v29, %v2394_v16  ;;  %v2455_v41 = vadd.f32 %v2452_v40, %v2402_v17  ;;  %v2467_v8 = vmul.f32 %v8983_v32, %v2438_v37  ;;  %v2468_v14 = vmul.f32 %v8983_v32, %v2437_v63  ;;  %v8985_v16 = vld [vmem:[#allocation110_spill] sm:$0xff]  ;;  %v8986_v17 = vld [vmem:[#allocation111_spill] sm:$0xff] }
 0x39c   :  { %v2446_v36 = vadd.f32 %v2443_v48, %v2393_v30  ;;  %v2454_v2 = vadd.f32 %v2451_v61, %v2401_v25  ;;  %v2462_v45 = vadd.f32 %v2459_v60, %v2409_v57  ;;  %v2463_v21 = vadd.f32 %v2460_v59, %v2410_v42  ;;  %v7519_v34 = vpop.permute.xlu1 %2554  ;;  %v8988_v59 = vld [vmem:[#allocation113_spill] sm:$0xff]  ;;  %3606 = vrot.lane.b32.xlu1 %v6812_v62, %s8965_s22  ;;  %s8054_s22 = sld [smem:[#allocation14 + $0x8a]] }
 0x39d   :  { %v2470_v18 = vadd.f32 %v2467_v8, %v2417_v58  ;;  %v2471_v15 = vadd.f32 %v2468_v14, %v2418_v24  ;;  %v2479_v44 = vsel %vm187_vm1, %v7462_v43, %v7444_v1  ;;  %v2478_v23 = vsel %vm187_vm1, %v7444_v1, %v2477_v56  ;;  %v7528_v22 = vpop.permute.xlu0 %2663  ;;  %v8991_v14 = vld [vmem:[#allocation116_spill] sm:$0xff] }
 0x39e   :  { %v2484_v30 = vmul.f32 %v8984_v6, %v2479_v44  ;;  %v2492_v25 = vmul.f32 %v8985_v16, %v2479_v44  ;;  %v2500_v31 = vmul.f32 %v8986_v17, %v2479_v44  ;;  %v2508_v49 = vmul.f32 %v8987_v12, %v2479_v44 }
 0x39f   :  { %v2480_v27 = vsel %vm187_vm1, %v2477_v56, %v7462_v43  ;;  %v2485_v20 = vmul.f32 %v8984_v6, %v2478_v23  ;;  %v2493_v1 = vmul.f32 %v8985_v16, %v2478_v23  ;;  %v2501_v57 = vmul.f32 %v8986_v17, %v2478_v23 }
 0x3a0   :  { %v2487_v28 = vadd.f32 %v2484_v30, %v2446_v36  ;;  %v2495_v33 = vadd.f32 %v2492_v25, %v2454_v2  ;;  %v2503_v52 = vadd.f32 %v2500_v31, %v2462_v45  ;;  %v2511_v7 = vadd.f32 %v2508_v49, %v2470_v18  ;;  %v2559_v54 = vpop.permute.xlu1 %2558 }
 0x3a1   :  { %v2483_v50 = vmul.f32 %v8984_v6, %v2480_v27  ;;  %v2488_v42 = vadd.f32 %v2485_v20, %v2447_v19  ;;  %v2491_v58 = vmul.f32 %v8985_v16, %v2480_v27  ;;  %v2496_v43 = vadd.f32 %v2493_v1, %v2455_v41  ;;  %v7546_v56 = vpop.permute.xlu0 %2667 }
 0x3a2   :  { %v2499_v24 = vmul.f32 %v8986_v17, %v2480_v27  ;;  %v2504_v32 = vadd.f32 %v2501_v57, %v2463_v21  ;;  %v2507_v35 = vmul.f32 %v8987_v12, %v2480_v27  ;;  %v2509_v9 = vmul.f32 %v8987_v12, %v2478_v23 }
 0x3a3   :  { %v2486_v63 = vadd.f32 %v2483_v50, %v2445_v46  ;;  %v2494_v37 = vadd.f32 %v2491_v58, %v2453_v53  ;;  %v2521_v29 = vsel %vm229_vm2, %v7485_v0, %v7468_v38  ;;  %v2519_v40 = vsel %vm229_vm2, %v7499_v10, %v7485_v0  ;;  %v8990_v53 = vld [vmem:[#allocation115_spill] sm:$0xff]  ;;  %v8992_v50 = vld [vmem:[#allocation117_spill] sm:$0xff]  ;;  %v8993_v58 = vld [vmem:[#allocation118_spill] sm:$0xff] }
 0x3a4   :  { %v2502_v48 = vadd.f32 %v2499_v24, %v2461_v4  ;;  %v2510_v61 = vadd.f32 %v2507_v35, %v2469_v26  ;;  %v2512_v60 = vadd.f32 %v2509_v9, %v2471_v15  ;;  %v2524_v19 = vmul.f32 %v8988_v59, %v2521_v29  ;;  %v7562_v41 = vpop.permute.xlu1 %2665  ;;  %v8995_v35 = vld [vmem:[#allocation121_spill] sm:$0xff] }
 0x3a5   :  { %v2532_v46 = vmul.f32 %v8989_v39, %v2521_v29  ;;  %v2540_v8 = vmul.f32 %v8990_v53, %v2521_v29  ;;  %v2548_v36 = vmul.f32 %v8991_v14, %v2521_v29  ;;  %v2520_v2 = vsel %vm229_vm2, %v7468_v38, %v7499_v10  ;;  %v7571_v45 = vpop.permute.xlu0 %2706 }
 0x3a6   :  { %v2527_v0 = vadd.f32 %v2524_v19, %v2486_v63  ;;  %v2525_v4 = vmul.f32 %v8988_v59, %v2520_v2  ;;  %v2526_v26 = vmul.f32 %v8988_v59, %v2519_v40  ;;  %v2533_v21 = vmul.f32 %v8989_v39, %v2520_v2 }
 0x3a7   :  { %v2535_v18 = vadd.f32 %v2532_v46, %v2494_v37  ;;  %v2543_v15 = vadd.f32 %v2540_v8, %v2502_v48  ;;  %v2551_v44 = vadd.f32 %v2548_v36, %v2510_v61  ;;  %v2534_v23 = vmul.f32 %v8989_v39, %v2519_v40 }
 0x3a8   :  { %v2528_v6 = vadd.f32 %v2525_v4, %v2487_v28  ;;  %v2529_v30 = vadd.f32 %v2526_v26, %v2488_v42  ;;  %v2536_v38 = vadd.f32 %v2533_v21, %v2495_v33  ;;  %v2541_v10 = vmul.f32 %v8990_v53, %v2520_v2  ;;  %v7580_v16 = vpop.permute.xlu1 %2704  ;;  %v8998_v21 = vld [vmem:[#allocation71_spill] sm:$0xff] }
 0x3a9   :  { %v2537_v25 = vadd.f32 %v2534_v23, %v2496_v43  ;;  %v2542_v17 = vmul.f32 %v8990_v53, %v2519_v40  ;;  %v2549_v31 = vmul.f32 %v8991_v14, %v2520_v2  ;;  %v2550_v12 = vmul.f32 %v8991_v14, %v2519_v40  ;;  %v7585_v62 = vpop.permute.xlu0 %2745  ;;  %v8994_v43 = vld [vmem:[#allocation120_spill] sm:$0xff] }
 0x3aa   :  { %v2544_v49 = vadd.f32 %v2541_v10, %v2503_v52  ;;  %v2561_v27 = vsel %vm271_vm3, %v7519_v34, %v7507_v51  ;;  %v2560_v20 = vsel %vm271_vm3, %v7507_v51, %v2559_v54  ;;  %v2562_v1 = vsel %vm271_vm3, %v2559_v54, %v7519_v34 }
 0x3ab   :  { %v2545_v57 = vadd.f32 %v2542_v17, %v2504_v32  ;;  %v2552_v28 = vadd.f32 %v2549_v31, %v2511_v7  ;;  %v2553_v33 = vadd.f32 %v2550_v12, %v2512_v60  ;;  %v2566_v42 = vmul.f32 %v8992_v50, %v2561_v27  ;;  %v9001_v31 = vld [vmem:[#allocation124_spill] sm:$0xff] }
 0x3ac   :  { %v2574_v52 = vmul.f32 %v8993_v58, %v2561_v27  ;;  %v2582_v24 = vmul.f32 %v8994_v43, %v2561_v27  ;;  %v2590_v9 = vmul.f32 %v8995_v35, %v2561_v27  ;;  %v2565_v63 = vmul.f32 %v8992_v50, %v2562_v1  ;;  %v7602_v37 = vpop.permute.xlu1 %2708  ;;  %v9002_v27 = vld [vmem:[#allocation125_spill] sm:$0xff] }
 0x3ad   :  { %v2569_v51 = vadd.f32 %v2566_v42, %v2528_v6  ;;  %v2567_v29 = vmul.f32 %v8992_v50, %v2560_v20  ;;  %v2573_v34 = vmul.f32 %v8993_v58, %v2562_v1  ;;  %v2575_v7 = vmul.f32 %v8993_v58, %v2560_v20  ;;  %v7607_v54 = vpop.permute.xlu0 %2749  ;;  %v9000_v6 = vld [vmem:[#allocation122_spill] sm:$0xff]  ;;  %v9006_v58 = vld [vmem:[#allocation59_spill] sm:$0xff] }
 0x3ae   :  { %v2577_v32 = vadd.f32 %v2574_v52, %v2536_v38  ;;  %v2585_v40 = vadd.f32 %v2582_v24, %v2544_v49  ;;  %v2593_v48 = vadd.f32 %v2590_v9, %v2552_v28  ;;  %v2568_v61 = vadd.f32 %v2565_v63, %v2527_v0  ;;  %v8996_v0 = vld [vmem:[#allocation58_spill] sm:$0xff]  ;;  %v9008_v24 = vld [vmem:[#allocation60_spill] sm:$0xff] }
 0x3af   :  { %v2570_v60 = vadd.f32 %v2567_v29, %v2529_v30  ;;  %v2576_v59 = vadd.f32 %v2573_v34, %v2535_v18  ;;  %v2578_v19 = vadd.f32 %v2575_v7, %v2537_v25  ;;  %v2581_v39 = vmul.f32 %v8994_v43, %v2562_v1  ;;  %v9004_v28 = vld [vmem:[#allocation62_spill] sm:$0xff]  ;;  %v9012_v34 = vld [vmem:[#allocation64_spill] sm:$0xff] }
 0x3b0   :  { %v2583_v46 = vmul.f32 %v8994_v43, %v2560_v20  ;;  %v2589_v53 = vmul.f32 %v8995_v35, %v2562_v1  ;;  %v2591_v8 = vmul.f32 %v8995_v35, %v2560_v20  ;;  %v2671_v14 = vsel %vm345_vm4, %v7546_v56, %v7528_v22  ;;  %v7617_v36 = vpop.permute.xlu1 %2747  ;;  %v9003_v1 = vld [vmem:[#allocation126_spill] sm:$0xff] }
 0x3b1   :  { %v2584_v2 = vadd.f32 %v2581_v39, %v2543_v15  ;;  %v8997_v4 = vrot.slane %v8996_v0, 2  ;;  %v8999_v18 = vrot.slane %v8998_v21, 2  ;;  %v2676_v30 = vmul.f32 %v9000_v6, %v2671_v14  ;;  %v7624_v38 = vpop.permute.xlu0 %2788 }
 0x3b2   :  { %v2586_v10 = vadd.f32 %v2583_v46, %v2545_v57  ;;  %v2592_v25 = vadd.f32 %v2589_v53, %v2551_v44  ;;  %v2594_v17 = vadd.f32 %v2591_v8, %v2553_v33  ;;  %v2684_v12 = vmul.f32 %v9001_v31, %v2671_v14  ;;  %v9010_v57 = vld [vmem:[#allocation63_spill] sm:$0xff]  ;;  %v9016_v53 = vld [vmem:[#allocation66_spill] sm:$0xff] }
 0x3b3   :  { %v2611_v26 = vadd.f32 %v8997_v4, %v2570_v60  ;;  %v2628_v23 = vadd.f32 %v8999_v18, %v2578_v19  ;;  %v2692_v20 = vmul.f32 %v9002_v27, %v2671_v14  ;;  %v2700_v15 = vmul.f32 %v9003_v1, %v2671_v14  ;;  %v9014_v19 = vld [vmem:[#allocation65_spill] sm:$0xff]  ;;  %v9018_v14 = vld [vmem:[#allocation67_spill] sm:$0xff]  ;;  %v9020_v18 = vld [vmem:[#allocation68_spill] sm:$0xff] }
 0x3b4   :  { %v9005_v50 = vrot.slane %v9004_v28, 2  ;;  %v9007_v52 = vrot.slane %v9006_v58, 2  ;;  %v9009_v35 = vrot.slane %v9008_v24, 2  ;;  %v9011_v44 = vrot.slane %v9010_v57, 2  ;;  %v7637_v29 = vpop.permute.xlu1 %2786  ;;  %v9024_v57 = vld [vmem:[#allocation127_spill] sm:$0xff] }
 0x3b5   :  { %v2679_v49 = vadd.f32 %v2676_v30, %v2611_v26  ;;  %v2687_v63 = vadd.f32 %v2684_v12, %v2628_v23  ;;  %v9013_v7 = vrot.slane %v9012_v34, 2  ;;  %v9015_v39 = vrot.slane %v9014_v19, 2  ;;  %v7651_v12 = vpop.permute.xlu0 %2839 }
 0x3b6   :  { %v2609_v42 = vadd.f32 %v9005_v50, %v2568_v61  ;;  %v2645_v43 = vadd.f32 %v9007_v52, %v2586_v10  ;;  %v2662_v9 = vadd.f32 %v9009_v35, %v2594_v17  ;;  %v2610_v33 = vadd.f32 %v9011_v44, %v2569_v51  ;;  %v9022_v51 = vld [vmem:[#allocation69_spill] sm:$0xff]  ;;  %v9025_v44 = vld [vmem:[#allocation128_spill] sm:$0xff] }
 0x3b7   :  { %v2626_v60 = vadd.f32 %v9013_v7, %v2576_v59  ;;  %v2627_v46 = vadd.f32 %v9015_v39, %v2577_v32  ;;  %v9017_v61 = vrot.slane %v9016_v53, 2  ;;  %v9019_v0 = vrot.slane %v9018_v14, 2  ;;  %v9026_v7 = vld [vmem:[#allocation129_spill] sm:$0xff]  ;;  %v9027_v39 = vld [vmem:[#allocation130_spill] sm:$0xff] }
 0x3b8   :  { %v2695_v26 = vadd.f32 %v2692_v20, %v2645_v43  ;;  %v2703_v21 = vadd.f32 %v2700_v15, %v2662_v9  ;;  %v9021_v23 = vrot.slane %v9020_v18, 2  ;;  %v9023_v10 = vrot.slane %v9022_v51, 2  ;;  %v7673_v15 = vpop.permute.xlu1 %2790 }
 0x3b9   :  { %v2643_v8 = vadd.f32 %v9017_v61, %v2584_v2  ;;  %v2644_v4 = vadd.f32 %v9019_v0, %v2585_v40  ;;  %v2669_v32 = vsel %vm345_vm4, %v7562_v41, %v7546_v56  ;;  %v2670_v40 = vsel %vm345_vm4, %v7528_v22, %v7562_v41  ;;  %v7683_v53 = vpop.permute.xlu0 %2843 }
 0x3ba   :  { %v2660_v30 = vadd.f32 %v9021_v23, %v2592_v25  ;;  %v2661_v17 = vadd.f32 %v9023_v10, %v2593_v48  ;;  %v2711_v59 = vsel %vm387_vm5, %v7580_v16, %v7571_v45  ;;  %v2710_v48 = vsel %vm387_vm5, %v7571_v45, %v7602_v37 }
 0x3bb   :  { %v2674_v2 = vmul.f32 %v9000_v6, %v2670_v40  ;;  %v2675_v25 = vmul.f32 %v9000_v6, %v2669_v32  ;;  %v2682_v56 = vmul.f32 %v9001_v31, %v2670_v40  ;;  %v2683_v20 = vmul.f32 %v9001_v31, %v2669_v32 }
 0x3bc   :  { %v2690_v22 = vmul.f32 %v9002_v27, %v2670_v40  ;;  %v2691_v41 = vmul.f32 %v9002_v27, %v2669_v32  ;;  %v2698_v28 = vmul.f32 %v9003_v1, %v2670_v40  ;;  %v2699_v50 = vmul.f32 %v9003_v1, %v2669_v32  ;;  %v7685_v61 = vpop.permute.xlu1 %2841 }
 0x3bd   :  { %v2677_v58 = vadd.f32 %v2674_v2, %v2609_v42  ;;  %v2678_v45 = vadd.f32 %v2675_v25, %v2610_v33  ;;  %v2685_v52 = vadd.f32 %v2682_v56, %v2626_v60  ;;  %v2686_v43 = vadd.f32 %v2683_v20, %v2627_v46 }
 0x3be   :  { %v2693_v24 = vadd.f32 %v2690_v22, %v2643_v8  ;;  %v2694_v6 = vadd.f32 %v2691_v41, %v2644_v4  ;;  %v2701_v35 = vadd.f32 %v2698_v28, %v2660_v30  ;;  %v2702_v9 = vadd.f32 %v2699_v50, %v2661_v17  ;;  %v7710_v41 = vpop.permute.xlu0 %2882  ;;  %v9029_v28 = vld [vmem:[#allocation132_spill] sm:$0xff] }
 0x3bf   :  { %v2715_v31 = vmul.f32 %v9024_v57, %v2711_v59  ;;  %v2723_v34 = vmul.f32 %v9025_v44, %v2711_v59  ;;  %v2731_v19 = vmul.f32 %v9026_v7, %v2711_v59  ;;  %v2739_v27 = vmul.f32 %v9027_v39, %v2711_v59 }
 0x3c0   :  { %v2712_v1 = vsel %vm387_vm5, %v7602_v37, %v7580_v16  ;;  %v2716_v42 = vmul.f32 %v9024_v57, %v2710_v48  ;;  %v2724_v33 = vmul.f32 %v9025_v44, %v2710_v48  ;;  %v2732_v60 = vmul.f32 %v9026_v7, %v2710_v48  ;;  %v7699_v17 = vpop.permute.xlu1 %2880 }
 0x3c1   :  { %v2718_v46 = vadd.f32 %v2715_v31, %v2677_v58  ;;  %v2726_v8 = vadd.f32 %v2723_v34, %v2685_v52  ;;  %v2734_v14 = vadd.f32 %v2731_v19, %v2693_v24  ;;  %v2742_v0 = vadd.f32 %v2739_v27, %v2701_v35  ;;  %v9031_v58 = vld [vmem:[#allocation134_spill] sm:$0xff] }
 0x3c2   :  { %v2717_v4 = vmul.f32 %v9024_v57, %v2712_v1  ;;  %v2719_v18 = vadd.f32 %v2716_v42, %v2678_v45  ;;  %v2725_v23 = vmul.f32 %v9025_v44, %v2712_v1  ;;  %v2727_v30 = vadd.f32 %v2724_v33, %v2686_v43 }
 0x3c3   :  { %v2733_v51 = vmul.f32 %v9026_v7, %v2712_v1  ;;  %v2735_v10 = vadd.f32 %v2732_v60, %v2694_v6  ;;  %v2740_v16 = vmul.f32 %v9027_v39, %v2710_v48  ;;  %v2741_v37 = vmul.f32 %v9027_v39, %v2712_v1  ;;  %v9028_v48 = vld [vmem:[#allocation131_spill] sm:$0xff]  ;;  %v7741_v60 = vpop.permute.xlu0 %2921 }
 0x3c4   :  { %v2720_v32 = vadd.f32 %v2717_v4, %v2679_v49  ;;  %v2728_v40 = vadd.f32 %v2725_v23, %v2687_v63  ;;  %v2753_v59 = vsel %vm429_vm6, %v7607_v54, %v7585_v62  ;;  %v2751_v2 = vsel %vm429_vm6, %v7617_v36, %v7607_v54  ;;  %v9030_v63 = vld [vmem:[#allocation133_spill] sm:$0xff]  ;;  %v7724_v7 = vpop.permute.xlu1 %2884  ;;  %v9032_v4 = vld [vmem:[#allocation135_spill] sm:$0xff]  ;;  %v9033_v23 = vld [vmem:[#allocation136_spill] sm:$0xff] }
 0x3c5   :  { %v2736_v25 = vadd.f32 %v2733_v51, %v2695_v26  ;;  %v2743_v56 = vadd.f32 %v2740_v16, %v2702_v9  ;;  %v2744_v20 = vadd.f32 %v2741_v37, %v2703_v21  ;;  %v2758_v22 = vmul.f32 %v9028_v48, %v2753_v59  ;;  %v9034_v51 = vld [vmem:[#allocation137_spill] sm:$0xff]  ;;  %v9035_v37 = vld [vmem:[#allocation138_spill] sm:$0xff] }
 0x3c6   :  { %v2766_v49 = vmul.f32 %v9029_v28, %v2753_v59  ;;  %v2774_v50 = vmul.f32 %v9030_v63, %v2753_v59  ;;  %v2782_v45 = vmul.f32 %v9031_v58, %v2753_v59  ;;  %v2752_v52 = vsel %vm429_vm6, %v7585_v62, %v7617_v36 }
 0x3c7   :  { %v2761_v43 = vadd.f32 %v2758_v22, %v2720_v32  ;;  %v2756_v54 = vmul.f32 %v9028_v48, %v2752_v52  ;;  %v2757_v26 = vmul.f32 %v9028_v48, %v2751_v2  ;;  %v2764_v21 = vmul.f32 %v9029_v28, %v2752_v52 }
 0x3c8   :  { %v2769_v24 = vadd.f32 %v2766_v49, %v2728_v40  ;;  %v2777_v6 = vadd.f32 %v2774_v50, %v2736_v25  ;;  %v2785_v35 = vadd.f32 %v2782_v45, %v2744_v20  ;;  %v2765_v9 = vmul.f32 %v9029_v28, %v2751_v2  ;;  %v2926_v45 = vpop.permute.xlu0 %2925 }
 0x3c9   :  { %v2759_v57 = vadd.f32 %v2756_v54, %v2718_v46  ;;  %v2760_v31 = vadd.f32 %v2757_v26, %v2719_v18  ;;  %v2767_v44 = vadd.f32 %v2764_v21, %v2726_v8  ;;  %v2772_v34 = vmul.f32 %v9030_v63, %v2752_v52  ;;  %v9036_v54 = vld [vmem:[#allocation139_spill] sm:$0xff] }
 0x3ca   :  { %v2768_v62 = vadd.f32 %v2765_v9, %v2727_v30  ;;  %v2773_v36 = vmul.f32 %v9030_v63, %v2751_v2  ;;  %v2780_v19 = vmul.f32 %v9031_v58, %v2752_v52  ;;  %v2781_v39 = vmul.f32 %v9031_v58, %v2751_v2 }
 0x3cb   :  { %v2775_v27 = vadd.f32 %v2772_v34, %v2734_v14  ;;  %v2793_v1 = vsel %vm471_vm7, %v7637_v29, %v7624_v38  ;;  %v2792_v42 = vsel %vm471_vm7, %v7624_v38, %v7673_v15  ;;  %v2794_v33 = vsel %vm471_vm7, %v7673_v15, %v7637_v29  ;;  %v9039_v34 = vld [vmem:[#allocation142_spill] sm:$0xff] }
 0x3cc   :  { %v2776_v46 = vadd.f32 %v2773_v36, %v2735_v10  ;;  %v2783_v8 = vadd.f32 %v2780_v19, %v2742_v0  ;;  %v2784_v14 = vadd.f32 %v2781_v39, %v2743_v56  ;;  %v2797_v18 = vmul.f32 %v9032_v4, %v2793_v1  ;;  %v7751_v56 = vpop.permute.xlu1 %2923 }
 0x3cd   :  { %v2805_v30 = vmul.f32 %v9033_v23, %v2793_v1  ;;  %v2813_v16 = vmul.f32 %v9034_v51, %v2793_v1  ;;  %v2821_v32 = vmul.f32 %v9035_v37, %v2793_v1  ;;  %v2798_v38 = vmul.f32 %v9032_v4, %v2792_v42 }
 0x3ce   :  { %v2800_v40 = vadd.f32 %v2797_v18, %v2759_v57  ;;  %v2799_v59 = vmul.f32 %v9032_v4, %v2794_v33  ;;  %v2806_v29 = vmul.f32 %v9033_v23, %v2792_v42  ;;  %v2807_v15 = vmul.f32 %v9033_v23, %v2794_v33 }
 0x3cf   :  { %v2808_v10 = vadd.f32 %v2805_v30, %v2767_v44  ;;  %v2816_v0 = vadd.f32 %v2813_v16, %v2775_v27  ;;  %v2824_v2 = vadd.f32 %v2821_v32, %v2783_v8  ;;  %v2801_v25 = vadd.f32 %v2798_v38, %v2760_v31 }
 0x3d0   :  { %v2802_v20 = vadd.f32 %v2799_v59, %v2761_v43  ;;  %v2809_v48 = vadd.f32 %v2806_v29, %v2768_v62  ;;  %v2810_v22 = vadd.f32 %v2807_v15, %v2769_v24  ;;  %v2814_v28 = vmul.f32 %v9034_v51, %v2792_v42  ;;  %v9037_v43 = vld [vmem:[#allocation140_spill] sm:$0xff]  ;;  %v9038_v24 = vld [vmem:[#allocation141_spill] sm:$0xff]  ;;  %v9040_v29 = vld [vmem:[#allocation143_spill] sm:$0xff] }
 0x3d1   :  { %v2815_v49 = vmul.f32 %v9034_v51, %v2794_v33  ;;  %v2822_v63 = vmul.f32 %v9035_v37, %v2792_v42  ;;  %v2823_v50 = vmul.f32 %v9035_v37, %v2794_v33  ;;  %v2847_v58 = vsel %vm157_vm0, %v7683_v53, %v7651_v12  ;;  %v7775_v33 = vpop.permute.xlu1 %2962 }
 0x3d2   :  { %v2817_v52 = vadd.f32 %v2814_v28, %v2776_v46  ;;  %v2850_v26 = vmul.f32 %v9036_v54, %v2847_v58  ;;  %v2858_v21 = vmul.f32 %v9037_v43, %v2847_v58  ;;  %v2866_v9 = vmul.f32 %v9038_v24, %v2847_v58 }
 0x3d3   :  { %v2818_v57 = vadd.f32 %v2815_v49, %v2777_v6  ;;  %v2825_v31 = vadd.f32 %v2822_v63, %v2784_v14  ;;  %v2826_v44 = vadd.f32 %v2823_v50, %v2785_v35  ;;  %v2874_v62 = vmul.f32 %v9039_v34, %v2847_v58 }
 0x3d4   :  { %v2853_v36 = vadd.f32 %v2850_v26, %v2800_v40  ;;  %v2861_v19 = vadd.f32 %v2858_v21, %v2808_v10  ;;  %v2869_v39 = vadd.f32 %v2866_v9, %v2816_v0  ;;  %v2845_v27 = vsel %vm157_vm0, %v7685_v61, %v7683_v53  ;;  %v9041_v10 = vld [vmem:[#allocation144_spill] sm:$0xff] }
 0x3d5   :  { %v2877_v1 = vadd.f32 %v2874_v62, %v2824_v2  ;;  %v2846_v42 = vsel %vm157_vm0, %v7651_v12, %v7685_v61  ;;  %v2852_v6 = vmul.f32 %v9036_v54, %v2845_v27  ;;  %v2860_v35 = vmul.f32 %v9037_v43, %v2845_v27  ;;  %v7783_v61 = vpop.permute.xlu0 %2964  ;;  %v9042_v2 = vld [vmem:[#allocation145_spill] sm:$0xff] }
 0x3d6   :  { %v2851_v46 = vmul.f32 %v9036_v54, %v2846_v42  ;;  %v2859_v8 = vmul.f32 %v9037_v43, %v2846_v42  ;;  %v2867_v14 = vmul.f32 %v9038_v24, %v2846_v42  ;;  %v2868_v53 = vmul.f32 %v9038_v24, %v2845_v27 }
 0x3d7   :  { %v2855_v4 = vadd.f32 %v2852_v6, %v2802_v20  ;;  %v2863_v18 = vadd.f32 %v2860_v35, %v2810_v22  ;;  %v2875_v23 = vmul.f32 %v9039_v34, %v2846_v42  ;;  %v2876_v12 = vmul.f32 %v9039_v34, %v2845_v27  ;;  %v9043_v20 = vld [vmem:[#allocation146_spill] sm:$0xff] }
 0x3d8   :  { %v2854_v30 = vadd.f32 %v2851_v46, %v2801_v25  ;;  %v2862_v51 = vadd.f32 %v2859_v8, %v2809_v48  ;;  %v2870_v16 = vadd.f32 %v2867_v14, %v2817_v52  ;;  %v2871_v37 = vadd.f32 %v2868_v53, %v2818_v57  ;;  %v9044_v46 = vld [vmem:[#allocation147_spill] sm:$0xff]  ;;  %v9045_v14 = vld [vmem:[#allocation148_spill] sm:$0xff] }
 0x3d9   :  { %v2878_v32 = vadd.f32 %v2875_v23, %v2825_v31  ;;  %v2879_v38 = vadd.f32 %v2876_v12, %v2826_v44  ;;  %v2887_v40 = vsel %vm187_vm1, %v7699_v17, %v7710_v41  ;;  %v2886_v59 = vsel %vm187_vm1, %v7710_v41, %v7724_v7  ;;  %v2967_v41 = vpop.permute.xlu1 %2966  ;;  %v7806_v9 = vpop.permute.xlu0 %3071  ;;  %v9047_v23 = vld [vmem:[#allocation150_spill] sm:$0xff] }
 0x3da   :  { %v2892_v15 = vmul.f32 %v9040_v29, %v2887_v40  ;;  %v2900_v0 = vmul.f32 %v9041_v10, %v2887_v40  ;;  %v2908_v25 = vmul.f32 %v9042_v2, %v2887_v40  ;;  %v2916_v48 = vmul.f32 %v9043_v20, %v2887_v40 }
 0x3db   :  { %v2888_v22 = vsel %vm187_vm1, %v7724_v7, %v7699_v17  ;;  %v2893_v28 = vmul.f32 %v9040_v29, %v2886_v59  ;;  %v2901_v49 = vmul.f32 %v9041_v10, %v2886_v59  ;;  %v2909_v63 = vmul.f32 %v9042_v2, %v2886_v59 }
 0x3dc   :  { %v2895_v50 = vadd.f32 %v2892_v15, %v2854_v30  ;;  %v2903_v58 = vadd.f32 %v2900_v0, %v2862_v51  ;;  %v2911_v52 = vadd.f32 %v2908_v25, %v2870_v16  ;;  %v2919_v54 = vadd.f32 %v2916_v48, %v2878_v32 }
 0x3dd   :  { %v2891_v26 = vmul.f32 %v9040_v29, %v2888_v22  ;;  %v2896_v43 = vadd.f32 %v2893_v28, %v2855_v4  ;;  %v2899_v21 = vmul.f32 %v9041_v10, %v2888_v22  ;;  %v2904_v24 = vadd.f32 %v2901_v49, %v2863_v18  ;;  %v9046_v4 = vld [vmem:[#allocation149_spill] sm:$0xff]  ;;  %v7825_v12 = vpop.permute.xlu1 %3073 }
 0x3de   :  { %v2907_v17 = vmul.f32 %v9042_v2, %v2888_v22  ;;  %v2912_v7 = vadd.f32 %v2909_v63, %v2871_v37  ;;  %v2915_v57 = vmul.f32 %v9043_v20, %v2888_v22  ;;  %v2917_v31 = vmul.f32 %v9043_v20, %v2886_v59  ;;  %v9048_v63 = vld [vmem:[#allocation151_spill] sm:$0xff] }
 0x3df   :  { %v2894_v44 = vadd.f32 %v2891_v26, %v2853_v36  ;;  %v2902_v34 = vadd.f32 %v2899_v21, %v2861_v19  ;;  %v2929_v62 = vsel %vm229_vm2, %v2926_v45, %v7741_v60  ;;  %v2927_v27 = vsel %vm229_vm2, %v7751_v56, %v2926_v45 }
 0x3e0   :  { %v2910_v42 = vadd.f32 %v2907_v17, %v2869_v39  ;;  %v2918_v6 = vadd.f32 %v2915_v57, %v2877_v1  ;;  %v2920_v35 = vadd.f32 %v2917_v31, %v2879_v38  ;;  %v2932_v8 = vmul.f32 %v9044_v46, %v2929_v62  ;;  %v7831_v38 = vpop.permute.xlu0 %3075 }
 0x3e1   :  { %v2940_v53 = vmul.f32 %v9045_v14, %v2929_v62  ;;  %v2948_v18 = vmul.f32 %v9046_v4, %v2929_v62  ;;  %v2956_v36 = vmul.f32 %v9047_v23, %v2929_v62  ;;  %v2928_v19 = vsel %vm229_vm2, %v7741_v60, %v7751_v56 }
 0x3e2   :  { %v2935_v30 = vadd.f32 %v2932_v8, %v2894_v44  ;;  %v2933_v45 = vmul.f32 %v9044_v46, %v2928_v19  ;;  %v2934_v39 = vmul.f32 %v9044_v46, %v2927_v27  ;;  %v2941_v1 = vmul.f32 %v9045_v14, %v2928_v19  ;;  %v9049_v8 = vld [vmem:[#allocation70_spill] sm:$0xff] }
 0x3e3   :  { %v2943_v51 = vadd.f32 %v2940_v53, %v2902_v34  ;;  %v2951_v16 = vadd.f32 %v2948_v18, %v2910_v42  ;;  %v2959_v37 = vadd.f32 %v2956_v36, %v2918_v6  ;;  %v2942_v32 = vmul.f32 %v9045_v14, %v2927_v27 }
 0x3e4   :  { %v2936_v40 = vadd.f32 %v2933_v45, %v2895_v50  ;;  %v2937_v59 = vadd.f32 %v2934_v39, %v2896_v43  ;;  %v2944_v29 = vadd.f32 %v2941_v1, %v2903_v58  ;;  %v2949_v60 = vmul.f32 %v9046_v4, %v2928_v19  ;;  %v7852_v58 = vpop.permute.xlu1 %3112 }
 0x3e5   :  { %v2945_v56 = vadd.f32 %v2942_v32, %v2904_v24  ;;  %v2950_v15 = vmul.f32 %v9046_v4, %v2927_v27  ;;  %v2957_v10 = vmul.f32 %v9047_v23, %v2928_v19  ;;  %v2958_v0 = vmul.f32 %v9047_v23, %v2927_v27  ;;  %v9051_v4 = vld [vmem:[#allocation72_spill] sm:$0xff] }
 0x3e6   :  { %v2952_v2 = vadd.f32 %v2949_v60, %v2911_v52  ;;  %v2969_v25 = vsel %vm271_vm3, %v7775_v33, %v7783_v61  ;;  %v2968_v20 = vsel %vm271_vm3, %v7783_v61, %v2967_v41  ;;  %v2970_v48 = vsel %vm271_vm3, %v2967_v41, %v7775_v33 }
 0x3e7   :  { %v2953_v22 = vadd.f32 %v2950_v15, %v2912_v7  ;;  %v2960_v28 = vadd.f32 %v2957_v10, %v2919_v54  ;;  %v2961_v49 = vadd.f32 %v2958_v0, %v2920_v35  ;;  %v2974_v50 = vmul.f32 %v9048_v63, %v2969_v25  ;;  %v7861_v54 = vpop.permute.xlu0 %3114  ;;  %v9057_v15 = vld [vmem:[#allocation75_spill] sm:$0xff] }
 0x3e8   :  { %v2982_v52 = vmul.f32 %v7271_v47, %v2969_v25  ;;  %v2990_v26 = vmul.f32 %v7298_v55, %v2969_v25  ;;  %v2998_v43 = vmul.f32 %v7301_v11, %v2969_v25  ;;  %v2973_v21 = vmul.f32 %v9048_v63, %v2970_v48  ;;  %v3117_v19 = vpop.permute.xlu1 %3116 }
 0x3e9   :  { %v2977_v61 = vadd.f32 %v2974_v50, %v2936_v40  ;;  %v2975_v24 = vmul.f32 %v9048_v63, %v2968_v20  ;;  %v2981_v33 = vmul.f32 %v7271_v47, %v2970_v48  ;;  %v2983_v41 = vmul.f32 %v7271_v47, %v2968_v20  ;;  %v9053_v40 = vld [vmem:[#allocation73_spill] sm:$0xff]  ;;  %v9063_v50 = vld [vmem:[#allocation78_spill] sm:$0xff] }
 0x3ea   :  { %v2985_v17 = vadd.f32 %v2982_v52, %v2944_v29  ;;  %v2993_v7 = vadd.f32 %v2990_v26, %v2952_v2  ;;  %v3001_v57 = vadd.f32 %v2998_v43, %v2960_v28  ;;  %v2976_v31 = vadd.f32 %v2973_v21, %v2935_v30  ;;  %v9055_v29 = vld [vmem:[#allocation74_spill] sm:$0xff]  ;;  %v9059_v2 = vld [vmem:[#allocation76_spill] sm:$0xff]  ;;  %v9061_v28 = vld [vmem:[#allocation77_spill] sm:$0xff] }
 0x3eb   :  { %v2978_v44 = vadd.f32 %v2975_v24, %v2937_v59  ;;  %v2984_v34 = vadd.f32 %v2981_v33, %v2943_v51  ;;  %v2986_v62 = vadd.f32 %v2983_v41, %v2945_v56  ;;  %v2989_v27 = vmul.f32 %v7298_v55, %v2970_v48  ;;  %v7885_v32 = vpop.permute.xlu0 %3153  ;;  %v9065_v24 = vld [vmem:[#allocation79_spill] sm:$0xff] }
 0x3ec   :  { %v2991_v42 = vmul.f32 %v7298_v55, %v2968_v20  ;;  %v2997_v6 = vmul.f32 %v7301_v11, %v2970_v48  ;;  %v2999_v35 = vmul.f32 %v7301_v11, %v2968_v20  ;;  %v3097_v46 = vstv %s7834_s25  ;;  %s8067_s25 = sld [smem:[#allocation14 + $0x44]] }
 0x3ed   :  { %v2992_v47 = vadd.f32 %v2989_v27, %v2951_v16  ;;  %v9050_v14 = vrot.slane %v9049_v8, 4  ;;  %v9052_v18 = vrot.slane %v9051_v4, 4  ;;  %v3105_v36 = vstv %s7839_s8  ;;  %s8069_s8 = sld [smem:[#allocation14 + $0x68]] }
 0x3ee   :  { %v2994_v30 = vadd.f32 %v2991_v42, %v2953_v22  ;;  %v3000_v45 = vadd.f32 %v2997_v6, %v2959_v37  ;;  %v3002_v39 = vadd.f32 %v2999_v35, %v2961_v49  ;;  %v3079_v55 = vsel %vm345_vm4, %v7831_v38, %v7806_v9  ;;  %v9071_v6 = vld [vmem:[#allocation83_spill] sm:$0xff] }
 0x3ef   :  { %v3019_v53 = vadd.f32 %v9050_v14, %v2978_v44  ;;  %v3036_v23 = vadd.f32 %v9052_v18, %v2986_v62  ;;  %v3084_v11 = vmul.f32 %v7304_v5, %v3079_v55  ;;  %v3092_v1 = vmul.f32 %v7324_v3, %v3079_v55  ;;  %v9069_v62 = vld [vmem:[#allocation82_spill] sm:$0xff] }
 0x3f0   :  { %v3100_v51 = vmul.f32 %v3097_v46, %v3079_v55  ;;  %v3108_v16 = vmul.f32 %v3105_v36, %v3079_v55  ;;  %v9054_v37 = vrot.slane %v9053_v40, 4  ;;  %v9056_v60 = vrot.slane %v9055_v29, 4 }
 0x3f1   :  { %v9058_v10 = vrot.slane %v9057_v15, 4  ;;  %v9060_v25 = vrot.slane %v9059_v2, 4  ;;  %v3087_v48 = vadd.f32 %v3084_v11, %v3019_v53  ;;  %v3095_v22 = vadd.f32 %v3092_v1, %v3036_v23 }
 0x3f2   :  { %v3053_v59 = vadd.f32 %v9054_v37, %v2994_v30  ;;  %v3070_v56 = vadd.f32 %v9056_v60, %v3002_v39  ;;  %v9062_v49 = vrot.slane %v9061_v28, 4  ;;  %v9064_v52 = vrot.slane %v9063_v50, 4 }
 0x3f3   :  { %v3017_v0 = vadd.f32 %v9058_v10, %v2976_v31  ;;  %v3018_v20 = vadd.f32 %v9060_v25, %v2977_v61  ;;  %v9066_v33 = vrot.slane %v9065_v24, 4  ;;  %v9067_v61 = vld [vmem:[#allocation80_spill] sm:$0xff]  ;;  %v9070_v27 = vrot.slane %v9069_v62, 4 }
 0x3f4   :  { %v3034_v63 = vadd.f32 %v9062_v49, %v2984_v34  ;;  %v3035_v26 = vadd.f32 %v9064_v52, %v2985_v17  ;;  %v7903_v43 = vadd.f32 %v3100_v51, %v3053_v59  ;;  %v7905_v21 = vadd.f32 %v3108_v16, %v3070_v56 }
 0x3f5   :  { %v3051_v41 = vadd.f32 %v9066_v33, %v2992_v47  ;;  %v9068_v31 = vrot.slane %v9067_v61, 4  ;;  %v3068_v42 = vadd.f32 %v9070_v27, %v3000_v45  ;;  %v9072_v34 = vrot.slane %v9071_v6, 4  ;;  %v7923_v47 = vpop.permute.xlu1 %3155 }
 0x3f6   :  { %v3077_v17 = vsel %vm345_vm4, %v7825_v12, %v7831_v38  ;;  %v3078_v8 = vsel %vm345_vm4, %v7806_v9, %v7825_v12  ;;  %v3158_v9 = vpop.permute.xlu0 %3157  ;;  %v3130_v1 = vstv %s7879_s12  ;;  %v3146_v51 = vstv %s7895_s13  ;;  %s8087_s12 = sld [smem:[#allocation14 + $0x21]] }
 0x3f7   :  { %v3052_v44 = vadd.f32 %v9068_v31, %v2993_v7  ;;  %v3069_v35 = vadd.f32 %v9072_v34, %v3001_v57  ;;  %v3082_v7 = vmul.f32 %v7304_v5, %v3078_v8  ;;  %v3083_v14 = vmul.f32 %v7304_v5, %v3077_v17  ;;  %s8104_s13 = sld [smem:[#allocation14 + $0x69]] }
 0x3f8   :  { %v3090_v53 = vmul.f32 %v7324_v3, %v3078_v8  ;;  %v3091_v57 = vmul.f32 %v7324_v3, %v3077_v17  ;;  %v3098_v4 = vmul.f32 %v3097_v46, %v3078_v8  ;;  %v3099_v18 = vmul.f32 %v3097_v46, %v3077_v17 }
 0x3f9   :  { %v3106_v38 = vmul.f32 %v3105_v36, %v3078_v8  ;;  %v3107_v23 = vmul.f32 %v3105_v36, %v3077_v17  ;;  %v3085_v12 = vadd.f32 %v3082_v7, %v3017_v0  ;;  %v3086_v30 = vadd.f32 %v3083_v14, %v3018_v20  ;;  %v7952_v29 = vpop.permute.xlu1 %3194 }
 0x3fa   :  { %v3093_v45 = vadd.f32 %v3090_v53, %v3034_v63  ;;  %v3094_v5 = vadd.f32 %v3091_v57, %v3035_v26  ;;  %v3101_v39 = vadd.f32 %v3098_v4, %v3051_v41  ;;  %v3102_v3 = vadd.f32 %v3099_v18, %v3052_v44  ;;  %v3197_v20 = vpop.permute.xlu0 %3196 }
 0x3fb   :  { %v3109_v55 = vadd.f32 %v3106_v38, %v3068_v42  ;;  %v3110_v11 = vadd.f32 %v3107_v23, %v3069_v35  ;;  %v3122_v46 = vstv %s7873_s10  ;;  %v3138_v36 = vstv %s7883_s4  ;;  %s8077_s10 = sld [smem:[#allocation14 + $0x8c]] }
 0x3fc   :  { %v3119_v16 = vsel %vm387_vm5, %v7852_v58, %v7861_v54  ;;  %v3118_v40 = vsel %vm387_vm5, %v7861_v54, %v3117_v19  ;;  %v3120_v37 = vsel %vm387_vm5, %v3117_v19, %v7852_v58  ;;  %v3163_v59 = vstv %s7901_s18  ;;  %s8093_s4 = sld [smem:[#allocation14 + $0x45]] }
 0x3fd   :  { %v3123_v60 = vmul.f32 %v3122_v46, %v3119_v16  ;;  %v3131_v56 = vmul.f32 %v3130_v1, %v3119_v16  ;;  %v3139_v15 = vmul.f32 %v3138_v36, %v3119_v16  ;;  %v3147_v10 = vmul.f32 %v3146_v51, %v3119_v16  ;;  %v3199_v42 = vpop.permute.xlu1 %3198  ;;  %s8106_s18 = sld [smem:[#allocation14 + $0x8d]] }
 0x3fe   :  { %v3124_v0 = vmul.f32 %v3122_v46, %v3118_v40  ;;  %v3125_v2 = vmul.f32 %v3122_v46, %v3120_v37  ;;  %v3132_v25 = vmul.f32 %v3130_v1, %v3118_v40  ;;  %v3133_v54 = vmul.f32 %v3130_v1, %v3120_v37  ;;  %v7968_v14 = vpop.permute.xlu0 %3247 }
 0x3ff   :  { %v3126_v58 = vadd.f32 %v3123_v60, %v3085_v12  ;;  %v3134_v19 = vadd.f32 %v3131_v56, %v3093_v45  ;;  %v3142_v28 = vadd.f32 %v3139_v15, %v3101_v39  ;;  %v3150_v49 = vadd.f32 %v3147_v10, %v3109_v55 }
 0x400   :  { %v3127_v63 = vadd.f32 %v3124_v0, %v3086_v30  ;;  %v3128_v50 = vadd.f32 %v3125_v2, %v3087_v48  ;;  %v3135_v52 = vadd.f32 %v3132_v25, %v3094_v5  ;;  %v3136_v26 = vadd.f32 %v3133_v54, %v3095_v22 }
 0x401   :  { %v3140_v24 = vmul.f32 %v3138_v36, %v3118_v40  ;;  %v3141_v33 = vmul.f32 %v3138_v36, %v3120_v37  ;;  %v3148_v41 = vmul.f32 %v3146_v51, %v3118_v40  ;;  %v3149_v61 = vmul.f32 %v3146_v51, %v3120_v37 }
 0x402   :  { %v3171_v31 = vstv %s7929_s2  ;;  %v3179_v44 = vstv %s7931_s19  ;;  %v3187_v62 = vstv %s7933_s0  ;;  %v3161_v27 = vsel %vm429_vm6, %v3158_v9, %v7885_v32  ;;  %v3252_v37 = vpop.permute.xlu0 %3251  ;;  %s8116_s2 = sld [smem:[#allocation14 + $0x22]] }
 0x403   :  { %v3143_v6 = vadd.f32 %v3140_v24, %v3102_v3  ;;  %v3144_v48 = vadd.f32 %v3141_v33, %v7903_v43  ;;  %v3151_v22 = vadd.f32 %v3148_v41, %v3110_v11  ;;  %v3152_v34 = vadd.f32 %v3149_v61, %v7905_v21  ;;  %v3250_v11 = vpop.permute.xlu1 %3249  ;;  %s8131_s19 = sld [smem:[#allocation14 + $0x46]] }
 0x404   :  { %v3166_v35 = vmul.f32 %v3163_v59, %v3161_v27  ;;  %v3174_v17 = vmul.f32 %v3171_v31, %v3161_v27  ;;  %v3182_v8 = vmul.f32 %v3179_v44, %v3161_v27  ;;  %v3190_v7 = vmul.f32 %v3187_v62, %v3161_v27  ;;  %s8133_s0 = sld [smem:[#allocation14 + $0x6a]] }
 0x405   :  { %v3159_v53 = vsel %vm429_vm6, %v7923_v47, %v3158_v9  ;;  %v3160_v43 = vsel %vm429_vm6, %v7885_v32, %v7923_v47  ;;  %v3204_v57 = vstv %s7950_s27  ;;  %v3212_v4 = vstv %s7954_s23  ;;  %s8135_s27 = sld [smem:[#allocation14 + $0x8e]] }
 0x406   :  { %v3169_v21 = vadd.f32 %v3166_v35, %v3128_v50  ;;  %v3177_v18 = vadd.f32 %v3174_v17, %v3136_v26  ;;  %v3185_v38 = vadd.f32 %v3182_v8, %v3144_v48  ;;  %v3193_v23 = vadd.f32 %v3190_v7, %v3152_v34  ;;  %s8148_s23 = sld [smem:[#allocation14 + $0x23]] }
 0x407   :  { %v3164_v12 = vmul.f32 %v3163_v59, %v3160_v43  ;;  %v3165_v30 = vmul.f32 %v3163_v59, %v3159_v53  ;;  %v3172_v45 = vmul.f32 %v3171_v31, %v3160_v43  ;;  %v3173_v5 = vmul.f32 %v3171_v31, %v3159_v53 }
 0x408   :  { %v3180_v39 = vmul.f32 %v3179_v44, %v3160_v43  ;;  %v3181_v3 = vmul.f32 %v3179_v44, %v3159_v53  ;;  %v3188_v55 = vmul.f32 %v3187_v62, %v3160_v43  ;;  %v3189_v9 = vmul.f32 %v3187_v62, %v3159_v53  ;;  %v3291_v62 = vpop.permute.xlu0 %3290 }
 0x409   :  { %v3167_v32 = vadd.f32 %v3164_v12, %v3126_v58  ;;  %v3168_v47 = vadd.f32 %v3165_v30, %v3127_v63  ;;  %v3175_v46 = vadd.f32 %v3172_v45, %v3134_v19  ;;  %v3176_v1 = vadd.f32 %v3173_v5, %v3135_v52 }
 0x40a   :  { %v3183_v36 = vadd.f32 %v3180_v39, %v3142_v28  ;;  %v3184_v51 = vadd.f32 %v3181_v3, %v3143_v6  ;;  %v3191_v16 = vadd.f32 %v3188_v55, %v3150_v49  ;;  %v3192_v40 = vadd.f32 %v3189_v9, %v3151_v22 }
 0x40b   :  { %v3220_v59 = vstv %s7962_s3  ;;  %v3228_v60 = vstv %s7966_s28  ;;  %v3201_v56 = vsel %vm471_vm7, %v7952_v29, %v3197_v20  ;;  %v3200_v15 = vsel %vm471_vm7, %v3197_v20, %v3199_v42  ;;  %v7999_v20 = vpop.permute.xlu1 %3288  ;;  %s8150_s3 = sld [smem:[#allocation14 + $0x47]] }
 0x40c   :  { %v3205_v10 = vmul.f32 %v3204_v57, %v3201_v56  ;;  %v3213_v0 = vmul.f32 %v3212_v4, %v3201_v56  ;;  %v3221_v2 = vmul.f32 %v3220_v59, %v3201_v56  ;;  %v3229_v25 = vmul.f32 %v3228_v60, %v3201_v56  ;;  %s8152_s28 = sld [smem:[#allocation14 + $0x6b]] }
 0x40d   :  { %v3202_v54 = vsel %vm471_vm7, %v3199_v42, %v7952_v29  ;;  %v3206_v58 = vmul.f32 %v3204_v57, %v3200_v15  ;;  %v3214_v19 = vmul.f32 %v3212_v4, %v3200_v15  ;;  %v3222_v28 = vmul.f32 %v3220_v59, %v3200_v15 }
 0x40e   :  { %v3208_v49 = vadd.f32 %v3205_v10, %v3167_v32  ;;  %v3216_v63 = vadd.f32 %v3213_v0, %v3175_v46  ;;  %v3224_v50 = vadd.f32 %v3221_v2, %v3183_v36  ;;  %v3232_v52 = vadd.f32 %v3229_v25, %v3191_v16 }
 0x40f   :  { %v3207_v26 = vmul.f32 %v3204_v57, %v3202_v54  ;;  %v3209_v24 = vadd.f32 %v3206_v58, %v3168_v47  ;;  %v3215_v33 = vmul.f32 %v3212_v4, %v3202_v54  ;;  %v3217_v41 = vadd.f32 %v3214_v19, %v3176_v1 }
 0x410   :  { %v3223_v29 = vmul.f32 %v3220_v59, %v3202_v54  ;;  %v3225_v61 = vadd.f32 %v3222_v28, %v3184_v51  ;;  %v3230_v31 = vmul.f32 %v3228_v60, %v3200_v15  ;;  %v3231_v44 = vmul.f32 %v3228_v60, %v3202_v54 }
 0x411   :  { %v3210_v27 = vadd.f32 %v3207_v26, %v3169_v21  ;;  %v3218_v42 = vadd.f32 %v3215_v33, %v3177_v18  ;;  %v3257_v6 = vstv %s7979_s21  ;;  %v3265_v48 = vstv %s7981_s5  ;;  %s8154_s21 = sld [smem:[#allocation14 + $0x8f]] }
 0x412   :  { %v3226_v22 = vadd.f32 %v3223_v29, %v3185_v38  ;;  %v3233_v34 = vadd.f32 %v3230_v31, %v3192_v40  ;;  %v3234_v35 = vadd.f32 %v3231_v44, %v3193_v23  ;;  %v3273_v17 = vstv %s7983_s30  ;;  %v3293_v38 = vpop.permute.xlu1 %3292  ;;  %s8156_s5 = sld [smem:[#allocation16]] }
 0x413   :  { %v3281_v8 = vstv %s7992_s9  ;;  %v3255_v7 = vsel %vm157_vm0, %v3252_v37, %v7968_v14  ;;  %v3253_v53 = vsel %vm157_vm0, %v3250_v11, %v3252_v37  ;;  %v3254_v43 = vsel %vm157_vm0, %v7968_v14, %v3250_v11  ;;  %v8021_v14 = vpop.permute.xlu0 %3329  ;;  %s8163_s30 = sld [smem:[#allocation16 + $0x1]] }
 0x414   :  { %v3258_v57 = vmul.f32 %v3257_v6, %v3255_v7  ;;  %v3266_v4 = vmul.f32 %v3265_v48, %v3255_v7  ;;  %v3274_v21 = vmul.f32 %v3273_v17, %v3255_v7  ;;  %v3282_v18 = vmul.f32 %v3281_v8, %v3255_v7  ;;  %s8167_s9 = sld [smem:[#allocation16 + $0x2]] }
 0x415   :  { %v3259_v23 = vmul.f32 %v3257_v6, %v3254_v43  ;;  %v3260_v12 = vmul.f32 %v3257_v6, %v3253_v53  ;;  %v3267_v30 = vmul.f32 %v3265_v48, %v3254_v43  ;;  %v3268_v45 = vmul.f32 %v3265_v48, %v3253_v53 }
 0x416   :  { %v3261_v5 = vadd.f32 %v3258_v57, %v3208_v49  ;;  %v3269_v39 = vadd.f32 %v3266_v4, %v3216_v63  ;;  %v3277_v3 = vadd.f32 %v3274_v21, %v3224_v50  ;;  %v3285_v55 = vadd.f32 %v3282_v18, %v3232_v52  ;;  %v3332_v0 = vpop.permute.xlu1 %3331 }
 0x417   :  { %v3262_v9 = vadd.f32 %v3259_v23, %v3209_v24  ;;  %v3263_v11 = vadd.f32 %v3260_v12, %v3210_v27  ;;  %v3270_v32 = vadd.f32 %v3267_v30, %v3217_v41  ;;  %v3271_v47 = vadd.f32 %v3268_v45, %v3218_v42  ;;  %v3334_v50 = vpop.permute.xlu0 %3333 }
 0x418   :  { %v3275_v46 = vmul.f32 %v3273_v17, %v3254_v43  ;;  %v3276_v1 = vmul.f32 %v3273_v17, %v3253_v53  ;;  %v3283_v36 = vmul.f32 %v3281_v8, %v3254_v43  ;;  %v3284_v51 = vmul.f32 %v3281_v8, %v3253_v53 }
 0x419   :  { %v3298_v16 = vstv %s7997_s14  ;;  %v3306_v40 = vstv %s8001_s1  ;;  %v3314_v37 = vstv %s8003_s20  ;;  %v3322_v59 = vstv %s8007_s16  ;;  %s8169_s14 = sld [smem:[#allocation16 + $0x3]] }
 0x41a   :  { %v3278_v60 = vadd.f32 %v3275_v46, %v3225_v61  ;;  %v3279_v56 = vadd.f32 %v3276_v1, %v3226_v22  ;;  %v3286_v15 = vadd.f32 %v3283_v36, %v3233_v34  ;;  %v3287_v10 = vadd.f32 %v3284_v51, %v3234_v35  ;;  %v3371_v34 = vpop.permute.xlu1 %3370  ;;  %s4254_s1 = sld [smem:[#allocation17 + $0x1]] }
 0x41b   :  { %v3295_v2 = vsel %vm187_vm1, %v7999_v20, %v3291_v62  ;;  %v3294_v25 = vsel %vm187_vm1, %v3291_v62, %v3293_v38  ;;  %v3296_v54 = vsel %vm187_vm1, %v3293_v38, %v7999_v20  ;;  %v3339_v58 = vstv %s8019_s6  ;;  %v3373_v21 = vpop.permute.xlu0 %3372  ;;  %s4255_s20 = sld [smem:[#allocation19 + $0x1]] }
 0x41c   :  { %v3300_v19 = vmul.f32 %v3298_v16, %v3295_v2  ;;  %v3308_v28 = vmul.f32 %v3306_v40, %v3295_v2  ;;  %v3316_v49 = vmul.f32 %v3314_v37, %v3295_v2  ;;  %v3324_v63 = vmul.f32 %v3322_v59, %v3295_v2  ;;  %s4260_s16 = sld [smem:[#allocation17 + $0x3]] }
 0x41d   :  { %v3299_v52 = vmul.f32 %v3298_v16, %v3296_v54  ;;  %v3301_v26 = vmul.f32 %v3298_v16, %v3294_v25  ;;  %v3307_v24 = vmul.f32 %v3306_v40, %v3296_v54  ;;  %v3309_v33 = vmul.f32 %v3306_v40, %v3294_v25  ;;  %s8293_s6 = sld [smem:[#allocation19 + $0x3]] }
 0x41e   :  { %v3303_v41 = vadd.f32 %v3300_v19, %v3262_v9  ;;  %v3311_v29 = vadd.f32 %v3308_v28, %v3270_v32  ;;  %v3319_v20 = vadd.f32 %v3316_v49, %v3278_v60  ;;  %v3327_v61 = vadd.f32 %v3324_v63, %v3286_v15  ;;  %v3375_v36 = vpop.permute.xlu1 %3374 }
 0x41f   :  { %v3302_v31 = vadd.f32 %v3299_v52, %v3261_v5  ;;  %v3304_v44 = vadd.f32 %v3301_v26, %v3263_v11  ;;  %v3310_v62 = vadd.f32 %v3307_v24, %v3269_v39  ;;  %v3312_v27 = vadd.f32 %v3309_v33, %v3271_v47  ;;  %v8065_v15 = vpop.permute.xlu0 %3479 }
 0x420   :  { %v3315_v42 = vmul.f32 %v3314_v37, %v3296_v54  ;;  %v3317_v6 = vmul.f32 %v3314_v37, %v3294_v25  ;;  %v3323_v48 = vmul.f32 %v3322_v59, %v3296_v54  ;;  %v3325_v22 = vmul.f32 %v3322_v59, %v3294_v25 }
 0x421   :  { %v3347_v35 = vstv %s8023_s11  ;;  %v3355_v17 = vstv %s8025_s29  ;;  %v3363_v8 = vstv %s8031_s26  ;;  %v3337_v7 = vsel %vm229_vm2, %v3334_v50, %v8021_v14  ;;  %s8295_s11 = sld [smem:[#allocation17 + $0x2]] }
 0x422   :  { %v3318_v53 = vadd.f32 %v3315_v42, %v3277_v3  ;;  %v3320_v43 = vadd.f32 %v3317_v6, %v3279_v56  ;;  %v3326_v57 = vadd.f32 %v3323_v48, %v3285_v55  ;;  %v3328_v4 = vadd.f32 %v3325_v22, %v3287_v10  ;;  %s8299_s29 = sld [smem:[#allocation17]] }
 0x423   :  { %v3340_v18 = vmul.f32 %v3339_v58, %v3337_v7  ;;  %v3348_v38 = vmul.f32 %v3347_v35, %v3337_v7  ;;  %v3356_v23 = vmul.f32 %v3355_v17, %v3337_v7  ;;  %v3364_v12 = vmul.f32 %v3363_v8, %v3337_v7  ;;  %v3484_v48 = vpop.permute.xlu0 %3483  ;;  %s8303_s26 = sld [smem:[#allocation19 + $0x2]] }
 0x424   :  { %v3335_v30 = vsel %vm229_vm2, %v3332_v0, %v3334_v50  ;;  %v3336_v45 = vsel %vm229_vm2, %v8021_v14, %v3332_v0  ;;  %v3380_v5 = vstv %s8042_s24  ;;  %v3388_v39 = vstv %s8044_s15  ;;  %s8306_s24 = sld [smem:[#allocation19]]  ;;  %s4465_s15 = smov [#allocation20]  }
 0x425   :  { %v3343_v3 = vadd.f32 %v3340_v18, %v3302_v31  ;;  %v3351_v9 = vadd.f32 %v3348_v38, %v3310_v62  ;;  %v3359_v55 = vadd.f32 %v3356_v23, %v3318_v53  ;;  %v3367_v11 = vadd.f32 %v3364_v12, %v3326_v57  ;;  %v9073_v53 = vld [vmem:[#allocation86_spill] sm:$0xff] }
 0x426   :  { %v3341_v32 = vmul.f32 %v3339_v58, %v3336_v45  ;;  %v3342_v47 = vmul.f32 %v3339_v58, %v3335_v30  ;;  %v3349_v46 = vmul.f32 %v3347_v35, %v3336_v45  ;;  %v3350_v1 = vmul.f32 %v3347_v35, %v3335_v30 }
 0x427   :  { %v3357_v51 = vmul.f32 %v3355_v17, %v3336_v45  ;;  %v3358_v16 = vmul.f32 %v3355_v17, %v3335_v30  ;;  %v3365_v40 = vmul.f32 %v3363_v8, %v3336_v45  ;;  %v3366_v37 = vmul.f32 %v3363_v8, %v3335_v30  ;;  %v9077_v30 = vld [vmem:[#allocation90_spill] sm:$0xff] }
 0x428   :  { %v3344_v14 = vadd.f32 %v3341_v32, %v3303_v41  ;;  %v3345_v59 = vadd.f32 %v3342_v47, %v3304_v44  ;;  %v3352_v60 = vadd.f32 %v3349_v46, %v3311_v29  ;;  %v3353_v56 = vadd.f32 %v3350_v1, %v3312_v27  ;;  %v3482_v29 = vpop.permute.xlu1 %3481 }
 0x429   :  { %v3360_v10 = vadd.f32 %v3357_v51, %v3319_v20  ;;  %v3361_v0 = vadd.f32 %v3358_v16, %v3320_v43  ;;  %v3368_v2 = vadd.f32 %v3365_v40, %v3327_v61  ;;  %v3369_v25 = vadd.f32 %v3366_v37, %v3328_v4  ;;  %v9075_v4 = vld [vmem:[#allocation87_spill] sm:$0xff]  ;;  %v9083_v40 = vld [vmem:[#allocation81_spill] sm:$0xff] }
 0x42a   :  { %v3396_v54 = vstv %s8052_s7  ;;  %v3404_v58 = vstv %s8054_s22  ;;  %v3377_v19 = vsel %vm271_vm3, %v3371_v34, %v3373_v21  ;;  %v3376_v28 = vsel %vm271_vm3, %v3373_v21, %v3375_v36  ;;  %s3944_s7 = sshll.u32 %s4465_s15, 4  ;;  %s3945_s7 = int_to_ptr.vmem [resolvable:$true] %s3944_s7 }
 0x42b   :  { %v3382_v49 = vmul.f32 %v3380_v5, %v3377_v19  ;;  %v3390_v63 = vmul.f32 %v3388_v39, %v3377_v19  ;;  %v3398_v50 = vmul.f32 %v3396_v54, %v3377_v19  ;;  %v3406_v52 = vmul.f32 %v3404_v58, %v3377_v19  ;;  %s4414_s22 = scalar_lea.vmem %s3945_s7, 384  ;;  %p4419_p13 = scmp.lt.s32.totalorder %s3945_s7, %s3945_s7 }
 0x42c   :  { %v3378_v26 = vsel %vm271_vm3, %v3375_v36, %v3371_v34  ;;  %v3383_v24 = vmul.f32 %v3380_v5, %v3376_v28  ;;  %v3391_v33 = vmul.f32 %v3388_v39, %v3376_v28  ;;  %v3399_v41 = vmul.f32 %v3396_v54, %v3376_v28  ;;  %p4415_p12 = scmp.ne.s32.totalorder %s3945_s7, %s4414_s22  ;;  %p4420_p0 = scmp.lt.s32.totalorder %s4414_s22, %s4414_s22 }
 0x42d   :  { %v3385_v20 = vadd.f32 %v3382_v49, %v3344_v14  ;;  %v3393_v61 = vadd.f32 %v3390_v63, %v3352_v60  ;;  %v3401_v31 = vadd.f32 %v3398_v50, %v3360_v10  ;;  %v3409_v44 = vadd.f32 %v3406_v52, %v3368_v2  ;;  %v9085_v2 = vld [vmem:[#allocation84_spill] sm:$0xff]  ;;  %v9089_v49 = vld [vmem:[#allocation97_spill] sm:$0xff]  ;;  %v9091_v52 = vld [vmem:[#allocation99_spill] sm:$0xff] }
 0x42e   :  { %v3381_v62 = vmul.f32 %v3380_v5, %v3378_v26  ;;  %v3386_v27 = vadd.f32 %v3383_v24, %v3345_v59  ;;  %v3389_v42 = vmul.f32 %v3388_v39, %v3378_v26  ;;  %v3394_v6 = vadd.f32 %v3391_v33, %v3353_v56  ;;  %p4421_p1 = por %p4420_p0, %p4419_p13 }
 0x42f   :  { %v3397_v22 = vmul.f32 %v3396_v54, %v3378_v26  ;;  %v3402_v35 = vadd.f32 %v3399_v41, %v3361_v0  ;;  %v3405_v34 = vmul.f32 %v3404_v58, %v3378_v26  ;;  %v3407_v17 = vmul.f32 %v3404_v58, %v3376_v28  ;;  %v3523_v0 = vpop.permute.xlu0 %3522  ;;  %v9087_v58 = vld [vmem:[#allocation88_spill] sm:$0xff] }
 0x430   :  { %v3384_v8 = vadd.f32 %v3381_v62, %v3343_v3  ;;  %v3392_v7 = vadd.f32 %v3389_v42, %v3351_v9  ;;  %v9074_v43 = vrot.slane %v9073_v53, 6  ;;  %v9076_v21 = vrot.slane %v9075_v4, 6  ;;  %v3521_v3 = vpop.permute.xlu1 %3520  ;;  %v9079_v9 = vld [vmem:[#allocation94_spill] sm:$0xff]  ;;  %p4422_p2 = pnand %p4421_p1, %p4415_p12 }
 0x431   :  { %v3400_v38 = vadd.f32 %v3397_v22, %v3359_v55  ;;  %v3408_v23 = vadd.f32 %v3405_v34, %v3367_v11  ;;  %v3410_v12 = vadd.f32 %v3407_v17, %v3369_v25  ;;  %v9078_v45 = vrot.slane %v9077_v30, 6  ;;  %v9081_v11 = vld [vmem:[#allocation95_spill] sm:$0xff] }
 0x432   :  { %v3427_v57 = vadd.f32 %v9074_v43, %v3386_v27  ;;  %v3444_v18 = vadd.f32 %v9076_v21, %v3394_v6  ;;  %v3489_v39 = vstv %s8063_s17  ;;  %v3497_v32 = vstv %s8067_s25  ;;  %v9093_v27 = vld [vmem:[#allocation119_spill] sm:$0xff] }
 0x433   :  { %v3461_v5 = vadd.f32 %v9078_v45, %v3402_v35  ;;  %v3505_v47 = vstv %s8069_s8  ;;  %v3513_v46 = vstv %s8077_s10  ;;  %v9080_v1 = vrot.slane %v9079_v9, 6  ;;  %v9095_v22 = vld [vmem:[#allocation123_spill] sm:$0xff] }
 0x434   :  { %v3487_v55 = vsel %vm345_vm4, %v3484_v48, %v8065_v15  ;;  %v9082_v51 = vrot.slane %v9081_v11, 6  ;;  %v9084_v37 = vrot.slane %v9083_v40, 6  ;;  %v9086_v25 = vrot.slane %v9085_v2, 6  ;;  %v3525_v43 = vpop.permute.xlu1 %3524 }
 0x435   :  { %v3478_v36 = vadd.f32 %v9080_v1, %v3410_v12  ;;  %v3492_v59 = vmul.f32 %v3489_v39, %v3487_v55  ;;  %v3500_v60 = vmul.f32 %v3497_v32, %v3487_v55  ;;  %v3508_v56 = vmul.f32 %v3505_v47, %v3487_v55 }
 0x436   :  { %v3425_v16 = vadd.f32 %v9082_v51, %v3384_v8  ;;  %v3426_v14 = vadd.f32 %v9084_v37, %v3385_v20  ;;  %v3516_v10 = vmul.f32 %v3513_v46, %v3487_v55  ;;  %v3442_v54 = vadd.f32 %v9086_v25, %v3392_v7 }
 0x437   :  { %v9088_v19 = vrot.slane %v9087_v58, 6  ;;  %v9090_v63 = vrot.slane %v9089_v49, 6  ;;  %v9092_v26 = vrot.slane %v9091_v52, 6  ;;  %v3495_v33 = vadd.f32 %v3492_v59, %v3427_v57 }
 0x438   :  { %v3503_v41 = vadd.f32 %v3500_v60, %v3444_v18  ;;  %v8118_v20 = vadd.f32 %v3508_v56, %v3461_v5  ;;  %v8120_v62 = vadd.f32 %v3516_v10, %v3478_v36  ;;  %v9094_v42 = vrot.slane %v9093_v27, 6  ;;  %v3564_v40 = vpop.permute.xlu1 %3563 }
 0x439   :  { %v3443_v28 = vadd.f32 %v9088_v19, %v3393_v61  ;;  %v3459_v50 = vadd.f32 %v9090_v63, %v3400_v38  ;;  %v3460_v24 = vadd.f32 %v9092_v26, %v3401_v31  ;;  %v9096_v35 = vrot.slane %v9095_v22, 6 }
 0x43a   :  { %v3476_v6 = vadd.f32 %v9094_v42, %v3408_v23  ;;  %v3485_v34 = vsel %vm345_vm4, %v3482_v29, %v3484_v48  ;;  %v3486_v31 = vsel %vm345_vm4, %v8065_v15, %v3482_v29  ;;  %v3562_v29 = vpop.permute.xlu0 %3561  ;;  %v3530_v5 = vstv %s8087_s12 }
 0x43b   :  { %v3477_v61 = vadd.f32 %v9096_v35, %v3409_v44  ;;  %v3490_v17 = vmul.f32 %v3489_v39, %v3486_v31  ;;  %v3491_v8 = vmul.f32 %v3489_v39, %v3485_v34  ;;  %v3498_v7 = vmul.f32 %v3497_v32, %v3486_v31 }
 0x43c   :  { %v3499_v53 = vmul.f32 %v3497_v32, %v3485_v34  ;;  %v3506_v57 = vmul.f32 %v3505_v47, %v3486_v31  ;;  %v3507_v4 = vmul.f32 %v3505_v47, %v3485_v34  ;;  %v3514_v21 = vmul.f32 %v3513_v46, %v3486_v31  ;;  %v3603_v22 = vpop.permute.xlu1 %3602 }
 0x43d   :  { %v3515_v18 = vmul.f32 %v3513_v46, %v3485_v34  ;;  %v3493_v44 = vadd.f32 %v3490_v17, %v3425_v16  ;;  %v3494_v48 = vadd.f32 %v3491_v8, %v3426_v14  ;;  %v3501_v38 = vadd.f32 %v3498_v7, %v3442_v54 }
 0x43e   :  { %v3502_v15 = vadd.f32 %v3499_v53, %v3443_v28  ;;  %v3509_v23 = vadd.f32 %v3506_v57, %v3459_v50  ;;  %v3510_v12 = vadd.f32 %v3507_v4, %v3460_v24  ;;  %v3517_v30 = vadd.f32 %v3514_v21, %v3476_v6  ;;  %v3566_v2 = vpop.permute.xlu0 %3565 }
 0x43f   :  { %v3518_v45 = vadd.f32 %v3515_v18, %v3477_v61  ;;  %v3538_v39 = vstv %s8093_s4  ;;  %v3546_v32 = vstv %s8104_s13  ;;  %v3554_v47 = vstv %s8106_s18 }
 0x440   :  { %v3527_v46 = vsel %vm387_vm5, %v3521_v3, %v3523_v0  ;;  %v3526_v9 = vsel %vm387_vm5, %v3523_v0, %v3525_v43  ;;  %v3528_v1 = vsel %vm387_vm5, %v3525_v43, %v3521_v3  ;;  %v3571_v36 = vstv %s8116_s2 }
 0x441   :  { %v3531_v55 = vmul.f32 %v3530_v5, %v3527_v46  ;;  %v3539_v11 = vmul.f32 %v3538_v39, %v3527_v46  ;;  %v3547_v51 = vmul.f32 %v3546_v32, %v3527_v46  ;;  %v3555_v16 = vmul.f32 %v3554_v47, %v3527_v46 }
 0x442   :  { %v3532_v37 = vmul.f32 %v3530_v5, %v3526_v9  ;;  %v3533_v14 = vmul.f32 %v3530_v5, %v3528_v1  ;;  %v3540_v59 = vmul.f32 %v3538_v39, %v3526_v9  ;;  %v3541_v60 = vmul.f32 %v3538_v39, %v3528_v1  ;;  %v3607_v5 = vpop.permute.xlu1 %3606 }
 0x443   :  { %v3534_v56 = vadd.f32 %v3531_v55, %v3493_v44  ;;  %v3542_v10 = vadd.f32 %v3539_v11, %v3501_v38  ;;  %v3550_v0 = vadd.f32 %v3547_v51, %v3509_v23  ;;  %v3558_v3 = vadd.f32 %v3555_v16, %v3517_v30 }
 0x444   :  { %v3535_v25 = vadd.f32 %v3532_v37, %v3494_v48  ;;  %v3536_v54 = vadd.f32 %v3533_v14, %v3495_v33  ;;  %v3543_v58 = vadd.f32 %v3540_v59, %v3502_v15  ;;  %v3544_v19 = vadd.f32 %v3541_v60, %v3503_v41 }
 0x445   :  { %v3548_v28 = vmul.f32 %v3546_v32, %v3526_v9  ;;  %v3549_v49 = vmul.f32 %v3546_v32, %v3528_v1  ;;  %v3556_v63 = vmul.f32 %v3554_v47, %v3526_v9  ;;  %v3557_v50 = vmul.f32 %v3554_v47, %v3528_v1  ;;  %v3605_v9 = vpop.permute.xlu0 %3604 }
 0x446   :  { %v3579_v52 = vstv %s8131_s19  ;;  %v3587_v26 = vstv %s8133_s0  ;;  %v3595_v24 = vstv %s8135_s27  ;;  %v3569_v27 = vsel %vm429_vm6, %v3566_v2, %v3562_v29 }
 0x447   :  { %v3551_v33 = vadd.f32 %v3548_v28, %v3510_v12  ;;  %v3552_v41 = vadd.f32 %v3549_v49, %v8118_v20  ;;  %v3559_v42 = vadd.f32 %v3556_v63, %v3518_v45  ;;  %v3560_v6 = vadd.f32 %v3557_v50, %v8120_v62 }
 0x448   :  { %v3574_v35 = vmul.f32 %v3571_v36, %v3569_v27  ;;  %v3582_v61 = vmul.f32 %v3579_v52, %v3569_v27  ;;  %v3590_v34 = vmul.f32 %v3587_v26, %v3569_v27  ;;  %v3598_v31 = vmul.f32 %v3595_v24, %v3569_v27 }
 0x449   :  { %v3567_v17 = vsel %vm429_vm6, %v3564_v40, %v3566_v2  ;;  %v3568_v8 = vsel %vm429_vm6, %v3562_v29, %v3564_v40  ;;  %v3612_v7 = vstv %s8148_s23  ;;  %v3620_v20 = vstv %s8150_s3 }
 0x44a   :  { %v3577_v53 = vadd.f32 %v3574_v35, %v3536_v54  ;;  %v3585_v43 = vadd.f32 %v3582_v61, %v3544_v19  ;;  %v3593_v62 = vadd.f32 %v3590_v34, %v3552_v41  ;;  %v3601_v57 = vadd.f32 %v3598_v31, %v3560_v6 }
 0x44b   :  { %v3572_v4 = vmul.f32 %v3571_v36, %v3568_v8  ;;  %v3573_v21 = vmul.f32 %v3571_v36, %v3567_v17  ;;  %v3580_v18 = vmul.f32 %v3579_v52, %v3568_v8  ;;  %v3581_v44 = vmul.f32 %v3579_v52, %v3567_v17 }
 0x44c   :  { %v3588_v48 = vmul.f32 %v3587_v26, %v3568_v8  ;;  %v3589_v38 = vmul.f32 %v3587_v26, %v3567_v17  ;;  %v3596_v15 = vmul.f32 %v3595_v24, %v3568_v8  ;;  %v3597_v23 = vmul.f32 %v3595_v24, %v3567_v17 }
 0x44d   :  { %v3575_v29 = vadd.f32 %v3572_v4, %v3534_v56  ;;  %v3576_v12 = vadd.f32 %v3573_v21, %v3535_v25  ;;  %v3583_v30 = vadd.f32 %v3580_v18, %v3542_v10  ;;  %v3584_v45 = vadd.f32 %v3581_v44, %v3543_v58  ;;  %v9097_v4 = vld [vmem:[#allocation55_spill] sm:$0xff]  ;;  %v9098_v18 = vld [vmem:[#allocation56_spill] sm:$0xff] }
 0x44e   :  { %v3591_v39 = vadd.f32 %v3588_v48, %v3550_v0  ;;  %v3592_v32 = vadd.f32 %v3589_v38, %v3551_v33  ;;  %v3599_v47 = vadd.f32 %v3596_v15, %v3558_v3  ;;  %v3600_v46 = vadd.f32 %v3597_v23, %v3559_v42  ;;  %v9099_v48 = vld [vmem:[#allocation57_spill] sm:$0xff] }
 0x44f   :  { %v3628_v1 = vstv %s8152_s28  ;;  %v3636_v36 = vstv %s8154_s21  ;;  %v3644_v55 = vstv %s8156_s5  ;;  %v3702_v11 = vstv %s8163_s30 }
 0x450   :  { %v3760_v51 = vstv %s8167_s9  ;;  %v3818_v16 = vstv %s8169_s14  ;;  %v3609_v40 = vsel %vm471_vm7, %v3603_v22, %v3605_v9  ;;  %v3608_v37 = vsel %vm471_vm7, %v3605_v9, %v3607_v5 }
 0x451   :  { %v3613_v14 = vmul.f32 %v3612_v7, %v3609_v40  ;;  %v3621_v59 = vmul.f32 %v3620_v20, %v3609_v40  ;;  %v3629_v60 = vmul.f32 %v3628_v1, %v3609_v40  ;;  %v3637_v56 = vmul.f32 %v3636_v36, %v3609_v40 }
 0x452   :  { %v3610_v10 = vsel %vm471_vm7, %v3607_v5, %v3603_v22  ;;  %v3614_v0 = vmul.f32 %v3612_v7, %v3608_v37  ;;  %v3622_v3 = vmul.f32 %v3620_v20, %v3608_v37  ;;  %v3630_v2 = vmul.f32 %v3628_v1, %v3608_v37 }
 0x453   :  { %v3616_v25 = vadd.f32 %v3613_v14, %v3575_v29  ;;  %v3624_v54 = vadd.f32 %v3621_v59, %v3583_v30  ;;  %v3632_v58 = vadd.f32 %v3629_v60, %v3591_v39  ;;  %v3640_v19 = vadd.f32 %v3637_v56, %v3599_v47 }
 0x454   :  { %v3615_v28 = vmul.f32 %v3612_v7, %v3610_v10  ;;  %v3617_v49 = vadd.f32 %v3614_v0, %v3576_v12  ;;  %v3623_v63 = vmul.f32 %v3620_v20, %v3610_v10  ;;  %v3625_v50 = vadd.f32 %v3622_v3, %v3584_v45 }
 0x455   :  { %v8189_v52 = vadd.f32 %v3644_v55, %v3616_v25  ;;  %v8191_v26 = vadd.f32 %v3702_v11, %v3624_v54  ;;  %v8193_v24 = vadd.f32 %v3760_v51, %v3632_v58  ;;  %v8195_v27 = vadd.f32 %v3818_v16, %v3640_v19 }
 0x456   :  { %v3618_v13 = vadd.f32 %v3615_v28, %v3577_v53  ;;  %v3626_v33 = vadd.f32 %v3623_v63, %v3585_v43  ;;  %v3631_v41 = vmul.f32 %v3628_v1, %v3610_v10  ;;  %v3633_v42 = vadd.f32 %v3630_v2, %v3592_v32 }
 0x457   :  { %v3638_v6 = vmul.f32 %v3636_v36, %v3608_v37  ;;  %v3639_v22 = vmul.f32 %v3636_v36, %v3610_v10  ;;  %v8197_v35 = vadd.f32 %v3644_v55, %v3617_v49  ;;  %v8199_v61 = vadd.f32 %v3702_v11, %v3625_v50 }
 0x458   :  { %v3634_v34 = vadd.f32 %v3631_v41, %v3593_v62  ;;  %v8201_v31 = vadd.f32 %v3644_v55, %v3618_v13  ;;  %v8203_v17 = vadd.f32 %v3702_v11, %v3626_v33  ;;  %v8205_v8 = vadd.f32 %v3760_v51, %v3633_v42 }
 0x459   :  { %v3641_v7 = vadd.f32 %v3638_v6, %v3600_v46  ;;  %v3642_v20 = vadd.f32 %v3639_v22, %v3601_v57  ;;  %v3764_v53 = vmul.f32 %v8193_v24, %v9097_v4  ;;  %v3706_v43 = vmul.f32 %v8191_v26, %v9097_v4 }
 0x45a   :  { %v8211_v21 = vadd.f32 %v3760_v51, %v3634_v34  ;;  %v3765_v44 = vmul.f32 %v8205_v8, %v9098_v18  ;;  %v3707_v62 = vmul.f32 %v8199_v61, %v9098_v18  ;;  %v3708_v38 = vmul.f32 %v8203_v17, %v9099_v48 }
 0x45b   :  { %v8219_v15 = vadd.f32 %v3818_v16, %v3641_v7  ;;  %v8221_v57 = vadd.f32 %v3818_v16, %v3642_v20  ;;  %v3767_v23 = vsel %vm1755_vm8, %v3764_v53, 0.0  ;;  %v3709_v29 = vsel %vm1755_vm8, %v3706_v43, 0.0 }
 0x45c   :  { %v3766_v12 = vmul.f32 %v8211_v21, %v9099_v48  ;;  %v3768_v30 = vsel %vm1755_vm8, %v3765_v44, 0.0  ;;  %v3710_v45 = vsel %vm1755_vm8, %v3707_v62, 0.0  ;;  %v3712_v5 = vsel %vm1755_vm8, %v3708_v38, 0.0 }
 0x45d   :  { %v3769_v39 = vadd.f32 %v3768_v30, %v3767_v23  ;;  %v3711_v32 = vadd.f32 %v3710_v45, %v3709_v29  ;;  %v3723_v47 = vmul.f32 %v3706_v43, %v8191_v26  ;;  %v3724_v46 = vmul.f32 %v3707_v62, %v8199_v61 }
 0x45e   :  { %v3770_v9 = vsel %vm1755_vm8, %v3766_v12, 0.0  ;;  %v3725_v1 = vmul.f32 %v3708_v38, %v8203_v17  ;;  %v3822_v36 = vmul.f32 %v8195_v27, %v9097_v4  ;;  %v3823_v55 = vmul.f32 %v8219_v15, %v9098_v18 }
 0x45f   :  { %v3771_v11 = vadd.f32 %v3770_v9, %v3769_v39  ;;  %v3713_v51 = vadd.f32 %v3712_v5, %v3711_v32  ;;  %v3726_v16 = vsel %vm1755_vm8, %v3723_v47, 0.0  ;;  %v3727_v40 = vsel %vm1755_vm8, %v3724_v46, 0.0 }
 0x460   :  { %v3728_v37 = vadd.f32 %v3727_v40, %v3726_v16  ;;  %v3729_v14 = vsel %vm1755_vm8, %v3725_v1, 0.0  ;;  %v3824_v59 = vmul.f32 %v8221_v57, %v9099_v48  ;;  %v3825_v60 = vsel %vm1755_vm8, %v3822_v36, 0.0 }
 0x461   :  { %3772 = vadd.xlane.f32.xlu1 %v3771_v11  ;;  %3714 = vadd.xlane.f32.xlu0 %v3713_v51  ;;  %v3826_v56 = vsel %vm1755_vm8, %v3823_v55, 0.0  ;;  %v3839_v10 = vmul.f32 %v3822_v36, %v8195_v27  ;;  %v3840_v0 = vmul.f32 %v3823_v55, %v8219_v15  ;;  %v3648_v3 = vmul.f32 %v8189_v52, %v9097_v4 }
 0x462   :  { %v3730_v2 = vadd.f32 %v3729_v14, %v3728_v37  ;;  %v3827_v25 = vadd.f32 %v3826_v56, %v3825_v60  ;;  %v3828_v54 = vsel %vm1755_vm8, %v3824_v59, 0.0  ;;  %v3841_v58 = vmul.f32 %v3824_v59, %v8221_v57 }
 0x463   :  { %v3842_v19 = vsel %vm1755_vm8, %v3839_v10, 0.0  ;;  %v3843_v28 = vsel %vm1755_vm8, %v3840_v0, 0.0  ;;  %v3649_v49 = vmul.f32 %v8197_v35, %v9098_v18  ;;  %v3650_v63 = vmul.f32 %v8201_v31, %v9099_v48 }
 0x464   :  { %v3829_v50 = vadd.f32 %v3828_v54, %v3827_v25  ;;  %v3844_v13 = vadd.f32 %v3843_v28, %v3842_v19  ;;  %v3845_v33 = vsel %vm1755_vm8, %v3841_v58, 0.0  ;;  %v3651_v41 = vsel %vm1755_vm8, %v3648_v3, 0.0 }
 0x465   :  { %3731 = vadd.xlane.f32.xlu1 %v3730_v2  ;;  %v3652_v42 = vsel %vm1755_vm8, %v3649_v49, 0.0  ;;  %v3781_v6 = vmul.f32 %v3764_v53, %v8193_v24  ;;  %v3782_v22 = vmul.f32 %v3765_v44, %v8205_v8  ;;  %v3654_v20 = vsel %vm1755_vm8, %v3650_v63, 0.0 }
 0x466   :  { %3830 = vadd.xlane.f32.xlu0 %v3829_v50  ;;  %v3846_v34 = vadd.f32 %v3845_v33, %v3844_v13  ;;  %v3653_v7 = vadd.f32 %v3652_v42, %v3651_v41  ;;  %v3783_v4 = vmul.f32 %v3766_v12, %v8211_v21  ;;  %v3665_v62 = vmul.f32 %v3648_v3, %v8189_v52 }
 0x467   :  { %v3784_v43 = vsel %vm1755_vm8, %v3781_v6, 0.0  ;;  %v3785_v18 = vsel %vm1755_vm8, %v3782_v22, 0.0  ;;  %v3666_v48 = vmul.f32 %v3649_v49, %v8197_v35  ;;  %v3667_v29 = vmul.f32 %v3650_v63, %v8201_v31 }
 0x468   :  { %v3655_v38 = vadd.f32 %v3654_v20, %v3653_v7  ;;  %v3786_v23 = vadd.f32 %v3785_v18, %v3784_v43  ;;  %v3787_v44 = vsel %vm1755_vm8, %v3783_v4, 0.0  ;;  %v3668_v12 = vsel %vm1755_vm8, %v3665_v62, 0.0 }
 0x469   :  { %3847 = vadd.xlane.f32.xlu1 %v3846_v34  ;;  %v3669_v53 = vsel %vm1755_vm8, %v3666_v48, 0.0  ;;  %v3671_v5 = vsel %vm1755_vm8, %v3667_v29, 0.0 }
 0x46a   :  { %3656 = vadd.xlane.f32.xlu0 %v3655_v38  ;;  %v3788_v30 = vadd.f32 %v3787_v44, %v3786_v23  ;;  %v3670_v45 = vadd.f32 %v3669_v53, %v3668_v12 }
 0x46c   :  { %v3672_v39 = vadd.f32 %v3671_v5, %v3670_v45 }
 0x46e   :  { %3789 = vadd.xlane.f32.xlu0 %v3788_v30 }
 0x472   :  { %3673 = vadd.xlane.f32.xlu0 %v3672_v39 }
 0x4ea   :  { %v3773_v32 = vpop.xlane.xlu1 %3772  ;;  %v3715_v47 = vpop.xlane.xlu0 %3714 }
 0x4eb   :  { %v3774_v46 = vsel %vm1755_vm8, %v3773_v32, 0.0  ;;  %v3716_v9 = vsel %vm1755_vm8, %v3715_v47, 0.0 }
 0x4ec   :  { %v3775_v1 = vrot.slane %v3774_v46, 4  ;;  %v3717_v36 = vrot.slane %v3716_v9, 4 }
 0x4ee   :  { %v3718_v55 = vadd.f32 %v3717_v36, %v3716_v9  ;;  %v3732_v11 = vpop.xlane.xlu1 %3731  ;;  %v3776_v51 = vadd.f32 %v3775_v1, %v3774_v46 }
 0x4ef   :  { %v3733_v16 = vsel %vm1755_vm8, %v3732_v11, 0.0  ;;  %v3831_v40 = vpop.xlane.xlu0 %3830 }
 0x4f0   :  { %v3719_v37 = vrot.slane %v3718_v55, 2  ;;  %v3734_v14 = vrot.slane %v3733_v16, 4  ;;  %v3832_v59 = vsel %vm1755_vm8, %v3831_v40, 0.0  ;;  %v3777_v3 = vrot.slane %v3776_v51, 2 }
 0x4f1   :  { %v3833_v60 = vrot.slane %v3832_v59, 4 }
 0x4f2   :  { %v3720_v56 = vadd.f32 %v3719_v37, %v3718_v55  ;;  %v3735_v10 = vadd.f32 %v3734_v14, %v3733_v16  ;;  %v3848_v0 = vpop.xlane.xlu1 %3847  ;;  %v3778_v41 = vadd.f32 %v3777_v3, %v3776_v51 }
 0x4f3   :  { %v3834_v2 = vadd.f32 %v3833_v60, %v3832_v59  ;;  %v3849_v25 = vsel %vm1755_vm8, %v3848_v0, 0.0  ;;  %v3657_v54 = vpop.xlane.xlu0 %3656 }
 0x4f4   :  { %v3721_v58 = vrot.slane %v3720_v56, 1  ;;  %v3736_v19 = vrot.slane %v3735_v10, 2  ;;  %v3850_v28 = vrot.slane %v3849_v25, 4  ;;  %v3658_v63 = vsel %vm1755_vm8, %v3657_v54, 0.0 }
 0x4f5   :  { %v3835_v49 = vrot.slane %v3834_v2, 2  ;;  %v3659_v6 = vrot.slane %v3658_v63, 4  ;;  %v3779_v38 = vrot.slane %v3778_v41, 1 }
 0x4f6   :  { %v3722_v50 = vadd.f32 %v3721_v58, %v3720_v56  ;;  %v3737_v13 = vadd.f32 %v3736_v19, %v3735_v10  ;;  %v3851_v33 = vadd.f32 %v3850_v28, %v3849_v25 }
 0x4f7   :  { %v3836_v42 = vadd.f32 %v3835_v49, %v3834_v2  ;;  %v3790_v22 = vpop.xlane.xlu0 %3789  ;;  %v3660_v43 = vadd.f32 %v3659_v6, %v3658_v63  ;;  %v3780_v36 = vadd.f32 %v3779_v38, %v3778_v41 }
 0x4f8   :  { %v8279_v34 = vmul.f32 0.001953125, %v3722_v50  ;;  %v3738_v7 = vrot.slane %v3737_v13, 1  ;;  %v3852_v20 = vrot.slane %v3851_v33, 2  ;;  %v3791_v18 = vsel %vm1755_vm8, %v3790_v22, 0.0 }
 0x4f9   :  { %v3837_v4 = vrot.slane %v3836_v42, 1  ;;  %v3661_v53 = vrot.slane %v3660_v43, 2  ;;  %v3792_v44 = vrot.slane %v3791_v18, 4  ;;  %v8285_v10 = vmul.f32 0.001953125, %v3780_v36 }
 0x4fa   :  { %v3739_v62 = vadd.f32 %v3738_v7, %v3737_v13  ;;  %v3853_v48 = vadd.f32 %v3852_v20, %v3851_v33  ;;  %v3742_v12 = vmul.f32 %v8279_v34, %v8279_v34  ;;  %v3751_v20 = vstv %s4255_s20 }
 0x4fb   :  { %v3838_v23 = vadd.f32 %v3837_v4, %v3836_v42  ;;  %v3674_v29 = vpop.xlane.xlu0 %3673  ;;  %v3662_v32 = vadd.f32 %v3661_v53, %v3660_v43  ;;  %v3793_v47 = vadd.f32 %v3792_v44, %v3791_v18  ;;  %v3800_v19 = vmul.f32 %v8285_v10, %v8285_v10 }
 0x4fc   :  { %v3741_v30 = vmul.f32 0.001953125, %v3739_v62  ;;  %v3854_v45 = vrot.slane %v3853_v48, 1  ;;  %v3675_v5 = vsel %vm1755_vm8, %v3674_v29, 0.0  ;;  %v3747_v42 = vstv %s4254_s1 }
 0x4fd   :  { %v3856_v39 = vmul.f32 0.001953125, %v3838_v23  ;;  %v3676_v46 = vrot.slane %v3675_v5, 4  ;;  %v3663_v55 = vrot.slane %v3662_v32, 1  ;;  %v3794_v11 = vrot.slane %v3793_v47, 2 }
 0x4fe   :  { %v3743_v9 = vsub.f32 %v3741_v30, %v3742_v12  ;;  %v3855_v1 = vadd.f32 %v3854_v45, %v3853_v48  ;;  %v3863_v4 = vstv %s4260_s16  ;;  %v3867_v44 = vstv %s8293_s6  ;;  %v3884_v45 = vld [vmem:[#allocation4] sm:$0xc] }
 0x4ff   :  { %v3677_v51 = vadd.f32 %v3676_v46, %v3675_v5  ;;  %v3858_v40 = vmul.f32 %v3856_v39, %v3856_v39  ;;  %v3664_v14 = vadd.f32 %v3663_v55, %v3662_v32  ;;  %v3795_v59 = vadd.f32 %v3794_v11, %v3793_v47  ;;  %v3886_v5 = vld [vmem:[#allocation4 + $0x10] sm:$0xc] }
 0x500   :  { %v3744_v16 = vadd.f32 0.8, %v3743_v9  ;;  %v3857_v37 = vmul.f32 0.001953125, %v3855_v1  ;;  %v3805_v47 = vstv %s8295_s11 }
 0x501   :  { %v3678_v60 = vrot.slane %v3677_v51, 2  ;;  %v3796_v0 = vrot.slane %v3795_v59, 1  ;;  %v8287_v25 = vmul.f32 0.001953125, %v3664_v14 }
 0x502   :  { %4288 = vrsqrt.f32 %v3744_v16  ;;  %v3859_v56 = vsub.f32 %v3857_v37, %v3858_v40  ;;  %v3920_v40 = vld [vmem:[#allocation4] sm:$0xc0] }
 0x503   :  { %v3679_v3 = vadd.f32 %v3678_v60, %v3677_v51  ;;  %v3797_v54 = vadd.f32 %v3796_v0, %v3795_v59  ;;  %v3684_v63 = vmul.f32 %v8287_v25, %v8287_v25  ;;  %v3689_v59 = vstv %s8299_s29 }
 0x504   :  { %v3860_v2 = vadd.f32 0.8, %v3859_v56  ;;  %v3921_v56 = vld [vmem:[#allocation4 + $0x8] sm:$0xc0] }
 0x505   :  { %v3680_v58 = vrot.slane %v3679_v3, 1  ;;  %v3799_v28 = vmul.f32 0.001953125, %v3797_v54 }
 0x506   :  { %4290 = vrsqrt.f32 %v3860_v2 }
 0x507   :  { %v3681_v49 = vadd.f32 %v3680_v58, %v3679_v3  ;;  %v3801_v50 = vsub.f32 %v3799_v28, %v3800_v19  ;;  %v3693_v58 = vstv %s8306_s24 }
 0x509   :  { %v3683_v13 = vmul.f32 0.001953125, %v3681_v49  ;;  %v3802_v33 = vadd.f32 0.8, %v3801_v50 }
 0x50b   :  { %v3685_v41 = vsub.f32 %v3683_v13, %v3684_v63  ;;  %4292 = vrsqrt.f32 %v3802_v33 }
 0x50d   :  { %v3686_v6 = vadd.f32 0.8, %v3685_v41 }
 0x50f   :  { %v4289_v22 = vpop.eup %4288  ;;  %4294 = vrsqrt.f32 %v3686_v6  ;;  %v3902_v6 = vld [vmem:[#allocation4] sm:$0x30] }
 0x510   :  { %v3748_v7 = vmul.f32 %v4289_v22, %v3747_v42  ;;  %v3903_v22 = vld [vmem:[#allocation4 + $0x8] sm:$0x30] }
 0x512   :  { %v3750_v43 = vmul.f32 %v3748_v7, %v8279_v34  ;;  %v3753_v62 = vmul.f32 %v3748_v7, %v8191_v26  ;;  %v3754_v38 = vmul.f32 %v3748_v7, %v8199_v61  ;;  %v3755_v23 = vmul.f32 %v3748_v7, %v8203_v17  ;;  %v3885_v26 = vld [vmem:[#allocation4 + $0x8] sm:$0xc] }
 0x513   :  { %v4291_v18 = vpop.eup %4290 }
 0x514   :  { %v3752_v48 = vsub.f32 %v3751_v20, %v3750_v43  ;;  %v3864_v53 = vmul.f32 %v4291_v18, %v3863_v4  ;;  %v3904_v4 = vld [vmem:[#allocation4 + $0x10] sm:$0x30]  ;;  %v3876_v43 = vld [vmem:[#allocation4 + $0x8] sm:$0x3] }
 0x516   :  { %v3756_v29 = vadd.f32 %v3753_v62, %v3752_v48  ;;  %v3757_v12 = vadd.f32 %v3754_v38, %v3752_v48  ;;  %v3758_v34 = vadd.f32 %v3755_v23, %v3752_v48  ;;  %v3866_v30 = vmul.f32 %v3864_v53, %v3856_v39  ;;  %v3877_v23 = vld [vmem:[#allocation4 + $0x10] sm:$0x3] }
 0x517   :  { %v3869_v32 = vmul.f32 %v3864_v53, %v8195_v27  ;;  %v3870_v1 = vmul.f32 %v3864_v53, %v8219_v15  ;;  %v3871_v36 = vmul.f32 %v3864_v53, %v8221_v57  ;;  %v3922_v15 = vld [vmem:[#allocation4 + $0x10] sm:$0xc0]  ;;  %v3809_v57 = vstv %s8303_s26 }
 0x518   :  { %v3890_v61 = vrot.slane %v3756_v29, 6  ;;  %v3891_v46 = vrot.slane %v3757_v12, 6  ;;  %v3892_v17 = vrot.slane %v3758_v34, 6  ;;  %v3868_v9 = vsub.f32 %v3867_v44, %v3866_v30  ;;  %v4293_v55 = vpop.eup %4292 }
 0x519   :  { %v3806_v14 = vmul.f32 %v4293_v55, %v3805_v47 }
 0x51a   :  { %v3896_v11 = vadd.f32 %v3890_v61, %v3884_v45  ;;  %v3897_v51 = vadd.f32 %v3891_v46, %v3885_v26  ;;  %v3898_v39 = vadd.f32 %v3892_v17, %v3886_v5  ;;  %v3872_v16 = vadd.f32 %v3869_v32, %v3868_v9 }
 0x51b   :  { %v3873_v37 = vadd.f32 %v3870_v1, %v3868_v9  ;;  %v3874_v27 = vadd.f32 %v3871_v36, %v3868_v9  ;;  %v3808_v54 = vmul.f32 %v3806_v14, %v8285_v10  ;;  %v3811_v28 = vmul.f32 %v3806_v14, %v8193_v24  ;;  %v3875_v24 = vld [vmem:[#allocation4] sm:$0x3] }
 0x51c   :  { %v4295_v60 = vpop.eup %4294  ;;  %3899 = vst [vmem:[#allocation20] sm:$0xc] %v3896_v11  ;;  %3900 = vst [vmem:[#allocation20 + $0x8] sm:$0xc] %v3897_v51  ;;  %v3926_v0 = vrot.slane %v3872_v16, 2  ;;  %v3812_v49 = vmul.f32 %v3806_v14, %v8205_v8  ;;  %v3813_v41 = vmul.f32 %v3806_v14, %v8211_v21 }
 0x51d   :  { %3901 = vst [vmem:[#allocation20 + $0x10] sm:$0xc] %v3898_v39  ;;  %v3927_v3 = vrot.slane %v3873_v37, 2  ;;  %v3928_v2 = vrot.slane %v3874_v27, 2  ;;  %v3690_v63 = vmul.f32 %v4295_v60, %v3689_v59  ;;  %v3810_v33 = vsub.f32 %v3809_v57, %v3808_v54 }
 0x51e   :  { %v3932_v19 = vadd.f32 %v3926_v0, %v3920_v40 }
 0x51f   :  { %v3933_v50 = vadd.f32 %v3927_v3, %v3921_v56  ;;  %v3934_v13 = vadd.f32 %v3928_v2, %v3922_v15  ;;  %v3692_v42 = vmul.f32 %v3690_v63, %v8287_v25  ;;  %v3814_v10 = vadd.f32 %v3811_v28, %v3810_v33 }
 0x520   :  { %3935 = vst [vmem:[#allocation20] sm:$0xc0] %v3932_v19  ;;  %v3815_v7 = vadd.f32 %v3812_v49, %v3810_v33  ;;  %v3816_v20 = vadd.f32 %v3813_v41, %v3810_v33  ;;  %v3695_v18 = vmul.f32 %v3690_v63, %v8189_v52  ;;  %v3696_v62 = vmul.f32 %v3690_v63, %v8197_v35 }
 0x521   :  { %3936 = vst [vmem:[#allocation20 + $0x8] sm:$0xc0] %v3933_v50  ;;  %3937 = vst [vmem:[#allocation20 + $0x10] sm:$0xc0] %v3934_v13  ;;  %v3694_v8 = vsub.f32 %v3693_v58, %v3692_v42  ;;  %v3697_v21 = vmul.f32 %v3690_v63, %v8201_v31  ;;  %v3908_v48 = vrot.slane %v3814_v10, 4 }
 0x522   :  { %v3909_v38 = vrot.slane %v3815_v7, 4  ;;  %v3910_v25 = vrot.slane %v3816_v20, 4 }
 0x523   :  { %v3698_v53 = vadd.f32 %v3695_v18, %v3694_v8  ;;  %v3699_v44 = vadd.f32 %v3696_v62, %v3694_v8  ;;  %v3700_v29 = vadd.f32 %v3697_v21, %v3694_v8  ;;  %v3914_v12 = vadd.f32 %v3908_v48, %v3902_v6 }
 0x524   :  { %v3915_v34 = vadd.f32 %v3909_v38, %v3903_v22  ;;  %v3916_v30 = vadd.f32 %v3910_v25, %v3904_v4 }
 0x525   :  { %v3878_v45 = vadd.f32 %v3875_v24, %v3698_v53  ;;  %v3879_v26 = vadd.f32 %v3876_v43, %v3699_v44  ;;  %v3880_v5 = vadd.f32 %v3877_v23, %v3700_v29  ;;  %3917 = vst [vmem:[#allocation20] sm:$0x30] %v3914_v12 }
 0x526   :  { %3918 = vst [vmem:[#allocation20 + $0x8] sm:$0x30] %v3915_v34  ;;  %3919 = vst [vmem:[#allocation20 + $0x10] sm:$0x30] %v3916_v30 }
 0x527   :  { %3881 = vst [vmem:[#allocation20] sm:$0x3] %v3878_v45  ;;  %3882 = vst [vmem:[#allocation20 + $0x8] sm:$0x3] %v3879_v26 }
 0x528   :  { %3883 = vst [vmem:[#allocation20 + $0x10] sm:$0x3] %v3880_v5 }
 0x529   :  { %4425 = shalt.err (!%p4422_p2)
}
 0x52a   :  { %s9100_s8 = sld [smem:[#allocation154_spill]] }
 0x530   :  { %3947 = dma.vmem_to_hbm [thread:$0]  %s3945_s7, 384, %s9100_s8, [#allocation6]  }
 0x531   :  { %4446 = dma.done.wait [#allocation6], 384  }
 0x532   :  { %4447 = vsyncadd [#allocation6], 4294966912 }
 0x533   :  { %3951 = vsyncpa [#allocation5], 1 }
 0x534   :  { %3952 = vsyncpa [#allocation6], 1 }
 0x535   :  { %3953 = vsyncpa [#allocation7], 1 }
 0x536   :  { %3954 = vsyncpa [#allocation8], 1 }
 0x537   :  { %3955 = vsyncpa [#allocation12], 1 }
 0x538   :  { %3956 = vsyncpa [#allocation15], 1 }
 0x539   :  { %3957 = vsyncpa [#allocation18], 1 }

</bundles_post_ra>
